<compile_context>
chip_gen: v6e
topology: v6e:2x2x1
jax: 0.10.0
libtpu: 0.0.40
codegen_flags: <defaults>
</compile_context>

<pallas_src>
import functools
import math

import jax
import jax.numpy as jnp
from jax import lax
from jax.experimental import pallas as pl
from jax.experimental.pallas import tpu as pltpu  # noqa: F401  (TPU backend)

_NEG_INF = -1e30
_LN_EPS = 1e-5

_ENC_NAMES = ("e_wq", "e_wk", "e_wv", "e_wo", "e_w1", "e_b1", "e_w2", "e_b2",
              "e_g1", "e_be1", "e_g2", "e_be2")
_DEC_NAMES = ("d_sq", "d_sk", "d_sv", "d_so", "d_cq", "d_ck", "d_cv", "d_co",
              "d_w1", "d_b1", "d_w2", "d_b2",
              "d_g1", "d_be1", "d_g2", "d_be2", "d_g3", "d_be3")
_PARAM_ORDER = _ENC_NAMES + ("enc_g", "enc_b") + _DEC_NAMES + ("dec_g", "dec_b")


# --------------------------- in-kernel helpers ------------------------------ #

def _layernorm(z, g, b, eps=_LN_EPS):
    mean = jnp.mean(z, axis=-1, keepdims=True)
    var = jnp.mean((z - mean) ** 2, axis=-1, keepdims=True)
    return (z - mean) * lax.rsqrt(var + eps) * g + b


def _batch_bias(n_rows, n_cols, bsz):
    """Additive -inf bias: rows/cols are (pos, batch)-flattened; only same-batch pairs attend."""
    r = lax.broadcasted_iota(jnp.int32, (n_rows, n_cols), 0)
    c = lax.broadcasted_iota(jnp.int32, (n_rows, n_cols), 1)
    if bsz & (bsz - 1) == 0:                      # power-of-two batch: avoid integer mod
        same = (r & (bsz - 1)) == (c & (bsz - 1))
    else:
        same = (r % bsz) == (c % bsz)
    return jnp.where(same, 0.0, _NEG_INF).astype(jnp.float32)


def _mha(qb, kb, vb, wo_b, bias, nh, d_k, scale):
    """Multi-head attention + W_O on (pos, batch)-flattened bf16 slabs.

    qb: [R, D] bf16; kb, vb: [C, D] bf16; wo_b: [D, D] bf16 (applied form);
    bias: [R, C] f32.  Scores accumulate and softmax runs in f32; per-head
    outputs are lane-concatenated so W_O is one K=D matmul.
    """
    heads = []
    for a in range(nh):                           # nh is small & static -> unrolled
        lo = a * d_k
        qa = qb[:, lo:lo + d_k]
        ka = kb[:, lo:lo + d_k]
        va = vb[:, lo:lo + d_k]
        s = lax.dot_general(qa, ka, (((1,), (1,)), ((), ())),
                            preferred_element_type=jnp.float32)
        s = s * scale + bias                      # f32 bias after f32 accumulation
        m = jnp.max(s, axis=-1, keepdims=True)
        p = jnp.exp(s - m)
        p = p * pl.reciprocal(jnp.sum(p, axis=-1, keepdims=True), approx=True)
        heads.append(jnp.dot(p.astype(jnp.bfloat16), va,
                             preferred_element_type=jnp.float32))
    attn = jnp.concatenate(heads, axis=-1).astype(jnp.bfloat16)   # [R, D]
    return jnp.dot(attn, wo_b, preferred_element_type=jnp.float32)


def _ffn(h, w1, b1, w2, b2):
    hb = h.astype(jnp.bfloat16)
    ff = jnp.dot(hb, w1, preferred_element_type=jnp.float32) + b1
    ff = jnp.maximum(ff, 0.0).astype(jnp.bfloat16)
    return jnp.dot(ff, w2, preferred_element_type=jnp.float32) + b2


def _enc_layer(x, bias, wq, wk, wv, wo, w1, b1, w2, b2, g1, be1, g2, be2,
               nh, d_k, scale):
    xb = x.astype(jnp.bfloat16)
    q = jnp.dot(xb, wq, preferred_element_type=jnp.float32).astype(jnp.bfloat16)
    k = jnp.dot(xb, wk, preferred_element_type=jnp.float32).astype(jnp.bfloat16)
    v = jnp.dot(xb, wv, preferred_element_type=jnp.float32).astype(jnp.bfloat16)
    sa = _mha(q, k, v, wo, bias, nh, d_k, scale)
    h = _layernorm(x + sa, g1, be1)
    ff = _ffn(h, w1, b1, w2, b2)
    return _layernorm(h + ff, g2, be2)


def _dec_layer(x, memb, bias_s, bias_c,
               sq, sk, sv, so, cq, ck, cv, co,
               w1, b1, w2, b2, g1, be1, g2, be2, g3, be3,
               nh, d_k, scale):
    # --- masked self-attention + LN1 ---
    xb = x.astype(jnp.bfloat16)
    q = jnp.dot(xb, sq, preferred_element_type=jnp.float32).astype(jnp.bfloat16)
    k = jnp.dot(xb, sk, preferred_element_type=jnp.float32).astype(jnp.bfloat16)
    v = jnp.dot(xb, sv, preferred_element_type=jnp.float32).astype(jnp.bfloat16)
    sa = _mha(q, k, v, so, bias_s, nh, d_k, scale)
    h1 = _layernorm(x + sa, g1, be1)

    # --- cross-attention + LN2 ---
    h1b = h1.astype(jnp.bfloat16)
    qc = jnp.dot(h1b, cq, preferred_element_type=jnp.float32).astype(jnp.bfloat16)
    kc = jnp.dot(memb, ck, preferred_element_type=jnp.float32).astype(jnp.bfloat16)
    vc = jnp.dot(memb, cv, preferred_element_type=jnp.float32).astype(jnp.bfloat16)
    ca = _mha(qc, kc, vc, co, bias_c, nh, d_k, scale)
    h2 = _layernorm(h1 + ca, g2, be2)

    # --- FFN + LN3 ---
    ff = _ffn(h2, w1, b1, w2, b2)
    return _layernorm(h2 + ff, g3, be3)


# ------------------------------ fused kernel -------------------------------- #

def _transformer_kernel(*refs, bsz, nh, d_k, n_enc, n_dec):
    (src_ref, tgt_ref,
     e_wq, e_wk, e_wv, e_wo, e_w1, e_b1, e_w2, e_b2,
     e_g1, e_be1, e_g2, e_be2,
     enc_g, enc_b,
     d_sq, d_sk, d_sv, d_so, d_cq, d_ck, d_cv, d_co,
     d_w1, d_b1, d_w2, d_b2,
     d_g1, d_be1, d_g2, d_be2, d_g3, d_be3,
     dec_g, dec_b,
     o_ref) = refs

    scale = 1.0 / math.sqrt(d_k)
    src = src_ref[...]                         # [S*B, D] f32, rows = (pos, batch)
    tgt = tgt_ref[...]                         # [T*B, D] f32
    re, rd = src.shape[0], tgt.shape[0]

    # cross-batch masks, built once for the whole fused forward
    bias_enc = _batch_bias(re, re, bsz)
    bias_self = bias_enc if rd == re else _batch_bias(rd, rd, bsz)
    bias_cross = bias_enc if rd == re else _batch_bias(rd, re, bsz)

    # ---- encoder stack + final encoder norm (memory stays in VMEM) ----
    x = src
    for i in range(n_enc):                     # static unrolled layer loop
        x = _enc_layer(x, bias_enc,
                       e_wq[i], e_wk[i], e_wv[i], e_wo[i],
                       e_w1[i], e_b1[i], e_w2[i], e_b2[i],
                       e_g1[i], e_be1[i], e_g2[i], e_be2[i],
                       nh, d_k, scale)
    mem = _layernorm(x, enc_g[...], enc_b[...])
    memb = mem.astype(jnp.bfloat16)            # cast once; reused by every decoder layer

    # ---- decoder stack + final decoder norm ----
    y = tgt
    for i in range(n_dec):
        y = _dec_layer(y, memb, bias_self, bias_cross,
                       d_sq[i], d_sk[i], d_sv[i], d_so[i],
                       d_cq[i], d_ck[i], d_cv[i], d_co[i],
                       d_w1[i], d_b1[i], d_w2[i], d_b2[i],
                       d_g1[i], d_be1[i], d_g2[i], d_be2[i], d_g3[i], d_be3[i],
                       nh, d_k, scale)
    y = _layernorm(y, dec_g[...], dec_b[...])
    o_ref[...] = y.astype(o_ref.dtype)


# ------------------------------ python wrapper ------------------------------ #

def transformer_forward(src, tgt, params, *, nh, d_k):
    S, B, D = src.shape
    T = tgt.shape[0]
    n_enc = params["e_wq"].shape[0]
    n_dec = params["d_sq"].shape[0]

    kern = functools.partial(_transformer_kernel, bsz=B, nh=nh, d_k=d_k,
                             n_enc=n_enc, n_dec=n_dec)
    args = (src.reshape(S * B, D), tgt.reshape(T * B, D),
            *(params[name] for name in _PARAM_ORDER))
    out = pl.pallas_call(
        kern,
        out_shape=jax.ShapeDtypeStruct((T * B, D), src.dtype),
    )(*args)
    return out.reshape(T, B, D)


# --------------------------- parameter creation ----------------------------- #

def _xavier(key, shape):
    fan_out, fan_in = shape
    std = math.sqrt(2.0 / (fan_in + fan_out))
    return std * jax.random.normal(key, shape, dtype=jnp.float32)


def init_transformer(key, rank, d_model, nh, n_enc, n_dec, dim_ff):
    d_k = d_model // nh

    def eff_proj(k3):
        k0, k1, k2 = jax.random.split(k3, 3)
        W0 = _xavier(k0, (d_model, rank))   # (d_model, rank)
        W1 = _xavier(k1, (nh, rank))        # (num_heads, rank)
        W2 = _xavier(k2, (d_k, rank))       # (d_k, rank)
        # M[a*d_k + c, d] = sum_r W1[a,r] * W2[c,r] * W0[d,r]   (applied as x @ M)
        return jnp.einsum("ar,cr,dr->acd", W1, W2, W0).reshape(d_model, d_model)

    def decomp_mha(k):
        kq, kk, kv, ko = jax.random.split(k, 4)
        return (eff_proj(kq), eff_proj(kk), eff_proj(kv),
                _xavier(ko, (d_model, d_model)).T)   # W_O pre-transposed (applied form)

    def ffn_ln(k, n_norms):
        k1, k2 = jax.random.split(k, 2)
        d = {"w1": _xavier(k1, (dim_ff, d_model)).T,   # applied form [d_model, dim_ff]
             "b1": jnp.zeros((1, dim_ff), jnp.float32),
             "w2": _xavier(k2, (d_model, dim_ff)).T,   # applied form [dim_ff, d_model]
             "b2": jnp.zeros((1, d_model), jnp.float32)}
        for n in range(1, n_norms + 1):
            d[f"g{n}"] = jnp.ones((1, d_model), jnp.float32)
            d[f"be{n}"] = jnp.zeros((1, d_model), jnp.float32)
        return d

    keys = jax.random.split(key, n_enc + n_dec)

    enc_names = ("wq", "wk", "wv", "wo", "w1", "b1", "w2", "b2",
                 "g1", "be1", "g2", "be2")
    dec_names = ("sq", "sk", "sv", "so", "cq", "ck", "cv", "co",
                 "w1", "b1", "w2", "b2", "g1", "be1", "g2", "be2", "g3", "be3")
    enc = {n: [] for n in enc_names}
    dec = {n: [] for n in dec_names}

    for i in range(n_enc):
        ka, kf = jax.random.split(keys[i], 2)
        wq, wk, wv, wo = decomp_mha(ka)
        f = ffn_ln(kf, 2)
        vals = {"wq": wq, "wk": wk, "wv": wv, "wo": wo, **f}
        for n in enc_names:
            enc[n].append(vals[n])

    for i in range(n_dec):
        ksa, kca, kf = jax.random.split(keys[n_enc + i], 3)
        sq, sk, sv, so = decomp_mha(ksa)
        cq, ck, cv, co = decomp_mha(kca)
        f = ffn_ln(kf, 3)
        vals = {"sq": sq, "sk": sk, "sv": sv, "so": so,
                "cq": cq, "ck": ck, "cv": cv, "co": co, **f}
        for n in dec_names:
            dec[n].append(vals[n])

    # Stack per-layer weights along a leading layer axis; bf16 for MXU operands only.
    enc_mm = {"wq", "wk", "wv", "wo", "w1", "w2"}
    dec_mm = {"sq", "sk", "sv", "so", "cq", "ck", "cv", "co", "w1", "w2"}
    params = {}
    for n, lst in enc.items():
        arr = jnp.stack(lst, axis=0)
        params["e_" + n] = arr.astype(jnp.bfloat16) if n in enc_mm else arr
    for n, lst in dec.items():
        arr = jnp.stack(lst, axis=0)
        params["d_" + n] = arr.astype(jnp.bfloat16) if n in dec_mm else arr
    params["enc_g"] = jnp.ones((1, d_model), jnp.float32)
    params["enc_b"] = jnp.zeros((1, d_model), jnp.float32)
    params["dec_g"] = jnp.ones((1, d_model), jnp.float32)
    params["dec_b"] = jnp.zeros((1, d_model), jnp.float32)
    return params


# ----------------------------------- main ----------------------------------- #

if __name__ == "__main__":
    rank, d_model, nhead = 4, 32, 4
    num_encoder_layers, num_decoder_layers, dim_feedforward = 2, 2, 64
    src_len, tgt_len, batch = 8, 8, 2
    d_k = d_model // nhead

    key = jax.random.PRNGKey(0)
    kp, ksrc, ktgt = jax.random.split(key, 3)

    params = init_transformer(kp, rank, d_model, nhead,
                              num_encoder_layers, num_decoder_layers,
                              dim_feedforward)

    src = jax.random.normal(ksrc, (src_len, batch, d_model), jnp.float32)
    tgt = jax.random.normal(ktgt, (tgt_len, batch, d_model), jnp.float32)

    fwd = jax.jit(functools.partial(transformer_forward, nh=nhead, d_k=d_k))
    out = fwd(src, tgt, params)
    jax.block_until_ready(out)

    assert out.shape == (tgt_len, batch, d_model)
    assert bool(jnp.all(jnp.isfinite(out)))
    print("KERNEL_OK")
</pallas_src>

<mosaic_0001>
module attributes {stable_mosaic.version = 11 : i64} {
  func.func @_transformer_kernel(%arg0: memref<16x32xf32, #tpu.memory_space<vmem>>, %arg1: memref<16x32xf32, #tpu.memory_space<vmem>>, %arg2: memref<2x32x32xbf16, #tpu.memory_space<vmem>>, %arg3: memref<2x32x32xbf16, #tpu.memory_space<vmem>>, %arg4: memref<2x32x32xbf16, #tpu.memory_space<vmem>>, %arg5: memref<2x32x32xbf16, #tpu.memory_space<vmem>>, %arg6: memref<2x32x64xbf16, #tpu.memory_space<vmem>>, %arg7: memref<2x1x64xf32, #tpu.memory_space<vmem>>, %arg8: memref<2x64x32xbf16, #tpu.memory_space<vmem>>, %arg9: memref<2x1x32xf32, #tpu.memory_space<vmem>>, %arg10: memref<2x1x32xf32, #tpu.memory_space<vmem>>, %arg11: memref<2x1x32xf32, #tpu.memory_space<vmem>>, %arg12: memref<2x1x32xf32, #tpu.memory_space<vmem>>, %arg13: memref<2x1x32xf32, #tpu.memory_space<vmem>>, %arg14: memref<1x32xf32, #tpu.memory_space<vmem>>, %arg15: memref<1x32xf32, #tpu.memory_space<vmem>>, %arg16: memref<2x32x32xbf16, #tpu.memory_space<vmem>>, %arg17: memref<2x32x32xbf16, #tpu.memory_space<vmem>>, %arg18: memref<2x32x32xbf16, #tpu.memory_space<vmem>>, %arg19: memref<2x32x32xbf16, #tpu.memory_space<vmem>>, %arg20: memref<2x32x32xbf16, #tpu.memory_space<vmem>>, %arg21: memref<2x32x32xbf16, #tpu.memory_space<vmem>>, %arg22: memref<2x32x32xbf16, #tpu.memory_space<vmem>>, %arg23: memref<2x32x32xbf16, #tpu.memory_space<vmem>>, %arg24: memref<2x32x64xbf16, #tpu.memory_space<vmem>>, %arg25: memref<2x1x64xf32, #tpu.memory_space<vmem>>, %arg26: memref<2x64x32xbf16, #tpu.memory_space<vmem>>, %arg27: memref<2x1x32xf32, #tpu.memory_space<vmem>>, %arg28: memref<2x1x32xf32, #tpu.memory_space<vmem>>, %arg29: memref<2x1x32xf32, #tpu.memory_space<vmem>>, %arg30: memref<2x1x32xf32, #tpu.memory_space<vmem>>, %arg31: memref<2x1x32xf32, #tpu.memory_space<vmem>>, %arg32: memref<2x1x32xf32, #tpu.memory_space<vmem>>, %arg33: memref<2x1x32xf32, #tpu.memory_space<vmem>>, %arg34: memref<1x32xf32, #tpu.memory_space<vmem>>, %arg35: memref<1x32xf32, #tpu.memory_space<vmem>>, %arg36: memref<16x32xf32, #tpu.memory_space<vmem>>) attributes {dimension_semantics = [], scalar_prefetch = 0 : i64, scratch_operands = 0 : i64, tpu.core_type = #tpu.core_type<tc>} {
    %c0 = arith.constant 0 : index
    %c0_0 = arith.constant 0 : index
    %0 = vector.load %arg0[%c0, %c0_0] : memref<16x32xf32, #tpu.memory_space<vmem>>, vector<16x32xf32>
    %c0_1 = arith.constant 0 : index
    %c0_2 = arith.constant 0 : index
    %1 = vector.load %arg1[%c0_1, %c0_2] : memref<16x32xf32, #tpu.memory_space<vmem>>, vector<16x32xf32>
    %2 = tpu.iota {dimensions = array<i32: 0>} : vector<16x16xi32>
    %3 = tpu.iota {dimensions = array<i32: 1>} : vector<16x16xi32>
    %c1_i32 = arith.constant 1 : i32
    %4 = vector.broadcast %c1_i32 : i32 to vector<16x16xi32>
    %5 = arith.andi %2, %4 : vector<16x16xi32>
    %c1_i32_3 = arith.constant 1 : i32
    %6 = vector.broadcast %c1_i32_3 : i32 to vector<16x16xi32>
    %7 = arith.andi %3, %6 : vector<16x16xi32>
    %8 = arith.cmpi eq, %5, %7 : vector<16x16xi32>
    %cst = arith.constant 0.000000e+00 : f32
    %cst_4 = arith.constant -1.000000e+30 : f32
    %9 = vector.broadcast %cst : f32 to vector<16x16xf32>
    %10 = vector.broadcast %cst_4 : f32 to vector<16x16xf32>
    %11 = arith.select %8, %9, %10 : vector<16x16xi1>, vector<16x16xf32>
    %c0_5 = arith.constant 0 : index
    %c0_6 = arith.constant 0 : index
    %c0_7 = arith.constant 0 : index
    %12 = vector.load %arg2[%c0_5, %c0_6, %c0_7] : memref<2x32x32xbf16, #tpu.memory_space<vmem>>, vector<1x32x32xbf16>
    %13 = vector.shape_cast %12 : vector<1x32x32xbf16> to vector<32x32xbf16>
    %c0_8 = arith.constant 0 : index
    %c0_9 = arith.constant 0 : index
    %c0_10 = arith.constant 0 : index
    %14 = vector.load %arg3[%c0_8, %c0_9, %c0_10] : memref<2x32x32xbf16, #tpu.memory_space<vmem>>, vector<1x32x32xbf16>
    %15 = vector.shape_cast %14 : vector<1x32x32xbf16> to vector<32x32xbf16>
    %c0_11 = arith.constant 0 : index
    %c0_12 = arith.constant 0 : index
    %c0_13 = arith.constant 0 : index
    %16 = vector.load %arg4[%c0_11, %c0_12, %c0_13] : memref<2x32x32xbf16, #tpu.memory_space<vmem>>, vector<1x32x32xbf16>
    %17 = vector.shape_cast %16 : vector<1x32x32xbf16> to vector<32x32xbf16>
    %c0_14 = arith.constant 0 : index
    %c0_15 = arith.constant 0 : index
    %c0_16 = arith.constant 0 : index
    %18 = vector.load %arg5[%c0_14, %c0_15, %c0_16] : memref<2x32x32xbf16, #tpu.memory_space<vmem>>, vector<1x32x32xbf16>
    %19 = vector.shape_cast %18 : vector<1x32x32xbf16> to vector<32x32xbf16>
    %c0_17 = arith.constant 0 : index
    %c0_18 = arith.constant 0 : index
    %c0_19 = arith.constant 0 : index
    %20 = vector.load %arg6[%c0_17, %c0_18, %c0_19] : memref<2x32x64xbf16, #tpu.memory_space<vmem>>, vector<1x32x64xbf16>
    %21 = vector.shape_cast %20 : vector<1x32x64xbf16> to vector<32x64xbf16>
    %c0_20 = arith.constant 0 : index
    %c0_21 = arith.constant 0 : index
    %c0_22 = arith.constant 0 : index
    %22 = vector.load %arg7[%c0_20, %c0_21, %c0_22] : memref<2x1x64xf32, #tpu.memory_space<vmem>>, vector<1x1x64xf32>
    %23 = vector.shape_cast %22 : vector<1x1x64xf32> to vector<1x64xf32>
    %c0_23 = arith.constant 0 : index
    %c0_24 = arith.constant 0 : index
    %c0_25 = arith.constant 0 : index
    %24 = vector.load %arg8[%c0_23, %c0_24, %c0_25] : memref<2x64x32xbf16, #tpu.memory_space<vmem>>, vector<1x64x32xbf16>
    %25 = vector.shape_cast %24 : vector<1x64x32xbf16> to vector<64x32xbf16>
    %c0_26 = arith.constant 0 : index
    %c0_27 = arith.constant 0 : index
    %c0_28 = arith.constant 0 : index
    %26 = vector.load %arg9[%c0_26, %c0_27, %c0_28] : memref<2x1x32xf32, #tpu.memory_space<vmem>>, vector<1x1x32xf32>
    %27 = vector.shape_cast %26 : vector<1x1x32xf32> to vector<1x32xf32>
    %c0_29 = arith.constant 0 : index
    %c0_30 = arith.constant 0 : index
    %c0_31 = arith.constant 0 : index
    %28 = vector.load %arg10[%c0_29, %c0_30, %c0_31] : memref<2x1x32xf32, #tpu.memory_space<vmem>>, vector<1x1x32xf32>
    %29 = vector.shape_cast %28 : vector<1x1x32xf32> to vector<1x32xf32>
    %c0_32 = arith.constant 0 : index
    %c0_33 = arith.constant 0 : index
    %c0_34 = arith.constant 0 : index
    %30 = vector.load %arg11[%c0_32, %c0_33, %c0_34] : memref<2x1x32xf32, #tpu.memory_space<vmem>>, vector<1x1x32xf32>
    %31 = vector.shape_cast %30 : vector<1x1x32xf32> to vector<1x32xf32>
    %c0_35 = arith.constant 0 : index
    %c0_36 = arith.constant 0 : index
    %c0_37 = arith.constant 0 : index
    %32 = vector.load %arg12[%c0_35, %c0_36, %c0_37] : memref<2x1x32xf32, #tpu.memory_space<vmem>>, vector<1x1x32xf32>
    %33 = vector.shape_cast %32 : vector<1x1x32xf32> to vector<1x32xf32>
    %c0_38 = arith.constant 0 : index
    %c0_39 = arith.constant 0 : index
    %c0_40 = arith.constant 0 : index
    %34 = vector.load %arg13[%c0_38, %c0_39, %c0_40] : memref<2x1x32xf32, #tpu.memory_space<vmem>>, vector<1x1x32xf32>
    %35 = vector.shape_cast %34 : vector<1x1x32xf32> to vector<1x32xf32>
    %36 = arith.truncf %0 : vector<16x32xf32> to vector<16x32xbf16>
    %cst_41 = arith.constant dense<0.000000e+00> : vector<16x32xf32>
    %37 = tpu.matmul %36, %13, %cst_41 {dimension_numbers = #tpu.dot_dimension_numbers<[1], [0], [0], [1], [0, 0, 1, 1], [], []>} : vector<16x32xbf16>, vector<32x32xbf16>, vector<16x32xf32> -> vector<16x32xf32>
    %38 = arith.truncf %37 : vector<16x32xf32> to vector<16x32xbf16>
    %cst_42 = arith.constant dense<0.000000e+00> : vector<16x32xf32>
    %39 = tpu.matmul %36, %15, %cst_42 {dimension_numbers = #tpu.dot_dimension_numbers<[1], [0], [0], [1], [0, 0, 1, 1], [], []>} : vector<16x32xbf16>, vector<32x32xbf16>, vector<16x32xf32> -> vector<16x32xf32>
    %40 = arith.truncf %39 : vector<16x32xf32> to vector<16x32xbf16>
    %cst_43 = arith.constant dense<0.000000e+00> : vector<16x32xf32>
    %41 = tpu.matmul %36, %17, %cst_43 {dimension_numbers = #tpu.dot_dimension_numbers<[1], [0], [0], [1], [0, 0, 1, 1], [], []>} : vector<16x32xbf16>, vector<32x32xbf16>, vector<16x32xf32> -> vector<16x32xf32>
    %42 = arith.truncf %41 : vector<16x32xf32> to vector<16x32xbf16>
    %43 = vector.extract_strided_slice %38 {offsets = [0, 0], sizes = [16, 8], strides = [1, 1]} : vector<16x32xbf16> to vector<16x8xbf16>
    %44 = vector.extract_strided_slice %40 {offsets = [0, 0], sizes = [16, 8], strides = [1, 1]} : vector<16x32xbf16> to vector<16x8xbf16>
    %45 = vector.extract_strided_slice %42 {offsets = [0, 0], sizes = [16, 8], strides = [1, 1]} : vector<16x32xbf16> to vector<16x8xbf16>
    %cst_44 = arith.constant dense<0.000000e+00> : vector<16x16xf32>
    %46 = tpu.matmul %43, %44, %cst_44 {dimension_numbers = #tpu.dot_dimension_numbers<[1], [1], [0], [0], [0, 0, 1, 0], [], []>} : vector<16x8xbf16>, vector<16x8xbf16>, vector<16x16xf32> -> vector<16x16xf32>
    %cst_45 = arith.constant 0.353553385 : f32
    %47 = vector.broadcast %cst_45 : f32 to vector<16x16xf32>
    %48 = arith.mulf %46, %47 : vector<16x16xf32>
    %49 = arith.addf %48, %11 : vector<16x16xf32>
    %cst_46 = arith.constant dense<0xFF800000> : vector<16xf32>
    %50 = vector.multi_reduction <maximumf>, %49, %cst_46 [1] : vector<16x16xf32> to vector<16xf32>
    %51 = vector.shape_cast %50 : vector<16xf32> to vector<16x1xf32>
    %52 = vector.broadcast %51 : vector<16x1xf32> to vector<16x16xf32>
    %53 = arith.subf %49, %52 : vector<16x16xf32>
    %54 = math.exp %53 : vector<16x16xf32>
    %cst_47 = arith.constant dense<0.000000e+00> : vector<16xf32>
    %55 = vector.multi_reduction <add>, %54, %cst_47 [1] : vector<16x16xf32> to vector<16xf32>
    %56 = vector.shape_cast %55 : vector<16xf32> to vector<16x1xf32>
    %57 = tpu.reciprocal %56 {approx = true} : vector<16x1xf32> -> vector<16x1xf32>
    %58 = vector.broadcast %57 : vector<16x1xf32> to vector<16x16xf32>
    %59 = arith.mulf %54, %58 : vector<16x16xf32>
    %60 = arith.truncf %59 : vector<16x16xf32> to vector<16x16xbf16>
    %cst_48 = arith.constant dense<0.000000e+00> : vector<16x8xf32>
    %61 = tpu.matmul %60, %45, %cst_48 {dimension_numbers = #tpu.dot_dimension_numbers<[1], [0], [0], [1], [0, 0, 1, 1], [], []>} : vector<16x16xbf16>, vector<16x8xbf16>, vector<16x8xf32> -> vector<16x8xf32>
    %62 = vector.extract_strided_slice %38 {offsets = [0, 8], sizes = [16, 8], strides = [1, 1]} : vector<16x32xbf16> to vector<16x8xbf16>
    %63 = vector.extract_strided_slice %40 {offsets = [0, 8], sizes = [16, 8], strides = [1, 1]} : vector<16x32xbf16> to vector<16x8xbf16>
    %64 = vector.extract_strided_slice %42 {offsets = [0, 8], sizes = [16, 8], strides = [1, 1]} : vector<16x32xbf16> to vector<16x8xbf16>
    %cst_49 = arith.constant dense<0.000000e+00> : vector<16x16xf32>
    %65 = tpu.matmul %62, %63, %cst_49 {dimension_numbers = #tpu.dot_dimension_numbers<[1], [1], [0], [0], [0, 0, 1, 0], [], []>} : vector<16x8xbf16>, vector<16x8xbf16>, vector<16x16xf32> -> vector<16x16xf32>
    %cst_50 = arith.constant 0.353553385 : f32
    %66 = vector.broadcast %cst_50 : f32 to vector<16x16xf32>
    %67 = arith.mulf %65, %66 : vector<16x16xf32>
    %68 = arith.addf %67, %11 : vector<16x16xf32>
    %cst_51 = arith.constant dense<0xFF800000> : vector<16xf32>
    %69 = vector.multi_reduction <maximumf>, %68, %cst_51 [1] : vector<16x16xf32> to vector<16xf32>
    %70 = vector.shape_cast %69 : vector<16xf32> to vector<16x1xf32>
    %71 = vector.broadcast %70 : vector<16x1xf32> to vector<16x16xf32>
    %72 = arith.subf %68, %71 : vector<16x16xf32>
    %73 = math.exp %72 : vector<16x16xf32>
    %cst_52 = arith.constant dense<0.000000e+00> : vector<16xf32>
    %74 = vector.multi_reduction <add>, %73, %cst_52 [1] : vector<16x16xf32> to vector<16xf32>
    %75 = vector.shape_cast %74 : vector<16xf32> to vector<16x1xf32>
    %76 = tpu.reciprocal %75 {approx = true} : vector<16x1xf32> -> vector<16x1xf32>
    %77 = vector.broadcast %76 : vector<16x1xf32> to vector<16x16xf32>
    %78 = arith.mulf %73, %77 : vector<16x16xf32>
    %79 = arith.truncf %78 : vector<16x16xf32> to vector<16x16xbf16>
    %cst_53 = arith.constant dense<0.000000e+00> : vector<16x8xf32>
    %80 = tpu.matmul %79, %64, %cst_53 {dimension_numbers = #tpu.dot_dimension_numbers<[1], [0], [0], [1], [0, 0, 1, 1], [], []>} : vector<16x16xbf16>, vector<16x8xbf16>, vector<16x8xf32> -> vector<16x8xf32>
    %81 = vector.extract_strided_slice %38 {offsets = [0, 16], sizes = [16, 8], strides = [1, 1]} : vector<16x32xbf16> to vector<16x8xbf16>
    %82 = vector.extract_strided_slice %40 {offsets = [0, 16], sizes = [16, 8], strides = [1, 1]} : vector<16x32xbf16> to vector<16x8xbf16>
    %83 = vector.extract_strided_slice %42 {offsets = [0, 16], sizes = [16, 8], strides = [1, 1]} : vector<16x32xbf16> to vector<16x8xbf16>
    %cst_54 = arith.constant dense<0.000000e+00> : vector<16x16xf32>
    %84 = tpu.matmul %81, %82, %cst_54 {dimension_numbers = #tpu.dot_dimension_numbers<[1], [1], [0], [0], [0, 0, 1, 0], [], []>} : vector<16x8xbf16>, vector<16x8xbf16>, vector<16x16xf32> -> vector<16x16xf32>
    %cst_55 = arith.constant 0.353553385 : f32
    %85 = vector.broadcast %cst_55 : f32 to vector<16x16xf32>
    %86 = arith.mulf %84, %85 : vector<16x16xf32>
    %87 = arith.addf %86, %11 : vector<16x16xf32>
    %cst_56 = arith.constant dense<0xFF800000> : vector<16xf32>
    %88 = vector.multi_reduction <maximumf>, %87, %cst_56 [1] : vector<16x16xf32> to vector<16xf32>
    %89 = vector.shape_cast %88 : vector<16xf32> to vector<16x1xf32>
    %90 = vector.broadcast %89 : vector<16x1xf32> to vector<16x16xf32>
    %91 = arith.subf %87, %90 : vector<16x16xf32>
    %92 = math.exp %91 : vector<16x16xf32>
    %cst_57 = arith.constant dense<0.000000e+00> : vector<16xf32>
    %93 = vector.multi_reduction <add>, %92, %cst_57 [1] : vector<16x16xf32> to vector<16xf32>
    %94 = vector.shape_cast %93 : vector<16xf32> to vector<16x1xf32>
    %95 = tpu.reciprocal %94 {approx = true} : vector<16x1xf32> -> vector<16x1xf32>
    %96 = vector.broadcast %95 : vector<16x1xf32> to vector<16x16xf32>
    %97 = arith.mulf %92, %96 : vector<16x16xf32>
    %98 = arith.truncf %97 : vector<16x16xf32> to vector<16x16xbf16>
    %cst_58 = arith.constant dense<0.000000e+00> : vector<16x8xf32>
    %99 = tpu.matmul %98, %83, %cst_58 {dimension_numbers = #tpu.dot_dimension_numbers<[1], [0], [0], [1], [0, 0, 1, 1], [], []>} : vector<16x16xbf16>, vector<16x8xbf16>, vector<16x8xf32> -> vector<16x8xf32>
    %100 = vector.extract_strided_slice %38 {offsets = [0, 24], sizes = [16, 8], strides = [1, 1]} : vector<16x32xbf16> to vector<16x8xbf16>
    %101 = vector.extract_strided_slice %40 {offsets = [0, 24], sizes = [16, 8], strides = [1, 1]} : vector<16x32xbf16> to vector<16x8xbf16>
    %102 = vector.extract_strided_slice %42 {offsets = [0, 24], sizes = [16, 8], strides = [1, 1]} : vector<16x32xbf16> to vector<16x8xbf16>
    %cst_59 = arith.constant dense<0.000000e+00> : vector<16x16xf32>
    %103 = tpu.matmul %100, %101, %cst_59 {dimension_numbers = #tpu.dot_dimension_numbers<[1], [1], [0], [0], [0, 0, 1, 0], [], []>} : vector<16x8xbf16>, vector<16x8xbf16>, vector<16x16xf32> -> vector<16x16xf32>
    %cst_60 = arith.constant 0.353553385 : f32
    %104 = vector.broadcast %cst_60 : f32 to vector<16x16xf32>
    %105 = arith.mulf %103, %104 : vector<16x16xf32>
    %106 = arith.addf %105, %11 : vector<16x16xf32>
    %cst_61 = arith.constant dense<0xFF800000> : vector<16xf32>
    %107 = vector.multi_reduction <maximumf>, %106, %cst_61 [1] : vector<16x16xf32> to vector<16xf32>
    %108 = vector.shape_cast %107 : vector<16xf32> to vector<16x1xf32>
    %109 = vector.broadcast %108 : vector<16x1xf32> to vector<16x16xf32>
    %110 = arith.subf %106, %109 : vector<16x16xf32>
    %111 = math.exp %110 : vector<16x16xf32>
    %cst_62 = arith.constant dense<0.000000e+00> : vector<16xf32>
    %112 = vector.multi_reduction <add>, %111, %cst_62 [1] : vector<16x16xf32> to vector<16xf32>
    %113 = vector.shape_cast %112 : vector<16xf32> to vector<16x1xf32>
    %114 = tpu.reciprocal %113 {approx = true} : vector<16x1xf32> -> vector<16x1xf32>
    %115 = vector.broadcast %114 : vector<16x1xf32> to vector<16x16xf32>
    %116 = arith.mulf %111, %115 : vector<16x16xf32>
    %117 = arith.truncf %116 : vector<16x16xf32> to vector<16x16xbf16>
    %cst_63 = arith.constant dense<0.000000e+00> : vector<16x8xf32>
    %118 = tpu.matmul %117, %102, %cst_63 {dimension_numbers = #tpu.dot_dimension_numbers<[1], [0], [0], [1], [0, 0, 1, 1], [], []>} : vector<16x16xbf16>, vector<16x8xbf16>, vector<16x8xf32> -> vector<16x8xf32>
    %119 = tpu.concatenate %61, %80, %99, %118 in 1 : vector<16x8xf32>, vector<16x8xf32>, vector<16x8xf32>, vector<16x8xf32> -> vector<16x32xf32>
    %120 = arith.truncf %119 : vector<16x32xf32> to vector<16x32xbf16>
    %cst_64 = arith.constant dense<0.000000e+00> : vector<16x32xf32>
    %121 = tpu.matmul %120, %19, %cst_64 {dimension_numbers = #tpu.dot_dimension_numbers<[1], [0], [0], [1], [0, 0, 1, 1], [], []>} : vector<16x32xbf16>, vector<32x32xbf16>, vector<16x32xf32> -> vector<16x32xf32>
    %122 = arith.addf %0, %121 : vector<16x32xf32>
    %cst_65 = arith.constant dense<0.000000e+00> : vector<16xf32>
    %123 = vector.multi_reduction <add>, %122, %cst_65 [1] : vector<16x32xf32> to vector<16xf32>
    %124 = vector.shape_cast %123 : vector<16xf32> to vector<16x1xf32>
    %cst_66 = arith.constant 3.200000e+01 : f32
    %125 = vector.broadcast %cst_66 : f32 to vector<16x1xf32>
    %126 = arith.divf %124, %125 : vector<16x1xf32>
    %127 = vector.broadcast %126 : vector<16x1xf32> to vector<16x32xf32>
    %128 = arith.subf %122, %127 : vector<16x32xf32>
    %129 = arith.mulf %128, %128 : vector<16x32xf32>
    %cst_67 = arith.constant dense<0.000000e+00> : vector<16xf32>
    %130 = vector.multi_reduction <add>, %129, %cst_67 [1] : vector<16x32xf32> to vector<16xf32>
    %131 = vector.shape_cast %130 : vector<16xf32> to vector<16x1xf32>
    %cst_68 = arith.constant 3.200000e+01 : f32
    %132 = vector.broadcast %cst_68 : f32 to vector<16x1xf32>
    %133 = arith.divf %131, %132 : vector<16x1xf32>
    %134 = vector.broadcast %126 : vector<16x1xf32> to vector<16x32xf32>
    %135 = arith.subf %122, %134 : vector<16x32xf32>
    %cst_69 = arith.constant 9.99999974E-6 : f32
    %136 = vector.broadcast %cst_69 : f32 to vector<16x1xf32>
    %137 = arith.addf %133, %136 : vector<16x1xf32>
    %138 = math.rsqrt %137 : vector<16x1xf32>
    %139 = vector.broadcast %138 : vector<16x1xf32> to vector<16x32xf32>
    %140 = arith.mulf %135, %139 : vector<16x32xf32>
    %141 = vector.broadcast %29 : vector<1x32xf32> to vector<16x32xf32>
    %142 = arith.mulf %140, %141 : vector<16x32xf32>
    %143 = vector.broadcast %31 : vector<1x32xf32> to vector<16x32xf32>
    %144 = arith.addf %142, %143 : vector<16x32xf32>
    %145 = arith.truncf %144 : vector<16x32xf32> to vector<16x32xbf16>
    %cst_70 = arith.constant dense<0.000000e+00> : vector<16x64xf32>
    %146 = tpu.matmul %145, %21, %cst_70 {dimension_numbers = #tpu.dot_dimension_numbers<[1], [0], [0], [1], [0, 0, 1, 1], [], []>} : vector<16x32xbf16>, vector<32x64xbf16>, vector<16x64xf32> -> vector<16x64xf32>
    %147 = vector.broadcast %23 : vector<1x64xf32> to vector<16x64xf32>
    %148 = arith.addf %146, %147 : vector<16x64xf32>
    %cst_71 = arith.constant 0.000000e+00 : f32
    %149 = vector.broadcast %cst_71 : f32 to vector<16x64xf32>
    %150 = arith.maximumf %148, %149 : vector<16x64xf32>
    %151 = arith.truncf %150 : vector<16x64xf32> to vector<16x64xbf16>
    %cst_72 = arith.constant dense<0.000000e+00> : vector<16x32xf32>
    %152 = tpu.matmul %151, %25, %cst_72 {dimension_numbers = #tpu.dot_dimension_numbers<[1], [0], [0], [1], [0, 0, 1, 1], [], []>} : vector<16x64xbf16>, vector<64x32xbf16>, vector<16x32xf32> -> vector<16x32xf32>
    %153 = vector.broadcast %27 : vector<1x32xf32> to vector<16x32xf32>
    %154 = arith.addf %152, %153 : vector<16x32xf32>
    %155 = arith.addf %144, %154 : vector<16x32xf32>
    %cst_73 = arith.constant dense<0.000000e+00> : vector<16xf32>
    %156 = vector.multi_reduction <add>, %155, %cst_73 [1] : vector<16x32xf32> to vector<16xf32>
    %157 = vector.shape_cast %156 : vector<16xf32> to vector<16x1xf32>
    %cst_74 = arith.constant 3.200000e+01 : f32
    %158 = vector.broadcast %cst_74 : f32 to vector<16x1xf32>
    %159 = arith.divf %157, %158 : vector<16x1xf32>
    %160 = vector.broadcast %159 : vector<16x1xf32> to vector<16x32xf32>
    %161 = arith.subf %155, %160 : vector<16x32xf32>
    %162 = arith.mulf %161, %161 : vector<16x32xf32>
    %cst_75 = arith.constant dense<0.000000e+00> : vector<16xf32>
    %163 = vector.multi_reduction <add>, %162, %cst_75 [1] : vector<16x32xf32> to vector<16xf32>
    %164 = vector.shape_cast %163 : vector<16xf32> to vector<16x1xf32>
    %cst_76 = arith.constant 3.200000e+01 : f32
    %165 = vector.broadcast %cst_76 : f32 to vector<16x1xf32>
    %166 = arith.divf %164, %165 : vector<16x1xf32>
    %167 = vector.broadcast %159 : vector<16x1xf32> to vector<16x32xf32>
    %168 = arith.subf %155, %167 : vector<16x32xf32>
    %cst_77 = arith.constant 9.99999974E-6 : f32
    %169 = vector.broadcast %cst_77 : f32 to vector<16x1xf32>
    %170 = arith.addf %166, %169 : vector<16x1xf32>
    %171 = math.rsqrt %170 : vector<16x1xf32>
    %172 = vector.broadcast %171 : vector<16x1xf32> to vector<16x32xf32>
    %173 = arith.mulf %168, %172 : vector<16x32xf32>
    %174 = vector.broadcast %33 : vector<1x32xf32> to vector<16x32xf32>
    %175 = arith.mulf %173, %174 : vector<16x32xf32>
    %176 = vector.broadcast %35 : vector<1x32xf32> to vector<16x32xf32>
    %177 = arith.addf %175, %176 : vector<16x32xf32>
    %c1 = arith.constant 1 : index
    %c0_78 = arith.constant 0 : index
    %c0_79 = arith.constant 0 : index
    %178 = vector.load %arg2[%c1, %c0_78, %c0_79] : memref<2x32x32xbf16, #tpu.memory_space<vmem>>, vector<1x32x32xbf16>
    %179 = vector.shape_cast %178 : vector<1x32x32xbf16> to vector<32x32xbf16>
    %c1_80 = arith.constant 1 : index
    %c0_81 = arith.constant 0 : index
    %c0_82 = arith.constant 0 : index
    %180 = vector.load %arg3[%c1_80, %c0_81, %c0_82] : memref<2x32x32xbf16, #tpu.memory_space<vmem>>, vector<1x32x32xbf16>
    %181 = vector.shape_cast %180 : vector<1x32x32xbf16> to vector<32x32xbf16>
    %c1_83 = arith.constant 1 : index
    %c0_84 = arith.constant 0 : index
    %c0_85 = arith.constant 0 : index
    %182 = vector.load %arg4[%c1_83, %c0_84, %c0_85] : memref<2x32x32xbf16, #tpu.memory_space<vmem>>, vector<1x32x32xbf16>
    %183 = vector.shape_cast %182 : vector<1x32x32xbf16> to vector<32x32xbf16>
    %c1_86 = arith.constant 1 : index
    %c0_87 = arith.constant 0 : index
    %c0_88 = arith.constant 0 : index
    %184 = vector.load %arg5[%c1_86, %c0_87, %c0_88] : memref<2x32x32xbf16, #tpu.memory_space<vmem>>, vector<1x32x32xbf16>
    %185 = vector.shape_cast %184 : vector<1x32x32xbf16> to vector<32x32xbf16>
    %c1_89 = arith.constant 1 : index
    %c0_90 = arith.constant 0 : index
    %c0_91 = arith.constant 0 : index
    %186 = vector.load %arg6[%c1_89, %c0_90, %c0_91] : memref<2x32x64xbf16, #tpu.memory_space<vmem>>, vector<1x32x64xbf16>
    %187 = vector.shape_cast %186 : vector<1x32x64xbf16> to vector<32x64xbf16>
    %c1_92 = arith.constant 1 : index
    %c0_93 = arith.constant 0 : index
    %c0_94 = arith.constant 0 : index
    %188 = vector.load %arg7[%c1_92, %c0_93, %c0_94] : memref<2x1x64xf32, #tpu.memory_space<vmem>>, vector<1x1x64xf32>
    %189 = vector.shape_cast %188 : vector<1x1x64xf32> to vector<1x64xf32>
    %c1_95 = arith.constant 1 : index
    %c0_96 = arith.constant 0 : index
    %c0_97 = arith.constant 0 : index
    %190 = vector.load %arg8[%c1_95, %c0_96, %c0_97] : memref<2x64x32xbf16, #tpu.memory_space<vmem>>, vector<1x64x32xbf16>
    %191 = vector.shape_cast %190 : vector<1x64x32xbf16> to vector<64x32xbf16>
    %c1_98 = arith.constant 1 : index
    %c0_99 = arith.constant 0 : index
    %c0_100 = arith.constant 0 : index
    %192 = vector.load %arg9[%c1_98, %c0_99, %c0_100] : memref<2x1x32xf32, #tpu.memory_space<vmem>>, vector<1x1x32xf32>
    %193 = vector.shape_cast %192 : vector<1x1x32xf32> to vector<1x32xf32>
    %c1_101 = arith.constant 1 : index
    %c0_102 = arith.constant 0 : index
    %c0_103 = arith.constant 0 : index
    %194 = vector.load %arg10[%c1_101, %c0_102, %c0_103] : memref<2x1x32xf32, #tpu.memory_space<vmem>>, vector<1x1x32xf32>
    %195 = vector.shape_cast %194 : vector<1x1x32xf32> to vector<1x32xf32>
    %c1_104 = arith.constant 1 : index
    %c0_105 = arith.constant 0 : index
    %c0_106 = arith.constant 0 : index
    %196 = vector.load %arg11[%c1_104, %c0_105, %c0_106] : memref<2x1x32xf32, #tpu.memory_space<vmem>>, vector<1x1x32xf32>
    %197 = vector.shape_cast %196 : vector<1x1x32xf32> to vector<1x32xf32>
    %c1_107 = arith.constant 1 : index
    %c0_108 = arith.constant 0 : index
    %c0_109 = arith.constant 0 : index
    %198 = vector.load %arg12[%c1_107, %c0_108, %c0_109] : memref<2x1x32xf32, #tpu.memory_space<vmem>>, vector<1x1x32xf32>
    %199 = vector.shape_cast %198 : vector<1x1x32xf32> to vector<1x32xf32>
    %c1_110 = arith.constant 1 : index
    %c0_111 = arith.constant 0 : index
    %c0_112 = arith.constant 0 : index
    %200 = vector.load %arg13[%c1_110, %c0_111, %c0_112] : memref<2x1x32xf32, #tpu.memory_space<vmem>>, vector<1x1x32xf32>
    %201 = vector.shape_cast %200 : vector<1x1x32xf32> to vector<1x32xf32>
    %202 = arith.truncf %177 : vector<16x32xf32> to vector<16x32xbf16>
    %cst_113 = arith.constant dense<0.000000e+00> : vector<16x32xf32>
    %203 = tpu.matmul %202, %179, %cst_113 {dimension_numbers = #tpu.dot_dimension_numbers<[1], [0], [0], [1], [0, 0, 1, 1], [], []>} : vector<16x32xbf16>, vector<32x32xbf16>, vector<16x32xf32> -> vector<16x32xf32>
    %204 = arith.truncf %203 : vector<16x32xf32> to vector<16x32xbf16>
    %cst_114 = arith.constant dense<0.000000e+00> : vector<16x32xf32>
    %205 = tpu.matmul %202, %181, %cst_114 {dimension_numbers = #tpu.dot_dimension_numbers<[1], [0], [0], [1], [0, 0, 1, 1], [], []>} : vector<16x32xbf16>, vector<32x32xbf16>, vector<16x32xf32> -> vector<16x32xf32>
    %206 = arith.truncf %205 : vector<16x32xf32> to vector<16x32xbf16>
    %cst_115 = arith.constant dense<0.000000e+00> : vector<16x32xf32>
    %207 = tpu.matmul %202, %183, %cst_115 {dimension_numbers = #tpu.dot_dimension_numbers<[1], [0], [0], [1], [0, 0, 1, 1], [], []>} : vector<16x32xbf16>, vector<32x32xbf16>, vector<16x32xf32> -> vector<16x32xf32>
    %208 = arith.truncf %207 : vector<16x32xf32> to vector<16x32xbf16>
    %209 = vector.extract_strided_slice %204 {offsets = [0, 0], sizes = [16, 8], strides = [1, 1]} : vector<16x32xbf16> to vector<16x8xbf16>
    %210 = vector.extract_strided_slice %206 {offsets = [0, 0], sizes = [16, 8], strides = [1, 1]} : vector<16x32xbf16> to vector<16x8xbf16>
    %211 = vector.extract_strided_slice %208 {offsets = [0, 0], sizes = [16, 8], strides = [1, 1]} : vector<16x32xbf16> to vector<16x8xbf16>
    %cst_116 = arith.constant dense<0.000000e+00> : vector<16x16xf32>
    %212 = tpu.matmul %209, %210, %cst_116 {dimension_numbers = #tpu.dot_dimension_numbers<[1], [1], [0], [0], [0, 0, 1, 0], [], []>} : vector<16x8xbf16>, vector<16x8xbf16>, vector<16x16xf32> -> vector<16x16xf32>
    %cst_117 = arith.constant 0.353553385 : f32
    %213 = vector.broadcast %cst_117 : f32 to vector<16x16xf32>
    %214 = arith.mulf %212, %213 : vector<16x16xf32>
    %215 = arith.addf %214, %11 : vector<16x16xf32>
    %cst_118 = arith.constant dense<0xFF800000> : vector<16xf32>
    %216 = vector.multi_reduction <maximumf>, %215, %cst_118 [1] : vector<16x16xf32> to vector<16xf32>
    %217 = vector.shape_cast %216 : vector<16xf32> to vector<16x1xf32>
    %218 = vector.broadcast %217 : vector<16x1xf32> to vector<16x16xf32>
    %219 = arith.subf %215, %218 : vector<16x16xf32>
    %220 = math.exp %219 : vector<16x16xf32>
    %cst_119 = arith.constant dense<0.000000e+00> : vector<16xf32>
    %221 = vector.multi_reduction <add>, %220, %cst_119 [1] : vector<16x16xf32> to vector<16xf32>
    %222 = vector.shape_cast %221 : vector<16xf32> to vector<16x1xf32>
    %223 = tpu.reciprocal %222 {approx = true} : vector<16x1xf32> -> vector<16x1xf32>
    %224 = vector.broadcast %223 : vector<16x1xf32> to vector<16x16xf32>
    %225 = arith.mulf %220, %224 : vector<16x16xf32>
    %226 = arith.truncf %225 : vector<16x16xf32> to vector<16x16xbf16>
    %cst_120 = arith.constant dense<0.000000e+00> : vector<16x8xf32>
    %227 = tpu.matmul %226, %211, %cst_120 {dimension_numbers = #tpu.dot_dimension_numbers<[1], [0], [0], [1], [0, 0, 1, 1], [], []>} : vector<16x16xbf16>, vector<16x8xbf16>, vector<16x8xf32> -> vector<16x8xf32>
    %228 = vector.extract_strided_slice %204 {offsets = [0, 8], sizes = [16, 8], strides = [1, 1]} : vector<16x32xbf16> to vector<16x8xbf16>
    %229 = vector.extract_strided_slice %206 {offsets = [0, 8], sizes = [16, 8], strides = [1, 1]} : vector<16x32xbf16> to vector<16x8xbf16>
    %230 = vector.extract_strided_slice %208 {offsets = [0, 8], sizes = [16, 8], strides = [1, 1]} : vector<16x32xbf16> to vector<16x8xbf16>
    %cst_121 = arith.constant dense<0.000000e+00> : vector<16x16xf32>
    %231 = tpu.matmul %228, %229, %cst_121 {dimension_numbers = #tpu.dot_dimension_numbers<[1], [1], [0], [0], [0, 0, 1, 0], [], []>} : vector<16x8xbf16>, vector<16x8xbf16>, vector<16x16xf32> -> vector<16x16xf32>
    %cst_122 = arith.constant 0.353553385 : f32
    %232 = vector.broadcast %cst_122 : f32 to vector<16x16xf32>
    %233 = arith.mulf %231, %232 : vector<16x16xf32>
    %234 = arith.addf %233, %11 : vector<16x16xf32>
    %cst_123 = arith.constant dense<0xFF800000> : vector<16xf32>
    %235 = vector.multi_reduction <maximumf>, %234, %cst_123 [1] : vector<16x16xf32> to vector<16xf32>
    %236 = vector.shape_cast %235 : vector<16xf32> to vector<16x1xf32>
    %237 = vector.broadcast %236 : vector<16x1xf32> to vector<16x16xf32>
    %238 = arith.subf %234, %237 : vector<16x16xf32>
    %239 = math.exp %238 : vector<16x16xf32>
    %cst_124 = arith.constant dense<0.000000e+00> : vector<16xf32>
    %240 = vector.multi_reduction <add>, %239, %cst_124 [1] : vector<16x16xf32> to vector<16xf32>
    %241 = vector.shape_cast %240 : vector<16xf32> to vector<16x1xf32>
    %242 = tpu.reciprocal %241 {approx = true} : vector<16x1xf32> -> vector<16x1xf32>
    %243 = vector.broadcast %242 : vector<16x1xf32> to vector<16x16xf32>
    %244 = arith.mulf %239, %243 : vector<16x16xf32>
    %245 = arith.truncf %244 : vector<16x16xf32> to vector<16x16xbf16>
    %cst_125 = arith.constant dense<0.000000e+00> : vector<16x8xf32>
    %246 = tpu.matmul %245, %230, %cst_125 {dimension_numbers = #tpu.dot_dimension_numbers<[1], [0], [0], [1], [0, 0, 1, 1], [], []>} : vector<16x16xbf16>, vector<16x8xbf16>, vector<16x8xf32> -> vector<16x8xf32>
    %247 = vector.extract_strided_slice %204 {offsets = [0, 16], sizes = [16, 8], strides = [1, 1]} : vector<16x32xbf16> to vector<16x8xbf16>
    %248 = vector.extract_strided_slice %206 {offsets = [0, 16], sizes = [16, 8], strides = [1, 1]} : vector<16x32xbf16> to vector<16x8xbf16>
    %249 = vector.extract_strided_slice %208 {offsets = [0, 16], sizes = [16, 8], strides = [1, 1]} : vector<16x32xbf16> to vector<16x8xbf16>
    %cst_126 = arith.constant dense<0.000000e+00> : vector<16x16xf32>
    %250 = tpu.matmul %247, %248, %cst_126 {dimension_numbers = #tpu.dot_dimension_numbers<[1], [1], [0], [0], [0, 0, 1, 0], [], []>} : vector<16x8xbf16>, vector<16x8xbf16>, vector<16x16xf32> -> vector<16x16xf32>
    %cst_127 = arith.constant 0.353553385 : f32
    %251 = vector.broadcast %cst_127 : f32 to vector<16x16xf32>
    %252 = arith.mulf %250, %251 : vector<16x16xf32>
    %253 = arith.addf %252, %11 : vector<16x16xf32>
    %cst_128 = arith.constant dense<0xFF800000> : vector<16xf32>
    %254 = vector.multi_reduction <maximumf>, %253, %cst_128 [1] : vector<16x16xf32> to vector<16xf32>
    %255 = vector.shape_cast %254 : vector<16xf32> to vector<16x1xf32>
    %256 = vector.broadcast %255 : vector<16x1xf32> to vector<16x16xf32>
    %257 = arith.subf %253, %256 : vector<16x16xf32>
    %258 = math.exp %257 : vector<16x16xf32>
    %cst_129 = arith.constant dense<0.000000e+00> : vector<16xf32>
    %259 = vector.multi_reduction <add>, %258, %cst_129 [1] : vector<16x16xf32> to vector<16xf32>
    %260 = vector.shape_cast %259 : vector<16xf32> to vector<16x1xf32>
    %261 = tpu.reciprocal %260 {approx = true} : vector<16x1xf32> -> vector<16x1xf32>
    %262 = vector.broadcast %261 : vector<16x1xf32> to vector<16x16xf32>
    %263 = arith.mulf %258, %262 : vector<16x16xf32>
    %264 = arith.truncf %263 : vector<16x16xf32> to vector<16x16xbf16>
    %cst_130 = arith.constant dense<0.000000e+00> : vector<16x8xf32>
    %265 = tpu.matmul %264, %249, %cst_130 {dimension_numbers = #tpu.dot_dimension_numbers<[1], [0], [0], [1], [0, 0, 1, 1], [], []>} : vector<16x16xbf16>, vector<16x8xbf16>, vector<16x8xf32> -> vector<16x8xf32>
    %266 = vector.extract_strided_slice %204 {offsets = [0, 24], sizes = [16, 8], strides = [1, 1]} : vector<16x32xbf16> to vector<16x8xbf16>
    %267 = vector.extract_strided_slice %206 {offsets = [0, 24], sizes = [16, 8], strides = [1, 1]} : vector<16x32xbf16> to vector<16x8xbf16>
    %268 = vector.extract_strided_slice %208 {offsets = [0, 24], sizes = [16, 8], strides = [1, 1]} : vector<16x32xbf16> to vector<16x8xbf16>
    %cst_131 = arith.constant dense<0.000000e+00> : vector<16x16xf32>
    %269 = tpu.matmul %266, %267, %cst_131 {dimension_numbers = #tpu.dot_dimension_numbers<[1], [1], [0], [0], [0, 0, 1, 0], [], []>} : vector<16x8xbf16>, vector<16x8xbf16>, vector<16x16xf32> -> vector<16x16xf32>
    %cst_132 = arith.constant 0.353553385 : f32
    %270 = vector.broadcast %cst_132 : f32 to vector<16x16xf32>
    %271 = arith.mulf %269, %270 : vector<16x16xf32>
    %272 = arith.addf %271, %11 : vector<16x16xf32>
    %cst_133 = arith.constant dense<0xFF800000> : vector<16xf32>
    %273 = vector.multi_reduction <maximumf>, %272, %cst_133 [1] : vector<16x16xf32> to vector<16xf32>
    %274 = vector.shape_cast %273 : vector<16xf32> to vector<16x1xf32>
    %275 = vector.broadcast %274 : vector<16x1xf32> to vector<16x16xf32>
    %276 = arith.subf %272, %275 : vector<16x16xf32>
    %277 = math.exp %276 : vector<16x16xf32>
    %cst_134 = arith.constant dense<0.000000e+00> : vector<16xf32>
    %278 = vector.multi_reduction <add>, %277, %cst_134 [1] : vector<16x16xf32> to vector<16xf32>
    %279 = vector.shape_cast %278 : vector<16xf32> to vector<16x1xf32>
    %280 = tpu.reciprocal %279 {approx = true} : vector<16x1xf32> -> vector<16x1xf32>
    %281 = vector.broadcast %280 : vector<16x1xf32> to vector<16x16xf32>
    %282 = arith.mulf %277, %281 : vector<16x16xf32>
    %283 = arith.truncf %282 : vector<16x16xf32> to vector<16x16xbf16>
    %cst_135 = arith.constant dense<0.000000e+00> : vector<16x8xf32>
    %284 = tpu.matmul %283, %268, %cst_135 {dimension_numbers = #tpu.dot_dimension_numbers<[1], [0], [0], [1], [0, 0, 1, 1], [], []>} : vector<16x16xbf16>, vector<16x8xbf16>, vector<16x8xf32> -> vector<16x8xf32>
    %285 = tpu.concatenate %227, %246, %265, %284 in 1 : vector<16x8xf32>, vector<16x8xf32>, vector<16x8xf32>, vector<16x8xf32> -> vector<16x32xf32>
    %286 = arith.truncf %285 : vector<16x32xf32> to vector<16x32xbf16>
    %cst_136 = arith.constant dense<0.000000e+00> : vector<16x32xf32>
    %287 = tpu.matmul %286, %185, %cst_136 {dimension_numbers = #tpu.dot_dimension_numbers<[1], [0], [0], [1], [0, 0, 1, 1], [], []>} : vector<16x32xbf16>, vector<32x32xbf16>, vector<16x32xf32> -> vector<16x32xf32>
    %288 = arith.addf %177, %287 : vector<16x32xf32>
    %cst_137 = arith.constant dense<0.000000e+00> : vector<16xf32>
    %289 = vector.multi_reduction <add>, %288, %cst_137 [1] : vector<16x32xf32> to vector<16xf32>
    %290 = vector.shape_cast %289 : vector<16xf32> to vector<16x1xf32>
    %cst_138 = arith.constant 3.200000e+01 : f32
    %291 = vector.broadcast %cst_138 : f32 to vector<16x1xf32>
    %292 = arith.divf %290, %291 : vector<16x1xf32>
    %293 = vector.broadcast %292 : vector<16x1xf32> to vector<16x32xf32>
    %294 = arith.subf %288, %293 : vector<16x32xf32>
    %295 = arith.mulf %294, %294 : vector<16x32xf32>
    %cst_139 = arith.constant dense<0.000000e+00> : vector<16xf32>
    %296 = vector.multi_reduction <add>, %295, %cst_139 [1] : vector<16x32xf32> to vector<16xf32>
    %297 = vector.shape_cast %296 : vector<16xf32> to vector<16x1xf32>
    %cst_140 = arith.constant 3.200000e+01 : f32
    %298 = vector.broadcast %cst_140 : f32 to vector<16x1xf32>
    %299 = arith.divf %297, %298 : vector<16x1xf32>
    %300 = vector.broadcast %292 : vector<16x1xf32> to vector<16x32xf32>
    %301 = arith.subf %288, %300 : vector<16x32xf32>
    %cst_141 = arith.constant 9.99999974E-6 : f32
    %302 = vector.broadcast %cst_141 : f32 to vector<16x1xf32>
    %303 = arith.addf %299, %302 : vector<16x1xf32>
    %304 = math.rsqrt %303 : vector<16x1xf32>
    %305 = vector.broadcast %304 : vector<16x1xf32> to vector<16x32xf32>
    %306 = arith.mulf %301, %305 : vector<16x32xf32>
    %307 = vector.broadcast %195 : vector<1x32xf32> to vector<16x32xf32>
    %308 = arith.mulf %306, %307 : vector<16x32xf32>
    %309 = vector.broadcast %197 : vector<1x32xf32> to vector<16x32xf32>
    %310 = arith.addf %308, %309 : vector<16x32xf32>
    %311 = arith.truncf %310 : vector<16x32xf32> to vector<16x32xbf16>
    %cst_142 = arith.constant dense<0.000000e+00> : vector<16x64xf32>
    %312 = tpu.matmul %311, %187, %cst_142 {dimension_numbers = #tpu.dot_dimension_numbers<[1], [0], [0], [1], [0, 0, 1, 1], [], []>} : vector<16x32xbf16>, vector<32x64xbf16>, vector<16x64xf32> -> vector<16x64xf32>
    %313 = vector.broadcast %189 : vector<1x64xf32> to vector<16x64xf32>
    %314 = arith.addf %312, %313 : vector<16x64xf32>
    %cst_143 = arith.constant 0.000000e+00 : f32
    %315 = vector.broadcast %cst_143 : f32 to vector<16x64xf32>
    %316 = arith.maximumf %314, %315 : vector<16x64xf32>
    %317 = arith.truncf %316 : vector<16x64xf32> to vector<16x64xbf16>
    %cst_144 = arith.constant dense<0.000000e+00> : vector<16x32xf32>
    %318 = tpu.matmul %317, %191, %cst_144 {dimension_numbers = #tpu.dot_dimension_numbers<[1], [0], [0], [1], [0, 0, 1, 1], [], []>} : vector<16x64xbf16>, vector<64x32xbf16>, vector<16x32xf32> -> vector<16x32xf32>
    %319 = vector.broadcast %193 : vector<1x32xf32> to vector<16x32xf32>
    %320 = arith.addf %318, %319 : vector<16x32xf32>
    %321 = arith.addf %310, %320 : vector<16x32xf32>
    %cst_145 = arith.constant dense<0.000000e+00> : vector<16xf32>
    %322 = vector.multi_reduction <add>, %321, %cst_145 [1] : vector<16x32xf32> to vector<16xf32>
    %323 = vector.shape_cast %322 : vector<16xf32> to vector<16x1xf32>
    %cst_146 = arith.constant 3.200000e+01 : f32
    %324 = vector.broadcast %cst_146 : f32 to vector<16x1xf32>
    %325 = arith.divf %323, %324 : vector<16x1xf32>
    %326 = vector.broadcast %325 : vector<16x1xf32> to vector<16x32xf32>
    %327 = arith.subf %321, %326 : vector<16x32xf32>
    %328 = arith.mulf %327, %327 : vector<16x32xf32>
    %cst_147 = arith.constant dense<0.000000e+00> : vector<16xf32>
    %329 = vector.multi_reduction <add>, %328, %cst_147 [1] : vector<16x32xf32> to vector<16xf32>
    %330 = vector.shape_cast %329 : vector<16xf32> to vector<16x1xf32>
    %cst_148 = arith.constant 3.200000e+01 : f32
    %331 = vector.broadcast %cst_148 : f32 to vector<16x1xf32>
    %332 = arith.divf %330, %331 : vector<16x1xf32>
    %333 = vector.broadcast %325 : vector<16x1xf32> to vector<16x32xf32>
    %334 = arith.subf %321, %333 : vector<16x32xf32>
    %cst_149 = arith.constant 9.99999974E-6 : f32
    %335 = vector.broadcast %cst_149 : f32 to vector<16x1xf32>
    %336 = arith.addf %332, %335 : vector<16x1xf32>
    %337 = math.rsqrt %336 : vector<16x1xf32>
    %338 = vector.broadcast %337 : vector<16x1xf32> to vector<16x32xf32>
    %339 = arith.mulf %334, %338 : vector<16x32xf32>
    %340 = vector.broadcast %199 : vector<1x32xf32> to vector<16x32xf32>
    %341 = arith.mulf %339, %340 : vector<16x32xf32>
    %342 = vector.broadcast %201 : vector<1x32xf32> to vector<16x32xf32>
    %343 = arith.addf %341, %342 : vector<16x32xf32>
    %c0_150 = arith.constant 0 : index
    %c0_151 = arith.constant 0 : index
    %344 = vector.load %arg14[%c0_150, %c0_151] : memref<1x32xf32, #tpu.memory_space<vmem>>, vector<1x32xf32>
    %c0_152 = arith.constant 0 : index
    %c0_153 = arith.constant 0 : index
    %345 = vector.load %arg15[%c0_152, %c0_153] : memref<1x32xf32, #tpu.memory_space<vmem>>, vector<1x32xf32>
    %cst_154 = arith.constant dense<0.000000e+00> : vector<16xf32>
    %346 = vector.multi_reduction <add>, %343, %cst_154 [1] : vector<16x32xf32> to vector<16xf32>
    %347 = vector.shape_cast %346 : vector<16xf32> to vector<16x1xf32>
    %cst_155 = arith.constant 3.200000e+01 : f32
    %348 = vector.broadcast %cst_155 : f32 to vector<16x1xf32>
    %349 = arith.divf %347, %348 : vector<16x1xf32>
    %350 = vector.broadcast %349 : vector<16x1xf32> to vector<16x32xf32>
    %351 = arith.subf %343, %350 : vector<16x32xf32>
    %352 = arith.mulf %351, %351 : vector<16x32xf32>
    %cst_156 = arith.constant dense<0.000000e+00> : vector<16xf32>
    %353 = vector.multi_reduction <add>, %352, %cst_156 [1] : vector<16x32xf32> to vector<16xf32>
    %354 = vector.shape_cast %353 : vector<16xf32> to vector<16x1xf32>
    %cst_157 = arith.constant 3.200000e+01 : f32
    %355 = vector.broadcast %cst_157 : f32 to vector<16x1xf32>
    %356 = arith.divf %354, %355 : vector<16x1xf32>
    %357 = vector.broadcast %349 : vector<16x1xf32> to vector<16x32xf32>
    %358 = arith.subf %343, %357 : vector<16x32xf32>
    %cst_158 = arith.constant 9.99999974E-6 : f32
    %359 = vector.broadcast %cst_158 : f32 to vector<16x1xf32>
    %360 = arith.addf %356, %359 : vector<16x1xf32>
    %361 = math.rsqrt %360 : vector<16x1xf32>
    %362 = vector.broadcast %361 : vector<16x1xf32> to vector<16x32xf32>
    %363 = arith.mulf %358, %362 : vector<16x32xf32>
    %364 = vector.broadcast %344 : vector<1x32xf32> to vector<16x32xf32>
    %365 = arith.mulf %363, %364 : vector<16x32xf32>
    %366 = vector.broadcast %345 : vector<1x32xf32> to vector<16x32xf32>
    %367 = arith.addf %365, %366 : vector<16x32xf32>
    %368 = arith.truncf %367 : vector<16x32xf32> to vector<16x32xbf16>
    %c0_159 = arith.constant 0 : index
    %c0_160 = arith.constant 0 : index
    %c0_161 = arith.constant 0 : index
    %369 = vector.load %arg16[%c0_159, %c0_160, %c0_161] : memref<2x32x32xbf16, #tpu.memory_space<vmem>>, vector<1x32x32xbf16>
    %370 = vector.shape_cast %369 : vector<1x32x32xbf16> to vector<32x32xbf16>
    %c0_162 = arith.constant 0 : index
    %c0_163 = arith.constant 0 : index
    %c0_164 = arith.constant 0 : index
    %371 = vector.load %arg17[%c0_162, %c0_163, %c0_164] : memref<2x32x32xbf16, #tpu.memory_space<vmem>>, vector<1x32x32xbf16>
    %372 = vector.shape_cast %371 : vector<1x32x32xbf16> to vector<32x32xbf16>
    %c0_165 = arith.constant 0 : index
    %c0_166 = arith.constant 0 : index
    %c0_167 = arith.constant 0 : index
    %373 = vector.load %arg18[%c0_165, %c0_166, %c0_167] : memref<2x32x32xbf16, #tpu.memory_space<vmem>>, vector<1x32x32xbf16>
    %374 = vector.shape_cast %373 : vector<1x32x32xbf16> to vector<32x32xbf16>
    %c0_168 = arith.constant 0 : index
    %c0_169 = arith.constant 0 : index
    %c0_170 = arith.constant 0 : index
    %375 = vector.load %arg19[%c0_168, %c0_169, %c0_170] : memref<2x32x32xbf16, #tpu.memory_space<vmem>>, vector<1x32x32xbf16>
    %376 = vector.shape_cast %375 : vector<1x32x32xbf16> to vector<32x32xbf16>
    %c0_171 = arith.constant 0 : index
    %c0_172 = arith.constant 0 : index
    %c0_173 = arith.constant 0 : index
    %377 = vector.load %arg20[%c0_171, %c0_172, %c0_173] : memref<2x32x32xbf16, #tpu.memory_space<vmem>>, vector<1x32x32xbf16>
    %378 = vector.shape_cast %377 : vector<1x32x32xbf16> to vector<32x32xbf16>
    %c0_174 = arith.constant 0 : index
    %c0_175 = arith.constant 0 : index
    %c0_176 = arith.constant 0 : index
    %379 = vector.load %arg21[%c0_174, %c0_175, %c0_176] : memref<2x32x32xbf16, #tpu.memory_space<vmem>>, vector<1x32x32xbf16>
    %380 = vector.shape_cast %379 : vector<1x32x32xbf16> to vector<32x32xbf16>
    %c0_177 = arith.constant 0 : index
    %c0_178 = arith.constant 0 : index
    %c0_179 = arith.constant 0 : index
    %381 = vector.load %arg22[%c0_177, %c0_178, %c0_179] : memref<2x32x32xbf16, #tpu.memory_space<vmem>>, vector<1x32x32xbf16>
    %382 = vector.shape_cast %381 : vector<1x32x32xbf16> to vector<32x32xbf16>
    %c0_180 = arith.constant 0 : index
    %c0_181 = arith.constant 0 : index
    %c0_182 = arith.constant 0 : index
    %383 = vector.load %arg23[%c0_180, %c0_181, %c0_182] : memref<2x32x32xbf16, #tpu.memory_space<vmem>>, vector<1x32x32xbf16>
    %384 = vector.shape_cast %383 : vector<1x32x32xbf16> to vector<32x32xbf16>
    %c0_183 = arith.constant 0 : index
    %c0_184 = arith.constant 0 : index
    %c0_185 = arith.constant 0 : index
    %385 = vector.load %arg24[%c0_183, %c0_184, %c0_185] : memref<2x32x64xbf16, #tpu.memory_space<vmem>>, vector<1x32x64xbf16>
    %386 = vector.shape_cast %385 : vector<1x32x64xbf16> to vector<32x64xbf16>
    %c0_186 = arith.constant 0 : index
    %c0_187 = arith.constant 0 : index
    %c0_188 = arith.constant 0 : index
    %387 = vector.load %arg25[%c0_186, %c0_187, %c0_188] : memref<2x1x64xf32, #tpu.memory_space<vmem>>, vector<1x1x64xf32>
    %388 = vector.shape_cast %387 : vector<1x1x64xf32> to vector<1x64xf32>
    %c0_189 = arith.constant 0 : index
    %c0_190 = arith.constant 0 : index
    %c0_191 = arith.constant 0 : index
    %389 = vector.load %arg26[%c0_189, %c0_190, %c0_191] : memref<2x64x32xbf16, #tpu.memory_space<vmem>>, vector<1x64x32xbf16>
    %390 = vector.shape_cast %389 : vector<1x64x32xbf16> to vector<64x32xbf16>
    %c0_192 = arith.constant 0 : index
    %c0_193 = arith.constant 0 : index
    %c0_194 = arith.constant 0 : index
    %391 = vector.load %arg27[%c0_192, %c0_193, %c0_194] : memref<2x1x32xf32, #tpu.memory_space<vmem>>, vector<1x1x32xf32>
    %392 = vector.shape_cast %391 : vector<1x1x32xf32> to vector<1x32xf32>
    %c0_195 = arith.constant 0 : index
    %c0_196 = arith.constant 0 : index
    %c0_197 = arith.constant 0 : index
    %393 = vector.load %arg28[%c0_195, %c0_196, %c0_197] : memref<2x1x32xf32, #tpu.memory_space<vmem>>, vector<1x1x32xf32>
    %394 = vector.shape_cast %393 : vector<1x1x32xf32> to vector<1x32xf32>
    %c0_198 = arith.constant 0 : index
    %c0_199 = arith.constant 0 : index
    %c0_200 = arith.constant 0 : index
    %395 = vector.load %arg29[%c0_198, %c0_199, %c0_200] : memref<2x1x32xf32, #tpu.memory_space<vmem>>, vector<1x1x32xf32>
    %396 = vector.shape_cast %395 : vector<1x1x32xf32> to vector<1x32xf32>
    %c0_201 = arith.constant 0 : index
    %c0_202 = arith.constant 0 : index
    %c0_203 = arith.constant 0 : index
    %397 = vector.load %arg30[%c0_201, %c0_202, %c0_203] : memref<2x1x32xf32, #tpu.memory_space<vmem>>, vector<1x1x32xf32>
    %398 = vector.shape_cast %397 : vector<1x1x32xf32> to vector<1x32xf32>
    %c0_204 = arith.constant 0 : index
    %c0_205 = arith.constant 0 : index
    %c0_206 = arith.constant 0 : index
    %399 = vector.load %arg31[%c0_204, %c0_205, %c0_206] : memref<2x1x32xf32, #tpu.memory_space<vmem>>, vector<1x1x32xf32>
    %400 = vector.shape_cast %399 : vector<1x1x32xf32> to vector<1x32xf32>
    %c0_207 = arith.constant 0 : index
    %c0_208 = arith.constant 0 : index
    %c0_209 = arith.constant 0 : index
    %401 = vector.load %arg32[%c0_207, %c0_208, %c0_209] : memref<2x1x32xf32, #tpu.memory_space<vmem>>, vector<1x1x32xf32>
    %402 = vector.shape_cast %401 : vector<1x1x32xf32> to vector<1x32xf32>
    %c0_210 = arith.constant 0 : index
    %c0_211 = arith.constant 0 : index
    %c0_212 = arith.constant 0 : index
    %403 = vector.load %arg33[%c0_210, %c0_211, %c0_212] : memref<2x1x32xf32, #tpu.memory_space<vmem>>, vector<1x1x32xf32>
    %404 = vector.shape_cast %403 : vector<1x1x32xf32> to vector<1x32xf32>
    %405 = arith.truncf %1 : vector<16x32xf32> to vector<16x32xbf16>
    %cst_213 = arith.constant dense<0.000000e+00> : vector<16x32xf32>
    %406 = tpu.matmul %405, %370, %cst_213 {dimension_numbers = #tpu.dot_dimension_numbers<[1], [0], [0], [1], [0, 0, 1, 1], [], []>} : vector<16x32xbf16>, vector<32x32xbf16>, vector<16x32xf32> -> vector<16x32xf32>
    %407 = arith.truncf %406 : vector<16x32xf32> to vector<16x32xbf16>
    %cst_214 = arith.constant dense<0.000000e+00> : vector<16x32xf32>
    %408 = tpu.matmul %405, %372, %cst_214 {dimension_numbers = #tpu.dot_dimension_numbers<[1], [0], [0], [1], [0, 0, 1, 1], [], []>} : vector<16x32xbf16>, vector<32x32xbf16>, vector<16x32xf32> -> vector<16x32xf32>
    %409 = arith.truncf %408 : vector<16x32xf32> to vector<16x32xbf16>
    %cst_215 = arith.constant dense<0.000000e+00> : vector<16x32xf32>
    %410 = tpu.matmul %405, %374, %cst_215 {dimension_numbers = #tpu.dot_dimension_numbers<[1], [0], [0], [1], [0, 0, 1, 1], [], []>} : vector<16x32xbf16>, vector<32x32xbf16>, vector<16x32xf32> -> vector<16x32xf32>
    %411 = arith.truncf %410 : vector<16x32xf32> to vector<16x32xbf16>
    %412 = vector.extract_strided_slice %407 {offsets = [0, 0], sizes = [16, 8], strides = [1, 1]} : vector<16x32xbf16> to vector<16x8xbf16>
    %413 = vector.extract_strided_slice %409 {offsets = [0, 0], sizes = [16, 8], strides = [1, 1]} : vector<16x32xbf16> to vector<16x8xbf16>
    %414 = vector.extract_strided_slice %411 {offsets = [0, 0], sizes = [16, 8], strides = [1, 1]} : vector<16x32xbf16> to vector<16x8xbf16>
    %cst_216 = arith.constant dense<0.000000e+00> : vector<16x16xf32>
    %415 = tpu.matmul %412, %413, %cst_216 {dimension_numbers = #tpu.dot_dimension_numbers<[1], [1], [0], [0], [0, 0, 1, 0], [], []>} : vector<16x8xbf16>, vector<16x8xbf16>, vector<16x16xf32> -> vector<16x16xf32>
    %cst_217 = arith.constant 0.353553385 : f32
    %416 = vector.broadcast %cst_217 : f32 to vector<16x16xf32>
    %417 = arith.mulf %415, %416 : vector<16x16xf32>
    %418 = arith.addf %417, %11 : vector<16x16xf32>
    %cst_218 = arith.constant dense<0xFF800000> : vector<16xf32>
    %419 = vector.multi_reduction <maximumf>, %418, %cst_218 [1] : vector<16x16xf32> to vector<16xf32>
    %420 = vector.shape_cast %419 : vector<16xf32> to vector<16x1xf32>
    %421 = vector.broadcast %420 : vector<16x1xf32> to vector<16x16xf32>
    %422 = arith.subf %418, %421 : vector<16x16xf32>
    %423 = math.exp %422 : vector<16x16xf32>
    %cst_219 = arith.constant dense<0.000000e+00> : vector<16xf32>
    %424 = vector.multi_reduction <add>, %423, %cst_219 [1] : vector<16x16xf32> to vector<16xf32>
    %425 = vector.shape_cast %424 : vector<16xf32> to vector<16x1xf32>
    %426 = tpu.reciprocal %425 {approx = true} : vector<16x1xf32> -> vector<16x1xf32>
    %427 = vector.broadcast %426 : vector<16x1xf32> to vector<16x16xf32>
    %428 = arith.mulf %423, %427 : vector<16x16xf32>
    %429 = arith.truncf %428 : vector<16x16xf32> to vector<16x16xbf16>
    %cst_220 = arith.constant dense<0.000000e+00> : vector<16x8xf32>
    %430 = tpu.matmul %429, %414, %cst_220 {dimension_numbers = #tpu.dot_dimension_numbers<[1], [0], [0], [1], [0, 0, 1, 1], [], []>} : vector<16x16xbf16>, vector<16x8xbf16>, vector<16x8xf32> -> vector<16x8xf32>
    %431 = vector.extract_strided_slice %407 {offsets = [0, 8], sizes = [16, 8], strides = [1, 1]} : vector<16x32xbf16> to vector<16x8xbf16>
    %432 = vector.extract_strided_slice %409 {offsets = [0, 8], sizes = [16, 8], strides = [1, 1]} : vector<16x32xbf16> to vector<16x8xbf16>
    %433 = vector.extract_strided_slice %411 {offsets = [0, 8], sizes = [16, 8], strides = [1, 1]} : vector<16x32xbf16> to vector<16x8xbf16>
    %cst_221 = arith.constant dense<0.000000e+00> : vector<16x16xf32>
    %434 = tpu.matmul %431, %432, %cst_221 {dimension_numbers = #tpu.dot_dimension_numbers<[1], [1], [0], [0], [0, 0, 1, 0], [], []>} : vector<16x8xbf16>, vector<16x8xbf16>, vector<16x16xf32> -> vector<16x16xf32>
    %cst_222 = arith.constant 0.353553385 : f32
    %435 = vector.broadcast %cst_222 : f32 to vector<16x16xf32>
    %436 = arith.mulf %434, %435 : vector<16x16xf32>
    %437 = arith.addf %436, %11 : vector<16x16xf32>
    %cst_223 = arith.constant dense<0xFF800000> : vector<16xf32>
    %438 = vector.multi_reduction <maximumf>, %437, %cst_223 [1] : vector<16x16xf32> to vector<16xf32>
    %439 = vector.shape_cast %438 : vector<16xf32> to vector<16x1xf32>
    %440 = vector.broadcast %439 : vector<16x1xf32> to vector<16x16xf32>
    %441 = arith.subf %437, %440 : vector<16x16xf32>
    %442 = math.exp %441 : vector<16x16xf32>
    %cst_224 = arith.constant dense<0.000000e+00> : vector<16xf32>
    %443 = vector.multi_reduction <add>, %442, %cst_224 [1] : vector<16x16xf32> to vector<16xf32>
    %444 = vector.shape_cast %443 : vector<16xf32> to vector<16x1xf32>
    %445 = tpu.reciprocal %444 {approx = true} : vector<16x1xf32> -> vector<16x1xf32>
    %446 = vector.broadcast %445 : vector<16x1xf32> to vector<16x16xf32>
    %447 = arith.mulf %442, %446 : vector<16x16xf32>
    %448 = arith.truncf %447 : vector<16x16xf32> to vector<16x16xbf16>
    %cst_225 = arith.constant dense<0.000000e+00> : vector<16x8xf32>
    %449 = tpu.matmul %448, %433, %cst_225 {dimension_numbers = #tpu.dot_dimension_numbers<[1], [0], [0], [1], [0, 0, 1, 1], [], []>} : vector<16x16xbf16>, vector<16x8xbf16>, vector<16x8xf32> -> vector<16x8xf32>
    %450 = vector.extract_strided_slice %407 {offsets = [0, 16], sizes = [16, 8], strides = [1, 1]} : vector<16x32xbf16> to vector<16x8xbf16>
    %451 = vector.extract_strided_slice %409 {offsets = [0, 16], sizes = [16, 8], strides = [1, 1]} : vector<16x32xbf16> to vector<16x8xbf16>
    %452 = vector.extract_strided_slice %411 {offsets = [0, 16], sizes = [16, 8], strides = [1, 1]} : vector<16x32xbf16> to vector<16x8xbf16>
    %cst_226 = arith.constant dense<0.000000e+00> : vector<16x16xf32>
    %453 = tpu.matmul %450, %451, %cst_226 {dimension_numbers = #tpu.dot_dimension_numbers<[1], [1], [0], [0], [0, 0, 1, 0], [], []>} : vector<16x8xbf16>, vector<16x8xbf16>, vector<16x16xf32> -> vector<16x16xf32>
    %cst_227 = arith.constant 0.353553385 : f32
    %454 = vector.broadcast %cst_227 : f32 to vector<16x16xf32>
    %455 = arith.mulf %453, %454 : vector<16x16xf32>
    %456 = arith.addf %455, %11 : vector<16x16xf32>
    %cst_228 = arith.constant dense<0xFF800000> : vector<16xf32>
    %457 = vector.multi_reduction <maximumf>, %456, %cst_228 [1] : vector<16x16xf32> to vector<16xf32>
    %458 = vector.shape_cast %457 : vector<16xf32> to vector<16x1xf32>
    %459 = vector.broadcast %458 : vector<16x1xf32> to vector<16x16xf32>
    %460 = arith.subf %456, %459 : vector<16x16xf32>
    %461 = math.exp %460 : vector<16x16xf32>
    %cst_229 = arith.constant dense<0.000000e+00> : vector<16xf32>
    %462 = vector.multi_reduction <add>, %461, %cst_229 [1] : vector<16x16xf32> to vector<16xf32>
    %463 = vector.shape_cast %462 : vector<16xf32> to vector<16x1xf32>
    %464 = tpu.reciprocal %463 {approx = true} : vector<16x1xf32> -> vector<16x1xf32>
    %465 = vector.broadcast %464 : vector<16x1xf32> to vector<16x16xf32>
    %466 = arith.mulf %461, %465 : vector<16x16xf32>
    %467 = arith.truncf %466 : vector<16x16xf32> to vector<16x16xbf16>
    %cst_230 = arith.constant dense<0.000000e+00> : vector<16x8xf32>
    %468 = tpu.matmul %467, %452, %cst_230 {dimension_numbers = #tpu.dot_dimension_numbers<[1], [0], [0], [1], [0, 0, 1, 1], [], []>} : vector<16x16xbf16>, vector<16x8xbf16>, vector<16x8xf32> -> vector<16x8xf32>
    %469 = vector.extract_strided_slice %407 {offsets = [0, 24], sizes = [16, 8], strides = [1, 1]} : vector<16x32xbf16> to vector<16x8xbf16>
    %470 = vector.extract_strided_slice %409 {offsets = [0, 24], sizes = [16, 8], strides = [1, 1]} : vector<16x32xbf16> to vector<16x8xbf16>
    %471 = vector.extract_strided_slice %411 {offsets = [0, 24], sizes = [16, 8], strides = [1, 1]} : vector<16x32xbf16> to vector<16x8xbf16>
    %cst_231 = arith.constant dense<0.000000e+00> : vector<16x16xf32>
    %472 = tpu.matmul %469, %470, %cst_231 {dimension_numbers = #tpu.dot_dimension_numbers<[1], [1], [0], [0], [0, 0, 1, 0], [], []>} : vector<16x8xbf16>, vector<16x8xbf16>, vector<16x16xf32> -> vector<16x16xf32>
    %cst_232 = arith.constant 0.353553385 : f32
    %473 = vector.broadcast %cst_232 : f32 to vector<16x16xf32>
    %474 = arith.mulf %472, %473 : vector<16x16xf32>
    %475 = arith.addf %474, %11 : vector<16x16xf32>
    %cst_233 = arith.constant dense<0xFF800000> : vector<16xf32>
    %476 = vector.multi_reduction <maximumf>, %475, %cst_233 [1] : vector<16x16xf32> to vector<16xf32>
    %477 = vector.shape_cast %476 : vector<16xf32> to vector<16x1xf32>
    %478 = vector.broadcast %477 : vector<16x1xf32> to vector<16x16xf32>
    %479 = arith.subf %475, %478 : vector<16x16xf32>
    %480 = math.exp %479 : vector<16x16xf32>
    %cst_234 = arith.constant dense<0.000000e+00> : vector<16xf32>
    %481 = vector.multi_reduction <add>, %480, %cst_234 [1] : vector<16x16xf32> to vector<16xf32>
    %482 = vector.shape_cast %481 : vector<16xf32> to vector<16x1xf32>
    %483 = tpu.reciprocal %482 {approx = true} : vector<16x1xf32> -> vector<16x1xf32>
    %484 = vector.broadcast %483 : vector<16x1xf32> to vector<16x16xf32>
    %485 = arith.mulf %480, %484 : vector<16x16xf32>
    %486 = arith.truncf %485 : vector<16x16xf32> to vector<16x16xbf16>
    %cst_235 = arith.constant dense<0.000000e+00> : vector<16x8xf32>
    %487 = tpu.matmul %486, %471, %cst_235 {dimension_numbers = #tpu.dot_dimension_numbers<[1], [0], [0], [1], [0, 0, 1, 1], [], []>} : vector<16x16xbf16>, vector<16x8xbf16>, vector<16x8xf32> -> vector<16x8xf32>
    %488 = tpu.concatenate %430, %449, %468, %487 in 1 : vector<16x8xf32>, vector<16x8xf32>, vector<16x8xf32>, vector<16x8xf32> -> vector<16x32xf32>
    %489 = arith.truncf %488 : vector<16x32xf32> to vector<16x32xbf16>
    %cst_236 = arith.constant dense<0.000000e+00> : vector<16x32xf32>
    %490 = tpu.matmul %489, %376, %cst_236 {dimension_numbers = #tpu.dot_dimension_numbers<[1], [0], [0], [1], [0, 0, 1, 1], [], []>} : vector<16x32xbf16>, vector<32x32xbf16>, vector<16x32xf32> -> vector<16x32xf32>
    %491 = arith.addf %1, %490 : vector<16x32xf32>
    %cst_237 = arith.constant dense<0.000000e+00> : vector<16xf32>
    %492 = vector.multi_reduction <add>, %491, %cst_237 [1] : vector<16x32xf32> to vector<16xf32>
    %493 = vector.shape_cast %492 : vector<16xf32> to vector<16x1xf32>
    %cst_238 = arith.constant 3.200000e+01 : f32
    %494 = vector.broadcast %cst_238 : f32 to vector<16x1xf32>
    %495 = arith.divf %493, %494 : vector<16x1xf32>
    %496 = vector.broadcast %495 : vector<16x1xf32> to vector<16x32xf32>
    %497 = arith.subf %491, %496 : vector<16x32xf32>
    %498 = arith.mulf %497, %497 : vector<16x32xf32>
    %cst_239 = arith.constant dense<0.000000e+00> : vector<16xf32>
    %499 = vector.multi_reduction <add>, %498, %cst_239 [1] : vector<16x32xf32> to vector<16xf32>
    %500 = vector.shape_cast %499 : vector<16xf32> to vector<16x1xf32>
    %cst_240 = arith.constant 3.200000e+01 : f32
    %501 = vector.broadcast %cst_240 : f32 to vector<16x1xf32>
    %502 = arith.divf %500, %501 : vector<16x1xf32>
    %503 = vector.broadcast %495 : vector<16x1xf32> to vector<16x32xf32>
    %504 = arith.subf %491, %503 : vector<16x32xf32>
    %cst_241 = arith.constant 9.99999974E-6 : f32
    %505 = vector.broadcast %cst_241 : f32 to vector<16x1xf32>
    %506 = arith.addf %502, %505 : vector<16x1xf32>
    %507 = math.rsqrt %506 : vector<16x1xf32>
    %508 = vector.broadcast %507 : vector<16x1xf32> to vector<16x32xf32>
    %509 = arith.mulf %504, %508 : vector<16x32xf32>
    %510 = vector.broadcast %394 : vector<1x32xf32> to vector<16x32xf32>
    %511 = arith.mulf %509, %510 : vector<16x32xf32>
    %512 = vector.broadcast %396 : vector<1x32xf32> to vector<16x32xf32>
    %513 = arith.addf %511, %512 : vector<16x32xf32>
    %514 = arith.truncf %513 : vector<16x32xf32> to vector<16x32xbf16>
    %cst_242 = arith.constant dense<0.000000e+00> : vector<16x32xf32>
    %515 = tpu.matmul %514, %378, %cst_242 {dimension_numbers = #tpu.dot_dimension_numbers<[1], [0], [0], [1], [0, 0, 1, 1], [], []>} : vector<16x32xbf16>, vector<32x32xbf16>, vector<16x32xf32> -> vector<16x32xf32>
    %516 = arith.truncf %515 : vector<16x32xf32> to vector<16x32xbf16>
    %cst_243 = arith.constant dense<0.000000e+00> : vector<16x32xf32>
    %517 = tpu.matmul %368, %380, %cst_243 {dimension_numbers = #tpu.dot_dimension_numbers<[1], [0], [0], [1], [0, 0, 1, 1], [], []>} : vector<16x32xbf16>, vector<32x32xbf16>, vector<16x32xf32> -> vector<16x32xf32>
    %518 = arith.truncf %517 : vector<16x32xf32> to vector<16x32xbf16>
    %cst_244 = arith.constant dense<0.000000e+00> : vector<16x32xf32>
    %519 = tpu.matmul %368, %382, %cst_244 {dimension_numbers = #tpu.dot_dimension_numbers<[1], [0], [0], [1], [0, 0, 1, 1], [], []>} : vector<16x32xbf16>, vector<32x32xbf16>, vector<16x32xf32> -> vector<16x32xf32>
    %520 = arith.truncf %519 : vector<16x32xf32> to vector<16x32xbf16>
    %521 = vector.extract_strided_slice %516 {offsets = [0, 0], sizes = [16, 8], strides = [1, 1]} : vector<16x32xbf16> to vector<16x8xbf16>
    %522 = vector.extract_strided_slice %518 {offsets = [0, 0], sizes = [16, 8], strides = [1, 1]} : vector<16x32xbf16> to vector<16x8xbf16>
    %523 = vector.extract_strided_slice %520 {offsets = [0, 0], sizes = [16, 8], strides = [1, 1]} : vector<16x32xbf16> to vector<16x8xbf16>
    %cst_245 = arith.constant dense<0.000000e+00> : vector<16x16xf32>
    %524 = tpu.matmul %521, %522, %cst_245 {dimension_numbers = #tpu.dot_dimension_numbers<[1], [1], [0], [0], [0, 0, 1, 0], [], []>} : vector<16x8xbf16>, vector<16x8xbf16>, vector<16x16xf32> -> vector<16x16xf32>
    %cst_246 = arith.constant 0.353553385 : f32
    %525 = vector.broadcast %cst_246 : f32 to vector<16x16xf32>
    %526 = arith.mulf %524, %525 : vector<16x16xf32>
    %527 = arith.addf %526, %11 : vector<16x16xf32>
    %cst_247 = arith.constant dense<0xFF800000> : vector<16xf32>
    %528 = vector.multi_reduction <maximumf>, %527, %cst_247 [1] : vector<16x16xf32> to vector<16xf32>
    %529 = vector.shape_cast %528 : vector<16xf32> to vector<16x1xf32>
    %530 = vector.broadcast %529 : vector<16x1xf32> to vector<16x16xf32>
    %531 = arith.subf %527, %530 : vector<16x16xf32>
    %532 = math.exp %531 : vector<16x16xf32>
    %cst_248 = arith.constant dense<0.000000e+00> : vector<16xf32>
    %533 = vector.multi_reduction <add>, %532, %cst_248 [1] : vector<16x16xf32> to vector<16xf32>
    %534 = vector.shape_cast %533 : vector<16xf32> to vector<16x1xf32>
    %535 = tpu.reciprocal %534 {approx = true} : vector<16x1xf32> -> vector<16x1xf32>
    %536 = vector.broadcast %535 : vector<16x1xf32> to vector<16x16xf32>
    %537 = arith.mulf %532, %536 : vector<16x16xf32>
    %538 = arith.truncf %537 : vector<16x16xf32> to vector<16x16xbf16>
    %cst_249 = arith.constant dense<0.000000e+00> : vector<16x8xf32>
    %539 = tpu.matmul %538, %523, %cst_249 {dimension_numbers = #tpu.dot_dimension_numbers<[1], [0], [0], [1], [0, 0, 1, 1], [], []>} : vector<16x16xbf16>, vector<16x8xbf16>, vector<16x8xf32> -> vector<16x8xf32>
    %540 = vector.extract_strided_slice %516 {offsets = [0, 8], sizes = [16, 8], strides = [1, 1]} : vector<16x32xbf16> to vector<16x8xbf16>
    %541 = vector.extract_strided_slice %518 {offsets = [0, 8], sizes = [16, 8], strides = [1, 1]} : vector<16x32xbf16> to vector<16x8xbf16>
    %542 = vector.extract_strided_slice %520 {offsets = [0, 8], sizes = [16, 8], strides = [1, 1]} : vector<16x32xbf16> to vector<16x8xbf16>
    %cst_250 = arith.constant dense<0.000000e+00> : vector<16x16xf32>
    %543 = tpu.matmul %540, %541, %cst_250 {dimension_numbers = #tpu.dot_dimension_numbers<[1], [1], [0], [0], [0, 0, 1, 0], [], []>} : vector<16x8xbf16>, vector<16x8xbf16>, vector<16x16xf32> -> vector<16x16xf32>
    %cst_251 = arith.constant 0.353553385 : f32
    %544 = vector.broadcast %cst_251 : f32 to vector<16x16xf32>
    %545 = arith.mulf %543, %544 : vector<16x16xf32>
    %546 = arith.addf %545, %11 : vector<16x16xf32>
    %cst_252 = arith.constant dense<0xFF800000> : vector<16xf32>
    %547 = vector.multi_reduction <maximumf>, %546, %cst_252 [1] : vector<16x16xf32> to vector<16xf32>
    %548 = vector.shape_cast %547 : vector<16xf32> to vector<16x1xf32>
    %549 = vector.broadcast %548 : vector<16x1xf32> to vector<16x16xf32>
    %550 = arith.subf %546, %549 : vector<16x16xf32>
    %551 = math.exp %550 : vector<16x16xf32>
    %cst_253 = arith.constant dense<0.000000e+00> : vector<16xf32>
    %552 = vector.multi_reduction <add>, %551, %cst_253 [1] : vector<16x16xf32> to vector<16xf32>
    %553 = vector.shape_cast %552 : vector<16xf32> to vector<16x1xf32>
    %554 = tpu.reciprocal %553 {approx = true} : vector<16x1xf32> -> vector<16x1xf32>
    %555 = vector.broadcast %554 : vector<16x1xf32> to vector<16x16xf32>
    %556 = arith.mulf %551, %555 : vector<16x16xf32>
    %557 = arith.truncf %556 : vector<16x16xf32> to vector<16x16xbf16>
    %cst_254 = arith.constant dense<0.000000e+00> : vector<16x8xf32>
    %558 = tpu.matmul %557, %542, %cst_254 {dimension_numbers = #tpu.dot_dimension_numbers<[1], [0], [0], [1], [0, 0, 1, 1], [], []>} : vector<16x16xbf16>, vector<16x8xbf16>, vector<16x8xf32> -> vector<16x8xf32>
    %559 = vector.extract_strided_slice %516 {offsets = [0, 16], sizes = [16, 8], strides = [1, 1]} : vector<16x32xbf16> to vector<16x8xbf16>
    %560 = vector.extract_strided_slice %518 {offsets = [0, 16], sizes = [16, 8], strides = [1, 1]} : vector<16x32xbf16> to vector<16x8xbf16>
    %561 = vector.extract_strided_slice %520 {offsets = [0, 16], sizes = [16, 8], strides = [1, 1]} : vector<16x32xbf16> to vector<16x8xbf16>
    %cst_255 = arith.constant dense<0.000000e+00> : vector<16x16xf32>
    %562 = tpu.matmul %559, %560, %cst_255 {dimension_numbers = #tpu.dot_dimension_numbers<[1], [1], [0], [0], [0, 0, 1, 0], [], []>} : vector<16x8xbf16>, vector<16x8xbf16>, vector<16x16xf32> -> vector<16x16xf32>
    %cst_256 = arith.constant 0.353553385 : f32
    %563 = vector.broadcast %cst_256 : f32 to vector<16x16xf32>
    %564 = arith.mulf %562, %563 : vector<16x16xf32>
    %565 = arith.addf %564, %11 : vector<16x16xf32>
    %cst_257 = arith.constant dense<0xFF800000> : vector<16xf32>
    %566 = vector.multi_reduction <maximumf>, %565, %cst_257 [1] : vector<16x16xf32> to vector<16xf32>
    %567 = vector.shape_cast %566 : vector<16xf32> to vector<16x1xf32>
    %568 = vector.broadcast %567 : vector<16x1xf32> to vector<16x16xf32>
    %569 = arith.subf %565, %568 : vector<16x16xf32>
    %570 = math.exp %569 : vector<16x16xf32>
    %cst_258 = arith.constant dense<0.000000e+00> : vector<16xf32>
    %571 = vector.multi_reduction <add>, %570, %cst_258 [1] : vector<16x16xf32> to vector<16xf32>
    %572 = vector.shape_cast %571 : vector<16xf32> to vector<16x1xf32>
    %573 = tpu.reciprocal %572 {approx = true} : vector<16x1xf32> -> vector<16x1xf32>
    %574 = vector.broadcast %573 : vector<16x1xf32> to vector<16x16xf32>
    %575 = arith.mulf %570, %574 : vector<16x16xf32>
    %576 = arith.truncf %575 : vector<16x16xf32> to vector<16x16xbf16>
    %cst_259 = arith.constant dense<0.000000e+00> : vector<16x8xf32>
    %577 = tpu.matmul %576, %561, %cst_259 {dimension_numbers = #tpu.dot_dimension_numbers<[1], [0], [0], [1], [0, 0, 1, 1], [], []>} : vector<16x16xbf16>, vector<16x8xbf16>, vector<16x8xf32> -> vector<16x8xf32>
    %578 = vector.extract_strided_slice %516 {offsets = [0, 24], sizes = [16, 8], strides = [1, 1]} : vector<16x32xbf16> to vector<16x8xbf16>
    %579 = vector.extract_strided_slice %518 {offsets = [0, 24], sizes = [16, 8], strides = [1, 1]} : vector<16x32xbf16> to vector<16x8xbf16>
    %580 = vector.extract_strided_slice %520 {offsets = [0, 24], sizes = [16, 8], strides = [1, 1]} : vector<16x32xbf16> to vector<16x8xbf16>
    %cst_260 = arith.constant dense<0.000000e+00> : vector<16x16xf32>
    %581 = tpu.matmul %578, %579, %cst_260 {dimension_numbers = #tpu.dot_dimension_numbers<[1], [1], [0], [0], [0, 0, 1, 0], [], []>} : vector<16x8xbf16>, vector<16x8xbf16>, vector<16x16xf32> -> vector<16x16xf32>
    %cst_261 = arith.constant 0.353553385 : f32
    %582 = vector.broadcast %cst_261 : f32 to vector<16x16xf32>
    %583 = arith.mulf %581, %582 : vector<16x16xf32>
    %584 = arith.addf %583, %11 : vector<16x16xf32>
    %cst_262 = arith.constant dense<0xFF800000> : vector<16xf32>
    %585 = vector.multi_reduction <maximumf>, %584, %cst_262 [1] : vector<16x16xf32> to vector<16xf32>
    %586 = vector.shape_cast %585 : vector<16xf32> to vector<16x1xf32>
    %587 = vector.broadcast %586 : vector<16x1xf32> to vector<16x16xf32>
    %588 = arith.subf %584, %587 : vector<16x16xf32>
    %589 = math.exp %588 : vector<16x16xf32>
    %cst_263 = arith.constant dense<0.000000e+00> : vector<16xf32>
    %590 = vector.multi_reduction <add>, %589, %cst_263 [1] : vector<16x16xf32> to vector<16xf32>
    %591 = vector.shape_cast %590 : vector<16xf32> to vector<16x1xf32>
    %592 = tpu.reciprocal %591 {approx = true} : vector<16x1xf32> -> vector<16x1xf32>
    %593 = vector.broadcast %592 : vector<16x1xf32> to vector<16x16xf32>
    %594 = arith.mulf %589, %593 : vector<16x16xf32>
    %595 = arith.truncf %594 : vector<16x16xf32> to vector<16x16xbf16>
    %cst_264 = arith.constant dense<0.000000e+00> : vector<16x8xf32>
    %596 = tpu.matmul %595, %580, %cst_264 {dimension_numbers = #tpu.dot_dimension_numbers<[1], [0], [0], [1], [0, 0, 1, 1], [], []>} : vector<16x16xbf16>, vector<16x8xbf16>, vector<16x8xf32> -> vector<16x8xf32>
    %597 = tpu.concatenate %539, %558, %577, %596 in 1 : vector<16x8xf32>, vector<16x8xf32>, vector<16x8xf32>, vector<16x8xf32> -> vector<16x32xf32>
    %598 = arith.truncf %597 : vector<16x32xf32> to vector<16x32xbf16>
    %cst_265 = arith.constant dense<0.000000e+00> : vector<16x32xf32>
    %599 = tpu.matmul %598, %384, %cst_265 {dimension_numbers = #tpu.dot_dimension_numbers<[1], [0], [0], [1], [0, 0, 1, 1], [], []>} : vector<16x32xbf16>, vector<32x32xbf16>, vector<16x32xf32> -> vector<16x32xf32>
    %600 = arith.addf %513, %599 : vector<16x32xf32>
    %cst_266 = arith.constant dense<0.000000e+00> : vector<16xf32>
    %601 = vector.multi_reduction <add>, %600, %cst_266 [1] : vector<16x32xf32> to vector<16xf32>
    %602 = vector.shape_cast %601 : vector<16xf32> to vector<16x1xf32>
    %cst_267 = arith.constant 3.200000e+01 : f32
    %603 = vector.broadcast %cst_267 : f32 to vector<16x1xf32>
    %604 = arith.divf %602, %603 : vector<16x1xf32>
    %605 = vector.broadcast %604 : vector<16x1xf32> to vector<16x32xf32>
    %606 = arith.subf %600, %605 : vector<16x32xf32>
    %607 = arith.mulf %606, %606 : vector<16x32xf32>
    %cst_268 = arith.constant dense<0.000000e+00> : vector<16xf32>
    %608 = vector.multi_reduction <add>, %607, %cst_268 [1] : vector<16x32xf32> to vector<16xf32>
    %609 = vector.shape_cast %608 : vector<16xf32> to vector<16x1xf32>
    %cst_269 = arith.constant 3.200000e+01 : f32
    %610 = vector.broadcast %cst_269 : f32 to vector<16x1xf32>
    %611 = arith.divf %609, %610 : vector<16x1xf32>
    %612 = vector.broadcast %604 : vector<16x1xf32> to vector<16x32xf32>
    %613 = arith.subf %600, %612 : vector<16x32xf32>
    %cst_270 = arith.constant 9.99999974E-6 : f32
    %614 = vector.broadcast %cst_270 : f32 to vector<16x1xf32>
    %615 = arith.addf %611, %614 : vector<16x1xf32>
    %616 = math.rsqrt %615 : vector<16x1xf32>
    %617 = vector.broadcast %616 : vector<16x1xf32> to vector<16x32xf32>
    %618 = arith.mulf %613, %617 : vector<16x32xf32>
    %619 = vector.broadcast %398 : vector<1x32xf32> to vector<16x32xf32>
    %620 = arith.mulf %618, %619 : vector<16x32xf32>
    %621 = vector.broadcast %400 : vector<1x32xf32> to vector<16x32xf32>
    %622 = arith.addf %620, %621 : vector<16x32xf32>
    %623 = arith.truncf %622 : vector<16x32xf32> to vector<16x32xbf16>
    %cst_271 = arith.constant dense<0.000000e+00> : vector<16x64xf32>
    %624 = tpu.matmul %623, %386, %cst_271 {dimension_numbers = #tpu.dot_dimension_numbers<[1], [0], [0], [1], [0, 0, 1, 1], [], []>} : vector<16x32xbf16>, vector<32x64xbf16>, vector<16x64xf32> -> vector<16x64xf32>
    %625 = vector.broadcast %388 : vector<1x64xf32> to vector<16x64xf32>
    %626 = arith.addf %624, %625 : vector<16x64xf32>
    %cst_272 = arith.constant 0.000000e+00 : f32
    %627 = vector.broadcast %cst_272 : f32 to vector<16x64xf32>
    %628 = arith.maximumf %626, %627 : vector<16x64xf32>
    %629 = arith.truncf %628 : vector<16x64xf32> to vector<16x64xbf16>
    %cst_273 = arith.constant dense<0.000000e+00> : vector<16x32xf32>
    %630 = tpu.matmul %629, %390, %cst_273 {dimension_numbers = #tpu.dot_dimension_numbers<[1], [0], [0], [1], [0, 0, 1, 1], [], []>} : vector<16x64xbf16>, vector<64x32xbf16>, vector<16x32xf32> -> vector<16x32xf32>
    %631 = vector.broadcast %392 : vector<1x32xf32> to vector<16x32xf32>
    %632 = arith.addf %630, %631 : vector<16x32xf32>
    %633 = arith.addf %622, %632 : vector<16x32xf32>
    %cst_274 = arith.constant dense<0.000000e+00> : vector<16xf32>
    %634 = vector.multi_reduction <add>, %633, %cst_274 [1] : vector<16x32xf32> to vector<16xf32>
    %635 = vector.shape_cast %634 : vector<16xf32> to vector<16x1xf32>
    %cst_275 = arith.constant 3.200000e+01 : f32
    %636 = vector.broadcast %cst_275 : f32 to vector<16x1xf32>
    %637 = arith.divf %635, %636 : vector<16x1xf32>
    %638 = vector.broadcast %637 : vector<16x1xf32> to vector<16x32xf32>
    %639 = arith.subf %633, %638 : vector<16x32xf32>
    %640 = arith.mulf %639, %639 : vector<16x32xf32>
    %cst_276 = arith.constant dense<0.000000e+00> : vector<16xf32>
    %641 = vector.multi_reduction <add>, %640, %cst_276 [1] : vector<16x32xf32> to vector<16xf32>
    %642 = vector.shape_cast %641 : vector<16xf32> to vector<16x1xf32>
    %cst_277 = arith.constant 3.200000e+01 : f32
    %643 = vector.broadcast %cst_277 : f32 to vector<16x1xf32>
    %644 = arith.divf %642, %643 : vector<16x1xf32>
    %645 = vector.broadcast %637 : vector<16x1xf32> to vector<16x32xf32>
    %646 = arith.subf %633, %645 : vector<16x32xf32>
    %cst_278 = arith.constant 9.99999974E-6 : f32
    %647 = vector.broadcast %cst_278 : f32 to vector<16x1xf32>
    %648 = arith.addf %644, %647 : vector<16x1xf32>
    %649 = math.rsqrt %648 : vector<16x1xf32>
    %650 = vector.broadcast %649 : vector<16x1xf32> to vector<16x32xf32>
    %651 = arith.mulf %646, %650 : vector<16x32xf32>
    %652 = vector.broadcast %402 : vector<1x32xf32> to vector<16x32xf32>
    %653 = arith.mulf %651, %652 : vector<16x32xf32>
    %654 = vector.broadcast %404 : vector<1x32xf32> to vector<16x32xf32>
    %655 = arith.addf %653, %654 : vector<16x32xf32>
    %c1_279 = arith.constant 1 : index
    %c0_280 = arith.constant 0 : index
    %c0_281 = arith.constant 0 : index
    %656 = vector.load %arg16[%c1_279, %c0_280, %c0_281] : memref<2x32x32xbf16, #tpu.memory_space<vmem>>, vector<1x32x32xbf16>
    %657 = vector.shape_cast %656 : vector<1x32x32xbf16> to vector<32x32xbf16>
    %c1_282 = arith.constant 1 : index
    %c0_283 = arith.constant 0 : index
    %c0_284 = arith.constant 0 : index
    %658 = vector.load %arg17[%c1_282, %c0_283, %c0_284] : memref<2x32x32xbf16, #tpu.memory_space<vmem>>, vector<1x32x32xbf16>
    %659 = vector.shape_cast %658 : vector<1x32x32xbf16> to vector<32x32xbf16>
    %c1_285 = arith.constant 1 : index
    %c0_286 = arith.constant 0 : index
    %c0_287 = arith.constant 0 : index
    %660 = vector.load %arg18[%c1_285, %c0_286, %c0_287] : memref<2x32x32xbf16, #tpu.memory_space<vmem>>, vector<1x32x32xbf16>
    %661 = vector.shape_cast %660 : vector<1x32x32xbf16> to vector<32x32xbf16>
    %c1_288 = arith.constant 1 : index
    %c0_289 = arith.constant 0 : index
    %c0_290 = arith.constant 0 : index
    %662 = vector.load %arg19[%c1_288, %c0_289, %c0_290] : memref<2x32x32xbf16, #tpu.memory_space<vmem>>, vector<1x32x32xbf16>
    %663 = vector.shape_cast %662 : vector<1x32x32xbf16> to vector<32x32xbf16>
    %c1_291 = arith.constant 1 : index
    %c0_292 = arith.constant 0 : index
    %c0_293 = arith.constant 0 : index
    %664 = vector.load %arg20[%c1_291, %c0_292, %c0_293] : memref<2x32x32xbf16, #tpu.memory_space<vmem>>, vector<1x32x32xbf16>
    %665 = vector.shape_cast %664 : vector<1x32x32xbf16> to vector<32x32xbf16>
    %c1_294 = arith.constant 1 : index
    %c0_295 = arith.constant 0 : index
    %c0_296 = arith.constant 0 : index
    %666 = vector.load %arg21[%c1_294, %c0_295, %c0_296] : memref<2x32x32xbf16, #tpu.memory_space<vmem>>, vector<1x32x32xbf16>
    %667 = vector.shape_cast %666 : vector<1x32x32xbf16> to vector<32x32xbf16>
    %c1_297 = arith.constant 1 : index
    %c0_298 = arith.constant 0 : index
    %c0_299 = arith.constant 0 : index
    %668 = vector.load %arg22[%c1_297, %c0_298, %c0_299] : memref<2x32x32xbf16, #tpu.memory_space<vmem>>, vector<1x32x32xbf16>
    %669 = vector.shape_cast %668 : vector<1x32x32xbf16> to vector<32x32xbf16>
    %c1_300 = arith.constant 1 : index
    %c0_301 = arith.constant 0 : index
    %c0_302 = arith.constant 0 : index
    %670 = vector.load %arg23[%c1_300, %c0_301, %c0_302] : memref<2x32x32xbf16, #tpu.memory_space<vmem>>, vector<1x32x32xbf16>
    %671 = vector.shape_cast %670 : vector<1x32x32xbf16> to vector<32x32xbf16>
    %c1_303 = arith.constant 1 : index
    %c0_304 = arith.constant 0 : index
    %c0_305 = arith.constant 0 : index
    %672 = vector.load %arg24[%c1_303, %c0_304, %c0_305] : memref<2x32x64xbf16, #tpu.memory_space<vmem>>, vector<1x32x64xbf16>
    %673 = vector.shape_cast %672 : vector<1x32x64xbf16> to vector<32x64xbf16>
    %c1_306 = arith.constant 1 : index
    %c0_307 = arith.constant 0 : index
    %c0_308 = arith.constant 0 : index
    %674 = vector.load %arg25[%c1_306, %c0_307, %c0_308] : memref<2x1x64xf32, #tpu.memory_space<vmem>>, vector<1x1x64xf32>
    %675 = vector.shape_cast %674 : vector<1x1x64xf32> to vector<1x64xf32>
    %c1_309 = arith.constant 1 : index
    %c0_310 = arith.constant 0 : index
    %c0_311 = arith.constant 0 : index
    %676 = vector.load %arg26[%c1_309, %c0_310, %c0_311] : memref<2x64x32xbf16, #tpu.memory_space<vmem>>, vector<1x64x32xbf16>
    %677 = vector.shape_cast %676 : vector<1x64x32xbf16> to vector<64x32xbf16>
    %c1_312 = arith.constant 1 : index
    %c0_313 = arith.constant 0 : index
    %c0_314 = arith.constant 0 : index
    %678 = vector.load %arg27[%c1_312, %c0_313, %c0_314] : memref<2x1x32xf32, #tpu.memory_space<vmem>>, vector<1x1x32xf32>
    %679 = vector.shape_cast %678 : vector<1x1x32xf32> to vector<1x32xf32>
    %c1_315 = arith.constant 1 : index
    %c0_316 = arith.constant 0 : index
    %c0_317 = arith.constant 0 : index
    %680 = vector.load %arg28[%c1_315, %c0_316, %c0_317] : memref<2x1x32xf32, #tpu.memory_space<vmem>>, vector<1x1x32xf32>
    %681 = vector.shape_cast %680 : vector<1x1x32xf32> to vector<1x32xf32>
    %c1_318 = arith.constant 1 : index
    %c0_319 = arith.constant 0 : index
    %c0_320 = arith.constant 0 : index
    %682 = vector.load %arg29[%c1_318, %c0_319, %c0_320] : memref<2x1x32xf32, #tpu.memory_space<vmem>>, vector<1x1x32xf32>
    %683 = vector.shape_cast %682 : vector<1x1x32xf32> to vector<1x32xf32>
    %c1_321 = arith.constant 1 : index
    %c0_322 = arith.constant 0 : index
    %c0_323 = arith.constant 0 : index
    %684 = vector.load %arg30[%c1_321, %c0_322, %c0_323] : memref<2x1x32xf32, #tpu.memory_space<vmem>>, vector<1x1x32xf32>
    %685 = vector.shape_cast %684 : vector<1x1x32xf32> to vector<1x32xf32>
    %c1_324 = arith.constant 1 : index
    %c0_325 = arith.constant 0 : index
    %c0_326 = arith.constant 0 : index
    %686 = vector.load %arg31[%c1_324, %c0_325, %c0_326] : memref<2x1x32xf32, #tpu.memory_space<vmem>>, vector<1x1x32xf32>
    %687 = vector.shape_cast %686 : vector<1x1x32xf32> to vector<1x32xf32>
    %c1_327 = arith.constant 1 : index
    %c0_328 = arith.constant 0 : index
    %c0_329 = arith.constant 0 : index
    %688 = vector.load %arg32[%c1_327, %c0_328, %c0_329] : memref<2x1x32xf32, #tpu.memory_space<vmem>>, vector<1x1x32xf32>
    %689 = vector.shape_cast %688 : vector<1x1x32xf32> to vector<1x32xf32>
    %c1_330 = arith.constant 1 : index
    %c0_331 = arith.constant 0 : index
    %c0_332 = arith.constant 0 : index
    %690 = vector.load %arg33[%c1_330, %c0_331, %c0_332] : memref<2x1x32xf32, #tpu.memory_space<vmem>>, vector<1x1x32xf32>
    %691 = vector.shape_cast %690 : vector<1x1x32xf32> to vector<1x32xf32>
    %692 = arith.truncf %655 : vector<16x32xf32> to vector<16x32xbf16>
    %cst_333 = arith.constant dense<0.000000e+00> : vector<16x32xf32>
    %693 = tpu.matmul %692, %657, %cst_333 {dimension_numbers = #tpu.dot_dimension_numbers<[1], [0], [0], [1], [0, 0, 1, 1], [], []>} : vector<16x32xbf16>, vector<32x32xbf16>, vector<16x32xf32> -> vector<16x32xf32>
    %694 = arith.truncf %693 : vector<16x32xf32> to vector<16x32xbf16>
    %cst_334 = arith.constant dense<0.000000e+00> : vector<16x32xf32>
    %695 = tpu.matmul %692, %659, %cst_334 {dimension_numbers = #tpu.dot_dimension_numbers<[1], [0], [0], [1], [0, 0, 1, 1], [], []>} : vector<16x32xbf16>, vector<32x32xbf16>, vector<16x32xf32> -> vector<16x32xf32>
    %696 = arith.truncf %695 : vector<16x32xf32> to vector<16x32xbf16>
    %cst_335 = arith.constant dense<0.000000e+00> : vector<16x32xf32>
    %697 = tpu.matmul %692, %661, %cst_335 {dimension_numbers = #tpu.dot_dimension_numbers<[1], [0], [0], [1], [0, 0, 1, 1], [], []>} : vector<16x32xbf16>, vector<32x32xbf16>, vector<16x32xf32> -> vector<16x32xf32>
    %698 = arith.truncf %697 : vector<16x32xf32> to vector<16x32xbf16>
    %699 = vector.extract_strided_slice %694 {offsets = [0, 0], sizes = [16, 8], strides = [1, 1]} : vector<16x32xbf16> to vector<16x8xbf16>
    %700 = vector.extract_strided_slice %696 {offsets = [0, 0], sizes = [16, 8], strides = [1, 1]} : vector<16x32xbf16> to vector<16x8xbf16>
    %701 = vector.extract_strided_slice %698 {offsets = [0, 0], sizes = [16, 8], strides = [1, 1]} : vector<16x32xbf16> to vector<16x8xbf16>
    %cst_336 = arith.constant dense<0.000000e+00> : vector<16x16xf32>
    %702 = tpu.matmul %699, %700, %cst_336 {dimension_numbers = #tpu.dot_dimension_numbers<[1], [1], [0], [0], [0, 0, 1, 0], [], []>} : vector<16x8xbf16>, vector<16x8xbf16>, vector<16x16xf32> -> vector<16x16xf32>
    %cst_337 = arith.constant 0.353553385 : f32
    %703 = vector.broadcast %cst_337 : f32 to vector<16x16xf32>
    %704 = arith.mulf %702, %703 : vector<16x16xf32>
    %705 = arith.addf %704, %11 : vector<16x16xf32>
    %cst_338 = arith.constant dense<0xFF800000> : vector<16xf32>
    %706 = vector.multi_reduction <maximumf>, %705, %cst_338 [1] : vector<16x16xf32> to vector<16xf32>
    %707 = vector.shape_cast %706 : vector<16xf32> to vector<16x1xf32>
    %708 = vector.broadcast %707 : vector<16x1xf32> to vector<16x16xf32>
    %709 = arith.subf %705, %708 : vector<16x16xf32>
    %710 = math.exp %709 : vector<16x16xf32>
    %cst_339 = arith.constant dense<0.000000e+00> : vector<16xf32>
    %711 = vector.multi_reduction <add>, %710, %cst_339 [1] : vector<16x16xf32> to vector<16xf32>
    %712 = vector.shape_cast %711 : vector<16xf32> to vector<16x1xf32>
    %713 = tpu.reciprocal %712 {approx = true} : vector<16x1xf32> -> vector<16x1xf32>
    %714 = vector.broadcast %713 : vector<16x1xf32> to vector<16x16xf32>
    %715 = arith.mulf %710, %714 : vector<16x16xf32>
    %716 = arith.truncf %715 : vector<16x16xf32> to vector<16x16xbf16>
    %cst_340 = arith.constant dense<0.000000e+00> : vector<16x8xf32>
    %717 = tpu.matmul %716, %701, %cst_340 {dimension_numbers = #tpu.dot_dimension_numbers<[1], [0], [0], [1], [0, 0, 1, 1], [], []>} : vector<16x16xbf16>, vector<16x8xbf16>, vector<16x8xf32> -> vector<16x8xf32>
    %718 = vector.extract_strided_slice %694 {offsets = [0, 8], sizes = [16, 8], strides = [1, 1]} : vector<16x32xbf16> to vector<16x8xbf16>
    %719 = vector.extract_strided_slice %696 {offsets = [0, 8], sizes = [16, 8], strides = [1, 1]} : vector<16x32xbf16> to vector<16x8xbf16>
    %720 = vector.extract_strided_slice %698 {offsets = [0, 8], sizes = [16, 8], strides = [1, 1]} : vector<16x32xbf16> to vector<16x8xbf16>
    %cst_341 = arith.constant dense<0.000000e+00> : vector<16x16xf32>
    %721 = tpu.matmul %718, %719, %cst_341 {dimension_numbers = #tpu.dot_dimension_numbers<[1], [1], [0], [0], [0, 0, 1, 0], [], []>} : vector<16x8xbf16>, vector<16x8xbf16>, vector<16x16xf32> -> vector<16x16xf32>
    %cst_342 = arith.constant 0.353553385 : f32
    %722 = vector.broadcast %cst_342 : f32 to vector<16x16xf32>
    %723 = arith.mulf %721, %722 : vector<16x16xf32>
    %724 = arith.addf %723, %11 : vector<16x16xf32>
    %cst_343 = arith.constant dense<0xFF800000> : vector<16xf32>
    %725 = vector.multi_reduction <maximumf>, %724, %cst_343 [1] : vector<16x16xf32> to vector<16xf32>
    %726 = vector.shape_cast %725 : vector<16xf32> to vector<16x1xf32>
    %727 = vector.broadcast %726 : vector<16x1xf32> to vector<16x16xf32>
    %728 = arith.subf %724, %727 : vector<16x16xf32>
    %729 = math.exp %728 : vector<16x16xf32>
    %cst_344 = arith.constant dense<0.000000e+00> : vector<16xf32>
    %730 = vector.multi_reduction <add>, %729, %cst_344 [1] : vector<16x16xf32> to vector<16xf32>
    %731 = vector.shape_cast %730 : vector<16xf32> to vector<16x1xf32>
    %732 = tpu.reciprocal %731 {approx = true} : vector<16x1xf32> -> vector<16x1xf32>
    %733 = vector.broadcast %732 : vector<16x1xf32> to vector<16x16xf32>
    %734 = arith.mulf %729, %733 : vector<16x16xf32>
    %735 = arith.truncf %734 : vector<16x16xf32> to vector<16x16xbf16>
    %cst_345 = arith.constant dense<0.000000e+00> : vector<16x8xf32>
    %736 = tpu.matmul %735, %720, %cst_345 {dimension_numbers = #tpu.dot_dimension_numbers<[1], [0], [0], [1], [0, 0, 1, 1], [], []>} : vector<16x16xbf16>, vector<16x8xbf16>, vector<16x8xf32> -> vector<16x8xf32>
    %737 = vector.extract_strided_slice %694 {offsets = [0, 16], sizes = [16, 8], strides = [1, 1]} : vector<16x32xbf16> to vector<16x8xbf16>
    %738 = vector.extract_strided_slice %696 {offsets = [0, 16], sizes = [16, 8], strides = [1, 1]} : vector<16x32xbf16> to vector<16x8xbf16>
    %739 = vector.extract_strided_slice %698 {offsets = [0, 16], sizes = [16, 8], strides = [1, 1]} : vector<16x32xbf16> to vector<16x8xbf16>
    %cst_346 = arith.constant dense<0.000000e+00> : vector<16x16xf32>
    %740 = tpu.matmul %737, %738, %cst_346 {dimension_numbers = #tpu.dot_dimension_numbers<[1], [1], [0], [0], [0, 0, 1, 0], [], []>} : vector<16x8xbf16>, vector<16x8xbf16>, vector<16x16xf32> -> vector<16x16xf32>
    %cst_347 = arith.constant 0.353553385 : f32
    %741 = vector.broadcast %cst_347 : f32 to vector<16x16xf32>
    %742 = arith.mulf %740, %741 : vector<16x16xf32>
    %743 = arith.addf %742, %11 : vector<16x16xf32>
    %cst_348 = arith.constant dense<0xFF800000> : vector<16xf32>
    %744 = vector.multi_reduction <maximumf>, %743, %cst_348 [1] : vector<16x16xf32> to vector<16xf32>
    %745 = vector.shape_cast %744 : vector<16xf32> to vector<16x1xf32>
    %746 = vector.broadcast %745 : vector<16x1xf32> to vector<16x16xf32>
    %747 = arith.subf %743, %746 : vector<16x16xf32>
    %748 = math.exp %747 : vector<16x16xf32>
    %cst_349 = arith.constant dense<0.000000e+00> : vector<16xf32>
    %749 = vector.multi_reduction <add>, %748, %cst_349 [1] : vector<16x16xf32> to vector<16xf32>
    %750 = vector.shape_cast %749 : vector<16xf32> to vector<16x1xf32>
    %751 = tpu.reciprocal %750 {approx = true} : vector<16x1xf32> -> vector<16x1xf32>
    %752 = vector.broadcast %751 : vector<16x1xf32> to vector<16x16xf32>
    %753 = arith.mulf %748, %752 : vector<16x16xf32>
    %754 = arith.truncf %753 : vector<16x16xf32> to vector<16x16xbf16>
    %cst_350 = arith.constant dense<0.000000e+00> : vector<16x8xf32>
    %755 = tpu.matmul %754, %739, %cst_350 {dimension_numbers = #tpu.dot_dimension_numbers<[1], [0], [0], [1], [0, 0, 1, 1], [], []>} : vector<16x16xbf16>, vector<16x8xbf16>, vector<16x8xf32> -> vector<16x8xf32>
    %756 = vector.extract_strided_slice %694 {offsets = [0, 24], sizes = [16, 8], strides = [1, 1]} : vector<16x32xbf16> to vector<16x8xbf16>
    %757 = vector.extract_strided_slice %696 {offsets = [0, 24], sizes = [16, 8], strides = [1, 1]} : vector<16x32xbf16> to vector<16x8xbf16>
    %758 = vector.extract_strided_slice %698 {offsets = [0, 24], sizes = [16, 8], strides = [1, 1]} : vector<16x32xbf16> to vector<16x8xbf16>
    %cst_351 = arith.constant dense<0.000000e+00> : vector<16x16xf32>
    %759 = tpu.matmul %756, %757, %cst_351 {dimension_numbers = #tpu.dot_dimension_numbers<[1], [1], [0], [0], [0, 0, 1, 0], [], []>} : vector<16x8xbf16>, vector<16x8xbf16>, vector<16x16xf32> -> vector<16x16xf32>
    %cst_352 = arith.constant 0.353553385 : f32
    %760 = vector.broadcast %cst_352 : f32 to vector<16x16xf32>
    %761 = arith.mulf %759, %760 : vector<16x16xf32>
    %762 = arith.addf %761, %11 : vector<16x16xf32>
    %cst_353 = arith.constant dense<0xFF800000> : vector<16xf32>
    %763 = vector.multi_reduction <maximumf>, %762, %cst_353 [1] : vector<16x16xf32> to vector<16xf32>
    %764 = vector.shape_cast %763 : vector<16xf32> to vector<16x1xf32>
    %765 = vector.broadcast %764 : vector<16x1xf32> to vector<16x16xf32>
    %766 = arith.subf %762, %765 : vector<16x16xf32>
    %767 = math.exp %766 : vector<16x16xf32>
    %cst_354 = arith.constant dense<0.000000e+00> : vector<16xf32>
    %768 = vector.multi_reduction <add>, %767, %cst_354 [1] : vector<16x16xf32> to vector<16xf32>
    %769 = vector.shape_cast %768 : vector<16xf32> to vector<16x1xf32>
    %770 = tpu.reciprocal %769 {approx = true} : vector<16x1xf32> -> vector<16x1xf32>
    %771 = vector.broadcast %770 : vector<16x1xf32> to vector<16x16xf32>
    %772 = arith.mulf %767, %771 : vector<16x16xf32>
    %773 = arith.truncf %772 : vector<16x16xf32> to vector<16x16xbf16>
    %cst_355 = arith.constant dense<0.000000e+00> : vector<16x8xf32>
    %774 = tpu.matmul %773, %758, %cst_355 {dimension_numbers = #tpu.dot_dimension_numbers<[1], [0], [0], [1], [0, 0, 1, 1], [], []>} : vector<16x16xbf16>, vector<16x8xbf16>, vector<16x8xf32> -> vector<16x8xf32>
    %775 = tpu.concatenate %717, %736, %755, %774 in 1 : vector<16x8xf32>, vector<16x8xf32>, vector<16x8xf32>, vector<16x8xf32> -> vector<16x32xf32>
    %776 = arith.truncf %775 : vector<16x32xf32> to vector<16x32xbf16>
    %cst_356 = arith.constant dense<0.000000e+00> : vector<16x32xf32>
    %777 = tpu.matmul %776, %663, %cst_356 {dimension_numbers = #tpu.dot_dimension_numbers<[1], [0], [0], [1], [0, 0, 1, 1], [], []>} : vector<16x32xbf16>, vector<32x32xbf16>, vector<16x32xf32> -> vector<16x32xf32>
    %778 = arith.addf %655, %777 : vector<16x32xf32>
    %cst_357 = arith.constant dense<0.000000e+00> : vector<16xf32>
    %779 = vector.multi_reduction <add>, %778, %cst_357 [1] : vector<16x32xf32> to vector<16xf32>
    %780 = vector.shape_cast %779 : vector<16xf32> to vector<16x1xf32>
    %cst_358 = arith.constant 3.200000e+01 : f32
    %781 = vector.broadcast %cst_358 : f32 to vector<16x1xf32>
    %782 = arith.divf %780, %781 : vector<16x1xf32>
    %783 = vector.broadcast %782 : vector<16x1xf32> to vector<16x32xf32>
    %784 = arith.subf %778, %783 : vector<16x32xf32>
    %785 = arith.mulf %784, %784 : vector<16x32xf32>
    %cst_359 = arith.constant dense<0.000000e+00> : vector<16xf32>
    %786 = vector.multi_reduction <add>, %785, %cst_359 [1] : vector<16x32xf32> to vector<16xf32>
    %787 = vector.shape_cast %786 : vector<16xf32> to vector<16x1xf32>
    %cst_360 = arith.constant 3.200000e+01 : f32
    %788 = vector.broadcast %cst_360 : f32 to vector<16x1xf32>
    %789 = arith.divf %787, %788 : vector<16x1xf32>
    %790 = vector.broadcast %782 : vector<16x1xf32> to vector<16x32xf32>
    %791 = arith.subf %778, %790 : vector<16x32xf32>
    %cst_361 = arith.constant 9.99999974E-6 : f32
    %792 = vector.broadcast %cst_361 : f32 to vector<16x1xf32>
    %793 = arith.addf %789, %792 : vector<16x1xf32>
    %794 = math.rsqrt %793 : vector<16x1xf32>
    %795 = vector.broadcast %794 : vector<16x1xf32> to vector<16x32xf32>
    %796 = arith.mulf %791, %795 : vector<16x32xf32>
    %797 = vector.broadcast %681 : vector<1x32xf32> to vector<16x32xf32>
    %798 = arith.mulf %796, %797 : vector<16x32xf32>
    %799 = vector.broadcast %683 : vector<1x32xf32> to vector<16x32xf32>
    %800 = arith.addf %798, %799 : vector<16x32xf32>
    %801 = arith.truncf %800 : vector<16x32xf32> to vector<16x32xbf16>
    %cst_362 = arith.constant dense<0.000000e+00> : vector<16x32xf32>
    %802 = tpu.matmul %801, %665, %cst_362 {dimension_numbers = #tpu.dot_dimension_numbers<[1], [0], [0], [1], [0, 0, 1, 1], [], []>} : vector<16x32xbf16>, vector<32x32xbf16>, vector<16x32xf32> -> vector<16x32xf32>
    %803 = arith.truncf %802 : vector<16x32xf32> to vector<16x32xbf16>
    %cst_363 = arith.constant dense<0.000000e+00> : vector<16x32xf32>
    %804 = tpu.matmul %368, %667, %cst_363 {dimension_numbers = #tpu.dot_dimension_numbers<[1], [0], [0], [1], [0, 0, 1, 1], [], []>} : vector<16x32xbf16>, vector<32x32xbf16>, vector<16x32xf32> -> vector<16x32xf32>
    %805 = arith.truncf %804 : vector<16x32xf32> to vector<16x32xbf16>
    %cst_364 = arith.constant dense<0.000000e+00> : vector<16x32xf32>
    %806 = tpu.matmul %368, %669, %cst_364 {dimension_numbers = #tpu.dot_dimension_numbers<[1], [0], [0], [1], [0, 0, 1, 1], [], []>} : vector<16x32xbf16>, vector<32x32xbf16>, vector<16x32xf32> -> vector<16x32xf32>
    %807 = arith.truncf %806 : vector<16x32xf32> to vector<16x32xbf16>
    %808 = vector.extract_strided_slice %803 {offsets = [0, 0], sizes = [16, 8], strides = [1, 1]} : vector<16x32xbf16> to vector<16x8xbf16>
    %809 = vector.extract_strided_slice %805 {offsets = [0, 0], sizes = [16, 8], strides = [1, 1]} : vector<16x32xbf16> to vector<16x8xbf16>
    %810 = vector.extract_strided_slice %807 {offsets = [0, 0], sizes = [16, 8], strides = [1, 1]} : vector<16x32xbf16> to vector<16x8xbf16>
    %cst_365 = arith.constant dense<0.000000e+00> : vector<16x16xf32>
    %811 = tpu.matmul %808, %809, %cst_365 {dimension_numbers = #tpu.dot_dimension_numbers<[1], [1], [0], [0], [0, 0, 1, 0], [], []>} : vector<16x8xbf16>, vector<16x8xbf16>, vector<16x16xf32> -> vector<16x16xf32>
    %cst_366 = arith.constant 0.353553385 : f32
    %812 = vector.broadcast %cst_366 : f32 to vector<16x16xf32>
    %813 = arith.mulf %811, %812 : vector<16x16xf32>
    %814 = arith.addf %813, %11 : vector<16x16xf32>
    %cst_367 = arith.constant dense<0xFF800000> : vector<16xf32>
    %815 = vector.multi_reduction <maximumf>, %814, %cst_367 [1] : vector<16x16xf32> to vector<16xf32>
    %816 = vector.shape_cast %815 : vector<16xf32> to vector<16x1xf32>
    %817 = vector.broadcast %816 : vector<16x1xf32> to vector<16x16xf32>
    %818 = arith.subf %814, %817 : vector<16x16xf32>
    %819 = math.exp %818 : vector<16x16xf32>
    %cst_368 = arith.constant dense<0.000000e+00> : vector<16xf32>
    %820 = vector.multi_reduction <add>, %819, %cst_368 [1] : vector<16x16xf32> to vector<16xf32>
    %821 = vector.shape_cast %820 : vector<16xf32> to vector<16x1xf32>
    %822 = tpu.reciprocal %821 {approx = true} : vector<16x1xf32> -> vector<16x1xf32>
    %823 = vector.broadcast %822 : vector<16x1xf32> to vector<16x16xf32>
    %824 = arith.mulf %819, %823 : vector<16x16xf32>
    %825 = arith.truncf %824 : vector<16x16xf32> to vector<16x16xbf16>
    %cst_369 = arith.constant dense<0.000000e+00> : vector<16x8xf32>
    %826 = tpu.matmul %825, %810, %cst_369 {dimension_numbers = #tpu.dot_dimension_numbers<[1], [0], [0], [1], [0, 0, 1, 1], [], []>} : vector<16x16xbf16>, vector<16x8xbf16>, vector<16x8xf32> -> vector<16x8xf32>
    %827 = vector.extract_strided_slice %803 {offsets = [0, 8], sizes = [16, 8], strides = [1, 1]} : vector<16x32xbf16> to vector<16x8xbf16>
    %828 = vector.extract_strided_slice %805 {offsets = [0, 8], sizes = [16, 8], strides = [1, 1]} : vector<16x32xbf16> to vector<16x8xbf16>
    %829 = vector.extract_strided_slice %807 {offsets = [0, 8], sizes = [16, 8], strides = [1, 1]} : vector<16x32xbf16> to vector<16x8xbf16>
    %cst_370 = arith.constant dense<0.000000e+00> : vector<16x16xf32>
    %830 = tpu.matmul %827, %828, %cst_370 {dimension_numbers = #tpu.dot_dimension_numbers<[1], [1], [0], [0], [0, 0, 1, 0], [], []>} : vector<16x8xbf16>, vector<16x8xbf16>, vector<16x16xf32> -> vector<16x16xf32>
    %cst_371 = arith.constant 0.353553385 : f32
    %831 = vector.broadcast %cst_371 : f32 to vector<16x16xf32>
    %832 = arith.mulf %830, %831 : vector<16x16xf32>
    %833 = arith.addf %832, %11 : vector<16x16xf32>
    %cst_372 = arith.constant dense<0xFF800000> : vector<16xf32>
    %834 = vector.multi_reduction <maximumf>, %833, %cst_372 [1] : vector<16x16xf32> to vector<16xf32>
    %835 = vector.shape_cast %834 : vector<16xf32> to vector<16x1xf32>
    %836 = vector.broadcast %835 : vector<16x1xf32> to vector<16x16xf32>
    %837 = arith.subf %833, %836 : vector<16x16xf32>
    %838 = math.exp %837 : vector<16x16xf32>
    %cst_373 = arith.constant dense<0.000000e+00> : vector<16xf32>
    %839 = vector.multi_reduction <add>, %838, %cst_373 [1] : vector<16x16xf32> to vector<16xf32>
    %840 = vector.shape_cast %839 : vector<16xf32> to vector<16x1xf32>
    %841 = tpu.reciprocal %840 {approx = true} : vector<16x1xf32> -> vector<16x1xf32>
    %842 = vector.broadcast %841 : vector<16x1xf32> to vector<16x16xf32>
    %843 = arith.mulf %838, %842 : vector<16x16xf32>
    %844 = arith.truncf %843 : vector<16x16xf32> to vector<16x16xbf16>
    %cst_374 = arith.constant dense<0.000000e+00> : vector<16x8xf32>
    %845 = tpu.matmul %844, %829, %cst_374 {dimension_numbers = #tpu.dot_dimension_numbers<[1], [0], [0], [1], [0, 0, 1, 1], [], []>} : vector<16x16xbf16>, vector<16x8xbf16>, vector<16x8xf32> -> vector<16x8xf32>
    %846 = vector.extract_strided_slice %803 {offsets = [0, 16], sizes = [16, 8], strides = [1, 1]} : vector<16x32xbf16> to vector<16x8xbf16>
    %847 = vector.extract_strided_slice %805 {offsets = [0, 16], sizes = [16, 8], strides = [1, 1]} : vector<16x32xbf16> to vector<16x8xbf16>
    %848 = vector.extract_strided_slice %807 {offsets = [0, 16], sizes = [16, 8], strides = [1, 1]} : vector<16x32xbf16> to vector<16x8xbf16>
    %cst_375 = arith.constant dense<0.000000e+00> : vector<16x16xf32>
    %849 = tpu.matmul %846, %847, %cst_375 {dimension_numbers = #tpu.dot_dimension_numbers<[1], [1], [0], [0], [0, 0, 1, 0], [], []>} : vector<16x8xbf16>, vector<16x8xbf16>, vector<16x16xf32> -> vector<16x16xf32>
    %cst_376 = arith.constant 0.353553385 : f32
    %850 = vector.broadcast %cst_376 : f32 to vector<16x16xf32>
    %851 = arith.mulf %849, %850 : vector<16x16xf32>
    %852 = arith.addf %851, %11 : vector<16x16xf32>
    %cst_377 = arith.constant dense<0xFF800000> : vector<16xf32>
    %853 = vector.multi_reduction <maximumf>, %852, %cst_377 [1] : vector<16x16xf32> to vector<16xf32>
    %854 = vector.shape_cast %853 : vector<16xf32> to vector<16x1xf32>
    %855 = vector.broadcast %854 : vector<16x1xf32> to vector<16x16xf32>
    %856 = arith.subf %852, %855 : vector<16x16xf32>
    %857 = math.exp %856 : vector<16x16xf32>
    %cst_378 = arith.constant dense<0.000000e+00> : vector<16xf32>
    %858 = vector.multi_reduction <add>, %857, %cst_378 [1] : vector<16x16xf32> to vector<16xf32>
    %859 = vector.shape_cast %858 : vector<16xf32> to vector<16x1xf32>
    %860 = tpu.reciprocal %859 {approx = true} : vector<16x1xf32> -> vector<16x1xf32>
    %861 = vector.broadcast %860 : vector<16x1xf32> to vector<16x16xf32>
    %862 = arith.mulf %857, %861 : vector<16x16xf32>
    %863 = arith.truncf %862 : vector<16x16xf32> to vector<16x16xbf16>
    %cst_379 = arith.constant dense<0.000000e+00> : vector<16x8xf32>
    %864 = tpu.matmul %863, %848, %cst_379 {dimension_numbers = #tpu.dot_dimension_numbers<[1], [0], [0], [1], [0, 0, 1, 1], [], []>} : vector<16x16xbf16>, vector<16x8xbf16>, vector<16x8xf32> -> vector<16x8xf32>
    %865 = vector.extract_strided_slice %803 {offsets = [0, 24], sizes = [16, 8], strides = [1, 1]} : vector<16x32xbf16> to vector<16x8xbf16>
    %866 = vector.extract_strided_slice %805 {offsets = [0, 24], sizes = [16, 8], strides = [1, 1]} : vector<16x32xbf16> to vector<16x8xbf16>
    %867 = vector.extract_strided_slice %807 {offsets = [0, 24], sizes = [16, 8], strides = [1, 1]} : vector<16x32xbf16> to vector<16x8xbf16>
    %cst_380 = arith.constant dense<0.000000e+00> : vector<16x16xf32>
    %868 = tpu.matmul %865, %866, %cst_380 {dimension_numbers = #tpu.dot_dimension_numbers<[1], [1], [0], [0], [0, 0, 1, 0], [], []>} : vector<16x8xbf16>, vector<16x8xbf16>, vector<16x16xf32> -> vector<16x16xf32>
    %cst_381 = arith.constant 0.353553385 : f32
    %869 = vector.broadcast %cst_381 : f32 to vector<16x16xf32>
    %870 = arith.mulf %868, %869 : vector<16x16xf32>
    %871 = arith.addf %870, %11 : vector<16x16xf32>
    %cst_382 = arith.constant dense<0xFF800000> : vector<16xf32>
    %872 = vector.multi_reduction <maximumf>, %871, %cst_382 [1] : vector<16x16xf32> to vector<16xf32>
    %873 = vector.shape_cast %872 : vector<16xf32> to vector<16x1xf32>
    %874 = vector.broadcast %873 : vector<16x1xf32> to vector<16x16xf32>
    %875 = arith.subf %871, %874 : vector<16x16xf32>
    %876 = math.exp %875 : vector<16x16xf32>
    %cst_383 = arith.constant dense<0.000000e+00> : vector<16xf32>
    %877 = vector.multi_reduction <add>, %876, %cst_383 [1] : vector<16x16xf32> to vector<16xf32>
    %878 = vector.shape_cast %877 : vector<16xf32> to vector<16x1xf32>
    %879 = tpu.reciprocal %878 {approx = true} : vector<16x1xf32> -> vector<16x1xf32>
    %880 = vector.broadcast %879 : vector<16x1xf32> to vector<16x16xf32>
    %881 = arith.mulf %876, %880 : vector<16x16xf32>
    %882 = arith.truncf %881 : vector<16x16xf32> to vector<16x16xbf16>
    %cst_384 = arith.constant dense<0.000000e+00> : vector<16x8xf32>
    %883 = tpu.matmul %882, %867, %cst_384 {dimension_numbers = #tpu.dot_dimension_numbers<[1], [0], [0], [1], [0, 0, 1, 1], [], []>} : vector<16x16xbf16>, vector<16x8xbf16>, vector<16x8xf32> -> vector<16x8xf32>
    %884 = tpu.concatenate %826, %845, %864, %883 in 1 : vector<16x8xf32>, vector<16x8xf32>, vector<16x8xf32>, vector<16x8xf32> -> vector<16x32xf32>
    %885 = arith.truncf %884 : vector<16x32xf32> to vector<16x32xbf16>
    %cst_385 = arith.constant dense<0.000000e+00> : vector<16x32xf32>
    %886 = tpu.matmul %885, %671, %cst_385 {dimension_numbers = #tpu.dot_dimension_numbers<[1], [0], [0], [1], [0, 0, 1, 1], [], []>} : vector<16x32xbf16>, vector<32x32xbf16>, vector<16x32xf32> -> vector<16x32xf32>
    %887 = arith.addf %800, %886 : vector<16x32xf32>
    %cst_386 = arith.constant dense<0.000000e+00> : vector<16xf32>
    %888 = vector.multi_reduction <add>, %887, %cst_386 [1] : vector<16x32xf32> to vector<16xf32>
    %889 = vector.shape_cast %888 : vector<16xf32> to vector<16x1xf32>
    %cst_387 = arith.constant 3.200000e+01 : f32
    %890 = vector.broadcast %cst_387 : f32 to vector<16x1xf32>
    %891 = arith.divf %889, %890 : vector<16x1xf32>
    %892 = vector.broadcast %891 : vector<16x1xf32> to vector<16x32xf32>
    %893 = arith.subf %887, %892 : vector<16x32xf32>
    %894 = arith.mulf %893, %893 : vector<16x32xf32>
    %cst_388 = arith.constant dense<0.000000e+00> : vector<16xf32>
    %895 = vector.multi_reduction <add>, %894, %cst_388 [1] : vector<16x32xf32> to vector<16xf32>
    %896 = vector.shape_cast %895 : vector<16xf32> to vector<16x1xf32>
    %cst_389 = arith.constant 3.200000e+01 : f32
    %897 = vector.broadcast %cst_389 : f32 to vector<16x1xf32>
    %898 = arith.divf %896, %897 : vector<16x1xf32>
    %899 = vector.broadcast %891 : vector<16x1xf32> to vector<16x32xf32>
    %900 = arith.subf %887, %899 : vector<16x32xf32>
    %cst_390 = arith.constant 9.99999974E-6 : f32
    %901 = vector.broadcast %cst_390 : f32 to vector<16x1xf32>
    %902 = arith.addf %898, %901 : vector<16x1xf32>
    %903 = math.rsqrt %902 : vector<16x1xf32>
    %904 = vector.broadcast %903 : vector<16x1xf32> to vector<16x32xf32>
    %905 = arith.mulf %900, %904 : vector<16x32xf32>
    %906 = vector.broadcast %685 : vector<1x32xf32> to vector<16x32xf32>
    %907 = arith.mulf %905, %906 : vector<16x32xf32>
    %908 = vector.broadcast %687 : vector<1x32xf32> to vector<16x32xf32>
    %909 = arith.addf %907, %908 : vector<16x32xf32>
    %910 = arith.truncf %909 : vector<16x32xf32> to vector<16x32xbf16>
    %cst_391 = arith.constant dense<0.000000e+00> : vector<16x64xf32>
    %911 = tpu.matmul %910, %673, %cst_391 {dimension_numbers = #tpu.dot_dimension_numbers<[1], [0], [0], [1], [0, 0, 1, 1], [], []>} : vector<16x32xbf16>, vector<32x64xbf16>, vector<16x64xf32> -> vector<16x64xf32>
    %912 = vector.broadcast %675 : vector<1x64xf32> to vector<16x64xf32>
    %913 = arith.addf %911, %912 : vector<16x64xf32>
    %cst_392 = arith.constant 0.000000e+00 : f32
    %914 = vector.broadcast %cst_392 : f32 to vector<16x64xf32>
    %915 = arith.maximumf %913, %914 : vector<16x64xf32>
    %916 = arith.truncf %915 : vector<16x64xf32> to vector<16x64xbf16>
    %cst_393 = arith.constant dense<0.000000e+00> : vector<16x32xf32>
    %917 = tpu.matmul %916, %677, %cst_393 {dimension_numbers = #tpu.dot_dimension_numbers<[1], [0], [0], [1], [0, 0, 1, 1], [], []>} : vector<16x64xbf16>, vector<64x32xbf16>, vector<16x32xf32> -> vector<16x32xf32>
    %918 = vector.broadcast %679 : vector<1x32xf32> to vector<16x32xf32>
    %919 = arith.addf %917, %918 : vector<16x32xf32>
    %920 = arith.addf %909, %919 : vector<16x32xf32>
    %cst_394 = arith.constant dense<0.000000e+00> : vector<16xf32>
    %921 = vector.multi_reduction <add>, %920, %cst_394 [1] : vector<16x32xf32> to vector<16xf32>
    %922 = vector.shape_cast %921 : vector<16xf32> to vector<16x1xf32>
    %cst_395 = arith.constant 3.200000e+01 : f32
    %923 = vector.broadcast %cst_395 : f32 to vector<16x1xf32>
    %924 = arith.divf %922, %923 : vector<16x1xf32>
    %925 = vector.broadcast %924 : vector<16x1xf32> to vector<16x32xf32>
    %926 = arith.subf %920, %925 : vector<16x32xf32>
    %927 = arith.mulf %926, %926 : vector<16x32xf32>
    %cst_396 = arith.constant dense<0.000000e+00> : vector<16xf32>
    %928 = vector.multi_reduction <add>, %927, %cst_396 [1] : vector<16x32xf32> to vector<16xf32>
    %929 = vector.shape_cast %928 : vector<16xf32> to vector<16x1xf32>
    %cst_397 = arith.constant 3.200000e+01 : f32
    %930 = vector.broadcast %cst_397 : f32 to vector<16x1xf32>
    %931 = arith.divf %929, %930 : vector<16x1xf32>
    %932 = vector.broadcast %924 : vector<16x1xf32> to vector<16x32xf32>
    %933 = arith.subf %920, %932 : vector<16x32xf32>
    %cst_398 = arith.constant 9.99999974E-6 : f32
    %934 = vector.broadcast %cst_398 : f32 to vector<16x1xf32>
    %935 = arith.addf %931, %934 : vector<16x1xf32>
    %936 = math.rsqrt %935 : vector<16x1xf32>
    %937 = vector.broadcast %936 : vector<16x1xf32> to vector<16x32xf32>
    %938 = arith.mulf %933, %937 : vector<16x32xf32>
    %939 = vector.broadcast %689 : vector<1x32xf32> to vector<16x32xf32>
    %940 = arith.mulf %938, %939 : vector<16x32xf32>
    %941 = vector.broadcast %691 : vector<1x32xf32> to vector<16x32xf32>
    %942 = arith.addf %940, %941 : vector<16x32xf32>
    %c0_399 = arith.constant 0 : index
    %c0_400 = arith.constant 0 : index
    %943 = vector.load %arg34[%c0_399, %c0_400] : memref<1x32xf32, #tpu.memory_space<vmem>>, vector<1x32xf32>
    %c0_401 = arith.constant 0 : index
    %c0_402 = arith.constant 0 : index
    %944 = vector.load %arg35[%c0_401, %c0_402] : memref<1x32xf32, #tpu.memory_space<vmem>>, vector<1x32xf32>
    %cst_403 = arith.constant dense<0.000000e+00> : vector<16xf32>
    %945 = vector.multi_reduction <add>, %942, %cst_403 [1] : vector<16x32xf32> to vector<16xf32>
    %946 = vector.shape_cast %945 : vector<16xf32> to vector<16x1xf32>
    %cst_404 = arith.constant 3.200000e+01 : f32
    %947 = vector.broadcast %cst_404 : f32 to vector<16x1xf32>
    %948 = arith.divf %946, %947 : vector<16x1xf32>
    %949 = vector.broadcast %948 : vector<16x1xf32> to vector<16x32xf32>
    %950 = arith.subf %942, %949 : vector<16x32xf32>
    %951 = arith.mulf %950, %950 : vector<16x32xf32>
    %cst_405 = arith.constant dense<0.000000e+00> : vector<16xf32>
    %952 = vector.multi_reduction <add>, %951, %cst_405 [1] : vector<16x32xf32> to vector<16xf32>
    %953 = vector.shape_cast %952 : vector<16xf32> to vector<16x1xf32>
    %cst_406 = arith.constant 3.200000e+01 : f32
    %954 = vector.broadcast %cst_406 : f32 to vector<16x1xf32>
    %955 = arith.divf %953, %954 : vector<16x1xf32>
    %956 = vector.broadcast %948 : vector<16x1xf32> to vector<16x32xf32>
    %957 = arith.subf %942, %956 : vector<16x32xf32>
    %cst_407 = arith.constant 9.99999974E-6 : f32
    %958 = vector.broadcast %cst_407 : f32 to vector<16x1xf32>
    %959 = arith.addf %955, %958 : vector<16x1xf32>
    %960 = math.rsqrt %959 : vector<16x1xf32>
    %961 = vector.broadcast %960 : vector<16x1xf32> to vector<16x32xf32>
    %962 = arith.mulf %957, %961 : vector<16x32xf32>
    %963 = vector.broadcast %943 : vector<1x32xf32> to vector<16x32xf32>
    %964 = arith.mulf %962, %963 : vector<16x32xf32>
    %965 = vector.broadcast %944 : vector<1x32xf32> to vector<16x32xf32>
    %966 = arith.addf %964, %965 : vector<16x32xf32>
    %c0_408 = arith.constant 0 : index
    %c0_409 = arith.constant 0 : index
    %967 = vector.load %arg36[%c0_408, %c0_409] : memref<16x32xf32, #tpu.memory_space<vmem>>, vector<16x32xf32>
    tpu.vector_store %arg36[%c0_408, %c0_409], %966 {strides = array<i32>} : memref<16x32xf32, #tpu.memory_space<vmem>>, vector<16x32xf32>,
    return
  }
}

</mosaic_0001>

<bundles_post_ra>
// kernel: transformer_forward.1
= control target key start
LH: loop header
LB: loop body
LE: loop exit
PB: predicated region body
PF: predicated region fallthrough
CT: control target
= control target key end

     0   :  { %s8230_s6 = smov 1   ;;  %s8231_s10 = smov 2   ;;  %s9423_s0 = inlined_call_operand.smem [shape: u32[37], index: -1, kind: input, shape index: {}] }
   0x1   :  { %s8309_s5 = sld [smem:[%s9423_s0]]   ;;  %s8232_s14 = smov 3  }
   0x2   :  { %s8314_s9 = sld [smem:[%s9423_s0 + %s8230_s6]]   ;;  %s8233_s18 = smov 4  }
   0x3   :  { %s8319_s13 = sld [smem:[%s9423_s0 + %s8231_s10]]   ;;  %s8234_s22 = smov 5  }
   0x4   :  { %s8324_s17 = sld [smem:[%s9423_s0 + %s8232_s14]]   ;;  %s8235_s26 = smov 6  }
   0x5   :  { %s8329_s21 = sld [smem:[%s9423_s0 + %s8233_s18]]   ;;  %s8236_s30 = smov 7  }
   0x6   :  { %s8334_s25 = sld [smem:[%s9423_s0 + %s8234_s22]]   ;;  %s8237_s4 = smov 8  }
   0x7   :  { %s8339_s29 = sld [smem:[%s9423_s0 + %s8235_s26]]   ;;  %s8238_s10 = smov 9  }
   0x8   :  { %s8344_s3 = sld [smem:[%s9423_s0 + %s8236_s30]]   ;;  %s8239_s15 = smov 10  }
   0x9   :  { %9437 = sst [smem:[#allocation48_spill]] %s8319_s13  ;;  %s8240_s20 = smov 11  }
   0xa   :  { %9438 = sst [smem:[#allocation49_spill]] %s8324_s17  ;;  %s8241_s26 = smov 12  }
   0xb   :  { %9439 = sst [smem:[#allocation50_spill]] %s8329_s21  ;;  %s8242_s1 = smov 13  }
   0xc   :  { %9440 = sst [smem:[#allocation51_spill]] %s8334_s25  ;;  %s8243_s7 = smov 14  }
   0xd   :  { %9441 = sst [smem:[#allocation52_spill]] %s8339_s29  ;;  %s8245_s22 = smov 16  }
   0xe   :  { %9442 = sst [smem:[#allocation53_spill]] %s8344_s3  ;;  %s8246_s28 = smov 17  }
   0xf   :  { %s8349_s8 = sld [smem:[%s9423_s0 + %s8237_s4]]  }
  0x10   :  { %s8354_s14 = sld [smem:[%s9423_s0 + %s8238_s10]]  }
  0x11   :  { %s8359_s19 = sld [smem:[%s9423_s0 + %s8239_s15]]   ;;  %s8244_s15 = smov 15  }
  0x12   :  { %s8364_s24 = sld [smem:[%s9423_s0 + %s8240_s20]]  }
  0x13   :  { %s8369_s30 = sld [smem:[%s9423_s0 + %s8241_s26]]  }
  0x14   :  { %s8374_s6 = sld [smem:[%s9423_s0 + %s8242_s1]]  }
  0x15   :  { %9443 = sst [smem:[#allocation54_spill]] %s8349_s8 }
  0x16   :  { %9444 = sst [smem:[#allocation55_spill]] %s8354_s14 }
  0x17   :  { %9445 = sst [smem:[#allocation56_spill]] %s8359_s19 }
  0x18   :  { %9446 = sst [smem:[#allocation57_spill]] %s8364_s24 }
  0x19   :  { %9447 = sst [smem:[#allocation58_spill]] %s8369_s30 }
  0x1a   :  { %9448 = sst [smem:[#allocation59_spill]] %s8374_s6 }
  0x1b   :  { %s8379_s12 = sld [smem:[%s9423_s0 + %s8243_s7]]   ;;  %s8247_s7 = smov 18  }
  0x1c   :  { %s8384_s20 = sld [smem:[%s9423_s0 + %s8244_s15]]   ;;  %s8248_s15 = smov 19  }
  0x1d   :  { %s8389_s27 = sld [smem:[%s9423_s0 + %s8245_s22]]   ;;  %s8249_s22 = smov 20  }
  0x1e   :  { %s8394_s4 = sld [smem:[%s9423_s0 + %s8246_s28]]   ;;  %s8250_s28 = smov 21  }
  0x1f   :  { %s8409_s6 = sld [smem:[%s9423_s0 + %s8249_s22]]   ;;  %s8253_s22 = smov 24  }
  0x20   :  { %s8414_s30 = sld [smem:[%s9423_s0 + %s8250_s28]]   ;;  %s8254_s28 = smov 25  }
  0x21   :  { %9449 = sst [smem:[#allocation60_spill]] %s8379_s12 }
  0x22   :  { %9450 = sst [smem:[#allocation61_spill]] %s8384_s20 }
  0x23   :  { %s8399_s12 = sld [smem:[%s9423_s0 + %s8247_s7]]   ;;  %s8251_s7 = smov 22  }
  0x24   :  { %s8404_s20 = sld [smem:[%s9423_s0 + %s8248_s15]]   ;;  %s8252_s15 = smov 23  }
  0x25   :  { %s8419_s14 = sld [smem:[%s9423_s0 + %s8251_s7]]   ;;  %s8255_s7 = smov 26  }
  0x26   :  { %s8424_s3 = sld [smem:[%s9423_s0 + %s8252_s15]]   ;;  %s8256_s15 = smov 27  }
  0x27   :  { %s8429_s24 = sld [smem:[%s9423_s0 + %s8253_s22]]   ;;  %s8257_s22 = smov 28  }
  0x28   :  { %s8434_s19 = sld [smem:[%s9423_s0 + %s8254_s28]]   ;;  %s8258_s28 = smov 29  }
  0x29   :  { %s8439_s8 = sld [smem:[%s9423_s0 + %s8255_s7]]   ;;  %s8259_s7 = smov 30  }
  0x2a   :  { %s8444_s29 = sld [smem:[%s9423_s0 + %s8256_s15]]   ;;  %s8260_s15 = smov 31  }
  0x2b   :  { %s8449_s25 = sld [smem:[%s9423_s0 + %s8257_s22]]   ;;  %s8261_s22 = smov 32  }
  0x2c   :  { %s8454_s21 = sld [smem:[%s9423_s0 + %s8258_s28]]   ;;  %s8262_s28 = smov 33  }
  0x2d   :  { %9451 = sst [smem:[#allocation62_spill]] %s8429_s24 }
  0x2e   :  { %s8464_s17 = sld [smem:[%s9423_s0 + %s8260_s15]]   ;;  %s8264_s15 = smov 35  }
  0x2f   :  { %9452 = sst [smem:[#allocation63_spill]] %s8439_s8 }
  0x30   :  { %9453 = sst [smem:[#allocation64_spill]] %s8444_s29 }
  0x31   :  { %s8459_s8 = sld [smem:[%s9423_s0 + %s8259_s7]]   ;;  %s8263_s7 = smov 34  }
  0x32   :  { %9454 = sst [smem:[#allocation65_spill]] %s8454_s21 }
  0x33   :  { %s8469_s13 = sld [smem:[%s9423_s0 + %s8261_s22]]   ;;  %s8265_s22 = smov 36  }
  0x34   :  { %9455 = sst [smem:[#allocation66_spill]] %s8464_s17 }
  0x35   :  { %s8474_s21 = sld [smem:[%s9423_s0 + %s8262_s28]]  }
  0x36   :  { %s8479_s29 = sld [smem:[%s9423_s0 + %s8263_s7]]  }
  0x37   :  { %s8484_s17 = sld [smem:[%s9423_s0 + %s8264_s15]]  }
  0x38   :  { %s8489_s24 = sld [smem:[%s9423_s0 + %s8265_s22]]  }
  0x39   :  { %78 = vsyncpa [#allocation3], 0 }
  0x3a   :  { %79 = vsyncpa [#allocation6], 0 }
  0x3b   :  { %80 = vsyncpa [#allocation9], 0 }
  0x3c   :  { %81 = vsyncpa [#allocation12], 0 }
  0x3d   :  { %82 = vsyncpa [#allocation15], 0 }
  0x3e   :  { %83 = vsyncpa [#allocation18], 0 }
  0x3f   :  { %84 = vsyncpa [#allocation21], 0 }
  0x40   :  { %85 = vsyncpa [#allocation24], 0 }
  0x41   :  { %86 = vsyncpa [#allocation27], 0 }
  0x42   :  { %87 = vsyncpa [#allocation30], 0 }
  0x43   :  { %88 = vsyncpa [#allocation33], 0 }
  0x44   :  { %89 = vsyncpa [#allocation4], 0  ;;  %s8266_s28 = smov [#allocation5]  }
  0x45   :  { %s107_s1 = sshll.u32 %s8266_s28, 4  ;;  %s108_s1 = int_to_ptr.vmem [resolvable:$true] %s107_s1 }
  0x46   :  { %s7774_s2 = scalar_lea.vmem %s108_s1, 256  ;;  %p7779_p1 = scmp.lt.s32.totalorder %s108_s1, %s108_s1 }
  0x47   :  { %p7775_p0 = scmp.ne.s32.totalorder %s108_s1, %s7774_s2  ;;  %p7780_p2 = scmp.lt.s32.totalorder %s7774_s2, %s7774_s2 }
  0x49   :  { %p7781_p3 = por %p7780_p2, %p7779_p1 }
  0x4b   :  { %p7782_p4 = pnand %p7781_p3, %p7775_p0 }
  0x4d   :  { %7785 = shalt.err (!%p7782_p4)
}
  0x4e   :  { %s8267_s0 = smov 128   ;;  %s8268_s7 = smov 8  }
  0x4f   :  { %113 = dma.hbm_to_vmem [thread:$0]  %s8314_s9, 256, %s108_s1, [#allocation6], %s8267_s0, %s8267_s0, %s8268_s7  }
  0x50   :  { %s8269_s10 = smov [#allocation8]   ;;  %s8270_s15 = smov [#allocation11]  }
  0x51   :  { %s159_s11 = sshll.u32 %s8269_s10, 4  ;;  %s183_s16 = sshll.u32 %s8270_s15, 4  ;;  %s160_s11 = int_to_ptr.vmem [resolvable:$true] %s159_s11  ;;  %s184_s16 = int_to_ptr.vmem [resolvable:$true] %s183_s16 }
  0x52   :  { %s7794_s18 = scalar_lea.vmem %s160_s11, 512  ;;  %p7799_p6 = scmp.lt.s32.totalorder %s160_s11, %s160_s11 }
  0x53   :  { %p7795_p5 = scmp.ne.s32.totalorder %s160_s11, %s7794_s18  ;;  %p7800_p7 = scmp.lt.s32.totalorder %s7794_s18, %s7794_s18 }
  0x55   :  { %p7801_p8 = por %p7800_p7, %p7799_p6 }
  0x57   :  { %p7802_p9 = pnand %p7801_p8, %p7795_p5 }
  0x59   :  { %7805 = shalt.err (!%p7802_p9)
}
  0x5a   :  { %s8271_s22 = smov 64   ;;  %s8272_s23 = smov 4  }
  0x5b   :  { %165 = dma.hbm_to_vmem [thread:$0]  %s8394_s4, 512, %s160_s11, [#allocation9], %s8271_s22, %s8271_s22, %s8272_s23  }
  0x5c   :  { %s7814_s9 = scalar_lea.vmem %s184_s16, 512  ;;  %p7819_p11 = scmp.lt.s32.totalorder %s184_s16, %s184_s16 }
  0x5d   :  { %p7815_p10 = scmp.ne.s32.totalorder %s184_s16, %s7814_s9  ;;  %p7820_p12 = scmp.lt.s32.totalorder %s7814_s9, %s7814_s9 }
  0x5f   :  { %p7821_p13 = por %p7820_p12, %p7819_p11 }
  0x61   :  { %p7822_p0 = pnand %p7821_p13, %p7815_p10 }
  0x63   :  { %7825 = shalt.err (!%p7822_p0)
}
  0x64   :  { %189 = dma.hbm_to_vmem [thread:$0]  %s8404_s20, 512, %s184_s16, [#allocation12], %s8271_s22, %s8271_s22, %s8272_s23  }
  0x65   :  { %s8273_s26 = smov [#allocation14]   ;;  %s8274_s1 = smov [#allocation17]  }
  0x66   :  { %s207_s28 = sshll.u32 %s8273_s26, 4  ;;  %s231_s2 = sshll.u32 %s8274_s1, 4  ;;  %s208_s28 = int_to_ptr.vmem [resolvable:$true] %s207_s28  ;;  %s232_s2 = int_to_ptr.vmem [resolvable:$true] %s231_s2 }
  0x67   :  { %s7834_s10 = scalar_lea.vmem %s208_s28, 512  ;;  %p7839_p2 = scmp.lt.s32.totalorder %s208_s28, %s208_s28 }
  0x68   :  { %p7835_p1 = scmp.ne.s32.totalorder %s208_s28, %s7834_s10  ;;  %p7840_p3 = scmp.lt.s32.totalorder %s7834_s10, %s7834_s10 }
  0x6a   :  { %p7841_p4 = por %p7840_p3, %p7839_p2 }
  0x6c   :  { %p7842_p5 = pnand %p7841_p4, %p7835_p1 }
  0x6e   :  { %7845 = shalt.err (!%p7842_p5)
}
  0x6f   :  { %213 = dma.hbm_to_vmem [thread:$0]  %s8414_s30, 512, %s208_s28, [#allocation15], %s8271_s22, %s8271_s22, %s8272_s23  }
  0x70   :  { %s7854_s4 = scalar_lea.vmem %s232_s2, 512  ;;  %p7859_p7 = scmp.lt.s32.totalorder %s232_s2, %s232_s2 }
  0x71   :  { %p7855_p6 = scmp.ne.s32.totalorder %s232_s2, %s7854_s4  ;;  %p7860_p8 = scmp.lt.s32.totalorder %s7854_s4, %s7854_s4 }
  0x73   :  { %p7861_p9 = por %p7860_p8, %p7859_p7 }
  0x75   :  { %p7862_p10 = pnand %p7861_p9, %p7855_p6 }
  0x77   :  { %7865 = shalt.err (!%p7862_p10)
}
  0x78   :  { %237 = dma.hbm_to_vmem [thread:$0]  %s8424_s3, 512, %s232_s2, [#allocation18], %s8271_s22, %s8271_s22, %s8272_s23  }
  0x79   :  { %s8275_s20 = smov [#allocation20]  }
  0x7a   :  { %s255_s11 = sshll.u32 %s8275_s20, 4  ;;  %s256_s11 = int_to_ptr.vmem [resolvable:$true] %s255_s11 }
  0x7b   :  { %s7874_s15 = scalar_lea.vmem %s256_s11, 32  ;;  %p7879_p12 = scmp.lt.s32.totalorder %s256_s11, %s256_s11 }
  0x7c   :  { %p7875_p11 = scmp.ne.s32.totalorder %s256_s11, %s7874_s15  ;;  %p7880_p13 = scmp.lt.s32.totalorder %s7874_s15, %s7874_s15 }
  0x7e   :  { %p7881_p0 = por %p7880_p13, %p7879_p12 }
  0x80   :  { %p7882_p1 = pnand %p7881_p0, %p7875_p11 }
  0x82   :  { %7885 = shalt.err (!%p7882_p1)
}
  0x83   :  { %s8276_s30 = smov 16   ;;  %s8277_s16 = smov 1  }
  0x84   :  { %261 = dma.hbm_to_vmem [thread:$0]  %s8434_s19, 32, %s256_s11, [#allocation21], %s8276_s30, %s8276_s30, %s8277_s16  }
  0x85   :  { %s8278_s18 = smov [#allocation23]   ;;  %s8279_s3 = smov [#allocation26]  }
  0x86   :  { %s281_s9 = sshll.u32 %s8278_s18, 4  ;;  %s305_s26 = sshll.u32 %s8279_s3, 4  ;;  %s282_s9 = int_to_ptr.vmem [resolvable:$true] %s281_s9  ;;  %s306_s26 = int_to_ptr.vmem [resolvable:$true] %s305_s26 }
  0x87   :  { %s7894_s28 = scalar_lea.vmem %s282_s9, 32  ;;  %p7899_p3 = scmp.lt.s32.totalorder %s282_s9, %s282_s9 }
  0x88   :  { %p7895_p2 = scmp.ne.s32.totalorder %s282_s9, %s7894_s28  ;;  %p7900_p4 = scmp.lt.s32.totalorder %s7894_s28, %s7894_s28 }
  0x8a   :  { %p7901_p5 = por %p7900_p4, %p7899_p3 }
  0x8c   :  { %p7902_p6 = pnand %p7901_p5, %p7895_p2 }
  0x8e   :  { %7905 = shalt.err (!%p7902_p6)
}
  0x8f   :  { %287 = dma.hbm_to_vmem [thread:$0]  %s8449_s25, 32, %s282_s9, [#allocation24], %s8276_s30, %s8276_s30, %s8277_s16  }
  0x90   :  { %s7914_s1 = scalar_lea.vmem %s306_s26, 32  ;;  %p7919_p8 = scmp.lt.s32.totalorder %s306_s26, %s306_s26 }
  0x91   :  { %p7915_p7 = scmp.ne.s32.totalorder %s306_s26, %s7914_s1  ;;  %p7920_p9 = scmp.lt.s32.totalorder %s7914_s1, %s7914_s1 }
  0x93   :  { %p7921_p10 = por %p7920_p9, %p7919_p8 }
  0x95   :  { %p7922_p11 = pnand %p7921_p10, %p7915_p7 }
  0x97   :  { %7925 = shalt.err (!%p7922_p11)
}
  0x98   :  { %311 = dma.hbm_to_vmem [thread:$0]  %s8459_s8, 32, %s306_s26, [#allocation27], %s8276_s30, %s8276_s30, %s8277_s16  }
  0x99   :  { %s8280_s19 = smov [#allocation29]   ;;  %s8281_s10 = smov [#allocation32]  }
  0x9a   :  { %s329_s2 = sshll.u32 %s8280_s19, 4  ;;  %s354_s4 = sshll.u32 %s8281_s10, 4  ;;  %s330_s2 = int_to_ptr.vmem [resolvable:$true] %s329_s2  ;;  %s355_s4 = int_to_ptr.vmem [resolvable:$true] %s354_s4 }
  0x9b   :  { %s7934_s20 = scalar_lea.vmem %s330_s2, 32  ;;  %p7939_p13 = scmp.lt.s32.totalorder %s330_s2, %s330_s2 }
  0x9c   :  { %p7935_p12 = scmp.ne.s32.totalorder %s330_s2, %s7934_s20  ;;  %p7940_p0 = scmp.lt.s32.totalorder %s7934_s20, %s7934_s20 }
  0x9e   :  { %p7941_p1 = por %p7940_p0, %p7939_p13 }
  0xa0   :  { %p7942_p2 = pnand %p7941_p1, %p7935_p12 }
  0xa2   :  { %7945 = shalt.err (!%p7942_p2)
}
  0xa3   :  { %335 = dma.hbm_to_vmem [thread:$0]  %s8469_s13, 32, %s330_s2, [#allocation30], %s8276_s30, %s8276_s30, %s8277_s16  }
  0xa4   :  { %s7954_s25 = scalar_lea.vmem %s355_s4, 16  ;;  %s7958_s8 = scalar_lea.vmem %s355_s4, 32 }
  0xa5   :  { %p7955_p3 = scmp.ne.s32.totalorder %s355_s4, %s7954_s25  ;;  %p7959_p4 = scmp.lt.s32.totalorder %s355_s4, %s355_s4 }
  0xa6   :  { %p7960_p5 = scmp.lt.s32.totalorder %s7958_s8, %s7954_s25 }
  0xa8   :  { %p7961_p6 = por %p7960_p5, %p7959_p4 }
  0xaa   :  { %p7962_p7 = pnand %p7961_p6, %p7955_p3 }
  0xac   :  { %7965 = shalt.err (!%p7962_p7)
}
  0xad   :  { %357 = dma.hbm_to_vmem [thread:$0]  %s8479_s29, 16, %s355_s4, [#allocation33]  }
  0xae   :  { %s8282_s11 = smov [#allocation2]   ;;  %s8283_s18 = smov [#allocation7]  }
  0xaf   :  { %s95_s15 = sshll.u32 %s8282_s11, 4  ;;  %s147_s9 = sshll.u32 %s8283_s18, 4  ;;  %s96_s15 = int_to_ptr.vmem [resolvable:$true] %s95_s15  ;;  %s148_s9 = int_to_ptr.vmem [resolvable:$true] %s147_s9 }
  0xb0   :  { %s7974_s3 = scalar_lea.vmem %s96_s15, 256  ;;  %p7979_p9 = scmp.lt.s32.totalorder %s96_s15, %s96_s15 }
  0xb1   :  { %p7975_p8 = scmp.ne.s32.totalorder %s96_s15, %s7974_s3  ;;  %p7980_p10 = scmp.lt.s32.totalorder %s7974_s3, %s7974_s3 }
  0xb3   :  { %p7981_p11 = por %p7980_p10, %p7979_p9 }
  0xb5   :  { %p7982_p12 = pnand %p7981_p11, %p7975_p8 }
  0xb7   :  { %7985 = shalt.err (!%p7982_p12)
}
  0xb8   :  { %101 = dma.hbm_to_vmem [thread:$0]  %s8309_s5, 256, %s96_s15, [#allocation3], %s8267_s0, %s8267_s0, %s8268_s7  }
  0xb9   :  { %s7994_s13 = scalar_lea.vmem %s148_s9, 512  ;;  %p7999_p0 = scmp.lt.s32.totalorder %s148_s9, %s148_s9 }
  0xba   :  { %p7995_p13 = scmp.ne.s32.totalorder %s148_s9, %s7994_s13  ;;  %p8000_p1 = scmp.lt.s32.totalorder %s7994_s13, %s7994_s13 }
  0xbc   :  { %p8001_p2 = por %p8000_p1, %p7999_p0 }
  0xbe   :  { %p8002_p3 = pnand %p8001_p2, %p7995_p13 }
  0xc0   :  { %8005 = shalt.err (!%p8002_p3)
}
  0xc1   :  { %153 = dma.hbm_to_vmem [thread:$0]  %s8389_s27, 512, %s148_s9, [#allocation6], %s8271_s22, %s8271_s22, %s8272_s23  }
  0xc2   :  { %s8284_s29 = smov [#allocation10]   ;;  %s8285_s28 = smov [#allocation13]  }
  0xc3   :  { %s171_s26 = sshll.u32 %s8284_s29, 4  ;;  %s195_s1 = sshll.u32 %s8285_s28, 4  ;;  %s172_s26 = int_to_ptr.vmem [resolvable:$true] %s171_s26  ;;  %s196_s1 = int_to_ptr.vmem [resolvable:$true] %s195_s1 }
  0xc4   :  { %s8014_s19 = scalar_lea.vmem %s172_s26, 512  ;;  %p8019_p5 = scmp.lt.s32.totalorder %s172_s26, %s172_s26 }
  0xc5   :  { %p8015_p4 = scmp.ne.s32.totalorder %s172_s26, %s8014_s19  ;;  %p8020_p6 = scmp.lt.s32.totalorder %s8014_s19, %s8014_s19 }
  0xc7   :  { %p8021_p7 = por %p8020_p6, %p8019_p5 }
  0xc9   :  { %p8022_p8 = pnand %p8021_p7, %p8015_p4 }
  0xcb   :  { %8025 = shalt.err (!%p8022_p8)
}
  0xcc   :  { %177 = dma.hbm_to_vmem [thread:$0]  %s8399_s12, 512, %s172_s26, [#allocation9], %s8271_s22, %s8271_s22, %s8272_s23  }
  0xcd   :  { %s8034_s5 = scalar_lea.vmem %s196_s1, 512  ;;  %p8039_p10 = scmp.lt.s32.totalorder %s196_s1, %s196_s1 }
  0xce   :  { %p8035_p9 = scmp.ne.s32.totalorder %s196_s1, %s8034_s5  ;;  %p8040_p11 = scmp.lt.s32.totalorder %s8034_s5, %s8034_s5 }
  0xd0   :  { %p8041_p12 = por %p8040_p11, %p8039_p10 }
  0xd2   :  { %p8042_p13 = pnand %p8041_p12, %p8035_p9 }
  0xd4   :  { %8045 = shalt.err (!%p8042_p13)
}
  0xd5   :  { %201 = dma.hbm_to_vmem [thread:$0]  %s8409_s6, 512, %s196_s1, [#allocation12], %s8271_s22, %s8271_s22, %s8272_s23  }
  0xd6   :  { %s8286_s27 = smov [#allocation16]   ;;  %s8287_s10 = smov [#allocation19]  }
  0xd7   :  { %s219_s2 = sshll.u32 %s8286_s27, 4  ;;  %s243_s4 = sshll.u32 %s8287_s10, 4  ;;  %s220_s2 = int_to_ptr.vmem [resolvable:$true] %s219_s2  ;;  %s244_s4 = int_to_ptr.vmem [resolvable:$true] %s243_s4 }
  0xd8   :  { %s8054_s20 = scalar_lea.vmem %s220_s2, 512  ;;  %p8059_p1 = scmp.lt.s32.totalorder %s220_s2, %s220_s2 }
  0xd9   :  { %p8055_p0 = scmp.ne.s32.totalorder %s220_s2, %s8054_s20  ;;  %p8060_p2 = scmp.lt.s32.totalorder %s8054_s20, %s8054_s20 }
  0xdb   :  { %p8061_p3 = por %p8060_p2, %p8059_p1 }
  0xdd   :  { %p8062_p4 = pnand %p8061_p3, %p8055_p0 }
  0xdf   :  { %8065 = shalt.err (!%p8062_p4)
}
  0xe0   :  { %225 = dma.hbm_to_vmem [thread:$0]  %s8419_s14, 512, %s220_s2, [#allocation15], %s8271_s22, %s8271_s22, %s8272_s23  }
  0xe1   :  { %s8074_s12 = scalar_lea.vmem %s244_s4, 512  ;;  %p8079_p6 = scmp.lt.s32.totalorder %s244_s4, %s244_s4 }
  0xe2   :  { %p8075_p5 = scmp.ne.s32.totalorder %s244_s4, %s8074_s12  ;;  %p8080_p7 = scmp.lt.s32.totalorder %s8074_s12, %s8074_s12 }
  0xe4   :  { %p8081_p8 = por %p8080_p7, %p8079_p6 }
  0xe6   :  { %p8082_p9 = pnand %p8081_p8, %p8075_p5 }
  0xe8   :  { %8085 = shalt.err (!%p8082_p9)
}
  0xe9   :  { %s9456_s6 = sld [smem:[#allocation62_spill]]  ;;  %s8288_s25 = smov [#allocation22]  }
  0xea   :  { %s269_s8 = sshll.u32 %s8288_s25, 4  ;;  %s8289_s11 = smov [#allocation25]   ;;  %s270_s8 = int_to_ptr.vmem [resolvable:$true] %s269_s8 }
  0xeb   :  { %s293_s15 = sshll.u32 %s8289_s11, 4  ;;  %s8094_s18 = scalar_lea.vmem %s270_s8, 32  ;;  %s294_s15 = int_to_ptr.vmem [resolvable:$true] %s293_s15 }
  0xec   :  { %p8095_p10 = scmp.ne.s32.totalorder %s270_s8, %s8094_s18  ;;  %p8099_p11 = scmp.lt.s32.totalorder %s270_s8, %s270_s8 }
  0xed   :  { %p8100_p12 = scmp.lt.s32.totalorder %s8094_s18, %s8094_s18 }
  0xef   :  { %249 = dma.hbm_to_vmem [thread:$0]  %s9456_s6, 512, %s244_s4, [#allocation18], %s8271_s22, %s8271_s22, %s8272_s23  }
  0xf0   :  { %p8101_p13 = por %p8100_p12, %p8099_p11 }
  0xf2   :  { %p8102_p0 = pnand %p8101_p13, %p8095_p10 }
  0xf4   :  { %8105 = shalt.err (!%p8102_p0)
}
  0xf5   :  { %s9457_s14 = sld [smem:[#allocation64_spill]]  ;;  %s8114_s9 = scalar_lea.vmem %s294_s15, 32 }
  0xf6   :  { %p8115_p1 = scmp.ne.s32.totalorder %s294_s15, %s8114_s9  ;;  %p8119_p2 = scmp.lt.s32.totalorder %s294_s15, %s294_s15 }
  0xf7   :  { %p8120_p3 = scmp.lt.s32.totalorder %s8114_s9, %s8114_s9 }
  0xf9   :  { %p8121_p4 = por %p8120_p3, %p8119_p2 }
  0xfb   :  { %275 = dma.hbm_to_vmem [thread:$0]  %s9457_s14, 32, %s270_s8, [#allocation21], %s8276_s30, %s8276_s30, %s8277_s16  }
  0xfc   :  { %p8122_p5 = pnand %p8121_p4, %p8115_p1 }
  0xfe   :  { %8125 = shalt.err (!%p8122_p5)
}
  0xff   :  { %s9458_s22 = sld [smem:[#allocation65_spill]]  ;;  %s8290_s23 = smov [#allocation28]  }
 0x100   :  { %s317_s3 = sshll.u32 %s8290_s23, 4  ;;  %s8291_s13 = smov [#allocation31]   ;;  %s318_s3 = int_to_ptr.vmem [resolvable:$true] %s317_s3 }
 0x101   :  { %s341_s29 = sshll.u32 %s8291_s13, 4  ;;  %s8134_s26 = scalar_lea.vmem %s318_s3, 32  ;;  %s342_s29 = int_to_ptr.vmem [resolvable:$true] %s341_s29 }
 0x102   :  { %p8135_p6 = scmp.ne.s32.totalorder %s318_s3, %s8134_s26  ;;  %p8139_p7 = scmp.lt.s32.totalorder %s318_s3, %s318_s3 }
 0x103   :  { %p8140_p8 = scmp.lt.s32.totalorder %s8134_s26, %s8134_s26 }
 0x105   :  { %299 = dma.hbm_to_vmem [thread:$0]  %s9458_s22, 32, %s294_s15, [#allocation24], %s8276_s30, %s8276_s30, %s8277_s16  }
 0x106   :  { %p8141_p9 = por %p8140_p8, %p8139_p7 }
 0x108   :  { %p8142_p10 = pnand %p8141_p9, %p8135_p6 }
 0x10a   :  { %8145 = shalt.err (!%p8142_p10)
}
 0x10b   :  { %s9459_s28 = sld [smem:[#allocation66_spill]]  ;;  %s8154_s1 = scalar_lea.vmem %s342_s29, 32 }
 0x10c   :  { %p8155_p11 = scmp.ne.s32.totalorder %s342_s29, %s8154_s1  ;;  %p8159_p12 = scmp.lt.s32.totalorder %s342_s29, %s342_s29 }
 0x10d   :  { %p8160_p13 = scmp.lt.s32.totalorder %s8154_s1, %s8154_s1 }
 0x10f   :  { %p8161_p0 = por %p8160_p13, %p8159_p12 }
 0x111   :  { %323 = dma.hbm_to_vmem [thread:$0]  %s9459_s28, 32, %s318_s3, [#allocation27], %s8276_s30, %s8276_s30, %s8277_s16  }
 0x112   :  { %p8162_p1 = pnand %p8161_p0, %p8155_p11 }
 0x114   :  { %8165 = shalt.err (!%p8162_p1)
}
 0x115   :  { %347 = dma.hbm_to_vmem [thread:$0]  %s8474_s21, 32, %s342_s29, [#allocation30], %s8276_s30, %s8276_s30, %s8277_s16  }
 0x116   :  { %s8292_s19 = smov [#allocation34]  }
 0x117   :  { %s364_s5 = sshll.u32 %s8292_s19, 4  ;;  %s365_s5 = int_to_ptr.vmem [resolvable:$true] %s364_s5 }
 0x118   :  { %s8174_s27 = scalar_lea.vmem %s365_s5, 16  ;;  %s8178_s2 = scalar_lea.vmem %s365_s5, 32 }
 0x119   :  { %p8175_p2 = scmp.ne.s32.totalorder %s365_s5, %s8174_s27  ;;  %p8179_p3 = scmp.lt.s32.totalorder %s365_s5, %s365_s5 }
 0x11a   :  { %p8180_p4 = scmp.lt.s32.totalorder %s8178_s2, %s8174_s27 }
 0x11c   :  { %p8181_p5 = por %p8180_p4, %p8179_p3 }
 0x11e   :  { %p8182_p6 = pnand %p8181_p5, %p8175_p2 }
 0x120   :  { %8185 = shalt.err (!%p8182_p6)
}
 0x121   :  { %367 = dma.hbm_to_vmem [thread:$0]  %s8484_s17, 16, %s365_s5, [#allocation33]  }
 0x122   :  { %8206 = dma.done.wait [#allocation3], 256  }
 0x123   :  { %8207 = vsyncadd [#allocation3], 4294967040 }
 0x124   :  { %8208 = dma.done.wait [#allocation6], 768  }
 0x125   :  { %8209 = vsyncadd [#allocation6], 4294966528 }
 0x126   :  { %8210 = dma.done.wait [#allocation9], 1024  }
 0x127   :  { %8211 = vsyncadd [#allocation9], 4294966272 }
 0x128   :  { %8212 = dma.done.wait [#allocation12], 1024  }
 0x129   :  { %8213 = vsyncadd [#allocation12], 4294966272 }
 0x12a   :  { %8214 = dma.done.wait [#allocation15], 1024  }
 0x12b   :  { %8215 = vsyncadd [#allocation15], 4294966272 }
 0x12c   :  { %8216 = dma.done.wait [#allocation18], 1024  }
 0x12d   :  { %8217 = vsyncadd [#allocation18], 4294966272 }
 0x12e   :  { %8218 = dma.done.wait [#allocation21], 64  }
 0x12f   :  { %8219 = vsyncadd [#allocation21], 4294967232 }
 0x130   :  { %8220 = dma.done.wait [#allocation24], 64  }
 0x131   :  { %8221 = vsyncadd [#allocation24], 4294967232 }
 0x132   :  { %8222 = dma.done.wait [#allocation27], 64  }
 0x133   :  { %8223 = vsyncadd [#allocation27], 4294967232 }
 0x134   :  { %8224 = dma.done.wait [#allocation30], 64  }
 0x135   :  { %8225 = vsyncadd [#allocation30], 4294967232 }
 0x136   :  { %8226 = dma.done.wait [#allocation33], 32  }
 0x137   :  { %8227 = vsyncadd [#allocation33], 4294967264  ;;  %s9460_s17 = sld [smem:[#allocation48_spill]]  ;;  %v8293_v0 = vmov 0.0   ;;  %vm8294_vm0 = vmmov 0   ;;  %v8577_v3 = vld [vmem:[#allocation2] sm:$0xff]  ;;  %v436_v30 = vlaneseq }
 0x138   :  { %s9461_s21 = sld [smem:[#allocation49_spill]]  ;;  %6733 = vmatprep.subr.bf16.mxu1 %v8293_v0  ;;  %6737 = vmatprep.mubr.msk.bf16.mxu1 %vm8294_vm0, %v8293_v0  ;;  %v8579_v4 = vld [vmem:[#allocation2 + $0x8] sm:$0xff]  ;;  %vm495_vm1 = vcmask 261120   ;;  %vm649_vm2 = vcmask 64512   ;;  %s8295_s10 = smov 112   ;;  %vm701_vm5 = vcmask 130048  }
 0x139   :  { %6749 = vmatprep.subr.bf16.mxu0 %v8293_v0  ;;  %6753 = vmatprep.mubr.msk.bf16.mxu0 %vm8294_vm0, %v8293_v0  ;;  %v482_v6 = vpack.c.bf16 %v8579_v4, %v8577_v3  ;;  %s9462_s16 = sld [smem:[#allocation50_spill]]  ;;  %s8296_s4 = smov 120   ;;  %v437_v31 = vshrl.u32 %v436_v30, 7  ;;  %v440_v32 = vand.u32 127, %v436_v30  ;;  %v8298_v38 = vmov -1e+30  }
 0x13a   :  { %s8297_s20 = smov 104   ;;  %s9463_s12 = sld [smem:[#allocation51_spill]]  ;;  %vm1175_vm6 = vcmask 195584   ;;  %vm1376_vm7 = vcmask 523264  }
 0x13b   :  { %v441_v33 = vand.u32 1, %v437_v31  ;;  %v443_v34 = vand.u32 1, %v440_v32  ;;  %v438_v35 = vadd.s32 8, %v437_v31  ;;  %s8299_s6 = smov 24   ;;  %s9464_s25 = sld [smem:[#allocation52_spill]] }
 0x13c   :  { %s9465_s8 = sld [smem:[#allocation54_spill]] }
 0x13d   :  { %v7454_v1 = vld [vmem:[%s9460_s17 + $0x8] sm:$0xff]   ;;  %v7455_v2 = vld [vmem:[%s9460_s17] sm:$0xff]   ;;  %vm444_vm3 = vcmp.eq.s32.totalorder %v441_v33, %v443_v34  ;;  %v442_v36 = vand.u32 1, %v438_v35  ;;  %s9466_s11 = sld [smem:[#allocation56_spill]] }
 0x13e   :  { %6734 = vmatpush3.bf16.msra.mxu1 %v7454_v1  ;;  %v7456_v5 = vld [vmem:[%s9461_s21 + $0x8] sm:$0xff]   ;;  %v7457_v7 = vld [vmem:[%s9461_s21] sm:$0xff]   ;;  %v8628_v39 = vsel %vm444_vm3, 0.0, %v8298_v38  ;;  %s9467_s15 = sld [smem:[#allocation57_spill]] }
 0x13f   :  { %6735 = vmatprep.subr.bf16.mxu1 %v8293_v0  ;;  %v7458_v19 = vld [vmem:[%s9462_s16 + $0x8] sm:$0xff]   ;;  %v7459_v20 = vld [vmem:[%s9462_s16] sm:$0xff]   ;;  %vm445_vm4 = vcmp.eq.s32.totalorder %v442_v36, %v443_v34  ;;  %s9468_s18 = sld [smem:[#allocation53_spill]] }
 0x140   :  { %6750 = vmatpush3.bf16.msra.mxu0 %v7458_v19  ;;  %v8631_v44 = vsel %vm445_vm4, 0.0, %v8298_v38  ;;  %s9469_s14 = sld [smem:[#allocation55_spill]] }
 0x141   :  { %6751 = vmatprep.subr.bf16.mxu0 %v8293_v0  ;;  %s9470_s9 = sld [smem:[#allocation58_spill]] }
 0x142   :  { %6736 = vmatpush3.bf16.msra.mxu1 %v7455_v2  ;;  %s9471_s22 = sld [smem:[#allocation59_spill]] }
 0x143   :  { %6741 = vmatprep.subr.bf16.mxu1 %v8293_v0  ;;  %s9472_s23 = sld [smem:[#allocation60_spill]] }
 0x144   :  { %6752 = vmatpush3.bf16.msra.mxu0 %v7459_v20  ;;  %s9473_s3 = sld [smem:[#allocation61_spill]] }
 0x145   :  { %6738 = vmatmul.mubr.msk.bf16.vlgmr.msra.gmra.mxu1 %vm495_vm1, %v482_v6  ;;  %6763 = vmatprep.subr.bf16.mxu0 %v8293_v0  ;;  %s9474_s13 = sld [smem:[#allocation63_spill]] }
 0x146   :  { %6742 = vmatpush3.bf16.msra.mxu1 %v7456_v5  ;;  %6745 = vmatprep.mubr.msk.bf16.mxu1 %vm8294_vm0, %v8293_v0 }
 0x147   :  { %6743 = vmatprep.subr.bf16.mxu1 %v8293_v0  ;;  %6754 = vmatmul.mubr.msk.bf16.vlgmr.msra.gmra.mxu0 %vm495_vm1, %v482_v6 }
 0x148   :  { %6765 = vmatprep.mubr.msk.bf16.mxu0 %vm8294_vm0, %v8293_v0 }
 0x14a   :  { %6744 = vmatpush3.bf16.msra.mxu1 %v7457_v7 }
 0x14b   :  { %6757 = vmatprep.subr.bf16.mxu1 %v8293_v0 }
 0x14d   :  { %6746 = vmatmul.mubr.msk.bf16.vlgmr.msra.gmra.mxu1 %vm495_vm1, %v482_v6 }
 0x14e   :  { %6759 = vmatprep.mubr.msk.bf16.mxu1 %vm8294_vm0, %v8293_v0 }
 0x205   :  { %v533_v8 = vpop.f32.mrf.mxu1 }
 0x207   :  { %v6739_v9 = vpop.f32.mrf.mxu1  ;;  %v641_v50 = vpop.f32.mrf.mxu0 }
 0x209   :  { %v536_v10 = vpop.f32.mrf.mxu1  ;;  %v6755_v51 = vpop.f32.mrf.mxu0 }
 0x20a   :  { %v540_v18 = vpack.c.bf16 %v536_v10, %v533_v8 }
 0x20b   :  { %v6740_v11 = vpop.f32.mrf.mxu1  ;;  %v644_v52 = vpop.f32.mrf.mxu0 }
 0x20c   :  { %v8636_v53 = vpack.c.bf16 %v644_v52, %v641_v50 }
 0x20d   :  { %v587_v12 = vpop.f32.mrf.mxu1  ;;  %v6756_v54 = vpop.f32.mrf.mxu0 }
 0x20e   :  { %6764 = vmatpush3.bf16.msra.mxu0 %v8636_v53 }
 0x20f   :  { %v6747_v13 = vpop.f32.mrf.mxu1  ;;  %6775 = vmatprep.subr.bf16.mxu0 %v8293_v0 }
 0x211   :  { %v590_v14 = vpop.f32.mrf.mxu1 }
 0x212   :  { %v594_v15 = vpack.c.bf16 %v590_v14, %v587_v12 }
 0x213   :  { %v6748_v16 = vpop.f32.mrf.mxu1 }
 0x214   :  { %899 = vrot.lane.b32.xlu1 %v594_v15, %s8295_s10  ;;  %773 = vrot.lane.b32.xlu0 %v594_v15, %s8296_s4  ;;  %v654_v17 = vsel %vm649_vm2, %v594_v15, 0 }
 0x215   :  { %6758 = vmatpush3.bf16.xpose.msra.mxu1 %v654_v17 }
 0x216   :  { %6769 = vmatprep.subr.bf16.mxu1 %v8293_v0 }
 0x218   :  { %897 = vrot.lane.b32.xlu1 %v540_v18, %s8295_s10  ;;  %770 = vrot.lane.b32.xlu0 %v540_v18, %s8296_s4 }
 0x21c   :  { %1022 = vrot.lane.b32.xlu1 %v540_v18, %s8297_s20  ;;  %1024 = vrot.lane.b32.xlu0 %v594_v15, %s8297_s20 }
 0x21d   :  { %6760 = vmatmul.mubr.msk.bf16.vlgmr.msra.gmra.mxu1 %vm649_vm2, %v540_v18 }
 0x21e   :  { %6771 = vmatprep.mubr.msk.bf16.mxu1 %vm8294_vm0, %v8293_v0 }
 0x286   :  { %v774_v21 = vpop.permute.xlu0 %773  ;;  %v900_v23 = vpop.permute.xlu1 %899 }
 0x287   :  { %v779_v22 = vsel %vm649_vm2, %v774_v21, 0  ;;  %v905_v25 = vsel %vm649_vm2, %v900_v23, 0 }
 0x288   :  { %6770 = vmatpush3.bf16.xpose.msra.mxu1 %v779_v22 }
 0x289   :  { %6781 = vmatprep.subr.bf16.mxu1 %v8293_v0 }
 0x28a   :  { %v771_v24 = vpop.permute.xlu0 %770  ;;  %v898_v27 = vpop.permute.xlu1 %897 }
 0x28e   :  { %v1025_v26 = vpop.permute.xlu0 %1024  ;;  %v1023_v29 = vpop.permute.xlu1 %1022 }
 0x28f   :  { %6772 = vmatmul.mubr.msk.bf16.vlgmr.msra.gmra.mxu1 %vm649_vm2, %v771_v24  ;;  %v1030_v28 = vsel %vm649_vm2, %v1025_v26, 0 }
 0x290   :  { %6782 = vmatpush3.bf16.xpose.msra.mxu1 %v905_v25  ;;  %6783 = vmatprep.mubr.msk.bf16.mxu1 %vm8294_vm0, %v8293_v0 }
 0x291   :  { %6793 = vmatprep.subr.bf16.mxu1 %v8293_v0 }
 0x297   :  { %6784 = vmatmul.mubr.msk.bf16.vlgmr.msra.gmra.mxu1 %vm649_vm2, %v898_v27 }
 0x298   :  { %6794 = vmatpush3.bf16.xpose.msra.mxu1 %v1030_v28  ;;  %6795 = vmatprep.mubr.msk.bf16.mxu1 %vm8294_vm0, %v8293_v0 }
 0x299   :  { %6805 = vmatprep.subr.bf16.mxu1 %v8293_v0 }
 0x29f   :  { %6796 = vmatmul.mubr.msk.bf16.vlgmr.msra.gmra.mxu1 %vm649_vm2, %v1023_v29 }
 0x2a0   :  { %6809 = vmatprep.mubr.msk.bf16.mxu1 %vm8294_vm0, %v8293_v0 }
 0x2dd   :  { %v690_v37 = vpop.f32.mrf.mxu1 }
 0x2de   :  { %v697_v40 = vmul.f32 0.35355338, %v690_v37 }
 0x2df   :  { %v6761_v41 = vpop.f32.mrf.mxu1 }
 0x2e0   :  { %v699_v42 = vadd.f32 %v697_v40, %v8628_v39 }
 0x2e1   :  { %v693_v43 = vpop.f32.mrf.mxu1 }
 0x2e2   :  { %v698_v45 = vmul.f32 0.35355338, %v693_v43  ;;  %v702_v46 = vsel %vm701_vm5, %v699_v42, -inf }
 0x2e3   :  { %703 = vmax.xlane.f32.xlu0 %v702_v46  ;;  %v6762_v47 = vpop.f32.mrf.mxu1 }
 0x2e4   :  { %v700_v48 = vadd.f32 %v698_v45, %v8631_v44 }
 0x2e6   :  { %v705_v49 = vsel %vm701_vm5, %v700_v48, -inf }
 0x2e7   :  { %706 = vmax.xlane.f32.xlu1 %v705_v49 }
 0x34f   :  { %v815_v55 = vpop.f32.mrf.mxu1 }
 0x350   :  { %v822_v56 = vmul.f32 0.35355338, %v815_v55 }
 0x351   :  { %v6773_v57 = vpop.f32.mrf.mxu1 }
 0x352   :  { %v824_v58 = vadd.f32 %v822_v56, %v8628_v39 }
 0x353   :  { %v818_v59 = vpop.f32.mrf.mxu1 }
 0x354   :  { %v823_v60 = vmul.f32 0.35355338, %v818_v59  ;;  %v826_v61 = vsel %vm701_vm5, %v824_v58, -inf }
 0x355   :  { %827 = vmax.xlane.f32.xlu0 %v826_v61  ;;  %v6774_v62 = vpop.f32.mrf.mxu1 }
 0x356   :  { %v825_v63 = vadd.f32 %v823_v60, %v8631_v44 }
 0x357   :  { %v941_v1 = vpop.f32.mrf.mxu1 }
 0x358   :  { %v948_v2 = vmul.f32 0.35355338, %v941_v1  ;;  %v829_v5 = vsel %vm701_vm5, %v825_v63, -inf }
 0x359   :  { %830 = vmax.xlane.f32.xlu0 %v829_v5  ;;  %v6785_v6 = vpop.f32.mrf.mxu1 }
 0x35a   :  { %v950_v7 = vadd.f32 %v948_v2, %v8628_v39 }
 0x35b   :  { %v944_v8 = vpop.f32.mrf.mxu1 }
 0x35c   :  { %v949_v9 = vmul.f32 0.35355338, %v944_v8  ;;  %v952_v10 = vsel %vm701_vm5, %v950_v7, -inf }
 0x35d   :  { %953 = vmax.xlane.f32.xlu1 %v952_v10  ;;  %v6786_v11 = vpop.f32.mrf.mxu1 }
 0x35e   :  { %v951_v12 = vadd.f32 %v949_v9, %v8631_v44 }
 0x35f   :  { %v1066_v13 = vpop.f32.mrf.mxu1 }
 0x360   :  { %v1073_v14 = vmul.f32 0.35355338, %v1066_v13  ;;  %v955_v15 = vsel %vm701_vm5, %v951_v12, -inf }
 0x361   :  { %956 = vmax.xlane.f32.xlu0 %v955_v15  ;;  %v6797_v16 = vpop.f32.mrf.mxu1 }
 0x362   :  { %v1075_v17 = vadd.f32 %v1073_v14, %v8628_v39 }
 0x363   :  { %v1069_v18 = vpop.f32.mrf.mxu1 }
 0x364   :  { %v1074_v19 = vmul.f32 0.35355338, %v1069_v18  ;;  %v1077_v20 = vsel %vm701_vm5, %v1075_v17, -inf }
 0x365   :  { %1078 = vmax.xlane.f32.xlu1 %v1077_v20  ;;  %v6798_v21 = vpop.f32.mrf.mxu1 }
 0x366   :  { %v1076_v22 = vadd.f32 %v1074_v19, %v8631_v44 }
 0x368   :  { %v1080_v23 = vsel %vm701_vm5, %v1076_v22, -inf }
 0x369   :  { %1081 = vmax.xlane.f32.xlu0 %v1080_v23 }
 0x36c   :  { %v704_v24 = vpop.xlane.xlu0 %703 }
 0x36d   :  { %v708_v25 = vsub.f32 %v699_v42, %v704_v24 }
 0x36f   :  { %v710_v26 = vmul.f32 1.442695, %v708_v25 }
 0x370   :  { %v707_v27 = vpop.xlane.xlu1 %706 }
 0x371   :  { %7526 = vpow2.f32 %v710_v26  ;;  %v709_v28 = vsub.f32 %v700_v48, %v707_v27 }
 0x373   :  { %v712_v29 = vmul.f32 1.442695, %v709_v28 }
 0x375   :  { %7528 = vpow2.f32 %v712_v29 }
 0x37e   :  { %v7527_v30 = vpop.eup %7526 }
 0x37f   :  { %v714_v31 = vsel %vm701_vm5, %v7527_v30, 0.0 }
 0x380   :  { %715 = vadd.xlane.f32.xlu1 %v714_v31 }
 0x382   :  { %v7529_v32 = vpop.eup %7528 }
 0x383   :  { %v717_v33 = vsel %vm701_vm5, %v7529_v32, 0.0 }
 0x384   :  { %718 = vadd.xlane.f32.xlu0 %v717_v33 }
 0x391   :  { %850 = vrot.lane.b32.xlu1 %v8636_v53, %s8296_s4 }
 0x3de   :  { %v828_v34 = vpop.xlane.xlu0 %827 }
 0x3df   :  { %v832_v35 = vsub.f32 %v824_v58, %v828_v34 }
 0x3e1   :  { %v834_v36 = vmul.f32 1.442695, %v832_v35 }
 0x3e2   :  { %v831_v37 = vpop.xlane.xlu0 %830 }
 0x3e3   :  { %7530 = vpow2.f32 %v834_v36  ;;  %v833_v38 = vsub.f32 %v825_v63, %v831_v37 }
 0x3e5   :  { %v836_v40 = vmul.f32 1.442695, %v833_v38 }
 0x3e6   :  { %v954_v41 = vpop.xlane.xlu1 %953 }
 0x3e7   :  { %7532 = vpow2.f32 %v836_v40  ;;  %v958_v42 = vsub.f32 %v950_v7, %v954_v41 }
 0x3e9   :  { %v960_v43 = vmul.f32 1.442695, %v958_v42 }
 0x3ea   :  { %v957_v45 = vpop.xlane.xlu0 %956 }
 0x3eb   :  { %7534 = vpow2.f32 %v960_v43  ;;  %v959_v46 = vsub.f32 %v951_v12, %v957_v45  ;;  %v7460_v45 = vld [vmem:[%s9463_s12 + $0x8] sm:$0xff]  }
 0x3ec   :  { %6806 = vmatpush3.bf16.msra.mxu1 %v7460_v45 }
 0x3ed   :  { %v962_v47 = vmul.f32 1.442695, %v959_v46  ;;  %6807 = vmatprep.subr.bf16.mxu1 %v8293_v0 }
 0x3ee   :  { %v1079_v48 = vpop.xlane.xlu1 %1078 }
 0x3ef   :  { %7536 = vpow2.f32 %v962_v47  ;;  %v1083_v49 = vsub.f32 %v1075_v17, %v1079_v48 }
 0x3f0   :  { %v7531_v50 = vpop.eup %7530 }
 0x3f1   :  { %v1085_v51 = vmul.f32 1.442695, %v1083_v49  ;;  %v838_v52 = vsel %vm701_vm5, %v7531_v50, 0.0 }
 0x3f2   :  { %839 = vadd.xlane.f32.xlu1 %v838_v52  ;;  %v1082_v54 = vpop.xlane.xlu0 %1081 }
 0x3f3   :  { %7538 = vpow2.f32 %v1085_v51  ;;  %v1084_v55 = vsub.f32 %v1076_v22, %v1082_v54 }
 0x3f4   :  { %v7533_v56 = vpop.eup %7532 }
 0x3f5   :  { %v1087_v57 = vmul.f32 1.442695, %v1084_v55  ;;  %v841_v58 = vsel %vm701_vm5, %v7533_v56, 0.0 }
 0x3f6   :  { %842 = vadd.xlane.f32.xlu0 %v841_v58 }
 0x3f7   :  { %7540 = vpow2.f32 %v1087_v57 }
 0x3f8   :  { %v7535_v59 = vpop.eup %7534 }
 0x3f9   :  { %v964_v60 = vsel %vm701_vm5, %v7535_v59, 0.0 }
 0x3fa   :  { %965 = vadd.xlane.f32.xlu1 %v964_v60 }
 0x3fc   :  { %v7537_v61 = vpop.eup %7536 }
 0x3fd   :  { %v967_v62 = vsel %vm701_vm5, %v7537_v61, 0.0 }
 0x3fe   :  { %968 = vadd.xlane.f32.xlu0 %v967_v62 }
 0x400   :  { %v7539_v63 = vpop.eup %7538 }
 0x401   :  { %v1089_v1 = vsel %vm701_vm5, %v7539_v63, 0.0 }
 0x402   :  { %1090 = vadd.xlane.f32.xlu1 %v1089_v1 }
 0x404   :  { %v7541_v2 = vpop.eup %7540 }
 0x405   :  { %v1092_v5 = vsel %vm701_vm5, %v7541_v2, 0.0 }
 0x406   :  { %1093 = vadd.xlane.f32.xlu0 %v1092_v5 }
 0x409   :  { %v716_v6 = vpop.xlane.xlu1 %715 }
 0x40a   :  { %7542 = vrcp.f32 %v716_v6 }
 0x40d   :  { %v719_v7 = vpop.xlane.xlu0 %718  ;;  %v851_v13 = vpop.permute.xlu1 %850 }
 0x40e   :  { %7544 = vrcp.f32 %v719_v7 }
 0x413   :  { %1100 = vrot.lane.b32.xlu1 %v8636_v53, %s8297_s20 }
 0x417   :  { %v7543_v8 = vpop.eup %7542 }
 0x418   :  { %v722_v10 = vmul.f32 %v7543_v8, %v7527_v30 }
 0x41b   :  { %v7545_v9 = vpop.eup %7544 }
 0x41c   :  { %975 = vrot.lane.b32.xlu0 %v8636_v53, %s8295_s10  ;;  %v723_v11 = vmul.f32 %v7545_v9, %v7529_v32 }
 0x41e   :  { %v724_v12 = vpack.c.bf16 %v723_v11, %v722_v10 }
 0x420   :  { %6766 = vmatmul.mubr.msk.bf16.vlgmr.msra.gmra.mxu0 %vm701_vm5, %v724_v12 }
 0x421   :  { %6776 = vmatpush3.bf16.msra.mxu0 %v851_v13  ;;  %6777 = vmatprep.mubr.msk.bf16.mxu0 %vm8294_vm0, %v8293_v0 }
 0x422   :  { %6787 = vmatprep.subr.bf16.mxu0 %v8293_v0 }
 0x47b   :  { %v840_v14 = vpop.xlane.xlu1 %839 }
 0x47c   :  { %7546 = vrcp.f32 %v840_v14 }
 0x47f   :  { %v843_v15 = vpop.xlane.xlu0 %842 }
 0x480   :  { %7548 = vrcp.f32 %v843_v15 }
 0x483   :  { %v966_v16 = vpop.xlane.xlu1 %965 }
 0x484   :  { %7550 = vrcp.f32 %v966_v16 }
 0x487   :  { %v969_v17 = vpop.xlane.xlu0 %968 }
 0x488   :  { %7552 = vrcp.f32 %v969_v17 }
 0x489   :  { %v7547_v53 = vpop.eup %7546 }
 0x48a   :  { %v846_v20 = vmul.f32 %v7547_v53, %v7531_v50  ;;  %v7461_v50 = vld [vmem:[%s9463_s12] sm:$0xff]  }
 0x48b   :  { %v1091_v18 = vpop.xlane.xlu1 %1090  ;;  %6808 = vmatpush3.bf16.msra.mxu1 %v7461_v50 }
 0x48c   :  { %7554 = vrcp.f32 %v1091_v18  ;;  %6821 = vmatprep.subr.bf16.mxu1 %v8293_v0 }
 0x48d   :  { %v7549_v19 = vpop.eup %7548 }
 0x48e   :  { %v847_v21 = vmul.f32 %v7549_v19, %v7533_v56 }
 0x48f   :  { %v1094_v22 = vpop.xlane.xlu0 %1093  ;;  %v1101_v30 = vpop.permute.xlu1 %1100 }
 0x490   :  { %7556 = vrcp.f32 %v1094_v22  ;;  %v848_v23 = vpack.c.bf16 %v847_v21, %v846_v20 }
 0x491   :  { %v7551_v24 = vpop.eup %7550 }
 0x492   :  { %6778 = vmatmul.mubr.msk.bf16.vlgmr.msra.gmra.mxu0 %vm701_vm5, %v848_v23  ;;  %v972_v27 = vmul.f32 %v7551_v24, %v7535_v59 }
 0x493   :  { %v976_v25 = vpop.permute.xlu0 %975  ;;  %6789 = vmatprep.mubr.msk.bf16.mxu0 %vm8294_vm0, %v8293_v0 }
 0x494   :  { %6788 = vmatpush3.bf16.msra.mxu0 %v976_v25 }
 0x495   :  { %v7553_v26 = vpop.eup %7552  ;;  %6799 = vmatprep.subr.bf16.mxu0 %v8293_v0 }
 0x496   :  { %v973_v28 = vmul.f32 %v7553_v26, %v7537_v61 }
 0x498   :  { %v974_v29 = vpack.c.bf16 %v973_v28, %v972_v27 }
 0x499   :  { %v7555_v31 = vpop.eup %7554 }
 0x49a   :  { %6790 = vmatmul.mubr.msk.bf16.vlgmr.msra.gmra.mxu0 %vm701_vm5, %v974_v29  ;;  %v1097_v33 = vmul.f32 %v7555_v31, %v7539_v63  ;;  %v7463_v31 = vld [vmem:[%s9464_s25] sm:$0xff]  }
 0x49b   :  { %6800 = vmatpush3.bf16.msra.mxu0 %v1101_v30  ;;  %6801 = vmatprep.mubr.msk.bf16.mxu0 %vm8294_vm0, %v8293_v0  ;;  %v7462_v30 = vld [vmem:[%s9464_s25 + $0x8] sm:$0xff]  }
 0x49c   :  { %6813 = vmatprep.subr.bf16.mxu0 %v8293_v0 }
 0x49d   :  { %v7557_v32 = vpop.eup %7556 }
 0x49e   :  { %v1098_v34 = vmul.f32 %v7557_v32, %v7541_v2  ;;  %v7464_v32 = vld [vmem:[%s9465_s8 + $0x18] sm:$0xff]  }
 0x4a0   :  { %v1099_v35 = vpack.c.bf16 %v1098_v34, %v1097_v33 }
 0x4a2   :  { %6802 = vmatmul.mubr.msk.bf16.vlgmr.msra.gmra.mxu0 %vm701_vm5, %v1099_v35 }
 0x4a3   :  { %6817 = vmatprep.mubr.msk.bf16.mxu0 %vm8294_vm0, %v8293_v0  ;;  %6814 = vmatpush3.bf16.msra.mxu0 %v7462_v30 }
 0x4a4   :  { %6815 = vmatprep.subr.bf16.mxu0 %v8293_v0 }
 0x4a7   :  { %6816 = vmatpush3.bf16.msra.mxu0 %v7463_v31 }
 0x4a8   :  { %6833 = vmatprep.subr.bf16.mxu0 %v8293_v0 }
 0x4e0   :  { %v762_v36 = vpop.f32.mrf.mxu0 }
 0x4e2   :  { %v6767_v37 = vpop.f32.mrf.mxu0 }
 0x4e4   :  { %v765_v38 = vpop.f32.mrf.mxu0 }
 0x4e6   :  { %v6768_v40 = vpop.f32.mrf.mxu0 }
 0x552   :  { %v890_v41 = vpop.f32.mrf.mxu0 }
 0x554   :  { %v6779_v42 = vpop.f32.mrf.mxu0 }
 0x555   :  { %v6327_v42 = vld [vmem:[%s9466_s11] ss:$0 sm:$0xff] }
 0x556   :  { %v893_v43 = vpop.f32.mrf.mxu0 }
 0x557   :  { %v7364_v46 = vpack.i.bf16 %v893_v43, %v890_v41 }
 0x558   :  { %v6780_v47 = vpop.f32.mrf.mxu0 }
 0x559   :  { %7365 = vrot.lane.b32.xlu1 %v7364_v46, %s8268_s7  ;;  %v6328_v47 = vld [vmem:[%s9467_s15] ss:$0 sm:$0xff] }
 0x55a   :  { %v1015_v48 = vpop.f32.mrf.mxu0 }
 0x55c   :  { %v6791_v49 = vpop.f32.mrf.mxu0 }
 0x55e   :  { %v1018_v51 = vpop.f32.mrf.mxu0 }
 0x55f   :  { %v7369_v52 = vpack.i.bf16 %v1018_v51, %v1015_v48 }
 0x560   :  { %v6792_v54 = vpop.f32.mrf.mxu0 }
 0x561   :  { %7370 = vrot.lane.b32.xlu0 %v7369_v52, %s8276_s30  ;;  %v7465_v52 = vld [vmem:[%s9465_s8 + $0x10] sm:$0xff]   ;;  %v7466_v54 = vld [vmem:[%s9465_s8 + $0x8] sm:$0xff]  }
 0x562   :  { %v1140_v55 = vpop.f32.mrf.mxu0 }
 0x564   :  { %v6803_v56 = vpop.f32.mrf.mxu0 }
 0x565   :  { %v6329_v56 = vld [vmem:[%s9468_s18] ss:$0 sm:$0xff] }
 0x566   :  { %v1143_v57 = vpop.f32.mrf.mxu0 }
 0x567   :  { %v7374_v58 = vpack.i.bf16 %v1143_v57, %v1140_v55  ;;  %v7467_v55 = vld [vmem:[%s9465_s8] sm:$0xff]  }
 0x568   :  { %v6804_v59 = vpop.f32.mrf.mxu0 }
 0x569   :  { %7375 = vrot.lane.b32.xlu1 %v7374_v58, %s8299_s6 }
 0x5cb   :  { %v7366_v60 = vpop.permute.xlu1 %7365 }
 0x5cc   :  { %v7368_v62 = vunpack.i.h.bf16 %v7366_v60  ;;  %v7367_v63 = vunpack.i.l.bf16 %v7366_v60 }
 0x5ce   :  { %v1172_v6 = vsel %vm649_vm2, %v765_v38, %v7368_v62  ;;  %v1171_v7 = vsel %vm649_vm2, %v762_v36, %v7367_v63 }
 0x5d3   :  { %v7371_v61 = vpop.permute.xlu0 %7370 }
 0x5d4   :  { %v7373_v1 = vunpack.i.h.bf16 %v7371_v61  ;;  %v7372_v2 = vunpack.i.l.bf16 %v7371_v61 }
 0x5d6   :  { %v1174_v10 = vsel %vm701_vm5, %v1172_v6, %v7373_v1  ;;  %v1173_v11 = vsel %vm701_vm5, %v1171_v7, %v7372_v2 }
 0x5db   :  { %v7376_v5 = vpop.permute.xlu1 %7375 }
 0x5dc   :  { %v7378_v8 = vunpack.i.h.bf16 %v7376_v5  ;;  %v7377_v9 = vunpack.i.l.bf16 %v7376_v5  ;;  %v6333_v5 = vld [vmem:[%s9469_s14] ss:$0 sm:$0xff] }
 0x5de   :  { %v1177_v12 = vsel %vm1175_vm6, %v1174_v10, %v7378_v8  ;;  %v1176_v13 = vsel %vm1175_vm6, %v1173_v11, %v7377_v9 }
 0x5df   :  { %v1178_v14 = vpack.c.bf16 %v1177_v12, %v1176_v13 }
 0x5e1   :  { %6810 = vmatmul.mubr.msk.bf16.vlgmr.msra.gmra.mxu1 %vm495_vm1, %v1178_v14 }
 0x5e2   :  { %6829 = vmatprep.mubr.msk.bf16.mxu1 %vm8294_vm0, %v8293_v0  ;;  %6822 = vmatpush3.bf16.msra.mxu1 %v7464_v32 }
 0x5e3   :  { %6823 = vmatprep.subr.bf16.mxu1 %v8293_v0 }
 0x5e6   :  { %6824 = vmatpush3.bf16.msra.mxu1 %v7465_v52 }
 0x5e7   :  { %6825 = vmatprep.subr.bf16.mxu1 %v8293_v0 }
 0x5ea   :  { %6826 = vmatpush3.bf16.msra.mxu1 %v7466_v54 }
 0x5eb   :  { %6827 = vmatprep.subr.bf16.mxu1 %v8293_v0 }
 0x5ee   :  { %6828 = vmatpush3.bf16.msra.mxu1 %v7467_v55 }
 0x5ef   :  { %6849 = vmatprep.subr.bf16.mxu1 %v8293_v0 }
 0x6a1   :  { %v1228_v15 = vpop.f32.mrf.mxu1 }
 0x6a2   :  { %v1235_v16 = vadd.f32 %v1228_v15, %v8577_v3 }
 0x6a3   :  { %v6811_v17 = vpop.f32.mrf.mxu1 }
 0x6a4   :  { %v1237_v53 = vsel %vm495_vm1, %v1235_v16, 0.0 }
 0x6a5   :  { %1238 = vadd.xlane.f32.xlu0 %v1237_v53  ;;  %v1231_v18 = vpop.f32.mrf.mxu1 }
 0x6a6   :  { %v1236_v19 = vadd.f32 %v1231_v18, %v8579_v4 }
 0x6a7   :  { %v6812_v20 = vpop.f32.mrf.mxu1 }
 0x6a8   :  { %v1240_v21 = vsel %vm495_vm1, %v1236_v19, 0.0 }
 0x6a9   :  { %1241 = vadd.xlane.f32.xlu1 %v1240_v21 }
 0x72e   :  { %v1239_v22 = vpop.xlane.xlu0 %1238 }
 0x72f   :  { %v1244_v23 = vmul.f32 0.03125, %v1239_v22 }
 0x731   :  { %v1246_v24 = vsub.f32 %v1235_v16, %v1244_v23 }
 0x732   :  { %v1242_v25 = vpop.xlane.xlu1 %1241 }
 0x733   :  { %v1245_v26 = vmul.f32 0.03125, %v1242_v25  ;;  %v1248_v3 = vmul.f32 %v1246_v24, %v1246_v24  ;;  %v7468_v25 = vld [vmem:[%s9460_s17 + $0x18] sm:$0xff]  }
 0x735   :  { %v1247_v27 = vsub.f32 %v1236_v19, %v1245_v26  ;;  %v1250_v28 = vsel %vm495_vm1, %v1248_v3, 0.0  ;;  %v7469_v26 = vld [vmem:[%s9462_s16 + $0x18] sm:$0xff]   ;;  %v7470_v3 = vld [vmem:[%s9460_s17 + $0x10] sm:$0xff]  }
 0x736   :  { %1251 = vadd.xlane.f32.xlu0 %v1250_v28 }
 0x737   :  { %v1249_v29 = vmul.f32 %v1247_v27, %v1247_v27 }
 0x739   :  { %v1253_v4 = vsel %vm495_vm1, %v1249_v29, 0.0 }
 0x73a   :  { %1254 = vadd.xlane.f32.xlu0 %v1253_v4 }
 0x7bf   :  { %v1252_v33 = vpop.xlane.xlu0 %1251 }
 0x7c0   :  { %v1256_v34 = vmul.f32 0.03125, %v1252_v33 }
 0x7c2   :  { %v1258_v35 = vadd.f32 1e-05, %v1256_v34 }
 0x7c3   :  { %v1255_v36 = vpop.xlane.xlu0 %1254 }
 0x7c4   :  { %7558 = vrsqrt.f32 %v1258_v35  ;;  %v1257_v37 = vmul.f32 0.03125, %v1255_v36  ;;  %v6339_v35 = vld [vmem:[%s9470_s9] ss:$0 sm:$0xff] }
 0x7c6   :  { %v1259_v38 = vadd.f32 1e-05, %v1257_v37 }
 0x7c8   :  { %7560 = vrsqrt.f32 %v1259_v38 }
 0x7d1   :  { %v7559_v40 = vpop.eup %7558 }
 0x7d2   :  { %v1262_v41 = vmul.f32 %v7559_v40, %v1246_v24  ;;  %v6340_v40 = vld [vmem:[%s9471_s22] ss:$0 sm:$0xff] }
 0x7d4   :  { %v1270_v46 = vmul.f32 %v6327_v42, %v1262_v41 }
 0x7d5   :  { %v7561_v43 = vpop.eup %7560 }
 0x7d6   :  { %v1263_v45 = vmul.f32 %v7561_v43, %v1247_v27  ;;  %v1278_v49 = vadd.f32 %v6328_v47, %v1270_v46  ;;  %v7471_v27 = vld [vmem:[%s9462_s16 + $0x10] sm:$0xff]  }
 0x7d8   :  { %v1271_v48 = vmul.f32 %v6327_v42, %v1263_v45  ;;  %v7472_v45 = vld [vmem:[%s9461_s21 + $0x18] sm:$0xff]  }
 0x7da   :  { %v1279_v50 = vadd.f32 %v6328_v47, %v1271_v48  ;;  %v7473_v47 = vld [vmem:[%s9461_s21 + $0x10] sm:$0xff]  }
 0x7dc   :  { %v1280_v51 = vpack.c.bf16 %v1279_v50, %v1278_v49 }
 0x7de   :  { %6818 = vmatmul.mubr.msk.bf16.vlgmr.msra.gmra.mxu0 %vm495_vm1, %v1280_v51 }
 0x7df   :  { %6837 = vmatprep.mubr.msk.bf16.mxu0 %vm8294_vm0, %v8293_v0  ;;  %6834 = vmatpush3.bf16.msra.mxu0 %v7468_v25 }
 0x7e0   :  { %6835 = vmatprep.subr.bf16.mxu0 %v8293_v0 }
 0x7e3   :  { %6836 = vmatpush3.bf16.msra.mxu0 %v7470_v3 }
 0x7e4   :  { %6841 = vmatprep.subr.bf16.mxu0 %v8293_v0 }
 0x89e   :  { %v1336_v57 = vpop.f32.mrf.mxu0 }
 0x89f   :  { %v1337_v59 = vadd.f32 %v6329_v56, %v1336_v57 }
 0x8a0   :  { %v6819_v58 = vpop.f32.mrf.mxu0 }
 0x8a1   :  { %v1343_v63 = vmax.f32 %v1337_v59, 0.0 }
 0x8a2   :  { %v1339_v60 = vpop.f32.mrf.mxu0 }
 0x8a3   :  { %v1340_v61 = vadd.f32 %v6329_v56, %v1339_v60 }
 0x8a4   :  { %v6820_v62 = vpop.f32.mrf.mxu0 }
 0x8a5   :  { %v1344_v1 = vmax.f32 %v1340_v61, 0.0 }
 0x8a7   :  { %v1345_v2 = vpack.c.bf16 %v1344_v1, %v1343_v63 }
 0x8a9   :  { %6830 = vmatmul.mubr.msk.bf16.vlgmr.msra.gmra.mxu1 %vm1376_vm7, %v1345_v2 }
 0x8aa   :  { %6853 = vmatprep.mubr.msk.bf16.mxu1 %vm8294_vm0, %v8293_v0  ;;  %6850 = vmatpush3.bf16.msra.mxu1 %v7469_v26 }
 0x8ab   :  { %6851 = vmatprep.subr.bf16.mxu1 %v8293_v0 }
 0x8ae   :  { %6852 = vmatpush3.bf16.msra.mxu1 %v7471_v27 }
 0x8af   :  { %6863 = vmatprep.subr.bf16.mxu1 %v8293_v0 }
 0x969   :  { %v1414_v6 = vpop.f32.mrf.mxu1 }
 0x96a   :  { %v1415_v7 = vadd.f32 %v6333_v5, %v1414_v6 }
 0x96b   :  { %v6831_v8 = vpop.f32.mrf.mxu1 }
 0x96c   :  { %v1421_v9 = vadd.f32 %v1415_v7, %v1278_v49 }
 0x96d   :  { %v1417_v10 = vpop.f32.mrf.mxu1 }
 0x96e   :  { %v1418_v11 = vadd.f32 %v6333_v5, %v1417_v10  ;;  %v1423_v12 = vsel %vm495_vm1, %v1421_v9, 0.0 }
 0x96f   :  { %1424 = vadd.xlane.f32.xlu1 %v1423_v12  ;;  %v6832_v13 = vpop.f32.mrf.mxu1 }
 0x970   :  { %v1422_v14 = vadd.f32 %v1418_v11, %v1279_v50 }
 0x972   :  { %v1426_v15 = vsel %vm495_vm1, %v1422_v14, 0.0 }
 0x973   :  { %1427 = vadd.xlane.f32.xlu0 %v1426_v15 }
 0x9f8   :  { %v1425_v16 = vpop.xlane.xlu1 %1424 }
 0x9f9   :  { %v1429_v17 = vmul.f32 0.03125, %v1425_v16 }
 0x9fb   :  { %v1431_v53 = vsub.f32 %v1421_v9, %v1429_v17 }
 0x9fc   :  { %v1428_v18 = vpop.xlane.xlu0 %1427 }
 0x9fd   :  { %v1430_v19 = vmul.f32 0.03125, %v1428_v18  ;;  %v1433_v20 = vmul.f32 %v1431_v53, %v1431_v53 }
 0x9ff   :  { %v1432_v21 = vsub.f32 %v1422_v14, %v1430_v19  ;;  %v1435_v22 = vsel %vm495_vm1, %v1433_v20, 0.0 }
 0xa00   :  { %1436 = vadd.xlane.f32.xlu1 %v1435_v22 }
 0xa01   :  { %v1434_v23 = vmul.f32 %v1432_v21, %v1432_v21 }
 0xa03   :  { %v1438_v24 = vsel %vm495_vm1, %v1434_v23, 0.0 }
 0xa04   :  { %1439 = vadd.xlane.f32.xlu0 %v1438_v24 }
 0xa89   :  { %v1437_v28 = vpop.xlane.xlu1 %1436 }
 0xa8a   :  { %v1441_v29 = vmul.f32 0.03125, %v1437_v28 }
 0xa8c   :  { %v1443_v4 = vadd.f32 1e-05, %v1441_v29 }
 0xa8d   :  { %v1440_v30 = vpop.xlane.xlu0 %1439 }
 0xa8e   :  { %7562 = vrsqrt.f32 %v1443_v4  ;;  %v1442_v31 = vmul.f32 0.03125, %v1440_v30 }
 0xa90   :  { %v1444_v32 = vadd.f32 1e-05, %v1442_v31 }
 0xa92   :  { %7564 = vrsqrt.f32 %v1444_v32 }
 0xa9b   :  { %v7563_v33 = vpop.eup %7562 }
 0xa9c   :  { %v1447_v34 = vmul.f32 %v7563_v33, %v1431_v53 }
 0xa9e   :  { %v1455_v38 = vmul.f32 %v6339_v35, %v1447_v34 }
 0xa9f   :  { %v7565_v36 = vpop.eup %7564 }
 0xaa0   :  { %v1448_v37 = vmul.f32 %v7565_v36, %v1432_v21  ;;  %v8739_v42 = vadd.f32 %v6340_v40, %v1455_v38 }
 0xaa2   :  { %v1456_v41 = vmul.f32 %v6339_v35, %v1448_v37 }
 0xaa4   :  { %v8741_v43 = vadd.f32 %v6340_v40, %v1456_v41 }
 0xaa6   :  { %v1511_v46 = vpack.c.bf16 %v8741_v43, %v8739_v42 }
 0xaa8   :  { %6838 = vmatmul.mubr.msk.bf16.vlgmr.msra.gmra.mxu0 %vm495_vm1, %v1511_v46  ;;  %6854 = vmatmul.mubr.msk.bf16.vlgmr.msra.gmra.mxu1 %vm495_vm1, %v1511_v46 }
 0xaa9   :  { %6842 = vmatpush3.bf16.msra.mxu0 %v7472_v45  ;;  %6845 = vmatprep.mubr.msk.bf16.mxu0 %vm8294_vm0, %v8293_v0 }
 0xaaa   :  { %6843 = vmatprep.subr.bf16.mxu0 %v8293_v0  ;;  %6865 = vmatprep.mubr.msk.bf16.mxu1 %vm8294_vm0, %v8293_v0 }
 0xaad   :  { %6844 = vmatpush3.bf16.msra.mxu0 %v7473_v47 }
 0xaae   :  { %6857 = vmatprep.subr.bf16.mxu0 %v8293_v0 }
 0xab0   :  { %6846 = vmatmul.mubr.msk.bf16.vlgmr.msra.gmra.mxu0 %vm495_vm1, %v1511_v46 }
 0xab1   :  { %6859 = vmatprep.mubr.msk.bf16.mxu0 %vm8294_vm0, %v8293_v0 }
 0xb68   :  { %v1561_v48 = vpop.f32.mrf.mxu0  ;;  %v1669_v49 = vpop.f32.mrf.mxu1 }
 0xb6a   :  { %v6839_v50 = vpop.f32.mrf.mxu0  ;;  %v6855_v51 = vpop.f32.mrf.mxu1 }
 0xb6c   :  { %v1564_v52 = vpop.f32.mrf.mxu0  ;;  %v1672_v54 = vpop.f32.mrf.mxu1 }
 0xb6d   :  { %v1568_v55 = vpack.c.bf16 %v1564_v52, %v1561_v48  ;;  %v8758_v56 = vpack.c.bf16 %v1672_v54, %v1669_v49 }
 0xb6e   :  { %v6840_v57 = vpop.f32.mrf.mxu0  ;;  %v6856_v58 = vpop.f32.mrf.mxu1 }
 0xb6f   :  { %1796 = vrot.lane.b32.xlu0 %v1568_v55, %s8296_s4  ;;  %6864 = vmatpush3.bf16.msra.mxu1 %v8758_v56 }
 0xb70   :  { %v1615_v59 = vpop.f32.mrf.mxu0  ;;  %6875 = vmatprep.subr.bf16.mxu1 %v8293_v0 }
 0xb72   :  { %v6847_v60 = vpop.f32.mrf.mxu0 }
 0xb74   :  { %v1618_v61 = vpop.f32.mrf.mxu0 }
 0xb75   :  { %v1622_v62 = vpack.c.bf16 %v1618_v61, %v1615_v59 }
 0xb76   :  { %v6848_v63 = vpop.f32.mrf.mxu0 }
 0xb77   :  { %2050 = vrot.lane.b32.xlu0 %v1622_v62, %s8297_s20  ;;  %1799 = vrot.lane.b32.xlu1 %v1622_v62, %s8296_s4  ;;  %v1681_v1 = vsel %vm649_vm2, %v1622_v62, 0 }
 0xb78   :  { %6858 = vmatpush3.bf16.xpose.msra.mxu0 %v1681_v1 }
 0xb79   :  { %6869 = vmatprep.subr.bf16.mxu0 %v8293_v0 }
 0xb7b   :  { %1925 = vrot.lane.b32.xlu1 %v1622_v62, %s8295_s10 }
 0xb7f   :  { %1923 = vrot.lane.b32.xlu1 %v1568_v55, %s8295_s10  ;;  %6860 = vmatmul.mubr.msk.bf16.vlgmr.msra.gmra.mxu0 %vm649_vm2, %v1568_v55 }
 0xb80   :  { %6871 = vmatprep.mubr.msk.bf16.mxu0 %vm8294_vm0, %v8293_v0 }
 0xb83   :  { %2048 = vrot.lane.b32.xlu1 %v1568_v55, %s8297_s20 }
 0xbe1   :  { %v1797_v7 = vpop.permute.xlu0 %1796 }
 0xbe9   :  { %v1800_v2 = vpop.permute.xlu1 %1799  ;;  %v2051_v9 = vpop.permute.xlu0 %2050 }
 0xbea   :  { %v1805_v5 = vsel %vm649_vm2, %v1800_v2, 0  ;;  %v2056_v11 = vsel %vm649_vm2, %v2051_v9, 0 }
 0xbeb   :  { %6870 = vmatpush3.bf16.xpose.msra.mxu0 %v1805_v5 }
 0xbec   :  { %6881 = vmatprep.subr.bf16.mxu0 %v8293_v0 }
 0xbed   :  { %v1926_v6 = vpop.permute.xlu1 %1925 }
 0xbee   :  { %v1931_v8 = vsel %vm649_vm2, %v1926_v6, 0 }
 0xbf1   :  { %v1924_v10 = vpop.permute.xlu1 %1923 }
 0xbf2   :  { %6872 = vmatmul.mubr.msk.bf16.vlgmr.msra.gmra.mxu0 %vm649_vm2, %v1797_v7 }
 0xbf3   :  { %6882 = vmatpush3.bf16.xpose.msra.mxu0 %v1931_v8  ;;  %6883 = vmatprep.mubr.msk.bf16.mxu0 %vm8294_vm0, %v8293_v0 }
 0xbf4   :  { %6893 = vmatprep.subr.bf16.mxu0 %v8293_v0 }
 0xbf5   :  { %v2049_v12 = vpop.permute.xlu1 %2048 }
 0xbfa   :  { %6884 = vmatmul.mubr.msk.bf16.vlgmr.msra.gmra.mxu0 %vm649_vm2, %v1924_v10 }
 0xbfb   :  { %6894 = vmatpush3.bf16.xpose.msra.mxu0 %v2056_v11  ;;  %6895 = vmatprep.mubr.msk.bf16.mxu0 %vm8294_vm0, %v8293_v0 }
 0xbfc   :  { %6905 = vmatprep.subr.bf16.mxu0 %v8293_v0 }
 0xc02   :  { %6896 = vmatmul.mubr.msk.bf16.vlgmr.msra.gmra.mxu0 %vm649_vm2, %v2049_v12 }
 0xc03   :  { %6909 = vmatprep.mubr.msk.bf16.mxu0 %vm8294_vm0, %v8293_v0 }
 0xc3f   :  { %v1717_v13 = vpop.f32.mrf.mxu0 }
 0xc40   :  { %v1724_v14 = vmul.f32 0.35355338, %v1717_v13 }
 0xc41   :  { %v6861_v15 = vpop.f32.mrf.mxu0 }
 0xc42   :  { %v1726_v16 = vadd.f32 %v1724_v14, %v8628_v39 }
 0xc43   :  { %v1720_v17 = vpop.f32.mrf.mxu0 }
 0xc44   :  { %v1725_v53 = vmul.f32 0.35355338, %v1720_v17  ;;  %v1728_v18 = vsel %vm701_vm5, %v1726_v16, -inf }
 0xc45   :  { %1729 = vmax.xlane.f32.xlu0 %v1728_v18  ;;  %v6862_v19 = vpop.f32.mrf.mxu0 }
 0xc46   :  { %v1727_v20 = vadd.f32 %v1725_v53, %v8631_v44 }
 0xc48   :  { %v1731_v21 = vsel %vm701_vm5, %v1727_v20, -inf }
 0xc49   :  { %1732 = vmax.xlane.f32.xlu1 %v1731_v21 }
 0xcb2   :  { %v1841_v22 = vpop.f32.mrf.mxu0 }
 0xcb3   :  { %v1848_v23 = vmul.f32 0.35355338, %v1841_v22 }
 0xcb4   :  { %v6873_v24 = vpop.f32.mrf.mxu0 }
 0xcb5   :  { %v1850_v25 = vadd.f32 %v1848_v23, %v8628_v39 }
 0xcb6   :  { %v1844_v26 = vpop.f32.mrf.mxu0 }
 0xcb7   :  { %v1849_v3 = vmul.f32 0.35355338, %v1844_v26  ;;  %v1852_v27 = vsel %vm701_vm5, %v1850_v25, -inf }
 0xcb8   :  { %1853 = vmax.xlane.f32.xlu0 %v1852_v27  ;;  %v6874_v28 = vpop.f32.mrf.mxu0 }
 0xcb9   :  { %v1851_v29 = vadd.f32 %v1849_v3, %v8631_v44 }
 0xcba   :  { %v1967_v4 = vpop.f32.mrf.mxu0 }
 0xcbb   :  { %v1974_v30 = vmul.f32 0.35355338, %v1967_v4  ;;  %v1855_v31 = vsel %vm701_vm5, %v1851_v29, -inf }
 0xcbc   :  { %1856 = vmax.xlane.f32.xlu0 %v1855_v31  ;;  %v6885_v32 = vpop.f32.mrf.mxu0 }
 0xcbd   :  { %v1976_v33 = vadd.f32 %v1974_v30, %v8628_v39 }
 0xcbe   :  { %v1970_v34 = vpop.f32.mrf.mxu0 }
 0xcbf   :  { %v1975_v35 = vmul.f32 0.35355338, %v1970_v34  ;;  %v1978_v36 = vsel %vm701_vm5, %v1976_v33, -inf }
 0xcc0   :  { %1979 = vmax.xlane.f32.xlu1 %v1978_v36  ;;  %v6886_v37 = vpop.f32.mrf.mxu0 }
 0xcc1   :  { %v1977_v38 = vadd.f32 %v1975_v35, %v8631_v44 }
 0xcc2   :  { %v2092_v40 = vpop.f32.mrf.mxu0 }
 0xcc3   :  { %v2099_v41 = vmul.f32 0.35355338, %v2092_v40  ;;  %v1981_v45 = vsel %vm701_vm5, %v1977_v38, -inf }
 0xcc4   :  { %1982 = vmax.xlane.f32.xlu0 %v1981_v45  ;;  %v6897_v46 = vpop.f32.mrf.mxu0 }
 0xcc5   :  { %v2101_v47 = vadd.f32 %v2099_v41, %v8628_v39 }
 0xcc6   :  { %v2095_v48 = vpop.f32.mrf.mxu0 }
 0xcc7   :  { %v2100_v49 = vmul.f32 0.35355338, %v2095_v48  ;;  %v2103_v50 = vsel %vm701_vm5, %v2101_v47, -inf }
 0xcc8   :  { %2104 = vmax.xlane.f32.xlu1 %v2103_v50  ;;  %v6898_v51 = vpop.f32.mrf.mxu0 }
 0xcc9   :  { %v2102_v52 = vadd.f32 %v2100_v49, %v8631_v44 }
 0xccb   :  { %v2106_v54 = vsel %vm701_vm5, %v2102_v52, -inf }
 0xccc   :  { %2107 = vmax.xlane.f32.xlu0 %v2106_v54 }
 0xcce   :  { %v1730_v55 = vpop.xlane.xlu0 %1729 }
 0xccf   :  { %v1734_v57 = vsub.f32 %v1726_v16, %v1730_v55 }
 0xcd1   :  { %v1736_v58 = vmul.f32 1.442695, %v1734_v57 }
 0xcd2   :  { %v1733_v59 = vpop.xlane.xlu1 %1732 }
 0xcd3   :  { %7566 = vpow2.f32 %v1736_v58  ;;  %v1735_v60 = vsub.f32 %v1727_v20, %v1733_v59 }
 0xcd5   :  { %v1738_v61 = vmul.f32 1.442695, %v1735_v60 }
 0xcd7   :  { %7568 = vpow2.f32 %v1738_v61 }
 0xce0   :  { %v7567_v62 = vpop.eup %7566 }
 0xce1   :  { %v1740_v63 = vsel %vm701_vm5, %v7567_v62, 0.0 }
 0xce2   :  { %1741 = vadd.xlane.f32.xlu1 %v1740_v63 }
 0xce4   :  { %v7569_v1 = vpop.eup %7568 }
 0xce5   :  { %v1743_v2 = vsel %vm701_vm5, %v7569_v1, 0.0 }
 0xce6   :  { %1744 = vadd.xlane.f32.xlu0 %v1743_v2 }
 0xcf3   :  { %1876 = vrot.lane.b32.xlu1 %v8758_v56, %s8296_s4 }
 0xd41   :  { %v1854_v5 = vpop.xlane.xlu0 %1853 }
 0xd42   :  { %v1858_v6 = vsub.f32 %v1850_v25, %v1854_v5 }
 0xd44   :  { %v1860_v7 = vmul.f32 1.442695, %v1858_v6 }
 0xd45   :  { %v1857_v8 = vpop.xlane.xlu0 %1856 }
 0xd46   :  { %7570 = vpow2.f32 %v1860_v7  ;;  %v1859_v9 = vsub.f32 %v1851_v29, %v1857_v8 }
 0xd48   :  { %v1862_v10 = vmul.f32 1.442695, %v1859_v9 }
 0xd49   :  { %v1980_v11 = vpop.xlane.xlu1 %1979 }
 0xd4a   :  { %7572 = vpow2.f32 %v1862_v10  ;;  %v1984_v12 = vsub.f32 %v1976_v33, %v1980_v11 }
 0xd4c   :  { %v1986_v13 = vmul.f32 1.442695, %v1984_v12 }
 0xd4d   :  { %v1983_v14 = vpop.xlane.xlu0 %1982 }
 0xd4e   :  { %7574 = vpow2.f32 %v1986_v13  ;;  %v1985_v15 = vsub.f32 %v1977_v38, %v1983_v14  ;;  %v7474_v14 = vld [vmem:[%s9463_s12 + $0x18] sm:$0xff]  }
 0xd4f   :  { %6906 = vmatpush3.bf16.msra.mxu0 %v7474_v14 }
 0xd50   :  { %v1988_v16 = vmul.f32 1.442695, %v1985_v15  ;;  %6907 = vmatprep.subr.bf16.mxu0 %v8293_v0 }
 0xd51   :  { %v2105_v17 = vpop.xlane.xlu1 %2104 }
 0xd52   :  { %7576 = vpow2.f32 %v1988_v16  ;;  %v2109_v53 = vsub.f32 %v2101_v47, %v2105_v17 }
 0xd53   :  { %v7571_v18 = vpop.eup %7570 }
 0xd54   :  { %v2111_v19 = vmul.f32 1.442695, %v2109_v53  ;;  %v1864_v20 = vsel %vm701_vm5, %v7571_v18, 0.0 }
 0xd55   :  { %v2108_v21 = vpop.xlane.xlu0 %2107  ;;  %1865 = vadd.xlane.f32.xlu1 %v1864_v20 }
 0xd56   :  { %7578 = vpow2.f32 %v2111_v19  ;;  %v2110_v22 = vsub.f32 %v2102_v52, %v2108_v21 }
 0xd57   :  { %v7573_v23 = vpop.eup %7572 }
 0xd58   :  { %v2113_v24 = vmul.f32 1.442695, %v2110_v22  ;;  %v1867_v25 = vsel %vm701_vm5, %v7573_v23, 0.0 }
 0xd59   :  { %1868 = vadd.xlane.f32.xlu0 %v1867_v25 }
 0xd5a   :  { %7580 = vpow2.f32 %v2113_v24 }
 0xd5b   :  { %v7575_v26 = vpop.eup %7574 }
 0xd5c   :  { %v1990_v3 = vsel %vm701_vm5, %v7575_v26, 0.0 }
 0xd5d   :  { %1991 = vadd.xlane.f32.xlu1 %v1990_v3 }
 0xd5f   :  { %v7577_v27 = vpop.eup %7576 }
 0xd60   :  { %v1993_v28 = vsel %vm701_vm5, %v7577_v27, 0.0 }
 0xd61   :  { %1994 = vadd.xlane.f32.xlu0 %v1993_v28 }
 0xd63   :  { %v7579_v29 = vpop.eup %7578 }
 0xd64   :  { %v2115_v4 = vsel %vm701_vm5, %v7579_v29, 0.0 }
 0xd65   :  { %2116 = vadd.xlane.f32.xlu1 %v2115_v4 }
 0xd67   :  { %v7581_v30 = vpop.eup %7580 }
 0xd68   :  { %v2118_v31 = vsel %vm701_vm5, %v7581_v30, 0.0 }
 0xd69   :  { %2119 = vadd.xlane.f32.xlu0 %v2118_v31 }
 0xd6b   :  { %v1742_v32 = vpop.xlane.xlu1 %1741 }
 0xd6c   :  { %7582 = vrcp.f32 %v1742_v32 }
 0xd6f   :  { %v1745_v33 = vpop.xlane.xlu0 %1744  ;;  %v1877_v40 = vpop.permute.xlu1 %1876 }
 0xd70   :  { %7584 = vrcp.f32 %v1745_v33 }
 0xd76   :  { %2126 = vrot.lane.b32.xlu1 %v8758_v56, %s8297_s20 }
 0xd79   :  { %v7583_v34 = vpop.eup %7582 }
 0xd7a   :  { %v1748_v36 = vmul.f32 %v7583_v34, %v7567_v62 }
 0xd7d   :  { %v7585_v35 = vpop.eup %7584 }
 0xd7e   :  { %v1749_v37 = vmul.f32 %v7585_v35, %v7569_v1 }
 0xd7f   :  { %2001 = vrot.lane.b32.xlu0 %v8758_v56, %s8295_s10 }
 0xd80   :  { %v1750_v38 = vpack.c.bf16 %v1749_v37, %v1748_v36 }
 0xd82   :  { %6866 = vmatmul.mubr.msk.bf16.vlgmr.msra.gmra.mxu1 %vm701_vm5, %v1750_v38 }
 0xd83   :  { %6876 = vmatpush3.bf16.msra.mxu1 %v1877_v40  ;;  %6877 = vmatprep.mubr.msk.bf16.mxu1 %vm8294_vm0, %v8293_v0 }
 0xd84   :  { %6887 = vmatprep.subr.bf16.mxu1 %v8293_v0 }
 0xdde   :  { %v1866_v41 = vpop.xlane.xlu1 %1865 }
 0xddf   :  { %7586 = vrcp.f32 %v1866_v41 }
 0xde2   :  { %v1869_v45 = vpop.xlane.xlu0 %1868 }
 0xde3   :  { %7588 = vrcp.f32 %v1869_v45 }
 0xde6   :  { %v1992_v46 = vpop.xlane.xlu1 %1991 }
 0xde7   :  { %7590 = vrcp.f32 %v1992_v46 }
 0xdea   :  { %v1995_v47 = vpop.xlane.xlu0 %1994 }
 0xdeb   :  { %7592 = vrcp.f32 %v1995_v47 }
 0xdec   :  { %v7587_v48 = vpop.eup %7586 }
 0xded   :  { %v1872_v50 = vmul.f32 %v7587_v48, %v7571_v18  ;;  %v7475_v18 = vld [vmem:[%s9463_s12 + $0x10] sm:$0xff]  }
 0xdee   :  { %v2117_v56 = vpop.xlane.xlu1 %2116  ;;  %6908 = vmatpush3.bf16.msra.mxu0 %v7475_v18 }
 0xdef   :  { %7594 = vrcp.f32 %v2117_v56  ;;  %6921 = vmatprep.subr.bf16.mxu0 %v8293_v0 }
 0xdf0   :  { %v7589_v49 = vpop.eup %7588 }
 0xdf1   :  { %v1873_v51 = vmul.f32 %v7589_v49, %v7573_v23 }
 0xdf2   :  { %v2120_v52 = vpop.xlane.xlu0 %2119  ;;  %v2127_v62 = vpop.permute.xlu1 %2126 }
 0xdf3   :  { %7596 = vrcp.f32 %v2120_v52  ;;  %v1874_v54 = vpack.c.bf16 %v1873_v51, %v1872_v50 }
 0xdf4   :  { %v7591_v55 = vpop.eup %7590 }
 0xdf5   :  { %6878 = vmatmul.mubr.msk.bf16.vlgmr.msra.gmra.mxu1 %vm701_vm5, %v1874_v54  ;;  %v1998_v59 = vmul.f32 %v7591_v55, %v7575_v26 }
 0xdf6   :  { %v2002_v57 = vpop.permute.xlu0 %2001  ;;  %6889 = vmatprep.mubr.msk.bf16.mxu1 %vm8294_vm0, %v8293_v0 }
 0xdf7   :  { %6888 = vmatpush3.bf16.msra.mxu1 %v2002_v57 }
 0xdf8   :  { %v7593_v58 = vpop.eup %7592  ;;  %6899 = vmatprep.subr.bf16.mxu1 %v8293_v0 }
 0xdf9   :  { %v1999_v60 = vmul.f32 %v7593_v58, %v7577_v27 }
 0xdfb   :  { %v2000_v61 = vpack.c.bf16 %v1999_v60, %v1998_v59 }
 0xdfc   :  { %v7595_v63 = vpop.eup %7594 }
 0xdfd   :  { %6890 = vmatmul.mubr.msk.bf16.vlgmr.msra.gmra.mxu1 %vm701_vm5, %v2000_v61  ;;  %v2123_v2 = vmul.f32 %v7595_v63, %v7579_v29  ;;  %v7477_v63 = vld [vmem:[%s9464_s25 + $0x10] sm:$0xff]  }
 0xdfe   :  { %6900 = vmatpush3.bf16.msra.mxu1 %v2127_v62  ;;  %6901 = vmatprep.mubr.msk.bf16.mxu1 %vm8294_vm0, %v8293_v0  ;;  %v7476_v62 = vld [vmem:[%s9464_s25 + $0x18] sm:$0xff]  }
 0xdff   :  { %6913 = vmatprep.subr.bf16.mxu1 %v8293_v0 }
 0xe00   :  { %v7597_v1 = vpop.eup %7596 }
 0xe01   :  { %v2124_v5 = vmul.f32 %v7597_v1, %v7581_v30  ;;  %v7482_v1 = vld [vmem:[%s9465_s8 + $0x38] sm:$0xff]  }
 0xe03   :  { %v2125_v6 = vpack.c.bf16 %v2124_v5, %v2123_v2 }
 0xe05   :  { %6902 = vmatmul.mubr.msk.bf16.vlgmr.msra.gmra.mxu1 %vm701_vm5, %v2125_v6 }
 0xe06   :  { %6917 = vmatprep.mubr.msk.bf16.mxu1 %vm8294_vm0, %v8293_v0  ;;  %6914 = vmatpush3.bf16.msra.mxu1 %v7476_v62 }
 0xe07   :  { %6915 = vmatprep.subr.bf16.mxu1 %v8293_v0 }
 0xe0a   :  { %6916 = vmatpush3.bf16.msra.mxu1 %v7477_v63 }
 0xe0b   :  { %6933 = vmatprep.subr.bf16.mxu1 %v8293_v0 }
 0xe42   :  { %v1788_v7 = vpop.f32.mrf.mxu1 }
 0xe44   :  { %v6867_v8 = vpop.f32.mrf.mxu1 }
 0xe46   :  { %v1791_v9 = vpop.f32.mrf.mxu1 }
 0xe48   :  { %v6868_v10 = vpop.f32.mrf.mxu1 }
 0xeb5   :  { %v1916_v11 = vpop.f32.mrf.mxu1 }
 0xeb7   :  { %v6879_v12 = vpop.f32.mrf.mxu1 }
 0xeb8   :  { %v6395_v12 = vld [vmem:[%s9466_s11 + $0x1] ss:$0 sm:$0xff] }
 0xeb9   :  { %v1919_v13 = vpop.f32.mrf.mxu1 }
 0xeba   :  { %v7379_v15 = vpack.i.bf16 %v1919_v13, %v1916_v11 }
 0xebb   :  { %v6880_v16 = vpop.f32.mrf.mxu1 }
 0xebc   :  { %7380 = vrot.lane.b32.xlu1 %v7379_v15, %s8268_s7  ;;  %v6396_v16 = vld [vmem:[%s9467_s15 + $0x1] ss:$0 sm:$0xff] }
 0xebd   :  { %v2041_v17 = vpop.f32.mrf.mxu1 }
 0xebf   :  { %v6891_v53 = vpop.f32.mrf.mxu1 }
 0xec1   :  { %v2044_v19 = vpop.f32.mrf.mxu1 }
 0xec2   :  { %v7384_v20 = vpack.i.bf16 %v2044_v19, %v2041_v17  ;;  %v7478_v19 = vld [vmem:[#allocation7 + $0x8] sm:$0xff]  }
 0xec3   :  { %v6892_v21 = vpop.f32.mrf.mxu1 }
 0xec4   :  { %7385 = vrot.lane.b32.xlu0 %v7384_v20, %s8276_s30  ;;  %v7479_v21 = vld [vmem:[#allocation7] sm:$0xff]  }
 0xec5   :  { %v2166_v22 = vpop.f32.mrf.mxu1 }
 0xec7   :  { %v6903_v23 = vpop.f32.mrf.mxu1 }
 0xec8   :  { %v8874_v23 = vld [vmem:[#allocation5 + $0x8] sm:$0xff] }
 0xec9   :  { %v2169_v24 = vpop.f32.mrf.mxu1 }
 0xeca   :  { %v7389_v25 = vpack.i.bf16 %v2169_v24, %v2166_v22  ;;  %v8872_v22 = vld [vmem:[#allocation5] sm:$0xff] }
 0xecb   :  { %v6904_v26 = vpop.f32.mrf.mxu1  ;;  %v2585_v24 = vpack.c.bf16 %v8874_v23, %v8872_v22 }
 0xecc   :  { %7390 = vrot.lane.b32.xlu1 %v7389_v25, %s8299_s6  ;;  %v7480_v25 = vld [vmem:[#allocation8 + $0x8] sm:$0xff]   ;;  %v7481_v26 = vld [vmem:[#allocation8] sm:$0xff]  }
 0xf2e   :  { %v7381_v3 = vpop.permute.xlu1 %7380 }
 0xf2f   :  { %v7383_v28 = vunpack.i.h.bf16 %v7381_v3  ;;  %v7382_v29 = vunpack.i.l.bf16 %v7381_v3  ;;  %v7483_v3 = vld [vmem:[%s9465_s8 + $0x30] sm:$0xff]  }
 0xf31   :  { %v2198_v32 = vsel %vm649_vm2, %v1791_v9, %v7383_v28  ;;  %v2197_v33 = vsel %vm649_vm2, %v1788_v7, %v7382_v29  ;;  %v7485_v28 = vld [vmem:[%s9465_s8 + $0x20] sm:$0xff]  }
 0xf32   :  { %v6397_v29 = vld [vmem:[%s9468_s18 + $0x1] ss:$0 sm:$0xff] }
 0xf36   :  { %v7386_v27 = vpop.permute.xlu0 %7385 }
 0xf37   :  { %v7388_v4 = vunpack.i.h.bf16 %v7386_v27  ;;  %v7387_v30 = vunpack.i.l.bf16 %v7386_v27  ;;  %v7484_v27 = vld [vmem:[%s9465_s8 + $0x28] sm:$0xff]  }
 0xf39   :  { %v2200_v36 = vsel %vm701_vm5, %v2198_v32, %v7388_v4  ;;  %v2199_v37 = vsel %vm701_vm5, %v2197_v33, %v7387_v30 }
 0xf3e   :  { %v7391_v31 = vpop.permute.xlu1 %7390 }
 0xf3f   :  { %v7393_v34 = vunpack.i.h.bf16 %v7391_v31  ;;  %v7392_v35 = vunpack.i.l.bf16 %v7391_v31 }
 0xf41   :  { %v2202_v38 = vsel %vm1175_vm6, %v2200_v36, %v7393_v34  ;;  %v2201_v40 = vsel %vm1175_vm6, %v2199_v37, %v7392_v35 }
 0xf42   :  { %v2203_v41 = vpack.c.bf16 %v2202_v38, %v2201_v40 }
 0xf44   :  { %6910 = vmatmul.mubr.msk.bf16.vlgmr.msra.gmra.mxu0 %vm495_vm1, %v2203_v41 }
 0xf45   :  { %6929 = vmatprep.mubr.msk.bf16.mxu0 %vm8294_vm0, %v8293_v0  ;;  %6922 = vmatpush3.bf16.msra.mxu0 %v7482_v1 }
 0xf46   :  { %6923 = vmatprep.subr.bf16.mxu0 %v8293_v0 }
 0xf49   :  { %6924 = vmatpush3.bf16.msra.mxu0 %v7483_v3 }
 0xf4a   :  { %6925 = vmatprep.subr.bf16.mxu0 %v8293_v0 }
 0xf4d   :  { %6926 = vmatpush3.bf16.msra.mxu0 %v7484_v27 }
 0xf4e   :  { %6927 = vmatprep.subr.bf16.mxu0 %v8293_v0 }
 0xf51   :  { %6928 = vmatpush3.bf16.msra.mxu0 %v7485_v28 }
 0xf52   :  { %6949 = vmatprep.subr.bf16.mxu0 %v8293_v0 }
0x1004   :  { %v2253_v45 = vpop.f32.mrf.mxu0 }
0x1005   :  { %v2260_v46 = vadd.f32 %v2253_v45, %v8739_v42 }
0x1006   :  { %v6911_v47 = vpop.f32.mrf.mxu0 }
0x1007   :  { %v2262_v48 = vsel %vm495_vm1, %v2260_v46, 0.0 }
0x1008   :  { %2263 = vadd.xlane.f32.xlu0 %v2262_v48  ;;  %v2256_v56 = vpop.f32.mrf.mxu0 }
0x1009   :  { %v2261_v49 = vadd.f32 %v2256_v56, %v8741_v43 }
0x100a   :  { %v6912_v50 = vpop.f32.mrf.mxu0 }
0x100b   :  { %v2265_v51 = vsel %vm495_vm1, %v2261_v49, 0.0 }
0x100c   :  { %2266 = vadd.xlane.f32.xlu1 %v2265_v51 }
0x1091   :  { %v2264_v52 = vpop.xlane.xlu0 %2263 }
0x1092   :  { %v2268_v54 = vmul.f32 0.03125, %v2264_v52  ;;  %v7486_v52 = vld [vmem:[#allocation10 + $0x8] sm:$0xff]  }
0x1094   :  { %v2270_v55 = vsub.f32 %v2260_v46, %v2268_v54  ;;  %v7487_v54 = vld [vmem:[#allocation10] sm:$0xff]  }
0x1095   :  { %v2267_v57 = vpop.xlane.xlu1 %2266 }
0x1096   :  { %v2269_v58 = vmul.f32 0.03125, %v2267_v57  ;;  %v2272_v42 = vmul.f32 %v2270_v55, %v2270_v55 }
0x1098   :  { %v2271_v59 = vsub.f32 %v2261_v49, %v2269_v58  ;;  %v2274_v60 = vsel %vm495_vm1, %v2272_v42, 0.0 }
0x1099   :  { %2275 = vadd.xlane.f32.xlu0 %v2274_v60 }
0x109a   :  { %v2273_v61 = vmul.f32 %v2271_v59, %v2271_v59 }
0x109c   :  { %v2277_v43 = vsel %vm495_vm1, %v2273_v61, 0.0 }
0x109d   :  { %2278 = vadd.xlane.f32.xlu0 %v2277_v43 }
0x1122   :  { %v2276_v2 = vpop.xlane.xlu0 %2275 }
0x1123   :  { %v2280_v5 = vmul.f32 0.03125, %v2276_v2 }
0x1125   :  { %v2282_v6 = vadd.f32 1e-05, %v2280_v5 }
0x1126   :  { %v2279_v7 = vpop.xlane.xlu0 %2278 }
0x1127   :  { %7598 = vrsqrt.f32 %v2282_v6  ;;  %v2281_v8 = vmul.f32 0.03125, %v2279_v7 }
0x1129   :  { %v2283_v9 = vadd.f32 1e-05, %v2281_v8 }
0x112b   :  { %7600 = vrsqrt.f32 %v2283_v9 }
0x1134   :  { %v7599_v10 = vpop.eup %7598 }
0x1135   :  { %v2286_v11 = vmul.f32 %v7599_v10, %v2270_v55 }
0x1137   :  { %v2294_v15 = vmul.f32 %v6395_v12, %v2286_v11 }
0x1138   :  { %v7601_v13 = vpop.eup %7600 }
0x1139   :  { %v2287_v14 = vmul.f32 %v7601_v13, %v2271_v59  ;;  %v8863_v53 = vadd.f32 %v6396_v16, %v2294_v15 }
0x113b   :  { %v2295_v17 = vmul.f32 %v6395_v12, %v2287_v14 }
0x113d   :  { %v8865_v18 = vadd.f32 %v6396_v16, %v2295_v17 }
0x113f   :  { %v2304_v20 = vpack.c.bf16 %v8865_v18, %v8863_v53 }
0x1141   :  { %6918 = vmatmul.mubr.msk.bf16.vlgmr.msra.gmra.mxu1 %vm495_vm1, %v2304_v20 }
0x1142   :  { %6934 = vmatpush3.bf16.msra.mxu1 %v7478_v19  ;;  %6937 = vmatprep.mubr.msk.bf16.mxu1 %vm8294_vm0, %v8293_v0 }
0x1143   :  { %6935 = vmatprep.subr.bf16.mxu1 %v8293_v0 }
0x1146   :  { %6936 = vmatpush3.bf16.msra.mxu1 %v7479_v21 }
0x1147   :  { %6941 = vmatprep.subr.bf16.mxu1 %v8293_v0 }
0x1149   :  { %6938 = vmatmul.mubr.msk.bf16.vlgmr.msra.gmra.mxu1 %vm495_vm1, %v2585_v24 }
0x114a   :  { %6942 = vmatpush3.bf16.msra.mxu1 %v7480_v25  ;;  %6945 = vmatprep.mubr.msk.bf16.mxu1 %vm8294_vm0, %v8293_v0 }
0x114b   :  { %6943 = vmatprep.subr.bf16.mxu1 %v8293_v0 }
0x114e   :  { %6944 = vmatpush3.bf16.msra.mxu1 %v7481_v26 }
0x114f   :  { %6957 = vmatprep.subr.bf16.mxu1 %v8293_v0 }
0x1151   :  { %6946 = vmatmul.mubr.msk.bf16.vlgmr.msra.gmra.mxu1 %vm495_vm1, %v2585_v24 }
0x1152   :  { %6959 = vmatprep.mubr.msk.bf16.mxu1 %vm8294_vm0, %v8293_v0 }
0x1201   :  { %v2360_v4 = vpop.f32.mrf.mxu1 }
0x1202   :  { %v2361_v31 = vadd.f32 %v6397_v29, %v2360_v4 }
0x1203   :  { %v6919_v30 = vpop.f32.mrf.mxu1 }
0x1204   :  { %v2367_v35 = vmax.f32 %v2361_v31, 0.0 }
0x1205   :  { %v2363_v32 = vpop.f32.mrf.mxu1 }
0x1206   :  { %v2364_v33 = vadd.f32 %v6397_v29, %v2363_v32 }
0x1207   :  { %v6920_v34 = vpop.f32.mrf.mxu1 }
0x1208   :  { %v2368_v36 = vmax.f32 %v2364_v33, 0.0 }
0x1209   :  { %v2635_v37 = vpop.f32.mrf.mxu1 }
0x120a   :  { %v2369_v38 = vpack.c.bf16 %v2368_v36, %v2367_v35 }
0x120b   :  { %v6939_v40 = vpop.f32.mrf.mxu1 }
0x120c   :  { %6930 = vmatmul.mubr.msk.bf16.vlgmr.msra.gmra.mxu0 %vm1376_vm7, %v2369_v38 }
0x120d   :  { %v2638_v41 = vpop.f32.mrf.mxu1  ;;  %6953 = vmatprep.mubr.msk.bf16.mxu0 %vm8294_vm0, %v8293_v0  ;;  %6950 = vmatpush3.bf16.msra.mxu0 %v7486_v52 }
0x120e   :  { %v2642_v45 = vpack.c.bf16 %v2638_v41, %v2635_v37  ;;  %6951 = vmatprep.subr.bf16.mxu0 %v8293_v0 }
0x120f   :  { %v6940_v46 = vpop.f32.mrf.mxu1 }
0x1210   :  { %2870 = vrot.lane.b32.xlu0 %v2642_v45, %s8296_s4 }
0x1211   :  { %v2689_v47 = vpop.f32.mrf.mxu1  ;;  %6952 = vmatpush3.bf16.msra.mxu0 %v7487_v54 }
0x1212   :  { %6963 = vmatprep.subr.bf16.mxu0 %v8293_v0 }
0x1213   :  { %v6947_v48 = vpop.f32.mrf.mxu1 }
0x1214   :  { %6954 = vmatmul.mubr.msk.bf16.vlgmr.msra.gmra.mxu0 %vm495_vm1, %v2585_v24 }
0x1215   :  { %v2692_v56 = vpop.f32.mrf.mxu1  ;;  %6965 = vmatprep.mubr.msk.bf16.mxu0 %vm8294_vm0, %v8293_v0 }
0x1216   :  { %v2696_v49 = vpack.c.bf16 %v2692_v56, %v2689_v47 }
0x1217   :  { %v6948_v50 = vpop.f32.mrf.mxu1 }
0x1218   :  { %3124 = vrot.lane.b32.xlu0 %v2696_v49, %s8297_s20  ;;  %2873 = vrot.lane.b32.xlu1 %v2696_v49, %s8296_s4  ;;  %v2755_v51 = vsel %vm649_vm2, %v2696_v49, 0 }
0x1219   :  { %6958 = vmatpush3.bf16.xpose.msra.mxu1 %v2755_v51 }
0x121a   :  { %6969 = vmatprep.subr.bf16.mxu1 %v8293_v0 }
0x121c   :  { %2999 = vrot.lane.b32.xlu1 %v2696_v49, %s8295_s10 }
0x1220   :  { %2997 = vrot.lane.b32.xlu1 %v2642_v45, %s8295_s10  ;;  %6960 = vmatmul.mubr.msk.bf16.vlgmr.msra.gmra.mxu1 %vm649_vm2, %v2642_v45 }
0x1221   :  { %6971 = vmatprep.mubr.msk.bf16.mxu1 %vm8294_vm0, %v8293_v0 }
0x1224   :  { %3122 = vrot.lane.b32.xlu1 %v2642_v45, %s8297_s20 }
0x1282   :  { %v2871_v42 = vpop.permute.xlu0 %2870 }
0x128a   :  { %v2874_v55 = vpop.permute.xlu1 %2873  ;;  %v3125_v60 = vpop.permute.xlu0 %3124 }
0x128b   :  { %v2879_v57 = vsel %vm649_vm2, %v2874_v55, 0  ;;  %v3130_v43 = vsel %vm649_vm2, %v3125_v60, 0 }
0x128c   :  { %6970 = vmatpush3.bf16.xpose.msra.mxu1 %v2879_v57 }
0x128d   :  { %6981 = vmatprep.subr.bf16.mxu1 %v8293_v0 }
0x128e   :  { %v3000_v58 = vpop.permute.xlu1 %2999 }
0x128f   :  { %v3005_v59 = vsel %vm649_vm2, %v3000_v58, 0 }
0x1292   :  { %v2998_v61 = vpop.permute.xlu1 %2997 }
0x1293   :  { %6972 = vmatmul.mubr.msk.bf16.vlgmr.msra.gmra.mxu1 %vm649_vm2, %v2871_v42 }
0x1294   :  { %6982 = vmatpush3.bf16.xpose.msra.mxu1 %v3005_v59  ;;  %6983 = vmatprep.mubr.msk.bf16.mxu1 %vm8294_vm0, %v8293_v0 }
0x1295   :  { %6993 = vmatprep.subr.bf16.mxu1 %v8293_v0 }
0x1296   :  { %v3123_v62 = vpop.permute.xlu1 %3122 }
0x129b   :  { %6984 = vmatmul.mubr.msk.bf16.vlgmr.msra.gmra.mxu1 %vm649_vm2, %v2998_v61 }
0x129c   :  { %6994 = vmatpush3.bf16.xpose.msra.mxu1 %v3130_v43  ;;  %6995 = vmatprep.mubr.msk.bf16.mxu1 %vm8294_vm0, %v8293_v0 }
0x129d   :  { %7005 = vmatprep.subr.bf16.mxu1 %v8293_v0 }
0x12a3   :  { %6996 = vmatmul.mubr.msk.bf16.vlgmr.msra.gmra.mxu1 %vm649_vm2, %v3123_v62 }
0x12a4   :  { %7009 = vmatprep.mubr.msk.bf16.mxu1 %vm8294_vm0, %v8293_v0 }
0x12cc   :  { %v8929_v63 = vpop.f32.mrf.mxu0 }
0x12ce   :  { %v6931_v1 = vpop.f32.mrf.mxu0 }
0x12d0   :  { %v8931_v2 = vpop.f32.mrf.mxu0 }
0x12d2   :  { %v6932_v5 = vpop.f32.mrf.mxu0 }
0x12d4   :  { %v2743_v16 = vpop.f32.mrf.mxu0 }
0x12d6   :  { %v6955_v17 = vpop.f32.mrf.mxu0 }
0x12d8   :  { %v2746_v19 = vpop.f32.mrf.mxu0 }
0x12d9   :  { %v8937_v20 = vpack.c.bf16 %v2746_v19, %v2743_v16 }
0x12da   :  { %v6956_v21 = vpop.f32.mrf.mxu0 }
0x12db   :  { %6964 = vmatpush3.bf16.msra.mxu0 %v8937_v20 }
0x12dc   :  { %6975 = vmatprep.subr.bf16.mxu0 %v8293_v0 }
0x12e0   :  { %v2791_v6 = vpop.f32.mrf.mxu1 }
0x12e1   :  { %v2798_v7 = vmul.f32 0.35355338, %v2791_v6 }
0x12e2   :  { %v6961_v8 = vpop.f32.mrf.mxu1 }
0x12e3   :  { %v2800_v9 = vadd.f32 %v2798_v7, %v8628_v39 }
0x12e4   :  { %v2794_v10 = vpop.f32.mrf.mxu1 }
0x12e5   :  { %v2799_v11 = vmul.f32 0.35355338, %v2794_v10  ;;  %v2802_v12 = vsel %vm701_vm5, %v2800_v9, -inf }
0x12e6   :  { %2803 = vmax.xlane.f32.xlu0 %v2802_v12  ;;  %v6962_v13 = vpop.f32.mrf.mxu1 }
0x12e7   :  { %v2801_v14 = vadd.f32 %v2799_v11, %v8631_v44 }
0x12e9   :  { %v2805_v15 = vsel %vm701_vm5, %v2801_v14, -inf }
0x12ea   :  { %2806 = vmax.xlane.f32.xlu1 %v2805_v15 }
0x1353   :  { %v2915_v24 = vpop.f32.mrf.mxu1 }
0x1354   :  { %v2922_v25 = vmul.f32 0.35355338, %v2915_v24 }
0x1355   :  { %v6973_v26 = vpop.f32.mrf.mxu1 }
0x1356   :  { %v2924_v3 = vadd.f32 %v2922_v25, %v8628_v39 }
0x1357   :  { %v2918_v27 = vpop.f32.mrf.mxu1 }
0x1358   :  { %v2923_v28 = vmul.f32 0.35355338, %v2918_v27  ;;  %v2926_v29 = vsel %vm701_vm5, %v2924_v3, -inf }
0x1359   :  { %2927 = vmax.xlane.f32.xlu0 %v2926_v29  ;;  %v6974_v4 = vpop.f32.mrf.mxu1 }
0x135a   :  { %v2925_v30 = vadd.f32 %v2923_v28, %v8631_v44 }
0x135b   :  { %v3041_v31 = vpop.f32.mrf.mxu1 }
0x135c   :  { %v3048_v32 = vmul.f32 0.35355338, %v3041_v31  ;;  %v2929_v33 = vsel %vm701_vm5, %v2925_v30, -inf }
0x135d   :  { %2930 = vmax.xlane.f32.xlu0 %v2929_v33  ;;  %v6985_v34 = vpop.f32.mrf.mxu1 }
0x135e   :  { %v3050_v35 = vadd.f32 %v3048_v32, %v8628_v39 }
0x135f   :  { %v3044_v36 = vpop.f32.mrf.mxu1 }
0x1360   :  { %v3049_v37 = vmul.f32 0.35355338, %v3044_v36  ;;  %v3052_v38 = vsel %vm701_vm5, %v3050_v35, -inf }
0x1361   :  { %3053 = vmax.xlane.f32.xlu1 %v3052_v38  ;;  %v6986_v40 = vpop.f32.mrf.mxu1 }
0x1362   :  { %v3051_v41 = vadd.f32 %v3049_v37, %v8631_v44 }
0x1363   :  { %v3166_v45 = vpop.f32.mrf.mxu1 }
0x1364   :  { %v3173_v46 = vmul.f32 0.35355338, %v3166_v45  ;;  %v3055_v47 = vsel %vm701_vm5, %v3051_v41, -inf }
0x1365   :  { %3056 = vmax.xlane.f32.xlu0 %v3055_v47  ;;  %v6997_v48 = vpop.f32.mrf.mxu1 }
0x1366   :  { %v3175_v56 = vadd.f32 %v3173_v46, %v8628_v39 }
0x1367   :  { %v3169_v49 = vpop.f32.mrf.mxu1 }
0x1368   :  { %v3174_v50 = vmul.f32 0.35355338, %v3169_v49  ;;  %v3177_v51 = vsel %vm701_vm5, %v3175_v56, -inf }
0x1369   :  { %3178 = vmax.xlane.f32.xlu1 %v3177_v51  ;;  %v6998_v52 = vpop.f32.mrf.mxu1 }
0x136a   :  { %v3176_v54 = vadd.f32 %v3174_v50, %v8631_v44 }
0x136c   :  { %v3180_v55 = vsel %vm701_vm5, %v3176_v54, -inf }
0x136d   :  { %3181 = vmax.xlane.f32.xlu0 %v3180_v55 }
0x136f   :  { %v2804_v57 = vpop.xlane.xlu0 %2803 }
0x1370   :  { %v2808_v58 = vsub.f32 %v2800_v9, %v2804_v57 }
0x1372   :  { %v2810_v42 = vmul.f32 1.442695, %v2808_v58 }
0x1373   :  { %v2807_v59 = vpop.xlane.xlu1 %2806 }
0x1374   :  { %7602 = vpow2.f32 %v2810_v42  ;;  %v2809_v60 = vsub.f32 %v2801_v14, %v2807_v59 }
0x1376   :  { %v2812_v61 = vmul.f32 1.442695, %v2809_v60 }
0x1378   :  { %7604 = vpow2.f32 %v2812_v61 }
0x1381   :  { %v7603_v43 = vpop.eup %7602 }
0x1382   :  { %v2814_v62 = vsel %vm701_vm5, %v7603_v43, 0.0 }
0x1383   :  { %2815 = vadd.xlane.f32.xlu1 %v2814_v62 }
0x1385   :  { %v7605_v1 = vpop.eup %7604 }
0x1386   :  { %v2817_v5 = vsel %vm701_vm5, %v7605_v1, 0.0 }
0x1387   :  { %2818 = vadd.xlane.f32.xlu0 %v2817_v5 }
0x1394   :  { %2950 = vrot.lane.b32.xlu1 %v8937_v20, %s8296_s4 }
0x13e2   :  { %v2928_v6 = vpop.xlane.xlu0 %2927 }
0x13e3   :  { %v2932_v7 = vsub.f32 %v2924_v3, %v2928_v6 }
0x13e5   :  { %v2934_v8 = vmul.f32 1.442695, %v2932_v7 }
0x13e6   :  { %v2931_v9 = vpop.xlane.xlu0 %2930 }
0x13e7   :  { %7606 = vpow2.f32 %v2934_v8  ;;  %v2933_v10 = vsub.f32 %v2925_v30, %v2931_v9 }
0x13e9   :  { %v2936_v11 = vmul.f32 1.442695, %v2933_v10 }
0x13ea   :  { %v3054_v12 = vpop.xlane.xlu1 %3053 }
0x13eb   :  { %7608 = vpow2.f32 %v2936_v11  ;;  %v3058_v13 = vsub.f32 %v3050_v35, %v3054_v12 }
0x13ed   :  { %v3060_v14 = vmul.f32 1.442695, %v3058_v13 }
0x13ee   :  { %v3057_v15 = vpop.xlane.xlu0 %3056 }
0x13ef   :  { %7610 = vpow2.f32 %v3060_v14  ;;  %v3059_v16 = vsub.f32 %v3051_v41, %v3057_v15 }
0x13f1   :  { %v3062_v17 = vmul.f32 1.442695, %v3059_v16 }
0x13f2   :  { %v3179_v19 = vpop.xlane.xlu1 %3178 }
0x13f3   :  { %7612 = vpow2.f32 %v3062_v17  ;;  %v3183_v21 = vsub.f32 %v3175_v56, %v3179_v19 }
0x13f4   :  { %v7607_v24 = vpop.eup %7606 }
0x13f5   :  { %v3185_v25 = vmul.f32 1.442695, %v3183_v21  ;;  %v2938_v26 = vsel %vm701_vm5, %v7607_v24, 0.0  ;;  %v7488_v21 = vld [vmem:[#allocation11 + $0x8] sm:$0xff]  }
0x13f6   :  { %2939 = vadd.xlane.f32.xlu1 %v2938_v26  ;;  %v3182_v3 = vpop.xlane.xlu0 %3181  ;;  %7006 = vmatpush3.bf16.msra.mxu1 %v7488_v21 }
0x13f7   :  { %7614 = vpow2.f32 %v3185_v25  ;;  %v3184_v27 = vsub.f32 %v3176_v54, %v3182_v3  ;;  %7007 = vmatprep.subr.bf16.mxu1 %v8293_v0 }
0x13f8   :  { %v7609_v28 = vpop.eup %7608 }
0x13f9   :  { %v3187_v29 = vmul.f32 1.442695, %v3184_v27  ;;  %v2941_v4 = vsel %vm701_vm5, %v7609_v28, 0.0  ;;  %v7489_v27 = vld [vmem:[#allocation11] sm:$0xff]  }
0x13fa   :  { %2942 = vadd.xlane.f32.xlu0 %v2941_v4  ;;  %7008 = vmatpush3.bf16.msra.mxu1 %v7489_v27 }
0x13fb   :  { %7616 = vpow2.f32 %v3187_v29  ;;  %7021 = vmatprep.subr.bf16.mxu1 %v8293_v0 }
0x13fc   :  { %v7611_v30 = vpop.eup %7610 }
0x13fd   :  { %v3064_v31 = vsel %vm701_vm5, %v7611_v30, 0.0 }
0x13fe   :  { %3065 = vadd.xlane.f32.xlu1 %v3064_v31 }
0x1400   :  { %v7613_v32 = vpop.eup %7612 }
0x1401   :  { %v3067_v33 = vsel %vm701_vm5, %v7613_v32, 0.0 }
0x1402   :  { %3068 = vadd.xlane.f32.xlu0 %v3067_v33 }
0x1404   :  { %v7615_v34 = vpop.eup %7614 }
0x1405   :  { %v3189_v35 = vsel %vm701_vm5, %v7615_v34, 0.0 }
0x1406   :  { %3190 = vadd.xlane.f32.xlu1 %v3189_v35  ;;  %v6401_v35 = vld [vmem:[%s9469_s14 + $0x1] ss:$0 sm:$0xff] }
0x1408   :  { %v7617_v36 = vpop.eup %7616 }
0x1409   :  { %v3192_v37 = vsel %vm701_vm5, %v7617_v36, 0.0 }
0x140a   :  { %3193 = vadd.xlane.f32.xlu0 %v3192_v37 }
0x140c   :  { %v2816_v38 = vpop.xlane.xlu1 %2815 }
0x140d   :  { %7618 = vrcp.f32 %v2816_v38 }
0x1410   :  { %v2819_v40 = vpop.xlane.xlu0 %2818  ;;  %v2951_v56 = vpop.permute.xlu1 %2950 }
0x1411   :  { %7620 = vrcp.f32 %v2819_v40  ;;  %v2441_v40 = vadd.f32 %v6401_v35, %v8931_v2 }
0x1417   :  { %3200 = vrot.lane.b32.xlu1 %v8937_v20, %s8297_s20 }
0x141a   :  { %v7619_v41 = vpop.eup %7618 }
0x141b   :  { %v2822_v46 = vmul.f32 %v7619_v41, %v7603_v43  ;;  %v2445_v41 = vadd.f32 %v2441_v40, %v8865_v18 }
0x141e   :  { %v7621_v45 = vpop.eup %7620 }
0x141f   :  { %v2823_v47 = vmul.f32 %v7621_v45, %v7605_v1  ;;  %v2449_v45 = vsel %vm495_vm1, %v2445_v41, 0.0 }
0x1420   :  { %3075 = vrot.lane.b32.xlu0 %v8937_v20, %s8295_s10 }
0x1421   :  { %v2824_v48 = vpack.c.bf16 %v2823_v47, %v2822_v46 }
0x1423   :  { %6966 = vmatmul.mubr.msk.bf16.vlgmr.msra.gmra.mxu0 %vm701_vm5, %v2824_v48 }
0x1424   :  { %6976 = vmatpush3.bf16.msra.mxu0 %v2951_v56  ;;  %6977 = vmatprep.mubr.msk.bf16.mxu0 %vm8294_vm0, %v8293_v0 }
0x1425   :  { %6987 = vmatprep.subr.bf16.mxu0 %v8293_v0 }
0x147f   :  { %v2940_v49 = vpop.xlane.xlu1 %2939 }
0x1480   :  { %7622 = vrcp.f32 %v2940_v49 }
0x1483   :  { %v2943_v50 = vpop.xlane.xlu0 %2942 }
0x1484   :  { %7624 = vrcp.f32 %v2943_v50 }
0x1487   :  { %v3066_v51 = vpop.xlane.xlu1 %3065 }
0x1488   :  { %7626 = vrcp.f32 %v3066_v51 }
0x148b   :  { %v3069_v52 = vpop.xlane.xlu0 %3068 }
0x148c   :  { %7628 = vrcp.f32 %v3069_v52 }
0x148d   :  { %v7623_v54 = vpop.eup %7622 }
0x148e   :  { %v2946_v57 = vmul.f32 %v7623_v54, %v7607_v24 }
0x148f   :  { %v3191_v20 = vpop.xlane.xlu1 %3190 }
0x1490   :  { %7630 = vrcp.f32 %v3191_v20 }
0x1491   :  { %v7625_v55 = vpop.eup %7624 }
0x1492   :  { %v2947_v58 = vmul.f32 %v7625_v55, %v7609_v28 }
0x1493   :  { %v3194_v42 = vpop.xlane.xlu0 %3193  ;;  %v3201_v6 = vpop.permute.xlu1 %3200 }
0x1494   :  { %7632 = vrcp.f32 %v3194_v42  ;;  %v2948_v59 = vpack.c.bf16 %v2947_v58, %v2946_v57 }
0x1495   :  { %v7627_v60 = vpop.eup %7626 }
0x1496   :  { %6978 = vmatmul.mubr.msk.bf16.vlgmr.msra.gmra.mxu0 %vm701_vm5, %v2948_v59  ;;  %v3072_v62 = vmul.f32 %v7627_v60, %v7611_v30 }
0x1497   :  { %v3076_v61 = vpop.permute.xlu0 %3075  ;;  %6989 = vmatprep.mubr.msk.bf16.mxu0 %vm8294_vm0, %v8293_v0 }
0x1498   :  { %6988 = vmatpush3.bf16.msra.mxu0 %v3076_v61 }
0x1499   :  { %v7629_v43 = vpop.eup %7628  ;;  %6999 = vmatprep.subr.bf16.mxu0 %v8293_v0 }
0x149a   :  { %v3073_v1 = vmul.f32 %v7629_v43, %v7613_v32 }
0x149c   :  { %v3074_v5 = vpack.c.bf16 %v3073_v1, %v3072_v62 }
0x149d   :  { %v7631_v7 = vpop.eup %7630 }
0x149e   :  { %6990 = vmatmul.mubr.msk.bf16.vlgmr.msra.gmra.mxu0 %vm701_vm5, %v3074_v5  ;;  %v3197_v9 = vmul.f32 %v7631_v7, %v7615_v34 }
0x149f   :  { %7000 = vmatpush3.bf16.msra.mxu0 %v3201_v6  ;;  %7001 = vmatprep.mubr.msk.bf16.mxu0 %vm8294_vm0, %v8293_v0 }
0x14a0   :  { %7013 = vmatprep.subr.bf16.mxu0 %v8293_v0 }
0x14a1   :  { %v7633_v8 = vpop.eup %7632 }
0x14a2   :  { %v3198_v10 = vmul.f32 %v7633_v8, %v7617_v36  ;;  %v2438_v36 = vadd.f32 %v6401_v35, %v8929_v63 }
0x14a4   :  { %v3199_v11 = vpack.c.bf16 %v3198_v10, %v3197_v9  ;;  %v2444_v37 = vadd.f32 %v2438_v36, %v8863_v53 }
0x14a6   :  { %7002 = vmatmul.mubr.msk.bf16.vlgmr.msra.gmra.mxu0 %vm701_vm5, %v3199_v11  ;;  %v2446_v38 = vsel %vm495_vm1, %v2444_v37, 0.0 }
0x14a7   :  { %7017 = vmatprep.mubr.msk.bf16.mxu0 %vm8294_vm0, %v8293_v0 }
0x14e3   :  { %v2862_v12 = vpop.f32.mrf.mxu0 }
0x14e5   :  { %v6967_v13 = vpop.f32.mrf.mxu0 }
0x14e7   :  { %v2865_v14 = vpop.f32.mrf.mxu0 }
0x14e9   :  { %v6968_v15 = vpop.f32.mrf.mxu0 }
0x1556   :  { %v2990_v16 = vpop.f32.mrf.mxu0 }
0x1558   :  { %v6979_v17 = vpop.f32.mrf.mxu0 }
0x155a   :  { %v2993_v19 = vpop.f32.mrf.mxu0 }
0x155b   :  { %v7394_v24 = vpack.i.bf16 %v2993_v19, %v2990_v16  ;;  %v6407_v19 = vld [vmem:[%s9470_s9 + $0x1] ss:$0 sm:$0xff] }
0x155c   :  { %v6980_v25 = vpop.f32.mrf.mxu0 }
0x155d   :  { %7395 = vrot.lane.b32.xlu1 %v7394_v24, %s8268_s7  ;;  %v6408_v24 = vld [vmem:[%s9471_s22 + $0x1] ss:$0 sm:$0xff] }
0x155e   :  { %v3115_v26 = vpop.f32.mrf.mxu0 }
0x1560   :  { %v6991_v3 = vpop.f32.mrf.mxu0 }
0x1562   :  { %v3118_v28 = vpop.f32.mrf.mxu0 }
0x1563   :  { %v7399_v29 = vpack.i.bf16 %v3118_v28, %v3115_v26 }
0x1564   :  { %v6992_v4 = vpop.f32.mrf.mxu0 }
0x1565   :  { %7400 = vrot.lane.b32.xlu0 %v7399_v29, %s8276_s30 }
0x1566   :  { %v3240_v30 = vpop.f32.mrf.mxu0 }
0x1568   :  { %v7003_v31 = vpop.f32.mrf.mxu0 }
0x156a   :  { %v3243_v32 = vpop.f32.mrf.mxu0 }
0x156b   :  { %v7404_v33 = vpack.i.bf16 %v3243_v32, %v3240_v30 }
0x156c   :  { %v7004_v34 = vpop.f32.mrf.mxu0 }
0x156d   :  { %7405 = vrot.lane.b32.xlu1 %v7404_v33, %s8299_s6 }
0x1584   :  { %2447 = vadd.xlane.f32.xlu0 %v2446_v38 }
0x1591   :  { %2450 = vadd.xlane.f32.xlu1 %v2449_v45 }
0x15cf   :  { %v7396_v46 = vpop.permute.xlu1 %7395 }
0x15d0   :  { %v7398_v48 = vunpack.i.h.bf16 %v7396_v46  ;;  %v7397_v56 = vunpack.i.l.bf16 %v7396_v46 }
0x15d2   :  { %v3272_v63 = vsel %vm649_vm2, %v2865_v14, %v7398_v48  ;;  %v3271_v53 = vsel %vm649_vm2, %v2862_v12, %v7397_v56 }
0x15d7   :  { %v7401_v47 = vpop.permute.xlu0 %7400 }
0x15d8   :  { %v7403_v49 = vunpack.i.h.bf16 %v7401_v47  ;;  %v7402_v50 = vunpack.i.l.bf16 %v7401_v47 }
0x15da   :  { %v3274_v2 = vsel %vm701_vm5, %v3272_v63, %v7403_v49  ;;  %v3273_v18 = vsel %vm701_vm5, %v3271_v53, %v7402_v50 }
0x15df   :  { %v7406_v51 = vpop.permute.xlu1 %7405 }
0x15e0   :  { %v7408_v52 = vunpack.i.h.bf16 %v7406_v51  ;;  %v7407_v54 = vunpack.i.l.bf16 %v7406_v51 }
0x15e2   :  { %v3276_v20 = vsel %vm1175_vm6, %v3274_v2, %v7408_v52  ;;  %v3275_v55 = vsel %vm1175_vm6, %v3273_v18, %v7407_v54  ;;  %v7490_v2 = vld [vmem:[#allocation14 + $0x8] sm:$0xff]  }
0x15e3   :  { %v3277_v57 = vpack.c.bf16 %v3276_v20, %v3275_v55  ;;  %v7491_v18 = vld [vmem:[#allocation13 + $0x8] sm:$0xff]   ;;  %v7492_v20 = vld [vmem:[#allocation14] sm:$0xff]  }
0x15e4   :  { %7014 = vmatpush3.bf16.msra.mxu0 %v7491_v18  ;;  %v7493_v55 = vld [vmem:[#allocation13] sm:$0xff]  }
0x15e5   :  { %7010 = vmatmul.mubr.msk.bf16.vlgmr.msra.gmra.mxu1 %vm495_vm1, %v3277_v57  ;;  %7015 = vmatprep.subr.bf16.mxu0 %v8293_v0 }
0x15e6   :  { %7025 = vmatprep.mubr.msk.bf16.mxu1 %vm8294_vm0, %v8293_v0  ;;  %7022 = vmatpush3.bf16.msra.mxu1 %v7490_v2 }
0x15e7   :  { %7023 = vmatprep.subr.bf16.mxu1 %v8293_v0 }
0x15e8   :  { %7016 = vmatpush3.bf16.msra.mxu0 %v7493_v55 }
0x15e9   :  { %7029 = vmatprep.subr.bf16.mxu0 %v8293_v0 }
0x15ea   :  { %7024 = vmatpush3.bf16.msra.mxu1 %v7492_v20 }
0x15eb   :  { %7037 = vmatprep.subr.bf16.mxu1 %v8293_v0 }
0x160d   :  { %v2448_v58 = vpop.xlane.xlu0 %2447 }
0x160e   :  { %v2452_v42 = vmul.f32 0.03125, %v2448_v58 }
0x1610   :  { %v2454_v59 = vsub.f32 %v2444_v37, %v2452_v42 }
0x1612   :  { %v2456_v60 = vmul.f32 %v2454_v59, %v2454_v59 }
0x1614   :  { %v2458_v61 = vsel %vm495_vm1, %v2456_v60, 0.0 }
0x1615   :  { %2459 = vadd.xlane.f32.xlu0 %v2458_v61 }
0x161a   :  { %v2451_v43 = vpop.xlane.xlu1 %2450 }
0x161b   :  { %v2453_v62 = vmul.f32 0.03125, %v2451_v43 }
0x161d   :  { %v2455_v1 = vsub.f32 %v2445_v41, %v2453_v62 }
0x161f   :  { %v2457_v5 = vmul.f32 %v2455_v1, %v2455_v1 }
0x1621   :  { %v2461_v6 = vsel %vm495_vm1, %v2457_v5, 0.0 }
0x1622   :  { %2462 = vadd.xlane.f32.xlu0 %v2461_v6 }
0x169e   :  { %v2460_v7 = vpop.xlane.xlu0 %2459 }
0x169f   :  { %v2464_v8 = vmul.f32 0.03125, %v2460_v7 }
0x16a1   :  { %v2466_v9 = vadd.f32 1e-05, %v2464_v8 }
0x16a3   :  { %7634 = vrsqrt.f32 %v2466_v9 }
0x16a5   :  { %v3327_v10 = vpop.f32.mrf.mxu1 }
0x16a6   :  { %v3334_v3 = vadd.f32 %v3327_v10, %v8872_v22 }
0x16a7   :  { %v7011_v11 = vpop.f32.mrf.mxu1 }
0x16a8   :  { %v3336_v28 = vsel %vm495_vm1, %v3334_v3, 0.0  ;;  %v6409_v11 = vld [vmem:[%s9472_s23] ss:$0 sm:$0xff] }
0x16a9   :  { %v3330_v12 = vpop.f32.mrf.mxu1 }
0x16aa   :  { %v3335_v32 = vadd.f32 %v3330_v12, %v8874_v23 }
0x16ab   :  { %v2463_v13 = vpop.xlane.xlu0 %2462  ;;  %v7012_v14 = vpop.f32.mrf.mxu1 }
0x16ac   :  { %v2465_v15 = vmul.f32 0.03125, %v2463_v13  ;;  %v3339_v34 = vsel %vm495_vm1, %v3335_v32, 0.0 }
0x16ae   :  { %v2467_v16 = vadd.f32 1e-05, %v2465_v15 }
0x16b0   :  { %v7635_v17 = vpop.eup %7634  ;;  %7636 = vrsqrt.f32 %v2467_v16  ;;  %v6410_v16 = vld [vmem:[%s9473_s3] ss:$0 sm:$0xff] }
0x16b1   :  { %v2470_v21 = vmul.f32 %v7635_v17, %v2454_v59  ;;  %v6431_v17 = vld [vmem:[#allocation23] ss:$0 sm:$0xff] }
0x16b3   :  { %v2478_v25 = vmul.f32 %v6407_v19, %v2470_v21 }
0x16b5   :  { %v2486_v26 = vadd.f32 %v6408_v24, %v2478_v25 }
0x16b7   :  { %v2490_v27 = vsel %vm495_vm1, %v2486_v26, 0.0 }
0x16b8   :  { %2491 = vadd.xlane.f32.xlu1 %v2490_v27  ;;  %v6432_v27 = vld [vmem:[#allocation25] ss:$0 sm:$0xff] }
0x16bc   :  { %3337 = vadd.xlane.f32.xlu1 %v3336_v28 }
0x16bd   :  { %v7637_v29 = vpop.eup %7636 }
0x16be   :  { %v2471_v4 = vmul.f32 %v7637_v29, %v2455_v1 }
0x16c0   :  { %v2479_v30 = vmul.f32 %v6407_v19, %v2471_v4 }
0x16c2   :  { %v2487_v31 = vadd.f32 %v6408_v24, %v2479_v30 }
0x16c4   :  { %v2493_v33 = vsel %vm495_vm1, %v2487_v31, 0.0 }
0x16c5   :  { %2494 = vadd.xlane.f32.xlu0 %v2493_v33  ;;  %v7495_v33 = vld [vmem:[#allocation16] sm:$0xff]  }
0x16c9   :  { %3340 = vadd.xlane.f32.xlu0 %v3339_v34 }
0x1741   :  { %v2492_v35 = vpop.xlane.xlu1 %2491 }
0x1742   :  { %v2496_v22 = vmul.f32 0.03125, %v2492_v35 }
0x1744   :  { %v2498_v36 = vsub.f32 %v2486_v26, %v2496_v22 }
0x1745   :  { %v3338_v37 = vpop.xlane.xlu1 %3337 }
0x1746   :  { %v3342_v38 = vmul.f32 0.03125, %v3338_v37  ;;  %v2500_v40 = vmul.f32 %v2498_v36, %v2498_v36 }
0x1748   :  { %v3344_v41 = vsub.f32 %v3334_v3, %v3342_v38  ;;  %v2502_v45 = vsel %vm495_vm1, %v2500_v40, 0.0 }
0x1749   :  { %2503 = vadd.xlane.f32.xlu1 %v2502_v45 }
0x174a   :  { %v3346_v46 = vmul.f32 %v3344_v41, %v3344_v41 }
0x174c   :  { %v3348_v47 = vsel %vm495_vm1, %v3346_v46, 0.0 }
0x174d   :  { %3349 = vadd.xlane.f32.xlu1 %v3348_v47 }
0x174e   :  { %v2495_v23 = vpop.xlane.xlu0 %2494 }
0x174f   :  { %v2497_v48 = vmul.f32 0.03125, %v2495_v23 }
0x1751   :  { %v2499_v56 = vsub.f32 %v2487_v31, %v2497_v48  ;;  %v7494_v31 = vld [vmem:[#allocation16 + $0x8] sm:$0xff]  }
0x1752   :  { %v3341_v49 = vpop.xlane.xlu0 %3340 }
0x1753   :  { %v3343_v50 = vmul.f32 0.03125, %v3341_v49  ;;  %v2501_v51 = vmul.f32 %v2499_v56, %v2499_v56 }
0x1755   :  { %v3345_v63 = vsub.f32 %v3335_v32, %v3343_v50  ;;  %v2505_v53 = vsel %vm495_vm1, %v2501_v51, 0.0 }
0x1756   :  { %2506 = vadd.xlane.f32.xlu0 %v2505_v53 }
0x1757   :  { %v3347_v52 = vmul.f32 %v3345_v63, %v3345_v63 }
0x1759   :  { %v3351_v54 = vsel %vm495_vm1, %v3347_v52, 0.0 }
0x175a   :  { %3352 = vadd.xlane.f32.xlu0 %v3351_v54 }
0x17d2   :  { %v2504_v57 = vpop.xlane.xlu1 %2503 }
0x17d3   :  { %v2508_v58 = vmul.f32 0.03125, %v2504_v57 }
0x17d5   :  { %v2510_v59 = vadd.f32 1e-05, %v2508_v58 }
0x17d6   :  { %v3350_v42 = vpop.xlane.xlu1 %3349 }
0x17d7   :  { %v3354_v60 = vmul.f32 0.03125, %v3350_v42  ;;  %7638 = vrsqrt.f32 %v2510_v59 }
0x17d9   :  { %v3356_v61 = vadd.f32 1e-05, %v3354_v60 }
0x17db   :  { %7640 = vrsqrt.f32 %v3356_v61 }
0x17df   :  { %v2507_v43 = vpop.xlane.xlu0 %2506 }
0x17e0   :  { %v2509_v62 = vmul.f32 0.03125, %v2507_v43 }
0x17e2   :  { %v2511_v1 = vadd.f32 1e-05, %v2509_v62 }
0x17e3   :  { %v3353_v5 = vpop.xlane.xlu0 %3352 }
0x17e4   :  { %7642 = vrsqrt.f32 %v2511_v1  ;;  %v3355_v6 = vmul.f32 0.03125, %v3353_v5  ;;  %v7639_v8 = vpop.eup %7638 }
0x17e5   :  { %v2514_v9 = vmul.f32 %v7639_v8, %v2498_v36 }
0x17e6   :  { %v3357_v7 = vadd.f32 1e-05, %v3355_v6 }
0x17e7   :  { %v2522_v15 = vmul.f32 %v6409_v11, %v2514_v9 }
0x17e8   :  { %7644 = vrsqrt.f32 %v3357_v7  ;;  %v7641_v10 = vpop.eup %7640 }
0x17e9   :  { %v3360_v13 = vmul.f32 %v7641_v10, %v3344_v41  ;;  %v2530_v25 = vadd.f32 %v6410_v16, %v2522_v15 }
0x17eb   :  { %v3368_v3 = vmul.f32 %v6431_v17, %v3360_v13 }
0x17ed   :  { %v9027_v4 = vadd.f32 %v6432_v27, %v3368_v3 }
0x17f1   :  { %v7643_v12 = vpop.eup %7642 }
0x17f2   :  { %v2515_v14 = vmul.f32 %v7643_v12, %v2499_v56 }
0x17f4   :  { %v2523_v19 = vmul.f32 %v6409_v11, %v2515_v14 }
0x17f5   :  { %v7645_v21 = vpop.eup %7644 }
0x17f6   :  { %v3361_v24 = vmul.f32 %v7645_v21, %v3345_v63  ;;  %v2531_v26 = vadd.f32 %v6410_v16, %v2523_v19 }
0x17f8   :  { %v9023_v28 = vpack.c.bf16 %v2531_v26, %v2530_v25  ;;  %v3369_v29 = vmul.f32 %v6431_v17, %v3361_v24 }
0x17fa   :  { %7026 = vmatmul.mubr.msk.bf16.vlgmr.msra.gmra.mxu1 %vm495_vm1, %v9023_v28  ;;  %v9029_v30 = vadd.f32 %v6432_v27, %v3369_v29 }
0x17fb   :  { %7039 = vmatprep.mubr.msk.bf16.mxu1 %vm8294_vm0, %v8293_v0 }
0x17fc   :  { %v3378_v32 = vpack.c.bf16 %v9029_v30, %v9027_v4 }
0x17fe   :  { %7018 = vmatmul.mubr.msk.bf16.vlgmr.msra.gmra.mxu0 %vm495_vm1, %v3378_v32 }
0x17ff   :  { %7030 = vmatpush3.bf16.msra.mxu0 %v7494_v31  ;;  %7033 = vmatprep.mubr.msk.bf16.mxu0 %vm8294_vm0, %v8293_v0 }
0x1800   :  { %7031 = vmatprep.subr.bf16.mxu0 %v8293_v0 }
0x1803   :  { %7032 = vmatpush3.bf16.msra.mxu0 %v7495_v33 }
0x1804   :  { %7043 = vmatprep.subr.bf16.mxu0 %v8293_v0 }
0x1806   :  { %7034 = vmatmul.mubr.msk.bf16.vlgmr.msra.gmra.mxu0 %vm495_vm1, %v9023_v28 }
0x1807   :  { %7045 = vmatprep.mubr.msk.bf16.mxu0 %vm8294_vm0, %v8293_v0 }
0x18ba   :  { %v3485_v34 = vpop.f32.mrf.mxu1 }
0x18bc   :  { %v7027_v35 = vpop.f32.mrf.mxu1 }
0x18be   :  { %v3428_v22 = vpop.f32.mrf.mxu0  ;;  %v3488_v36 = vpop.f32.mrf.mxu1 }
0x18bf   :  { %v3492_v37 = vpack.c.bf16 %v3488_v36, %v3485_v34 }
0x18c0   :  { %v7019_v38 = vpop.f32.mrf.mxu0  ;;  %v7028_v40 = vpop.f32.mrf.mxu1 }
0x18c1   :  { %3669 = vrot.lane.b32.xlu1 %v3492_v37, %s8296_s4  ;;  %v3551_v41 = vsel %vm649_vm2, %v3492_v37, 0 }
0x18c2   :  { %v3431_v45 = vpop.f32.mrf.mxu0  ;;  %7038 = vmatpush3.bf16.xpose.msra.mxu1 %v3551_v41 }
0x18c3   :  { %v3435_v46 = vpack.c.bf16 %v3431_v45, %v3428_v22  ;;  %7049 = vmatprep.subr.bf16.mxu1 %v8293_v0 }
0x18c4   :  { %v7020_v47 = vpop.f32.mrf.mxu0 }
0x18c5   :  { %3666 = vrot.lane.b32.xlu0 %v3435_v46, %s8296_s4  ;;  %3795 = vrot.lane.b32.xlu1 %v3492_v37, %s8295_s10 }
0x18c6   :  { %v3539_v23 = vpop.f32.mrf.mxu0 }
0x18c8   :  { %v7035_v48 = vpop.f32.mrf.mxu0 }
0x18c9   :  { %3920 = vrot.lane.b32.xlu0 %v3492_v37, %s8297_s20  ;;  %3793 = vrot.lane.b32.xlu1 %v3435_v46, %s8295_s10 }
0x18ca   :  { %7040 = vmatmul.mubr.msk.bf16.vlgmr.msra.gmra.mxu1 %vm649_vm2, %v3435_v46  ;;  %v3542_v56 = vpop.f32.mrf.mxu0 }
0x18cb   :  { %v9052_v49 = vpack.c.bf16 %v3542_v56, %v3539_v23  ;;  %7051 = vmatprep.mubr.msk.bf16.mxu1 %vm8294_vm0, %v8293_v0 }
0x18cc   :  { %v7036_v50 = vpop.f32.mrf.mxu0 }
0x18cd   :  { %7044 = vmatpush3.bf16.msra.mxu0 %v9052_v49  ;;  %3918 = vrot.lane.b32.xlu1 %v3435_v46, %s8297_s20 }
0x18ce   :  { %7055 = vmatprep.subr.bf16.mxu0 %v8293_v0 }
0x1933   :  { %v3670_v51 = vpop.permute.xlu1 %3669 }
0x1934   :  { %v3675_v63 = vsel %vm649_vm2, %v3670_v51, 0 }
0x1935   :  { %7050 = vmatpush3.bf16.xpose.msra.mxu1 %v3675_v63 }
0x1936   :  { %7061 = vmatprep.subr.bf16.mxu1 %v8293_v0 }
0x1937   :  { %v3796_v53 = vpop.permute.xlu1 %3795  ;;  %v3667_v52 = vpop.permute.xlu0 %3666 }
0x1938   :  { %v3801_v54 = vsel %vm649_vm2, %v3796_v53, 0 }
0x193b   :  { %v3921_v2 = vpop.permute.xlu0 %3920  ;;  %v3794_v18 = vpop.permute.xlu1 %3793 }
0x193c   :  { %7052 = vmatmul.mubr.msk.bf16.vlgmr.msra.gmra.mxu1 %vm649_vm2, %v3667_v52  ;;  %v3926_v20 = vsel %vm649_vm2, %v3921_v2, 0 }
0x193d   :  { %7062 = vmatpush3.bf16.xpose.msra.mxu1 %v3801_v54  ;;  %7063 = vmatprep.mubr.msk.bf16.mxu1 %vm8294_vm0, %v8293_v0 }
0x193e   :  { %7073 = vmatprep.subr.bf16.mxu1 %v8293_v0 }
0x193f   :  { %v3919_v55 = vpop.permute.xlu1 %3918 }
0x1944   :  { %7064 = vmatmul.mubr.msk.bf16.vlgmr.msra.gmra.mxu1 %vm649_vm2, %v3794_v18 }
0x1945   :  { %7074 = vmatpush3.bf16.xpose.msra.mxu1 %v3926_v20  ;;  %7075 = vmatprep.mubr.msk.bf16.mxu1 %vm8294_vm0, %v8293_v0 }
0x1946   :  { %7085 = vmatprep.subr.bf16.mxu1 %v8293_v0 }
0x194c   :  { %7076 = vmatmul.mubr.msk.bf16.vlgmr.msra.gmra.mxu1 %vm649_vm2, %v3919_v55 }
0x194d   :  { %7089 = vmatprep.mubr.msk.bf16.mxu1 %vm8294_vm0, %v8293_v0 }
0x198a   :  { %v3587_v57 = vpop.f32.mrf.mxu1 }
0x198b   :  { %v3594_v58 = vmul.f32 0.35355338, %v3587_v57 }
0x198c   :  { %v7041_v42 = vpop.f32.mrf.mxu1 }
0x198d   :  { %v3596_v59 = vadd.f32 %v3594_v58, %v8628_v39 }
0x198e   :  { %v3590_v60 = vpop.f32.mrf.mxu1 }
0x198f   :  { %v3595_v61 = vmul.f32 0.35355338, %v3590_v60  ;;  %v3598_v43 = vsel %vm701_vm5, %v3596_v59, -inf }
0x1990   :  { %3599 = vmax.xlane.f32.xlu0 %v3598_v43  ;;  %v7042_v62 = vpop.f32.mrf.mxu1 }
0x1991   :  { %v3597_v1 = vadd.f32 %v3595_v61, %v8631_v44 }
0x1993   :  { %v3601_v5 = vsel %vm701_vm5, %v3597_v1, -inf }
0x1994   :  { %3602 = vmax.xlane.f32.xlu1 %v3601_v5 }
0x19fc   :  { %v3711_v6 = vpop.f32.mrf.mxu1 }
0x19fd   :  { %v3718_v7 = vmul.f32 0.35355338, %v3711_v6 }
0x19fe   :  { %v7053_v8 = vpop.f32.mrf.mxu1 }
0x19ff   :  { %v3720_v9 = vadd.f32 %v3718_v7, %v8628_v39 }
0x1a00   :  { %v3714_v10 = vpop.f32.mrf.mxu1 }
0x1a01   :  { %v3719_v11 = vmul.f32 0.35355338, %v3714_v10  ;;  %v3722_v12 = vsel %vm701_vm5, %v3720_v9, -inf }
0x1a02   :  { %3723 = vmax.xlane.f32.xlu0 %v3722_v12  ;;  %v7054_v13 = vpop.f32.mrf.mxu1 }
0x1a03   :  { %v3721_v14 = vadd.f32 %v3719_v11, %v8631_v44 }
0x1a04   :  { %v3837_v15 = vpop.f32.mrf.mxu1 }
0x1a05   :  { %v3844_v16 = vmul.f32 0.35355338, %v3837_v15  ;;  %v3725_v17 = vsel %vm701_vm5, %v3721_v14, -inf }
0x1a06   :  { %3726 = vmax.xlane.f32.xlu0 %v3725_v17  ;;  %v7065_v19 = vpop.f32.mrf.mxu1 }
0x1a07   :  { %v3846_v21 = vadd.f32 %v3844_v16, %v8628_v39 }
0x1a08   :  { %v3840_v24 = vpop.f32.mrf.mxu1 }
0x1a09   :  { %v3845_v25 = vmul.f32 0.35355338, %v3840_v24  ;;  %v3848_v26 = vsel %vm701_vm5, %v3846_v21, -inf }
0x1a0a   :  { %3849 = vmax.xlane.f32.xlu1 %v3848_v26  ;;  %v7066_v3 = vpop.f32.mrf.mxu1 }
0x1a0b   :  { %v3847_v27 = vadd.f32 %v3845_v25, %v8631_v44 }
0x1a0c   :  { %v3962_v29 = vpop.f32.mrf.mxu1 }
0x1a0d   :  { %v3969_v31 = vmul.f32 0.35355338, %v3962_v29  ;;  %v3851_v32 = vsel %vm701_vm5, %v3847_v27, -inf }
0x1a0e   :  { %3852 = vmax.xlane.f32.xlu0 %v3851_v32  ;;  %v7077_v33 = vpop.f32.mrf.mxu1 }
0x1a0f   :  { %v3971_v34 = vadd.f32 %v3969_v31, %v8628_v39 }
0x1a10   :  { %v3965_v35 = vpop.f32.mrf.mxu1 }
0x1a11   :  { %v3970_v22 = vmul.f32 0.35355338, %v3965_v35  ;;  %v3973_v36 = vsel %vm701_vm5, %v3971_v34, -inf }
0x1a12   :  { %3974 = vmax.xlane.f32.xlu1 %v3973_v36  ;;  %v7078_v37 = vpop.f32.mrf.mxu1 }
0x1a13   :  { %v3972_v38 = vadd.f32 %v3970_v22, %v8631_v44 }
0x1a15   :  { %v3976_v40 = vsel %vm701_vm5, %v3972_v38, -inf }
0x1a16   :  { %3977 = vmax.xlane.f32.xlu0 %v3976_v40 }
0x1a19   :  { %v3600_v41 = vpop.xlane.xlu0 %3599 }
0x1a1a   :  { %v3604_v45 = vsub.f32 %v3596_v59, %v3600_v41 }
0x1a1c   :  { %v3606_v46 = vmul.f32 1.442695, %v3604_v45 }
0x1a1d   :  { %v3603_v47 = vpop.xlane.xlu1 %3602 }
0x1a1e   :  { %7646 = vpow2.f32 %v3606_v46  ;;  %v3605_v23 = vsub.f32 %v3597_v1, %v3603_v47 }
0x1a20   :  { %v3608_v48 = vmul.f32 1.442695, %v3605_v23 }
0x1a22   :  { %7648 = vpow2.f32 %v3608_v48 }
0x1a2b   :  { %v7647_v56 = vpop.eup %7646 }
0x1a2c   :  { %v3610_v50 = vsel %vm701_vm5, %v7647_v56, 0.0 }
0x1a2d   :  { %3611 = vadd.xlane.f32.xlu1 %v3610_v50 }
0x1a2f   :  { %v7649_v51 = vpop.eup %7648 }
0x1a30   :  { %v3613_v63 = vsel %vm701_vm5, %v7649_v51, 0.0 }
0x1a31   :  { %3614 = vadd.xlane.f32.xlu0 %v3613_v63 }
0x1a3e   :  { %3746 = vrot.lane.b32.xlu1 %v9052_v49, %s8296_s4 }
0x1a8b   :  { %v3724_v53 = vpop.xlane.xlu0 %3723 }
0x1a8c   :  { %v3728_v52 = vsub.f32 %v3720_v9, %v3724_v53 }
0x1a8e   :  { %v3730_v54 = vmul.f32 1.442695, %v3728_v52 }
0x1a8f   :  { %v3727_v2 = vpop.xlane.xlu0 %3726 }
0x1a90   :  { %7650 = vpow2.f32 %v3730_v54  ;;  %v3729_v18 = vsub.f32 %v3721_v14, %v3727_v2 }
0x1a92   :  { %v3732_v20 = vmul.f32 1.442695, %v3729_v18 }
0x1a93   :  { %v3850_v55 = vpop.xlane.xlu1 %3849 }
0x1a94   :  { %7652 = vpow2.f32 %v3732_v20  ;;  %v3854_v57 = vsub.f32 %v3846_v21, %v3850_v55 }
0x1a96   :  { %v3856_v58 = vmul.f32 1.442695, %v3854_v57 }
0x1a97   :  { %v3853_v42 = vpop.xlane.xlu0 %3852 }
0x1a98   :  { %7654 = vpow2.f32 %v3856_v58  ;;  %v3855_v59 = vsub.f32 %v3847_v27, %v3853_v42 }
0x1a9a   :  { %v3858_v60 = vmul.f32 1.442695, %v3855_v59  ;;  %v7496_v59 = vld [vmem:[#allocation17 + $0x8] sm:$0xff]  }
0x1a9b   :  { %v3975_v61 = vpop.xlane.xlu1 %3974  ;;  %7086 = vmatpush3.bf16.msra.mxu1 %v7496_v59 }
0x1a9c   :  { %7656 = vpow2.f32 %v3858_v60  ;;  %v3979_v43 = vsub.f32 %v3971_v34, %v3975_v61  ;;  %7087 = vmatprep.subr.bf16.mxu1 %v8293_v0 }
0x1a9d   :  { %v7651_v62 = vpop.eup %7650 }
0x1a9e   :  { %v3981_v1 = vmul.f32 1.442695, %v3979_v43  ;;  %v3734_v5 = vsel %vm701_vm5, %v7651_v62, 0.0 }
0x1a9f   :  { %3735 = vadd.xlane.f32.xlu1 %v3734_v5  ;;  %v3978_v6 = vpop.xlane.xlu0 %3977  ;;  %v7497_v5 = vld [vmem:[#allocation17] sm:$0xff]  }
0x1aa0   :  { %7658 = vpow2.f32 %v3981_v1  ;;  %v3980_v7 = vsub.f32 %v3972_v38, %v3978_v6  ;;  %7088 = vmatpush3.bf16.msra.mxu1 %v7497_v5 }
0x1aa1   :  { %v7653_v8 = vpop.eup %7652  ;;  %7101 = vmatprep.subr.bf16.mxu1 %v8293_v0 }
0x1aa2   :  { %v3983_v9 = vmul.f32 1.442695, %v3980_v7  ;;  %v3737_v10 = vsel %vm701_vm5, %v7653_v8, 0.0 }
0x1aa3   :  { %3738 = vadd.xlane.f32.xlu0 %v3737_v10 }
0x1aa4   :  { %7660 = vpow2.f32 %v3983_v9 }
0x1aa5   :  { %v7655_v11 = vpop.eup %7654 }
0x1aa6   :  { %v3860_v12 = vsel %vm701_vm5, %v7655_v11, 0.0 }
0x1aa7   :  { %3861 = vadd.xlane.f32.xlu1 %v3860_v12 }
0x1aa9   :  { %v7657_v13 = vpop.eup %7656 }
0x1aaa   :  { %v3863_v14 = vsel %vm701_vm5, %v7657_v13, 0.0 }
0x1aab   :  { %3864 = vadd.xlane.f32.xlu0 %v3863_v14 }
0x1aad   :  { %v7659_v15 = vpop.eup %7658 }
0x1aae   :  { %v3985_v16 = vsel %vm701_vm5, %v7659_v15, 0.0 }
0x1aaf   :  { %3986 = vadd.xlane.f32.xlu1 %v3985_v16 }
0x1ab1   :  { %v7661_v17 = vpop.eup %7660 }
0x1ab2   :  { %v3988_v19 = vsel %vm701_vm5, %v7661_v17, 0.0 }
0x1ab3   :  { %3989 = vadd.xlane.f32.xlu0 %v3988_v19 }
0x1ab6   :  { %v3612_v21 = vpop.xlane.xlu1 %3611 }
0x1ab7   :  { %7662 = vrcp.f32 %v3612_v21 }
0x1aba   :  { %v3615_v24 = vpop.xlane.xlu0 %3614  ;;  %v3747_v31 = vpop.permute.xlu1 %3746 }
0x1abb   :  { %7664 = vrcp.f32 %v3615_v24 }
0x1ac0   :  { %3996 = vrot.lane.b32.xlu1 %v9052_v49, %s8297_s20 }
0x1ac4   :  { %v7663_v25 = vpop.eup %7662 }
0x1ac5   :  { %v3618_v3 = vmul.f32 %v7663_v25, %v7647_v56 }
0x1ac8   :  { %v7665_v26 = vpop.eup %7664 }
0x1ac9   :  { %3871 = vrot.lane.b32.xlu0 %v9052_v49, %s8295_s10  ;;  %v3619_v27 = vmul.f32 %v7665_v26, %v7649_v51 }
0x1acb   :  { %v3620_v29 = vpack.c.bf16 %v3619_v27, %v3618_v3 }
0x1acd   :  { %7046 = vmatmul.mubr.msk.bf16.vlgmr.msra.gmra.mxu0 %vm701_vm5, %v3620_v29 }
0x1ace   :  { %7056 = vmatpush3.bf16.msra.mxu0 %v3747_v31  ;;  %7057 = vmatprep.mubr.msk.bf16.mxu0 %vm8294_vm0, %v8293_v0 }
0x1acf   :  { %7067 = vmatprep.subr.bf16.mxu0 %v8293_v0 }
0x1b28   :  { %v3736_v32 = vpop.xlane.xlu1 %3735 }
0x1b29   :  { %7666 = vrcp.f32 %v3736_v32 }
0x1b2c   :  { %v3739_v33 = vpop.xlane.xlu0 %3738 }
0x1b2d   :  { %7668 = vrcp.f32 %v3739_v33 }
0x1b30   :  { %v3862_v34 = vpop.xlane.xlu1 %3861 }
0x1b31   :  { %7670 = vrcp.f32 %v3862_v34 }
0x1b34   :  { %v3865_v35 = vpop.xlane.xlu0 %3864 }
0x1b35   :  { %7672 = vrcp.f32 %v3865_v35 }
0x1b36   :  { %v7667_v49 = vpop.eup %7666 }
0x1b37   :  { %v3742_v37 = vmul.f32 %v7667_v49, %v7651_v62 }
0x1b38   :  { %v3987_v22 = vpop.xlane.xlu1 %3986 }
0x1b39   :  { %7674 = vrcp.f32 %v3987_v22 }
0x1b3a   :  { %v7669_v36 = vpop.eup %7668 }
0x1b3b   :  { %v3743_v38 = vmul.f32 %v7669_v36, %v7653_v8 }
0x1b3c   :  { %v3990_v40 = vpop.xlane.xlu0 %3989  ;;  %v3997_v50 = vpop.permute.xlu1 %3996 }
0x1b3d   :  { %7676 = vrcp.f32 %v3990_v40  ;;  %v3744_v41 = vpack.c.bf16 %v3743_v38, %v3742_v37 }
0x1b3e   :  { %v7671_v45 = vpop.eup %7670 }
0x1b3f   :  { %7058 = vmatmul.mubr.msk.bf16.vlgmr.msra.gmra.mxu0 %vm701_vm5, %v3744_v41  ;;  %v3868_v23 = vmul.f32 %v7671_v45, %v7655_v11 }
0x1b40   :  { %v3872_v46 = vpop.permute.xlu0 %3871  ;;  %7069 = vmatprep.mubr.msk.bf16.mxu0 %vm8294_vm0, %v8293_v0 }
0x1b41   :  { %7068 = vmatpush3.bf16.msra.mxu0 %v3872_v46 }
0x1b42   :  { %v7673_v47 = vpop.eup %7672  ;;  %7079 = vmatprep.subr.bf16.mxu0 %v8293_v0 }
0x1b43   :  { %v3869_v48 = vmul.f32 %v7673_v47, %v7657_v13 }
0x1b45   :  { %v3870_v56 = vpack.c.bf16 %v3869_v48, %v3868_v23 }
0x1b46   :  { %v7675_v51 = vpop.eup %7674 }
0x1b47   :  { %7070 = vmatmul.mubr.msk.bf16.vlgmr.msra.gmra.mxu0 %vm701_vm5, %v3870_v56  ;;  %v3993_v53 = vmul.f32 %v7675_v51, %v7659_v15 }
0x1b48   :  { %7080 = vmatpush3.bf16.msra.mxu0 %v3997_v50  ;;  %7081 = vmatprep.mubr.msk.bf16.mxu0 %vm8294_vm0, %v8293_v0 }
0x1b49   :  { %7093 = vmatprep.subr.bf16.mxu0 %v8293_v0 }
0x1b4a   :  { %v7677_v63 = vpop.eup %7676 }
0x1b4b   :  { %v3994_v52 = vmul.f32 %v7677_v63, %v7661_v17  ;;  %v7499_v63 = vld [vmem:[#allocation19] sm:$0xff]  }
0x1b4d   :  { %v3995_v54 = vpack.c.bf16 %v3994_v52, %v3993_v53  ;;  %v7500_v53 = vld [vmem:[%s9474_s13 + $0x18] sm:$0xff]  }
0x1b4f   :  { %7082 = vmatmul.mubr.msk.bf16.vlgmr.msra.gmra.mxu0 %vm701_vm5, %v3995_v54 }
0x1b50   :  { %7097 = vmatprep.mubr.msk.bf16.mxu0 %vm8294_vm0, %v8293_v0 }
0x1b8d   :  { %v3658_v2 = vpop.f32.mrf.mxu0 }
0x1b8f   :  { %v7047_v18 = vpop.f32.mrf.mxu0 }
0x1b91   :  { %v3661_v20 = vpop.f32.mrf.mxu0 }
0x1b93   :  { %v7048_v55 = vpop.f32.mrf.mxu0 }
0x1bff   :  { %v3786_v57 = vpop.f32.mrf.mxu0 }
0x1c01   :  { %v7059_v58 = vpop.f32.mrf.mxu0 }
0x1c03   :  { %v3789_v42 = vpop.f32.mrf.mxu0 }
0x1c04   :  { %v7409_v60 = vpack.i.bf16 %v3789_v42, %v3786_v57  ;;  %v6453_v42 = vld [vmem:[#allocation26] ss:$0 sm:$0xff] }
0x1c05   :  { %v7060_v61 = vpop.f32.mrf.mxu0 }
0x1c06   :  { %7410 = vrot.lane.b32.xlu1 %v7409_v60, %s8268_s7 }
0x1c07   :  { %v3911_v43 = vpop.f32.mrf.mxu0 }
0x1c09   :  { %v7071_v62 = vpop.f32.mrf.mxu0 }
0x1c0b   :  { %v3914_v1 = vpop.f32.mrf.mxu0 }
0x1c0c   :  { %v7414_v6 = vpack.i.bf16 %v3914_v1, %v3911_v43  ;;  %v6454_v43 = vld [vmem:[#allocation28] ss:$0 sm:$0xff] }
0x1c0d   :  { %v7072_v7 = vpop.f32.mrf.mxu0 }
0x1c0e   :  { %7415 = vrot.lane.b32.xlu0 %v7414_v6, %s8276_s30  ;;  %v7501_v7 = vld [vmem:[%s9474_s13 + $0x10] sm:$0xff]  }
0x1c0f   :  { %v4036_v8 = vpop.f32.mrf.mxu0 }
0x1c11   :  { %v7083_v9 = vpop.f32.mrf.mxu0 }
0x1c12   :  { %v7503_v9 = vld [vmem:[%s9474_s13] sm:$0xff]  }
0x1c13   :  { %v4039_v10 = vpop.f32.mrf.mxu0 }
0x1c14   :  { %v7419_v11 = vpack.i.bf16 %v4039_v10, %v4036_v8  ;;  %v7502_v8 = vld [vmem:[%s9474_s13 + $0x8] sm:$0xff]   ;;  %v6455_v10 = vld [vmem:[#allocation20] ss:$0 sm:$0xff] }
0x1c15   :  { %v7084_v12 = vpop.f32.mrf.mxu0 }
0x1c16   :  { %7420 = vrot.lane.b32.xlu1 %v7419_v11, %s8299_s6 }
0x1c78   :  { %v7411_v13 = vpop.permute.xlu1 %7410 }
0x1c79   :  { %v7413_v15 = vunpack.i.h.bf16 %v7411_v13  ;;  %v7412_v16 = vunpack.i.l.bf16 %v7411_v13 }
0x1c7b   :  { %v4068_v24 = vsel %vm649_vm2, %v3661_v20, %v7413_v15  ;;  %v4067_v25 = vsel %vm649_vm2, %v3658_v2, %v7412_v16 }
0x1c80   :  { %v7416_v14 = vpop.permute.xlu0 %7415 }
0x1c81   :  { %v7418_v17 = vunpack.i.h.bf16 %v7416_v14  ;;  %v7417_v19 = vunpack.i.l.bf16 %v7416_v14 }
0x1c83   :  { %v4070_v27 = vsel %vm701_vm5, %v4068_v24, %v7418_v17  ;;  %v4069_v29 = vsel %vm701_vm5, %v4067_v25, %v7417_v19  ;;  %v6459_v24 = vld [vmem:[#allocation22] ss:$0 sm:$0xff] }
0x1c88   :  { %v7421_v21 = vpop.permute.xlu1 %7420 }
0x1c89   :  { %v7423_v26 = vunpack.i.h.bf16 %v7421_v21  ;;  %v7422_v3 = vunpack.i.l.bf16 %v7421_v21 }
0x1c8b   :  { %v4072_v31 = vsel %vm1175_vm6, %v4070_v27, %v7423_v26  ;;  %v4071_v32 = vsel %vm1175_vm6, %v4069_v29, %v7422_v3 }
0x1c8c   :  { %v4073_v33 = vpack.c.bf16 %v4072_v31, %v4071_v32 }
0x1c8e   :  { %7090 = vmatmul.mubr.msk.bf16.vlgmr.msra.gmra.mxu1 %vm495_vm1, %v4073_v33 }
0x1c8f   :  { %7109 = vmatprep.mubr.msk.bf16.mxu1 %vm8294_vm0, %v8293_v0  ;;  %7102 = vmatpush3.bf16.msra.mxu1 %v7500_v53 }
0x1c90   :  { %7103 = vmatprep.subr.bf16.mxu1 %v8293_v0 }
0x1c93   :  { %7104 = vmatpush3.bf16.msra.mxu1 %v7501_v7 }
0x1c94   :  { %7105 = vmatprep.subr.bf16.mxu1 %v8293_v0 }
0x1c97   :  { %7106 = vmatpush3.bf16.msra.mxu1 %v7502_v8 }
0x1c98   :  { %7107 = vmatprep.subr.bf16.mxu1 %v8293_v0 }
0x1c9b   :  { %7108 = vmatpush3.bf16.msra.mxu1 %v7503_v9 }
0x1c9c   :  { %7129 = vmatprep.subr.bf16.mxu1 %v8293_v0 }
0x1d4e   :  { %v4123_v34 = vpop.f32.mrf.mxu1 }
0x1d4f   :  { %v4130_v35 = vadd.f32 %v4123_v34, %v9027_v4 }
0x1d50   :  { %v7091_v49 = vpop.f32.mrf.mxu1 }
0x1d51   :  { %v4132_v22 = vsel %vm495_vm1, %v4130_v35, 0.0 }
0x1d52   :  { %4133 = vadd.xlane.f32.xlu0 %v4132_v22  ;;  %v4126_v36 = vpop.f32.mrf.mxu1 }
0x1d53   :  { %v4131_v37 = vadd.f32 %v4126_v36, %v9029_v30  ;;  %v7498_v30 = vld [vmem:[#allocation19 + $0x8] sm:$0xff]  }
0x1d54   :  { %v7092_v38 = vpop.f32.mrf.mxu1  ;;  %7094 = vmatpush3.bf16.msra.mxu0 %v7498_v30 }
0x1d55   :  { %v4135_v40 = vsel %vm495_vm1, %v4131_v37, 0.0  ;;  %7095 = vmatprep.subr.bf16.mxu0 %v8293_v0 }
0x1d56   :  { %4136 = vadd.xlane.f32.xlu1 %v4135_v40 }
0x1d58   :  { %7096 = vmatpush3.bf16.msra.mxu0 %v7499_v63 }
0x1d59   :  { %7113 = vmatprep.subr.bf16.mxu0 %v8293_v0 }
0x1ddb   :  { %v4134_v41 = vpop.xlane.xlu0 %4133 }
0x1ddc   :  { %v4138_v45 = vmul.f32 0.03125, %v4134_v41 }
0x1dde   :  { %v4140_v46 = vsub.f32 %v4130_v35, %v4138_v45 }
0x1ddf   :  { %v4137_v47 = vpop.xlane.xlu1 %4136 }
0x1de0   :  { %v4139_v23 = vmul.f32 0.03125, %v4137_v47  ;;  %v4142_v48 = vmul.f32 %v4140_v46, %v4140_v46 }
0x1de2   :  { %v4141_v56 = vsub.f32 %v4131_v37, %v4139_v23  ;;  %v4144_v4 = vsel %vm495_vm1, %v4142_v48, 0.0  ;;  %v7504_v23 = vld [vmem:[#allocation7 + $0x18] sm:$0xff]  }
0x1de3   :  { %4145 = vadd.xlane.f32.xlu0 %v4144_v4  ;;  %v7505_v48 = vld [vmem:[#allocation10 + $0x18] sm:$0xff]   ;;  %v7507_v4 = vld [vmem:[#allocation10 + $0x10] sm:$0xff]  }
0x1de4   :  { %v4143_v50 = vmul.f32 %v4141_v56, %v4141_v56 }
0x1de6   :  { %v4147_v51 = vsel %vm495_vm1, %v4143_v50, 0.0 }
0x1de7   :  { %4148 = vadd.xlane.f32.xlu0 %v4147_v51 }
0x1e6c   :  { %v4146_v52 = vpop.xlane.xlu0 %4145 }
0x1e6d   :  { %v4150_v54 = vmul.f32 0.03125, %v4146_v52 }
0x1e6f   :  { %v4152_v2 = vadd.f32 1e-05, %v4150_v54 }
0x1e70   :  { %v4149_v18 = vpop.xlane.xlu0 %4148 }
0x1e71   :  { %7678 = vrsqrt.f32 %v4152_v2  ;;  %v4151_v20 = vmul.f32 0.03125, %v4149_v18  ;;  %v6465_v18 = vld [vmem:[#allocation29] ss:$0 sm:$0xff] }
0x1e73   :  { %v4153_v55 = vadd.f32 1e-05, %v4151_v20 }
0x1e75   :  { %7680 = vrsqrt.f32 %v4153_v55 }
0x1e7e   :  { %v7679_v57 = vpop.eup %7678 }
0x1e7f   :  { %v4156_v58 = vmul.f32 %v7679_v57, %v4140_v46 }
0x1e81   :  { %v4164_v61 = vmul.f32 %v6453_v42, %v4156_v58  ;;  %v6466_v58 = vld [vmem:[#allocation31] ss:$0 sm:$0xff] }
0x1e82   :  { %v7681_v59 = vpop.eup %7680 }
0x1e83   :  { %v4157_v60 = vmul.f32 %v7681_v59, %v4141_v56  ;;  %v4172_v1 = vadd.f32 %v6454_v43, %v4164_v61  ;;  %v7506_v56 = vld [vmem:[#allocation7 + $0x10] sm:$0xff]   ;;  %v7508_v61 = vld [vmem:[#allocation8 + $0x18] sm:$0xff]  }
0x1e85   :  { %v4165_v62 = vmul.f32 %v6453_v42, %v4157_v60 }
0x1e87   :  { %v4173_v5 = vadd.f32 %v6454_v43, %v4165_v62  ;;  %v7509_v62 = vld [vmem:[#allocation8 + $0x10] sm:$0xff]  }
0x1e89   :  { %v4174_v6 = vpack.c.bf16 %v4173_v5, %v4172_v1 }
0x1e8b   :  { %7098 = vmatmul.mubr.msk.bf16.vlgmr.msra.gmra.mxu0 %vm495_vm1, %v4174_v6 }
0x1e8c   :  { %7117 = vmatprep.mubr.msk.bf16.mxu0 %vm8294_vm0, %v8293_v0  ;;  %7114 = vmatpush3.bf16.msra.mxu0 %v7504_v23 }
0x1e8d   :  { %7115 = vmatprep.subr.bf16.mxu0 %v8293_v0 }
0x1e90   :  { %7116 = vmatpush3.bf16.msra.mxu0 %v7506_v56 }
0x1e91   :  { %7121 = vmatprep.subr.bf16.mxu0 %v8293_v0 }
0x1f4b   :  { %v4230_v11 = vpop.f32.mrf.mxu0 }
0x1f4c   :  { %v4231_v13 = vadd.f32 %v6455_v10, %v4230_v11 }
0x1f4d   :  { %v7099_v12 = vpop.f32.mrf.mxu0 }
0x1f4e   :  { %v4237_v17 = vmax.f32 %v4231_v13, 0.0 }
0x1f4f   :  { %v4233_v14 = vpop.f32.mrf.mxu0 }
0x1f50   :  { %v4234_v15 = vadd.f32 %v6455_v10, %v4233_v14 }
0x1f51   :  { %v7100_v16 = vpop.f32.mrf.mxu0 }
0x1f52   :  { %v4238_v19 = vmax.f32 %v4234_v15, 0.0 }
0x1f54   :  { %v4239_v21 = vpack.c.bf16 %v4238_v19, %v4237_v17 }
0x1f56   :  { %7110 = vmatmul.mubr.msk.bf16.vlgmr.msra.gmra.mxu1 %vm1376_vm7, %v4239_v21 }
0x1f57   :  { %7133 = vmatprep.mubr.msk.bf16.mxu1 %vm8294_vm0, %v8293_v0  ;;  %7130 = vmatpush3.bf16.msra.mxu1 %v7505_v48 }
0x1f58   :  { %7131 = vmatprep.subr.bf16.mxu1 %v8293_v0 }
0x1f5b   :  { %7132 = vmatpush3.bf16.msra.mxu1 %v7507_v4 }
0x1f5c   :  { %7143 = vmatprep.subr.bf16.mxu1 %v8293_v0 }
0x2016   :  { %v4307_v25 = vpop.f32.mrf.mxu1 }
0x2017   :  { %v4308_v26 = vadd.f32 %v6459_v24, %v4307_v25 }
0x2018   :  { %v7111_v3 = vpop.f32.mrf.mxu1 }
0x2019   :  { %v4314_v27 = vadd.f32 %v4308_v26, %v4172_v1 }
0x201a   :  { %v4310_v29 = vpop.f32.mrf.mxu1 }
0x201b   :  { %v4311_v31 = vadd.f32 %v6459_v24, %v4310_v29  ;;  %v4316_v32 = vsel %vm495_vm1, %v4314_v27, 0.0 }
0x201c   :  { %4317 = vadd.xlane.f32.xlu1 %v4316_v32  ;;  %v7112_v33 = vpop.f32.mrf.mxu1 }
0x201d   :  { %v4315_v34 = vadd.f32 %v4311_v31, %v4173_v5 }
0x201f   :  { %v4319_v35 = vsel %vm495_vm1, %v4315_v34, 0.0 }
0x2020   :  { %4320 = vadd.xlane.f32.xlu0 %v4319_v35 }
0x20a5   :  { %v4318_v49 = vpop.xlane.xlu1 %4317 }
0x20a6   :  { %v4322_v22 = vmul.f32 0.03125, %v4318_v49 }
0x20a8   :  { %v4324_v36 = vsub.f32 %v4314_v27, %v4322_v22 }
0x20a9   :  { %v4321_v37 = vpop.xlane.xlu0 %4320 }
0x20aa   :  { %v4323_v38 = vmul.f32 0.03125, %v4321_v37  ;;  %v4326_v40 = vmul.f32 %v4324_v36, %v4324_v36 }
0x20ac   :  { %v4325_v41 = vsub.f32 %v4315_v34, %v4323_v38  ;;  %v4328_v45 = vsel %vm495_vm1, %v4326_v40, 0.0 }
0x20ad   :  { %4329 = vadd.xlane.f32.xlu1 %v4328_v45 }
0x20ae   :  { %v4327_v46 = vmul.f32 %v4325_v41, %v4325_v41 }
0x20b0   :  { %v4331_v47 = vsel %vm495_vm1, %v4327_v46, 0.0 }
0x20b1   :  { %4332 = vadd.xlane.f32.xlu0 %v4331_v47 }
0x2136   :  { %v4330_v50 = vpop.xlane.xlu1 %4329 }
0x2137   :  { %v4334_v51 = vmul.f32 0.03125, %v4330_v50 }
0x2139   :  { %v4336_v30 = vadd.f32 1e-05, %v4334_v51 }
0x213a   :  { %v4333_v63 = vpop.xlane.xlu0 %4332 }
0x213b   :  { %7682 = vrsqrt.f32 %v4336_v30  ;;  %v4335_v53 = vmul.f32 0.03125, %v4333_v63 }
0x213d   :  { %v4337_v52 = vadd.f32 1e-05, %v4335_v53 }
0x213f   :  { %7684 = vrsqrt.f32 %v4337_v52 }
0x2148   :  { %v7683_v54 = vpop.eup %7682 }
0x2149   :  { %v4340_v2 = vmul.f32 %v7683_v54, %v4324_v36 }
0x214b   :  { %v4348_v57 = vmul.f32 %v6465_v18, %v4340_v2 }
0x214c   :  { %v7685_v20 = vpop.eup %7684 }
0x214d   :  { %v4341_v55 = vmul.f32 %v7685_v20, %v4325_v41  ;;  %v9163_v59 = vadd.f32 %v6466_v58, %v4348_v57 }
0x214f   :  { %v4349_v42 = vmul.f32 %v6465_v18, %v4341_v55 }
0x2151   :  { %v9165_v60 = vadd.f32 %v6466_v58, %v4349_v42 }
0x2153   :  { %v4428_v43 = vpack.c.bf16 %v9165_v60, %v9163_v59 }
0x2155   :  { %7118 = vmatmul.mubr.msk.bf16.vlgmr.msra.gmra.mxu0 %vm495_vm1, %v4428_v43  ;;  %7134 = vmatmul.mubr.msk.bf16.vlgmr.msra.gmra.mxu1 %vm495_vm1, %v4428_v43 }
0x2156   :  { %7122 = vmatpush3.bf16.msra.mxu0 %v7508_v61  ;;  %7125 = vmatprep.mubr.msk.bf16.mxu0 %vm8294_vm0, %v8293_v0 }
0x2157   :  { %7123 = vmatprep.subr.bf16.mxu0 %v8293_v0  ;;  %7145 = vmatprep.mubr.msk.bf16.mxu1 %vm8294_vm0, %v8293_v0 }
0x215a   :  { %7124 = vmatpush3.bf16.msra.mxu0 %v7509_v62 }
0x215b   :  { %7137 = vmatprep.subr.bf16.mxu0 %v8293_v0 }
0x215d   :  { %7126 = vmatmul.mubr.msk.bf16.vlgmr.msra.gmra.mxu0 %vm495_vm1, %v4428_v43 }
0x215e   :  { %7139 = vmatprep.mubr.msk.bf16.mxu0 %vm8294_vm0, %v8293_v0 }
0x2215   :  { %v4478_v1 = vpop.f32.mrf.mxu0  ;;  %v4586_v5 = vpop.f32.mrf.mxu1 }
0x2217   :  { %v7119_v6 = vpop.f32.mrf.mxu0  ;;  %v7135_v7 = vpop.f32.mrf.mxu1 }
0x2219   :  { %v4481_v8 = vpop.f32.mrf.mxu0  ;;  %v4589_v9 = vpop.f32.mrf.mxu1 }
0x221a   :  { %v4485_v10 = vpack.c.bf16 %v4481_v8, %v4478_v1  ;;  %v9180_v11 = vpack.c.bf16 %v4589_v9, %v4586_v5 }
0x221b   :  { %v7120_v12 = vpop.f32.mrf.mxu0  ;;  %v7136_v13 = vpop.f32.mrf.mxu1 }
0x221c   :  { %4713 = vrot.lane.b32.xlu0 %v4485_v10, %s8296_s4  ;;  %7144 = vmatpush3.bf16.msra.mxu1 %v9180_v11 }
0x221d   :  { %v4532_v14 = vpop.f32.mrf.mxu0  ;;  %7155 = vmatprep.subr.bf16.mxu1 %v8293_v0 }
0x221f   :  { %v7127_v15 = vpop.f32.mrf.mxu0 }
0x2221   :  { %v4535_v16 = vpop.f32.mrf.mxu0 }
0x2222   :  { %v4539_v17 = vpack.c.bf16 %v4535_v16, %v4532_v14 }
0x2223   :  { %v7128_v19 = vpop.f32.mrf.mxu0 }
0x2224   :  { %4967 = vrot.lane.b32.xlu0 %v4539_v17, %s8297_s20  ;;  %4716 = vrot.lane.b32.xlu1 %v4539_v17, %s8296_s4  ;;  %v4598_v21 = vsel %vm649_vm2, %v4539_v17, 0 }
0x2225   :  { %7138 = vmatpush3.bf16.xpose.msra.mxu0 %v4598_v21 }
0x2226   :  { %7149 = vmatprep.subr.bf16.mxu0 %v8293_v0 }
0x2228   :  { %4842 = vrot.lane.b32.xlu1 %v4539_v17, %s8295_s10 }
0x222c   :  { %4840 = vrot.lane.b32.xlu1 %v4485_v10, %s8295_s10  ;;  %7140 = vmatmul.mubr.msk.bf16.vlgmr.msra.gmra.mxu0 %vm649_vm2, %v4485_v10 }
0x222d   :  { %7151 = vmatprep.mubr.msk.bf16.mxu0 %vm8294_vm0, %v8293_v0 }
0x2230   :  { %4965 = vrot.lane.b32.xlu1 %v4485_v10, %s8297_s20 }
0x228e   :  { %v4714_v3 = vpop.permute.xlu0 %4713 }
0x2296   :  { %v4717_v24 = vpop.permute.xlu1 %4716  ;;  %v4968_v29 = vpop.permute.xlu0 %4967 }
0x2297   :  { %v4722_v25 = vsel %vm649_vm2, %v4717_v24, 0  ;;  %v4973_v32 = vsel %vm649_vm2, %v4968_v29, 0 }
0x2298   :  { %7150 = vmatpush3.bf16.xpose.msra.mxu0 %v4722_v25 }
0x2299   :  { %7161 = vmatprep.subr.bf16.mxu0 %v8293_v0 }
0x229a   :  { %v4843_v26 = vpop.permute.xlu1 %4842 }
0x229b   :  { %v4848_v27 = vsel %vm649_vm2, %v4843_v26, 0 }
0x229e   :  { %v4841_v31 = vpop.permute.xlu1 %4840 }
0x229f   :  { %7152 = vmatmul.mubr.msk.bf16.vlgmr.msra.gmra.mxu0 %vm649_vm2, %v4714_v3 }
0x22a0   :  { %7162 = vmatpush3.bf16.xpose.msra.mxu0 %v4848_v27  ;;  %7163 = vmatprep.mubr.msk.bf16.mxu0 %vm8294_vm0, %v8293_v0 }
0x22a1   :  { %7173 = vmatprep.subr.bf16.mxu0 %v8293_v0 }
0x22a2   :  { %v4966_v33 = vpop.permute.xlu1 %4965 }
0x22a7   :  { %7164 = vmatmul.mubr.msk.bf16.vlgmr.msra.gmra.mxu0 %vm649_vm2, %v4841_v31 }
0x22a8   :  { %7174 = vmatpush3.bf16.xpose.msra.mxu0 %v4973_v32  ;;  %7175 = vmatprep.mubr.msk.bf16.mxu0 %vm8294_vm0, %v8293_v0 }
0x22a9   :  { %7185 = vmatprep.subr.bf16.mxu0 %v8293_v0 }
0x22af   :  { %7176 = vmatmul.mubr.msk.bf16.vlgmr.msra.gmra.mxu0 %vm649_vm2, %v4966_v33 }
0x22b0   :  { %7189 = vmatprep.mubr.msk.bf16.mxu0 %vm8294_vm0, %v8293_v0 }
0x22ec   :  { %v4634_v34 = vpop.f32.mrf.mxu0 }
0x22ed   :  { %v4641_v35 = vmul.f32 0.35355338, %v4634_v34 }
0x22ee   :  { %v7141_v49 = vpop.f32.mrf.mxu0 }
0x22ef   :  { %v4643_v22 = vadd.f32 %v4641_v35, %v8628_v39 }
0x22f0   :  { %v4637_v36 = vpop.f32.mrf.mxu0 }
0x22f1   :  { %v4642_v37 = vmul.f32 0.35355338, %v4637_v36  ;;  %v4645_v38 = vsel %vm701_vm5, %v4643_v22, -inf }
0x22f2   :  { %4646 = vmax.xlane.f32.xlu0 %v4645_v38  ;;  %v7142_v40 = vpop.f32.mrf.mxu0 }
0x22f3   :  { %v4644_v41 = vadd.f32 %v4642_v37, %v8631_v44 }
0x22f5   :  { %v4648_v45 = vsel %vm701_vm5, %v4644_v41, -inf }
0x22f6   :  { %4649 = vmax.xlane.f32.xlu1 %v4648_v45 }
0x235f   :  { %v4758_v46 = vpop.f32.mrf.mxu0 }
0x2360   :  { %v4765_v47 = vmul.f32 0.35355338, %v4758_v46 }
0x2361   :  { %v7153_v23 = vpop.f32.mrf.mxu0 }
0x2362   :  { %v4767_v48 = vadd.f32 %v4765_v47, %v8628_v39 }
0x2363   :  { %v4761_v56 = vpop.f32.mrf.mxu0 }
0x2364   :  { %v4766_v4 = vmul.f32 0.35355338, %v4761_v56  ;;  %v4769_v50 = vsel %vm701_vm5, %v4767_v48, -inf }
0x2365   :  { %4770 = vmax.xlane.f32.xlu0 %v4769_v50  ;;  %v7154_v51 = vpop.f32.mrf.mxu0 }
0x2366   :  { %v4768_v30 = vadd.f32 %v4766_v4, %v8631_v44 }
0x2367   :  { %v4884_v63 = vpop.f32.mrf.mxu0 }
0x2368   :  { %v4891_v53 = vmul.f32 0.35355338, %v4884_v63  ;;  %v4772_v52 = vsel %vm701_vm5, %v4768_v30, -inf }
0x2369   :  { %4773 = vmax.xlane.f32.xlu0 %v4772_v52  ;;  %v7165_v54 = vpop.f32.mrf.mxu0 }
0x236a   :  { %v4893_v2 = vadd.f32 %v4891_v53, %v8628_v39 }
0x236b   :  { %v4887_v18 = vpop.f32.mrf.mxu0 }
0x236c   :  { %v4892_v20 = vmul.f32 0.35355338, %v4887_v18  ;;  %v4895_v55 = vsel %vm701_vm5, %v4893_v2, -inf }
0x236d   :  { %4896 = vmax.xlane.f32.xlu1 %v4895_v55  ;;  %v7166_v57 = vpop.f32.mrf.mxu0 }
0x236e   :  { %v4894_v58 = vadd.f32 %v4892_v20, %v8631_v44 }
0x236f   :  { %v5009_v42 = vpop.f32.mrf.mxu0 }
0x2370   :  { %v5016_v61 = vmul.f32 0.35355338, %v5009_v42  ;;  %v4898_v43 = vsel %vm701_vm5, %v4894_v58, -inf }
0x2371   :  { %4899 = vmax.xlane.f32.xlu0 %v4898_v43  ;;  %v7177_v62 = vpop.f32.mrf.mxu0 }
0x2372   :  { %v5018_v1 = vadd.f32 %v5016_v61, %v8628_v39 }
0x2373   :  { %v5012_v5 = vpop.f32.mrf.mxu0 }
0x2374   :  { %v5017_v6 = vmul.f32 0.35355338, %v5012_v5  ;;  %v5020_v7 = vsel %vm701_vm5, %v5018_v1, -inf }
0x2375   :  { %5021 = vmax.xlane.f32.xlu1 %v5020_v7  ;;  %v7178_v8 = vpop.f32.mrf.mxu0 }
0x2376   :  { %v5019_v9 = vadd.f32 %v5017_v6, %v8631_v44 }
0x2378   :  { %v5023_v10 = vsel %vm701_vm5, %v5019_v9, -inf }
0x2379   :  { %5024 = vmax.xlane.f32.xlu0 %v5023_v10 }
0x237b   :  { %v4647_v12 = vpop.xlane.xlu0 %4646 }
0x237c   :  { %v4651_v13 = vsub.f32 %v4643_v22, %v4647_v12 }
0x237e   :  { %v4653_v14 = vmul.f32 1.442695, %v4651_v13 }
0x237f   :  { %v4650_v15 = vpop.xlane.xlu1 %4649 }
0x2380   :  { %7686 = vpow2.f32 %v4653_v14  ;;  %v4652_v16 = vsub.f32 %v4644_v41, %v4650_v15 }
0x2382   :  { %v4655_v17 = vmul.f32 1.442695, %v4652_v16 }
0x2384   :  { %7688 = vpow2.f32 %v4655_v17 }
0x238d   :  { %v7687_v19 = vpop.eup %7686 }
0x238e   :  { %v4657_v21 = vsel %vm701_vm5, %v7687_v19, 0.0 }
0x238f   :  { %4658 = vadd.xlane.f32.xlu1 %v4657_v21 }
0x2391   :  { %v7689_v24 = vpop.eup %7688 }
0x2392   :  { %v4660_v25 = vsel %vm701_vm5, %v7689_v24, 0.0 }
0x2393   :  { %4661 = vadd.xlane.f32.xlu0 %v4660_v25 }
0x23a0   :  { %4793 = vrot.lane.b32.xlu1 %v9180_v11, %s8296_s4 }
0x23ee   :  { %v4771_v26 = vpop.xlane.xlu0 %4770 }
0x23ef   :  { %v4775_v3 = vsub.f32 %v4767_v48, %v4771_v26 }
0x23f1   :  { %v4777_v27 = vmul.f32 1.442695, %v4775_v3 }
0x23f2   :  { %v4774_v29 = vpop.xlane.xlu0 %4773 }
0x23f3   :  { %7690 = vpow2.f32 %v4777_v27  ;;  %v4776_v31 = vsub.f32 %v4768_v30, %v4774_v29 }
0x23f5   :  { %v4779_v32 = vmul.f32 1.442695, %v4776_v31 }
0x23f6   :  { %v4897_v33 = vpop.xlane.xlu1 %4896 }
0x23f7   :  { %7692 = vpow2.f32 %v4779_v32  ;;  %v4901_v34 = vsub.f32 %v4893_v2, %v4897_v33 }
0x23f9   :  { %v4903_v35 = vmul.f32 1.442695, %v4901_v34 }
0x23fa   :  { %v4900_v49 = vpop.xlane.xlu0 %4899 }
0x23fb   :  { %7694 = vpow2.f32 %v4903_v35  ;;  %v4902_v22 = vsub.f32 %v4894_v58, %v4900_v49 }
0x23fd   :  { %v4905_v36 = vmul.f32 1.442695, %v4902_v22  ;;  %v7510_v22 = vld [vmem:[#allocation11 + $0x18] sm:$0xff]  }
0x23fe   :  { %v5022_v37 = vpop.xlane.xlu1 %5021  ;;  %7186 = vmatpush3.bf16.msra.mxu0 %v7510_v22 }
0x23ff   :  { %7696 = vpow2.f32 %v4905_v36  ;;  %v5026_v38 = vsub.f32 %v5018_v1, %v5022_v37  ;;  %7187 = vmatprep.subr.bf16.mxu0 %v8293_v0 }
0x2400   :  { %v7691_v40 = vpop.eup %7690 }
0x2401   :  { %v5028_v41 = vmul.f32 1.442695, %v5026_v38  ;;  %v4781_v45 = vsel %vm701_vm5, %v7691_v40, 0.0 }
0x2402   :  { %v5025_v46 = vpop.xlane.xlu0 %5024  ;;  %4782 = vadd.xlane.f32.xlu1 %v4781_v45  ;;  %v7511_v45 = vld [vmem:[#allocation11 + $0x10] sm:$0xff]  }
0x2403   :  { %7698 = vpow2.f32 %v5028_v41  ;;  %v5027_v47 = vsub.f32 %v5019_v9, %v5025_v46  ;;  %7188 = vmatpush3.bf16.msra.mxu0 %v7511_v45  ;;  %v6495_v45 = vld [vmem:[#allocation23 + $0x1] ss:$0 sm:$0xff] }
0x2404   :  { %v7693_v23 = vpop.eup %7692  ;;  %7201 = vmatprep.subr.bf16.mxu0 %v8293_v0 }
0x2405   :  { %v5030_v48 = vmul.f32 1.442695, %v5027_v47  ;;  %v4784_v56 = vsel %vm701_vm5, %v7693_v23, 0.0 }
0x2406   :  { %4785 = vadd.xlane.f32.xlu0 %v4784_v56 }
0x2407   :  { %7700 = vpow2.f32 %v5030_v48 }
0x2408   :  { %v7695_v4 = vpop.eup %7694 }
0x2409   :  { %v4907_v50 = vsel %vm701_vm5, %v7695_v4, 0.0 }
0x240a   :  { %4908 = vadd.xlane.f32.xlu1 %v4907_v50 }
0x240c   :  { %v7697_v51 = vpop.eup %7696 }
0x240d   :  { %v4910_v30 = vsel %vm701_vm5, %v7697_v51, 0.0 }
0x240e   :  { %4911 = vadd.xlane.f32.xlu0 %v4910_v30 }
0x2410   :  { %v7699_v63 = vpop.eup %7698 }
0x2411   :  { %v5032_v53 = vsel %vm701_vm5, %v7699_v63, 0.0 }
0x2412   :  { %5033 = vadd.xlane.f32.xlu1 %v5032_v53 }
0x2414   :  { %v7701_v52 = vpop.eup %7700 }
0x2415   :  { %v5035_v54 = vsel %vm701_vm5, %v7701_v52, 0.0 }
0x2416   :  { %5036 = vadd.xlane.f32.xlu0 %v5035_v54 }
0x2418   :  { %v4659_v2 = vpop.xlane.xlu1 %4658 }
0x2419   :  { %7702 = vrcp.f32 %v4659_v2 }
0x241c   :  { %v4662_v18 = vpop.xlane.xlu0 %4661  ;;  %v4794_v61 = vpop.permute.xlu1 %4793 }
0x241d   :  { %7704 = vrcp.f32 %v4662_v18 }
0x2423   :  { %5043 = vrot.lane.b32.xlu1 %v9180_v11, %s8297_s20 }
0x2426   :  { %v7703_v20 = vpop.eup %7702 }
0x2427   :  { %v4665_v57 = vmul.f32 %v7703_v20, %v7687_v19 }
0x242a   :  { %v7705_v55 = vpop.eup %7704 }
0x242b   :  { %v4666_v58 = vmul.f32 %v7705_v55, %v7689_v24 }
0x242c   :  { %4918 = vrot.lane.b32.xlu0 %v9180_v11, %s8295_s10 }
0x242d   :  { %v4667_v42 = vpack.c.bf16 %v4666_v58, %v4665_v57 }
0x242f   :  { %7146 = vmatmul.mubr.msk.bf16.vlgmr.msra.gmra.mxu1 %vm701_vm5, %v4667_v42 }
0x2430   :  { %7156 = vmatpush3.bf16.msra.mxu1 %v4794_v61  ;;  %7157 = vmatprep.mubr.msk.bf16.mxu1 %vm8294_vm0, %v8293_v0 }
0x2431   :  { %7167 = vmatprep.subr.bf16.mxu1 %v8293_v0 }
0x248b   :  { %v4783_v43 = vpop.xlane.xlu1 %4782 }
0x248c   :  { %7706 = vrcp.f32 %v4783_v43 }
0x248f   :  { %v4786_v62 = vpop.xlane.xlu0 %4785 }
0x2490   :  { %7708 = vrcp.f32 %v4786_v62  ;;  %v7512_v62 = vld [vmem:[#allocation14 + $0x18] sm:$0xff]  }
0x2493   :  { %v4909_v1 = vpop.xlane.xlu1 %4908 }
0x2494   :  { %7710 = vrcp.f32 %v4909_v1 }
0x2497   :  { %v4912_v5 = vpop.xlane.xlu0 %4911 }
0x2498   :  { %7712 = vrcp.f32 %v4912_v5  ;;  %v7513_v5 = vld [vmem:[#allocation14 + $0x10] sm:$0xff]  }
0x2499   :  { %v7707_v6 = vpop.eup %7706 }
0x249a   :  { %v4789_v8 = vmul.f32 %v7707_v6, %v7691_v40 }
0x249b   :  { %v5034_v11 = vpop.xlane.xlu1 %5033 }
0x249c   :  { %7714 = vrcp.f32 %v5034_v11 }
0x249d   :  { %v7709_v7 = vpop.eup %7708 }
0x249e   :  { %v4790_v9 = vmul.f32 %v7709_v7, %v7693_v23 }
0x249f   :  { %v5037_v10 = vpop.xlane.xlu0 %5036  ;;  %v5044_v21 = vpop.permute.xlu1 %5043 }
0x24a0   :  { %v4791_v12 = vpack.c.bf16 %v4790_v9, %v4789_v8  ;;  %7716 = vrcp.f32 %v5037_v10 }
0x24a1   :  { %v7711_v13 = vpop.eup %7710 }
0x24a2   :  { %7158 = vmatmul.mubr.msk.bf16.vlgmr.msra.gmra.mxu1 %vm701_vm5, %v4791_v12  ;;  %v4915_v16 = vmul.f32 %v7711_v13, %v7695_v4 }
0x24a3   :  { %v4919_v14 = vpop.permute.xlu0 %4918  ;;  %7169 = vmatprep.mubr.msk.bf16.mxu1 %vm8294_vm0, %v8293_v0 }
0x24a4   :  { %7168 = vmatpush3.bf16.msra.mxu1 %v4919_v14 }
0x24a5   :  { %v7713_v15 = vpop.eup %7712  ;;  %7179 = vmatprep.subr.bf16.mxu1 %v8293_v0 }
0x24a6   :  { %v4916_v17 = vmul.f32 %v7713_v15, %v7697_v51 }
0x24a8   :  { %v4917_v19 = vpack.c.bf16 %v4916_v17, %v4915_v16 }
0x24a9   :  { %v7715_v24 = vpop.eup %7714 }
0x24aa   :  { %7170 = vmatmul.mubr.msk.bf16.vlgmr.msra.gmra.mxu1 %vm701_vm5, %v4917_v19  ;;  %v5040_v26 = vmul.f32 %v7715_v24, %v7699_v63 }
0x24ab   :  { %7180 = vmatpush3.bf16.msra.mxu1 %v5044_v21  ;;  %7181 = vmatprep.mubr.msk.bf16.mxu1 %vm8294_vm0, %v8293_v0 }
0x24ac   :  { %7193 = vmatprep.subr.bf16.mxu1 %v8293_v0 }
0x24ad   :  { %v7717_v25 = vpop.eup %7716 }
0x24ae   :  { %v5041_v3 = vmul.f32 %v7717_v25, %v7701_v52 }
0x24b0   :  { %v5042_v27 = vpack.c.bf16 %v5041_v3, %v5040_v26 }
0x24b2   :  { %7182 = vmatmul.mubr.msk.bf16.vlgmr.msra.gmra.mxu1 %vm701_vm5, %v5042_v27 }
0x24b3   :  { %7197 = vmatprep.mubr.msk.bf16.mxu1 %vm8294_vm0, %v8293_v0 }
0x24ef   :  { %v4705_v29 = vpop.f32.mrf.mxu1 }
0x24f1   :  { %v7147_v31 = vpop.f32.mrf.mxu1 }
0x24f3   :  { %v4708_v32 = vpop.f32.mrf.mxu1 }
0x24f5   :  { %v7148_v33 = vpop.f32.mrf.mxu1 }
0x24f6   :  { %v7514_v33 = vld [vmem:[#allocation13 + $0x18] sm:$0xff]  }
0x24f7   :  { %7194 = vmatpush3.bf16.msra.mxu1 %v7514_v33 }
0x24f8   :  { %7195 = vmatprep.subr.bf16.mxu1 %v8293_v0 }
0x2562   :  { %v4833_v34 = vpop.f32.mrf.mxu1 }
0x2564   :  { %v7159_v35 = vpop.f32.mrf.mxu1 }
0x2566   :  { %v4836_v49 = vpop.f32.mrf.mxu1 }
0x2567   :  { %v7424_v36 = vpack.i.bf16 %v4836_v49, %v4833_v34  ;;  %v7515_v34 = vld [vmem:[#allocation13 + $0x10] sm:$0xff]  }
0x2568   :  { %v7160_v37 = vpop.f32.mrf.mxu1  ;;  %7196 = vmatpush3.bf16.msra.mxu1 %v7515_v34 }
0x2569   :  { %7425 = vrot.lane.b32.xlu1 %v7424_v36, %s8268_s7  ;;  %7209 = vmatprep.subr.bf16.mxu1 %v8293_v0 }
0x256a   :  { %v4958_v38 = vpop.f32.mrf.mxu1 }
0x256c   :  { %v7171_v40 = vpop.f32.mrf.mxu1 }
0x256e   :  { %v4961_v41 = vpop.f32.mrf.mxu1 }
0x256f   :  { %v7429_v46 = vpack.i.bf16 %v4961_v41, %v4958_v38 }
0x2570   :  { %v7172_v47 = vpop.f32.mrf.mxu1 }
0x2571   :  { %7430 = vrot.lane.b32.xlu0 %v7429_v46, %s8276_s30 }
0x2572   :  { %v5083_v23 = vpop.f32.mrf.mxu1 }
0x2574   :  { %v7183_v48 = vpop.f32.mrf.mxu1 }
0x2575   :  { %v6496_v48 = vld [vmem:[#allocation25 + $0x1] ss:$0 sm:$0xff] }
0x2576   :  { %v5086_v56 = vpop.f32.mrf.mxu1 }
0x2577   :  { %v7434_v4 = vpack.i.bf16 %v5086_v56, %v5083_v23 }
0x2578   :  { %v7184_v50 = vpop.f32.mrf.mxu1 }
0x2579   :  { %7435 = vrot.lane.b32.xlu1 %v7434_v4, %s8299_s6 }
0x25db   :  { %v7426_v51 = vpop.permute.xlu1 %7425 }
0x25dc   :  { %v7428_v63 = vunpack.i.h.bf16 %v7426_v51  ;;  %v7427_v53 = vunpack.i.l.bf16 %v7426_v51  ;;  %v7516_v51 = vld [vmem:[#allocation16 + $0x18] sm:$0xff]  }
0x25de   :  { %v5115_v18 = vsel %vm649_vm2, %v4708_v32, %v7428_v63  ;;  %v5114_v20 = vsel %vm649_vm2, %v4705_v29, %v7427_v53  ;;  %v7517_v63 = vld [vmem:[#allocation16 + $0x10] sm:$0xff]  }
0x25e3   :  { %v7431_v30 = vpop.permute.xlu0 %7430 }
0x25e4   :  { %v7433_v52 = vunpack.i.h.bf16 %v7431_v30  ;;  %v7432_v54 = vunpack.i.l.bf16 %v7431_v30 }
0x25e6   :  { %v5117_v58 = vsel %vm701_vm5, %v5115_v18, %v7433_v52  ;;  %v5116_v42 = vsel %vm701_vm5, %v5114_v20, %v7432_v54 }
0x25eb   :  { %v7436_v2 = vpop.permute.xlu1 %7435 }
0x25ec   :  { %v7438_v55 = vunpack.i.h.bf16 %v7436_v2  ;;  %v7437_v57 = vunpack.i.l.bf16 %v7436_v2 }
0x25ee   :  { %v5119_v61 = vsel %vm1175_vm6, %v5117_v58, %v7438_v55  ;;  %v5118_v43 = vsel %vm1175_vm6, %v5116_v42, %v7437_v57 }
0x25ef   :  { %v5120_v1 = vpack.c.bf16 %v5119_v61, %v5118_v43 }
0x25f1   :  { %7190 = vmatmul.mubr.msk.bf16.vlgmr.msra.gmra.mxu0 %vm495_vm1, %v5120_v1 }
0x25f2   :  { %7202 = vmatpush3.bf16.msra.mxu0 %v7512_v62  ;;  %7205 = vmatprep.mubr.msk.bf16.mxu0 %vm8294_vm0, %v8293_v0 }
0x25f3   :  { %7203 = vmatprep.subr.bf16.mxu0 %v8293_v0 }
0x25f6   :  { %7204 = vmatpush3.bf16.msra.mxu0 %v7513_v5 }
0x25f7   :  { %7217 = vmatprep.subr.bf16.mxu0 %v8293_v0 }
0x25f9   :  { %7206 = vmatmul.mubr.msk.bf16.vlgmr.msra.gmra.mxu0 %vm495_vm1, %v9023_v28 }
0x25fa   :  { %7219 = vmatprep.mubr.msk.bf16.mxu0 %vm8294_vm0, %v8293_v0 }
0x26b1   :  { %v5170_v6 = vpop.f32.mrf.mxu0 }
0x26b2   :  { %v5177_v11 = vadd.f32 %v5170_v6, %v9163_v59 }
0x26b3   :  { %v7191_v7 = vpop.f32.mrf.mxu0 }
0x26b4   :  { %v5179_v8 = vsel %vm495_vm1, %v5177_v11, 0.0 }
0x26b5   :  { %5180 = vadd.xlane.f32.xlu0 %v5179_v8  ;;  %v5173_v9 = vpop.f32.mrf.mxu0 }
0x26b6   :  { %v5178_v10 = vadd.f32 %v5173_v9, %v9165_v60 }
0x26b7   :  { %v7192_v12 = vpop.f32.mrf.mxu0 }
0x26b8   :  { %v5182_v13 = vsel %vm495_vm1, %v5178_v10, 0.0 }
0x26b9   :  { %5183 = vadd.xlane.f32.xlu1 %v5182_v13  ;;  %v5325_v14 = vpop.f32.mrf.mxu0 }
0x26bb   :  { %v7207_v15 = vpop.f32.mrf.mxu0 }
0x26bd   :  { %v5328_v16 = vpop.f32.mrf.mxu0 }
0x26be   :  { %v9279_v17 = vpack.c.bf16 %v5328_v16, %v5325_v14 }
0x26bf   :  { %v7208_v19 = vpop.f32.mrf.mxu0 }
0x26c0   :  { %v5391_v59 = vsel %vm649_vm2, %v9279_v17, 0 }
0x26c1   :  { %7218 = vmatpush3.bf16.xpose.msra.mxu0 %v5391_v59 }
0x26c2   :  { %7229 = vmatprep.subr.bf16.mxu0 %v8293_v0 }
0x26ca   :  { %5509 = vrot.lane.b32.xlu1 %v9279_v17, %s8296_s4 }
0x26ce   :  { %5635 = vrot.lane.b32.xlu1 %v9279_v17, %s8295_s10 }
0x273e   :  { %v5181_v60 = vpop.xlane.xlu0 %5180 }
0x273f   :  { %v5185_v21 = vmul.f32 0.03125, %v5181_v60 }
0x2741   :  { %v5187_v24 = vsub.f32 %v5177_v11, %v5185_v21 }
0x2742   :  { %v5184_v25 = vpop.xlane.xlu1 %5183 }
0x2743   :  { %v5186_v26 = vmul.f32 0.03125, %v5184_v25  ;;  %v5189_v3 = vmul.f32 %v5187_v24, %v5187_v24 }
0x2745   :  { %v5188_v27 = vsub.f32 %v5178_v10, %v5186_v26  ;;  %v5191_v29 = vsel %vm495_vm1, %v5189_v3, 0.0 }
0x2746   :  { %5192 = vadd.xlane.f32.xlu0 %v5191_v29  ;;  %v5510_v2 = vpop.permute.xlu1 %5509 }
0x2747   :  { %v5190_v31 = vmul.f32 %v5188_v27, %v5188_v27  ;;  %v5515_v55 = vsel %vm649_vm2, %v5510_v2, 0 }
0x2749   :  { %v5194_v32 = vsel %vm495_vm1, %v5190_v31, 0.0 }
0x274a   :  { %5195 = vadd.xlane.f32.xlu0 %v5194_v32  ;;  %v5636_v43 = vpop.permute.xlu1 %5635 }
0x274b   :  { %v5641_v1 = vsel %vm649_vm2, %v5636_v43, 0 }
0x27cf   :  { %v5193_v35 = vpop.xlane.xlu0 %5192 }
0x27d0   :  { %v5197_v49 = vmul.f32 0.03125, %v5193_v35 }
0x27d2   :  { %v5199_v22 = vadd.f32 1e-05, %v5197_v49 }
0x27d3   :  { %v5196_v36 = vpop.xlane.xlu0 %5195 }
0x27d4   :  { %7718 = vrsqrt.f32 %v5199_v22  ;;  %v5198_v37 = vmul.f32 0.03125, %v5196_v36 }
0x27d6   :  { %v5200_v38 = vadd.f32 1e-05, %v5198_v37 }
0x27d8   :  { %7720 = vrsqrt.f32 %v5200_v38 }
0x27e1   :  { %v7719_v40 = vpop.eup %7718 }
0x27e2   :  { %v5203_v41 = vmul.f32 %v7719_v40, %v5187_v24 }
0x27e4   :  { %v5211_v47 = vmul.f32 %v6495_v45, %v5203_v41 }
0x27e5   :  { %v7721_v46 = vpop.eup %7720 }
0x27e6   :  { %v5204_v23 = vmul.f32 %v7721_v46, %v5188_v27  ;;  %v9292_v4 = vadd.f32 %v6496_v48, %v5211_v47 }
0x27e8   :  { %v5212_v56 = vmul.f32 %v6495_v45, %v5204_v23 }
0x27ea   :  { %v9294_v50 = vadd.f32 %v6496_v48, %v5212_v56 }
0x27ec   :  { %v5221_v30 = vpack.c.bf16 %v9294_v50, %v9292_v4 }
0x27ee   :  { %7198 = vmatmul.mubr.msk.bf16.vlgmr.msra.gmra.mxu1 %vm495_vm1, %v5221_v30 }
0x27ef   :  { %7210 = vmatpush3.bf16.msra.mxu1 %v7516_v51  ;;  %7213 = vmatprep.mubr.msk.bf16.mxu1 %vm8294_vm0, %v8293_v0 }
0x27f0   :  { %7211 = vmatprep.subr.bf16.mxu1 %v8293_v0 }
0x27f3   :  { %7212 = vmatpush3.bf16.msra.mxu1 %v7517_v63 }
0x27f4   :  { %7223 = vmatprep.subr.bf16.mxu1 %v8293_v0 }
0x27f6   :  { %7214 = vmatmul.mubr.msk.bf16.vlgmr.msra.gmra.mxu1 %vm495_vm1, %v9023_v28 }
0x27f7   :  { %7225 = vmatprep.mubr.msk.bf16.mxu1 %vm8294_vm0, %v8293_v0 }
0x28ae   :  { %v5271_v53 = vpop.f32.mrf.mxu1 }
0x28b0   :  { %v7199_v52 = vpop.f32.mrf.mxu1 }
0x28b2   :  { %v5274_v54 = vpop.f32.mrf.mxu1 }
0x28b3   :  { %v5278_v18 = vpack.c.bf16 %v5274_v54, %v5271_v53 }
0x28b4   :  { %v7200_v20 = vpop.f32.mrf.mxu1 }
0x28b5   :  { %5633 = vrot.lane.b32.xlu1 %v5278_v18, %s8295_s10  ;;  %5506 = vrot.lane.b32.xlu0 %v5278_v18, %s8296_s4 }
0x28b6   :  { %7220 = vmatmul.mubr.msk.bf16.vlgmr.msra.gmra.mxu0 %vm649_vm2, %v5278_v18  ;;  %v5379_v57 = vpop.f32.mrf.mxu1 }
0x28b7   :  { %7230 = vmatpush3.bf16.xpose.msra.mxu0 %v5515_v55  ;;  %7231 = vmatprep.mubr.msk.bf16.mxu0 %vm8294_vm0, %v8293_v0 }
0x28b8   :  { %v7215_v28 = vpop.f32.mrf.mxu1  ;;  %7241 = vmatprep.subr.bf16.mxu0 %v8293_v0 }
0x28b9   :  { %5758 = vrot.lane.b32.xlu1 %v5278_v18, %s8297_s20  ;;  %5760 = vrot.lane.b32.xlu0 %v9279_v17, %s8297_s20 }
0x28ba   :  { %v5382_v58 = vpop.f32.mrf.mxu1 }
0x28bb   :  { %v9317_v42 = vpack.c.bf16 %v5382_v58, %v5379_v57 }
0x28bc   :  { %v7216_v61 = vpop.f32.mrf.mxu1 }
0x28bd   :  { %7224 = vmatpush3.bf16.msra.mxu1 %v9317_v42 }
0x28be   :  { %7235 = vmatprep.subr.bf16.mxu1 %v8293_v0 }
0x2927   :  { %v5507_v62 = vpop.permute.xlu0 %5506  ;;  %v5634_v6 = vpop.permute.xlu1 %5633 }
0x2928   :  { %7232 = vmatmul.mubr.msk.bf16.vlgmr.msra.gmra.mxu0 %vm649_vm2, %v5507_v62 }
0x2929   :  { %7242 = vmatpush3.bf16.xpose.msra.mxu0 %v5641_v1  ;;  %7243 = vmatprep.mubr.msk.bf16.mxu0 %vm8294_vm0, %v8293_v0 }
0x292a   :  { %7253 = vmatprep.subr.bf16.mxu0 %v8293_v0 }
0x292b   :  { %v5761_v5 = vpop.permute.xlu0 %5760  ;;  %v5759_v7 = vpop.permute.xlu1 %5758 }
0x292c   :  { %v5766_v11 = vsel %vm649_vm2, %v5761_v5, 0 }
0x2930   :  { %7244 = vmatmul.mubr.msk.bf16.vlgmr.msra.gmra.mxu0 %vm649_vm2, %v5634_v6 }
0x2931   :  { %7254 = vmatpush3.bf16.xpose.msra.mxu0 %v5766_v11  ;;  %7255 = vmatprep.mubr.msk.bf16.mxu0 %vm8294_vm0, %v8293_v0 }
0x2932   :  { %7265 = vmatprep.subr.bf16.mxu0 %v8293_v0 }
0x2938   :  { %7256 = vmatmul.mubr.msk.bf16.vlgmr.msra.gmra.mxu0 %vm649_vm2, %v5759_v7 }
0x2939   :  { %7269 = vmatprep.mubr.msk.bf16.mxu0 %vm8294_vm0, %v8293_v0 }
0x2976   :  { %v5427_v8 = vpop.f32.mrf.mxu0 }
0x2977   :  { %v5434_v9 = vmul.f32 0.35355338, %v5427_v8 }
0x2978   :  { %v7221_v10 = vpop.f32.mrf.mxu0 }
0x2979   :  { %v5436_v12 = vadd.f32 %v5434_v9, %v8628_v39 }
0x297a   :  { %v5430_v13 = vpop.f32.mrf.mxu0 }
0x297b   :  { %v5435_v14 = vmul.f32 0.35355338, %v5430_v13  ;;  %v5438_v15 = vsel %vm701_vm5, %v5436_v12, -inf }
0x297c   :  { %5439 = vmax.xlane.f32.xlu0 %v5438_v15  ;;  %v7222_v16 = vpop.f32.mrf.mxu0 }
0x297d   :  { %v5437_v17 = vadd.f32 %v5435_v14, %v8631_v44 }
0x297f   :  { %v5441_v19 = vsel %vm701_vm5, %v5437_v17, -inf }
0x2980   :  { %5442 = vmax.xlane.f32.xlu1 %v5441_v19 }
0x29e8   :  { %v5551_v59 = vpop.f32.mrf.mxu0 }
0x29e9   :  { %v5558_v60 = vmul.f32 0.35355338, %v5551_v59 }
0x29ea   :  { %v7233_v21 = vpop.f32.mrf.mxu0 }
0x29eb   :  { %v5560_v24 = vadd.f32 %v5558_v60, %v8628_v39 }
0x29ec   :  { %v5554_v25 = vpop.f32.mrf.mxu0 }
0x29ed   :  { %v5559_v26 = vmul.f32 0.35355338, %v5554_v25  ;;  %v5562_v3 = vsel %vm701_vm5, %v5560_v24, -inf }
0x29ee   :  { %5563 = vmax.xlane.f32.xlu0 %v5562_v3  ;;  %v7234_v27 = vpop.f32.mrf.mxu0 }
0x29ef   :  { %v5561_v29 = vadd.f32 %v5559_v26, %v8631_v44 }
0x29f0   :  { %v5677_v31 = vpop.f32.mrf.mxu0 }
0x29f1   :  { %v5684_v32 = vmul.f32 0.35355338, %v5677_v31  ;;  %v5565_v33 = vsel %vm701_vm5, %v5561_v29, -inf }
0x29f2   :  { %5566 = vmax.xlane.f32.xlu0 %v5565_v33  ;;  %v7245_v34 = vpop.f32.mrf.mxu0 }
0x29f3   :  { %v5686_v35 = vadd.f32 %v5684_v32, %v8628_v39 }
0x29f4   :  { %v5680_v49 = vpop.f32.mrf.mxu0 }
0x29f5   :  { %v5685_v22 = vmul.f32 0.35355338, %v5680_v49  ;;  %v5688_v36 = vsel %vm701_vm5, %v5686_v35, -inf }
0x29f6   :  { %5689 = vmax.xlane.f32.xlu1 %v5688_v36  ;;  %v7246_v37 = vpop.f32.mrf.mxu0 }
0x29f7   :  { %v5687_v38 = vadd.f32 %v5685_v22, %v8631_v44 }
0x29f8   :  { %v5802_v40 = vpop.f32.mrf.mxu0 }
0x29f9   :  { %v5809_v41 = vmul.f32 0.35355338, %v5802_v40  ;;  %v5691_v45 = vsel %vm701_vm5, %v5687_v38, -inf }
0x29fa   :  { %5692 = vmax.xlane.f32.xlu0 %v5691_v45  ;;  %v7257_v46 = vpop.f32.mrf.mxu0 }
0x29fb   :  { %v5811_v47 = vadd.f32 %v5809_v41, %v8628_v39 }
0x29fc   :  { %v5805_v23 = vpop.f32.mrf.mxu0 }
0x29fd   :  { %v5810_v48 = vmul.f32 0.35355338, %v5805_v23  ;;  %v5813_v56 = vsel %vm701_vm5, %v5811_v47, -inf }
0x29fe   :  { %5814 = vmax.xlane.f32.xlu1 %v5813_v56  ;;  %v7258_v51 = vpop.f32.mrf.mxu0 }
0x29ff   :  { %v5812_v30 = vadd.f32 %v5810_v48, %v8631_v44 }
0x2a01   :  { %v5816_v63 = vsel %vm701_vm5, %v5812_v30, -inf }
0x2a02   :  { %5817 = vmax.xlane.f32.xlu0 %v5816_v63 }
0x2a05   :  { %v5440_v53 = vpop.xlane.xlu0 %5439 }
0x2a06   :  { %v5444_v52 = vsub.f32 %v5436_v12, %v5440_v53 }
0x2a08   :  { %v5446_v54 = vmul.f32 1.442695, %v5444_v52 }
0x2a09   :  { %v5443_v2 = vpop.xlane.xlu1 %5442 }
0x2a0a   :  { %7722 = vpow2.f32 %v5446_v54  ;;  %v5445_v18 = vsub.f32 %v5437_v17, %v5443_v2 }
0x2a0c   :  { %v5448_v20 = vmul.f32 1.442695, %v5445_v18 }
0x2a0e   :  { %7724 = vpow2.f32 %v5448_v20 }
0x2a17   :  { %v7723_v39 = vpop.eup %7722 }
0x2a18   :  { %v5450_v55 = vsel %vm701_vm5, %v7723_v39, 0.0 }
0x2a19   :  { %5451 = vadd.xlane.f32.xlu1 %v5450_v55 }
0x2a1b   :  { %v7725_v57 = vpop.eup %7724 }
0x2a1c   :  { %v5453_v28 = vsel %vm701_vm5, %v7725_v57, 0.0 }
0x2a1d   :  { %5454 = vadd.xlane.f32.xlu0 %v5453_v28 }
0x2a2a   :  { %5586 = vrot.lane.b32.xlu1 %v9317_v42, %s8296_s4 }
0x2a77   :  { %v5564_v44 = vpop.xlane.xlu0 %5563 }
0x2a78   :  { %v5568_v58 = vsub.f32 %v5560_v24, %v5564_v44 }
0x2a7a   :  { %v5570_v61 = vmul.f32 1.442695, %v5568_v58 }
0x2a7b   :  { %v5567_v43 = vpop.xlane.xlu0 %5566 }
0x2a7c   :  { %7726 = vpow2.f32 %v5570_v61  ;;  %v5569_v62 = vsub.f32 %v5561_v29, %v5567_v43 }
0x2a7e   :  { %v5572_v1 = vmul.f32 1.442695, %v5569_v62 }
0x2a7f   :  { %v5690_v5 = vpop.xlane.xlu1 %5689 }
0x2a80   :  { %7728 = vpow2.f32 %v5572_v1  ;;  %v5694_v6 = vsub.f32 %v5686_v35, %v5690_v5 }
0x2a82   :  { %v5696_v11 = vmul.f32 1.442695, %v5694_v6  ;;  %v7518_v6 = vld [vmem:[#allocation17 + $0x18] sm:$0xff]  }
0x2a83   :  { %v5693_v7 = vpop.xlane.xlu0 %5692  ;;  %7266 = vmatpush3.bf16.msra.mxu0 %v7518_v6  ;;  %v6518_v6 = vld [vmem:[#allocation28 + $0x1] ss:$0 sm:$0xff] }
0x2a84   :  { %7730 = vpow2.f32 %v5696_v11  ;;  %v5695_v8 = vsub.f32 %v5687_v38, %v5693_v7  ;;  %7267 = vmatprep.subr.bf16.mxu0 %v8293_v0 }
0x2a86   :  { %v5698_v9 = vmul.f32 1.442695, %v5695_v8 }
0x2a87   :  { %v5815_v10 = vpop.xlane.xlu1 %5814 }
0x2a88   :  { %7732 = vpow2.f32 %v5698_v9  ;;  %v5819_v12 = vsub.f32 %v5811_v47, %v5815_v10 }
0x2a89   :  { %v7727_v13 = vpop.eup %7726 }
0x2a8a   :  { %v5821_v14 = vmul.f32 1.442695, %v5819_v12  ;;  %v5574_v15 = vsel %vm701_vm5, %v7727_v13, 0.0  ;;  %v7519_v12 = vld [vmem:[#allocation17 + $0x10] sm:$0xff]  }
0x2a8b   :  { %v5818_v16 = vpop.xlane.xlu0 %5817  ;;  %5575 = vadd.xlane.f32.xlu1 %v5574_v15  ;;  %7268 = vmatpush3.bf16.msra.mxu0 %v7519_v12  ;;  %v7524_v12 = vld [vmem:[%s9474_s13 + $0x28] sm:$0xff]  }
0x2a8c   :  { %7734 = vpow2.f32 %v5821_v14  ;;  %v5820_v17 = vsub.f32 %v5812_v30, %v5818_v16  ;;  %7281 = vmatprep.subr.bf16.mxu0 %v8293_v0 }
0x2a8d   :  { %v7729_v19 = vpop.eup %7728 }
0x2a8e   :  { %v5823_v59 = vmul.f32 1.442695, %v5820_v17  ;;  %v5577_v60 = vsel %vm701_vm5, %v7729_v19, 0.0 }
0x2a8f   :  { %5578 = vadd.xlane.f32.xlu0 %v5577_v60 }
0x2a90   :  { %7736 = vpow2.f32 %v5823_v59 }
0x2a91   :  { %v7731_v21 = vpop.eup %7730 }
0x2a92   :  { %v5700_v24 = vsel %vm701_vm5, %v7731_v21, 0.0 }
0x2a93   :  { %5701 = vadd.xlane.f32.xlu1 %v5700_v24 }
0x2a95   :  { %v7733_v25 = vpop.eup %7732 }
0x2a96   :  { %v5703_v26 = vsel %vm701_vm5, %v7733_v25, 0.0 }
0x2a97   :  { %5704 = vadd.xlane.f32.xlu0 %v5703_v26 }
0x2a99   :  { %v7735_v3 = vpop.eup %7734 }
0x2a9a   :  { %v5825_v27 = vsel %vm701_vm5, %v7735_v3, 0.0 }
0x2a9b   :  { %5826 = vadd.xlane.f32.xlu1 %v5825_v27 }
0x2a9d   :  { %v7737_v29 = vpop.eup %7736 }
0x2a9e   :  { %v5828_v31 = vsel %vm701_vm5, %v7737_v29, 0.0 }
0x2a9f   :  { %5829 = vadd.xlane.f32.xlu0 %v5828_v31 }
0x2aa2   :  { %v5452_v32 = vpop.xlane.xlu1 %5451 }
0x2aa3   :  { %7738 = vrcp.f32 %v5452_v32 }
0x2aa6   :  { %v5455_v33 = vpop.xlane.xlu0 %5454  ;;  %v5587_v37 = vpop.permute.xlu1 %5586 }
0x2aa7   :  { %7740 = vrcp.f32 %v5455_v33 }
0x2aac   :  { %5836 = vrot.lane.b32.xlu1 %v9317_v42, %s8297_s20 }
0x2ab0   :  { %v7739_v34 = vpop.eup %7738 }
0x2ab1   :  { %v5458_v49 = vmul.f32 %v7739_v34, %v7723_v39 }
0x2ab4   :  { %v7741_v35 = vpop.eup %7740 }
0x2ab5   :  { %v5459_v22 = vmul.f32 %v7741_v35, %v7725_v57  ;;  %5711 = vrot.lane.b32.xlu0 %v9317_v42, %s8295_s10 }
0x2ab7   :  { %v5460_v36 = vpack.c.bf16 %v5459_v22, %v5458_v49 }
0x2ab9   :  { %7226 = vmatmul.mubr.msk.bf16.vlgmr.msra.gmra.mxu1 %vm701_vm5, %v5460_v36 }
0x2aba   :  { %7236 = vmatpush3.bf16.msra.mxu1 %v5587_v37  ;;  %7237 = vmatprep.mubr.msk.bf16.mxu1 %vm8294_vm0, %v8293_v0 }
0x2abb   :  { %7247 = vmatprep.subr.bf16.mxu1 %v8293_v0 }
0x2b14   :  { %v5576_v38 = vpop.xlane.xlu1 %5575 }
0x2b15   :  { %7742 = vrcp.f32 %v5576_v38 }
0x2b18   :  { %v5579_v40 = vpop.xlane.xlu0 %5578 }
0x2b19   :  { %7744 = vrcp.f32 %v5579_v40 }
0x2b1c   :  { %v5702_v41 = vpop.xlane.xlu1 %5701 }
0x2b1d   :  { %7746 = vrcp.f32 %v5702_v41 }
0x2b20   :  { %v5705_v45 = vpop.xlane.xlu0 %5704 }
0x2b21   :  { %7748 = vrcp.f32 %v5705_v45 }
0x2b22   :  { %v7743_v46 = vpop.eup %7742 }
0x2b23   :  { %v5582_v23 = vmul.f32 %v7743_v46, %v7727_v13 }
0x2b24   :  { %v5827_v42 = vpop.xlane.xlu1 %5826 }
0x2b25   :  { %7750 = vrcp.f32 %v5827_v42 }
0x2b26   :  { %v7745_v47 = vpop.eup %7744 }
0x2b27   :  { %v5583_v48 = vmul.f32 %v7745_v47, %v7729_v19 }
0x2b28   :  { %v5830_v56 = vpop.xlane.xlu0 %5829  ;;  %v5837_v18 = vpop.permute.xlu1 %5836 }
0x2b29   :  { %v5584_v51 = vpack.c.bf16 %v5583_v48, %v5582_v23  ;;  %7752 = vrcp.f32 %v5830_v56 }
0x2b2a   :  { %v7747_v30 = vpop.eup %7746 }
0x2b2b   :  { %7238 = vmatmul.mubr.msk.bf16.vlgmr.msra.gmra.mxu1 %vm701_vm5, %v5584_v51  ;;  %v5708_v52 = vmul.f32 %v7747_v30, %v7731_v21 }
0x2b2c   :  { %v5712_v63 = vpop.permute.xlu0 %5711  ;;  %7249 = vmatprep.mubr.msk.bf16.mxu1 %vm8294_vm0, %v8293_v0 }
0x2b2d   :  { %7248 = vmatpush3.bf16.msra.mxu1 %v5712_v63 }
0x2b2e   :  { %v7749_v53 = vpop.eup %7748  ;;  %7259 = vmatprep.subr.bf16.mxu1 %v8293_v0 }
0x2b2f   :  { %v5709_v54 = vmul.f32 %v7749_v53, %v7733_v25 }
0x2b31   :  { %v5710_v2 = vpack.c.bf16 %v5709_v54, %v5708_v52 }
0x2b32   :  { %v7751_v20 = vpop.eup %7750 }
0x2b33   :  { %7250 = vmatmul.mubr.msk.bf16.vlgmr.msra.gmra.mxu1 %vm701_vm5, %v5710_v2  ;;  %v5833_v55 = vmul.f32 %v7751_v20, %v7735_v3  ;;  %v7521_v2 = vld [vmem:[#allocation19 + $0x10] sm:$0xff]  }
0x2b34   :  { %7260 = vmatpush3.bf16.msra.mxu1 %v5837_v18  ;;  %7261 = vmatprep.mubr.msk.bf16.mxu1 %vm8294_vm0, %v8293_v0  ;;  %v7522_v18 = vld [vmem:[%s9474_s13 + $0x38] sm:$0xff]  }
0x2b35   :  { %7273 = vmatprep.subr.bf16.mxu1 %v8293_v0 }
0x2b36   :  { %v7753_v39 = vpop.eup %7752 }
0x2b37   :  { %v5834_v57 = vmul.f32 %v7753_v39, %v7737_v29 }
0x2b39   :  { %v5835_v28 = vpack.c.bf16 %v5834_v57, %v5833_v55 }
0x2b3b   :  { %7262 = vmatmul.mubr.msk.bf16.vlgmr.msra.gmra.mxu1 %vm701_vm5, %v5835_v28 }
0x2b3c   :  { %7277 = vmatprep.mubr.msk.bf16.mxu1 %vm8294_vm0, %v8293_v0 }
0x2b79   :  { %v5498_v44 = vpop.f32.mrf.mxu1 }
0x2b7b   :  { %v7227_v58 = vpop.f32.mrf.mxu1 }
0x2b7d   :  { %v5501_v61 = vpop.f32.mrf.mxu1 }
0x2b7f   :  { %v7228_v43 = vpop.f32.mrf.mxu1 }
0x2b80   :  { %v6517_v43 = vld [vmem:[#allocation26 + $0x1] ss:$0 sm:$0xff] }
0x2beb   :  { %v5626_v62 = vpop.f32.mrf.mxu1 }
0x2bed   :  { %v7239_v1 = vpop.f32.mrf.mxu1 }
0x2bef   :  { %v5629_v5 = vpop.f32.mrf.mxu1 }
0x2bf0   :  { %v7439_v11 = vpack.i.bf16 %v5629_v5, %v5626_v62 }
0x2bf1   :  { %v7240_v7 = vpop.f32.mrf.mxu1 }
0x2bf2   :  { %7440 = vrot.lane.b32.xlu1 %v7439_v11, %s8268_s7 }
0x2bf3   :  { %v5751_v8 = vpop.f32.mrf.mxu1 }
0x2bf5   :  { %v7251_v9 = vpop.f32.mrf.mxu1 }
0x2bf7   :  { %v5754_v10 = vpop.f32.mrf.mxu1 }
0x2bf8   :  { %v7444_v13 = vpack.i.bf16 %v5754_v10, %v5751_v8  ;;  %v7523_v10 = vld [vmem:[%s9474_s13 + $0x30] sm:$0xff]  }
0x2bf9   :  { %v7252_v14 = vpop.f32.mrf.mxu1 }
0x2bfa   :  { %7445 = vrot.lane.b32.xlu0 %v7444_v13, %s8276_s30  ;;  %v7525_v13 = vld [vmem:[%s9474_s13 + $0x20] sm:$0xff]   ;;  %s8300_s30 = smov [#allocation35]  }
0x2bfb   :  { %v5876_v15 = vpop.f32.mrf.mxu1  ;;  %v6519_v14 = vld [vmem:[#allocation20 + $0x1] ss:$0 sm:$0xff]  ;;  %s6249_s29 = sshll.u32 %s8300_s30, 4  ;;  %s6250_s29 = int_to_ptr.vmem [resolvable:$true] %s6249_s29 }
0x2bfc   :  { %s8186_s26 = scalar_lea.vmem %s6250_s29, 256  ;;  %p8191_p8 = scmp.lt.s32.totalorder %s6250_s29, %s6250_s29 }
0x2bfd   :  { %v7263_v16 = vpop.f32.mrf.mxu1  ;;  %p8187_p7 = scmp.ne.s32.totalorder %s6250_s29, %s8186_s26  ;;  %p8192_p9 = scmp.lt.s32.totalorder %s8186_s26, %s8186_s26 }
0x2bff   :  { %v5879_v17 = vpop.f32.mrf.mxu1  ;;  %p8193_p10 = por %p8192_p9, %p8191_p8 }
0x2c00   :  { %v7449_v19 = vpack.i.bf16 %v5879_v17, %v5876_v15 }
0x2c01   :  { %v7264_v59 = vpop.f32.mrf.mxu1  ;;  %p8194_p11 = pnand %p8193_p10, %p8187_p7 }
0x2c02   :  { %7450 = vrot.lane.b32.xlu1 %v7449_v19, %s8299_s6 }
0x2c64   :  { %v7441_v60 = vpop.permute.xlu1 %7440 }
0x2c65   :  { %v7443_v24 = vunpack.i.h.bf16 %v7441_v60  ;;  %v7442_v25 = vunpack.i.l.bf16 %v7441_v60 }
0x2c67   :  { %v5908_v29 = vsel %vm649_vm2, %v5501_v61, %v7443_v24  ;;  %v5907_v31 = vsel %vm649_vm2, %v5498_v44, %v7442_v25 }
0x2c6c   :  { %v7446_v21 = vpop.permute.xlu0 %7445 }
0x2c6d   :  { %v7448_v26 = vunpack.i.h.bf16 %v7446_v21  ;;  %v7447_v3 = vunpack.i.l.bf16 %v7446_v21 }
0x2c6f   :  { %v5910_v34 = vsel %vm701_vm5, %v5908_v29, %v7448_v26  ;;  %v5909_v35 = vsel %vm701_vm5, %v5907_v31, %v7447_v3  ;;  %v6523_v26 = vld [vmem:[#allocation22 + $0x1] ss:$0 sm:$0xff] }
0x2c74   :  { %v7451_v27 = vpop.permute.xlu1 %7450 }
0x2c75   :  { %v7453_v32 = vunpack.i.h.bf16 %v7451_v27  ;;  %v7452_v33 = vunpack.i.l.bf16 %v7451_v27 }
0x2c77   :  { %v5912_v49 = vsel %vm1175_vm6, %v5910_v34, %v7453_v32  ;;  %v5911_v22 = vsel %vm1175_vm6, %v5909_v35, %v7452_v33 }
0x2c78   :  { %v5913_v36 = vpack.c.bf16 %v5912_v49, %v5911_v22 }
0x2c7a   :  { %7270 = vmatmul.mubr.msk.bf16.vlgmr.msra.gmra.mxu0 %vm495_vm1, %v5913_v36 }
0x2c7b   :  { %7289 = vmatprep.mubr.msk.bf16.mxu0 %vm8294_vm0, %v8293_v0  ;;  %7282 = vmatpush3.bf16.msra.mxu0 %v7522_v18 }
0x2c7c   :  { %7283 = vmatprep.subr.bf16.mxu0 %v8293_v0 }
0x2c7f   :  { %7284 = vmatpush3.bf16.msra.mxu0 %v7523_v10 }
0x2c80   :  { %7285 = vmatprep.subr.bf16.mxu0 %v8293_v0 }
0x2c83   :  { %7286 = vmatpush3.bf16.msra.mxu0 %v7524_v12 }
0x2c84   :  { %7287 = vmatprep.subr.bf16.mxu0 %v8293_v0 }
0x2c87   :  { %7288 = vmatpush3.bf16.msra.mxu0 %v7525_v13 }
0x2d3a   :  { %v5963_v37 = vpop.f32.mrf.mxu0 }
0x2d3b   :  { %v5970_v38 = vadd.f32 %v5963_v37, %v9292_v4 }
0x2d3c   :  { %v7271_v40 = vpop.f32.mrf.mxu0 }
0x2d3d   :  { %v5972_v41 = vsel %vm495_vm1, %v5970_v38, 0.0 }
0x2d3e   :  { %5973 = vadd.xlane.f32.xlu0 %v5972_v41  ;;  %v5966_v45 = vpop.f32.mrf.mxu0 }
0x2d3f   :  { %v5971_v46 = vadd.f32 %v5966_v45, %v9294_v50  ;;  %v7520_v50 = vld [vmem:[#allocation19 + $0x18] sm:$0xff]  }
0x2d40   :  { %v7272_v42 = vpop.f32.mrf.mxu0  ;;  %7274 = vmatpush3.bf16.msra.mxu1 %v7520_v50 }
0x2d41   :  { %v5975_v47 = vsel %vm495_vm1, %v5971_v46, 0.0  ;;  %7275 = vmatprep.subr.bf16.mxu1 %v8293_v0 }
0x2d42   :  { %5976 = vadd.xlane.f32.xlu1 %v5975_v47 }
0x2d44   :  { %7276 = vmatpush3.bf16.msra.mxu1 %v7521_v2 }
0x2dc7   :  { %v5974_v23 = vpop.xlane.xlu0 %5973 }
0x2dc8   :  { %v5978_v48 = vmul.f32 0.03125, %v5974_v23 }
0x2dca   :  { %v5980_v56 = vsub.f32 %v5970_v38, %v5978_v48 }
0x2dcb   :  { %v5977_v51 = vpop.xlane.xlu1 %5976 }
0x2dcc   :  { %v5979_v30 = vmul.f32 0.03125, %v5977_v51  ;;  %v5982_v63 = vmul.f32 %v5980_v56, %v5980_v56 }
0x2dce   :  { %v5981_v53 = vsub.f32 %v5971_v46, %v5979_v30  ;;  %v5984_v4 = vsel %vm495_vm1, %v5982_v63, 0.0 }
0x2dcf   :  { %5985 = vadd.xlane.f32.xlu0 %v5984_v4  ;;  %v6529_v4 = vld [vmem:[#allocation29 + $0x1] ss:$0 sm:$0xff] }
0x2dd0   :  { %v5983_v52 = vmul.f32 %v5981_v53, %v5981_v53 }
0x2dd2   :  { %v5987_v54 = vsel %vm495_vm1, %v5983_v52, 0.0 }
0x2dd3   :  { %5988 = vadd.xlane.f32.xlu0 %v5987_v54  ;;  %v6530_v54 = vld [vmem:[#allocation31 + $0x1] ss:$0 sm:$0xff] }
0x2e58   :  { %v5986_v20 = vpop.xlane.xlu0 %5985 }
0x2e59   :  { %v5990_v39 = vmul.f32 0.03125, %v5986_v20 }
0x2e5b   :  { %v5992_v55 = vadd.f32 1e-05, %v5990_v39 }
0x2e5c   :  { %v5989_v57 = vpop.xlane.xlu0 %5988 }
0x2e5d   :  { %7754 = vrsqrt.f32 %v5992_v55  ;;  %v5991_v28 = vmul.f32 0.03125, %v5989_v57 }
0x2e5f   :  { %v5993_v44 = vadd.f32 1e-05, %v5991_v28 }
0x2e61   :  { %7756 = vrsqrt.f32 %v5993_v44 }
0x2e6a   :  { %v7755_v58 = vpop.eup %7754 }
0x2e6b   :  { %v5996_v61 = vmul.f32 %v7755_v58, %v5980_v56 }
0x2e6d   :  { %v6004_v1 = vmul.f32 %v6517_v43, %v5996_v61 }
0x2e6e   :  { %v7757_v62 = vpop.eup %7756 }
0x2e6f   :  { %v5997_v5 = vmul.f32 %v7757_v62, %v5981_v53  ;;  %v6012_v7 = vadd.f32 %v6518_v6, %v6004_v1 }
0x2e71   :  { %v6005_v11 = vmul.f32 %v6517_v43, %v5997_v5 }
0x2e73   :  { %v6013_v8 = vadd.f32 %v6518_v6, %v6005_v11 }
0x2e75   :  { %v6014_v9 = vpack.c.bf16 %v6013_v8, %v6012_v7 }
0x2e77   :  { %7278 = vmatmul.mubr.msk.bf16.vlgmr.msra.gmra.mxu1 %vm495_vm1, %v6014_v9 }
0x2f37   :  { %v6070_v15 = vpop.f32.mrf.mxu1 }
0x2f38   :  { %v6071_v17 = vadd.f32 %v6519_v14, %v6070_v15 }
0x2f39   :  { %v7279_v16 = vpop.f32.mrf.mxu1 }
0x2f3a   :  { %v6077_v21 = vmax.f32 %v6071_v17, 0.0  ;;  %v6531_v16 = vld [vmem:[#allocation32] ss:$0 sm:$0xff] }
0x2f3b   :  { %v6073_v19 = vpop.f32.mrf.mxu1 }
0x2f3c   :  { %v6074_v59 = vadd.f32 %v6519_v14, %v6073_v19  ;;  %v6532_v19 = vld [vmem:[#allocation34] ss:$0 sm:$0xff] }
0x2f3d   :  { %v7280_v60 = vpop.f32.mrf.mxu1 }
0x2f3e   :  { %v6078_v24 = vmax.f32 %v6074_v59, 0.0 }
0x2f40   :  { %v6079_v25 = vpack.c.bf16 %v6078_v24, %v6077_v21 }
0x2f42   :  { %7290 = vmatmul.mubr.msk.bf16.vlgmr.msra.gmra.mxu0 %vm1376_vm7, %v6079_v25 }
0x3002   :  { %v6147_v3 = vpop.f32.mrf.mxu0 }
0x3003   :  { %v6148_v27 = vadd.f32 %v6523_v26, %v6147_v3 }
0x3004   :  { %v7291_v29 = vpop.f32.mrf.mxu0 }
0x3005   :  { %v6154_v31 = vadd.f32 %v6148_v27, %v6012_v7 }
0x3006   :  { %v6150_v0 = vpop.f32.mrf.mxu0 }
0x3007   :  { %v6151_v32 = vadd.f32 %v6523_v26, %v6150_v0  ;;  %v6156_v33 = vsel %vm495_vm1, %v6154_v31, 0.0 }
0x3008   :  { %6157 = vadd.xlane.f32.xlu1 %v6156_v33  ;;  %v7292_v34 = vpop.f32.mrf.mxu0 }
0x3009   :  { %v6155_v35 = vadd.f32 %v6151_v32, %v6013_v8 }
0x300b   :  { %v6159_v49 = vsel %vm495_vm1, %v6155_v35, 0.0 }
0x300c   :  { %6160 = vadd.xlane.f32.xlu0 %v6159_v49 }
0x3091   :  { %v6158_v22 = vpop.xlane.xlu1 %6157 }
0x3092   :  { %v6162_v36 = vmul.f32 0.03125, %v6158_v22 }
0x3094   :  { %v6164_v37 = vsub.f32 %v6154_v31, %v6162_v36 }
0x3095   :  { %v6161_v38 = vpop.xlane.xlu0 %6160 }
0x3096   :  { %v6163_v40 = vmul.f32 0.03125, %v6161_v38  ;;  %v6166_v41 = vmul.f32 %v6164_v37, %v6164_v37 }
0x3098   :  { %v6165_v45 = vsub.f32 %v6155_v35, %v6163_v40  ;;  %v6168_v46 = vsel %vm495_vm1, %v6166_v41, 0.0 }
0x3099   :  { %6169 = vadd.xlane.f32.xlu1 %v6168_v46 }
0x309a   :  { %v6167_v42 = vmul.f32 %v6165_v45, %v6165_v45 }
0x309c   :  { %v6171_v47 = vsel %vm495_vm1, %v6167_v42, 0.0 }
0x309d   :  { %6172 = vadd.xlane.f32.xlu0 %v6171_v47 }
0x3122   :  { %v6170_v23 = vpop.xlane.xlu1 %6169 }
0x3123   :  { %v6174_v48 = vmul.f32 0.03125, %v6170_v23 }
0x3125   :  { %v6176_v56 = vadd.f32 1e-05, %v6174_v48 }
0x3126   :  { %v6173_v51 = vpop.xlane.xlu0 %6172 }
0x3127   :  { %7758 = vrsqrt.f32 %v6176_v56  ;;  %v6175_v30 = vmul.f32 0.03125, %v6173_v51 }
0x3129   :  { %v6177_v63 = vadd.f32 1e-05, %v6175_v30 }
0x312b   :  { %7760 = vrsqrt.f32 %v6177_v63 }
0x3134   :  { %v7759_v53 = vpop.eup %7758 }
0x3135   :  { %v6180_v52 = vmul.f32 %v7759_v53, %v6164_v37 }
0x3137   :  { %v6188_v50 = vmul.f32 %v6529_v4, %v6180_v52 }
0x3138   :  { %v7761_v2 = vpop.eup %7760 }
0x3139   :  { %v6196_v18 = vadd.f32 %v6530_v54, %v6188_v50  ;;  %v6181_v20 = vmul.f32 %v7761_v2, %v6165_v45 }
0x313b   :  { %v6200_v39 = vsel %vm495_vm1, %v6196_v18, 0.0  ;;  %v6189_v55 = vmul.f32 %v6529_v4, %v6181_v20 }
0x313c   :  { %6201 = vadd.xlane.f32.xlu1 %v6200_v39 }
0x313d   :  { %v6197_v57 = vadd.f32 %v6530_v54, %v6189_v55 }
0x313f   :  { %v6203_v28 = vsel %vm495_vm1, %v6197_v57, 0.0 }
0x3140   :  { %6204 = vadd.xlane.f32.xlu0 %v6203_v28 }
0x31c5   :  { %v6202_v44 = vpop.xlane.xlu1 %6201 }
0x31c6   :  { %v6206_v58 = vmul.f32 0.03125, %v6202_v44 }
0x31c8   :  { %v6208_v61 = vsub.f32 %v6196_v18, %v6206_v58 }
0x31c9   :  { %v6205_v43 = vpop.xlane.xlu0 %6204 }
0x31ca   :  { %v6207_v62 = vmul.f32 0.03125, %v6205_v43  ;;  %v6210_v1 = vmul.f32 %v6208_v61, %v6208_v61 }
0x31cc   :  { %v6209_v5 = vsub.f32 %v6197_v57, %v6207_v62  ;;  %v6212_v6 = vsel %vm495_vm1, %v6210_v1, 0.0 }
0x31cd   :  { %6213 = vadd.xlane.f32.xlu1 %v6212_v6 }
0x31ce   :  { %v6211_v11 = vmul.f32 %v6209_v5, %v6209_v5 }
0x31d0   :  { %v6215_v7 = vsel %vm495_vm1, %v6211_v11, 0.0 }
0x31d1   :  { %6216 = vadd.xlane.f32.xlu0 %v6215_v7 }
0x3256   :  { %v6214_v8 = vpop.xlane.xlu1 %6213 }
0x3257   :  { %v6218_v9 = vmul.f32 0.03125, %v6214_v8 }
0x3259   :  { %v6220_v10 = vadd.f32 1e-05, %v6218_v9 }
0x325a   :  { %v6217_v12 = vpop.xlane.xlu0 %6216 }
0x325b   :  { %7762 = vrsqrt.f32 %v6220_v10  ;;  %v6219_v13 = vmul.f32 0.03125, %v6217_v12 }
0x325d   :  { %v6221_v14 = vadd.f32 1e-05, %v6219_v13 }
0x325f   :  { %7764 = vrsqrt.f32 %v6221_v14 }
0x3268   :  { %v7763_v15 = vpop.eup %7762 }
0x3269   :  { %v6224_v17 = vmul.f32 %v7763_v15, %v6208_v61 }
0x326b   :  { %v6232_v59 = vmul.f32 %v6531_v16, %v6224_v17 }
0x326c   :  { %v7765_v60 = vpop.eup %7764 }
0x326d   :  { %v6225_v21 = vmul.f32 %v7765_v60, %v6209_v5  ;;  %v6240_v24 = vadd.f32 %v6532_v19, %v6232_v59 }
0x326f   :  { %v6233_v25 = vmul.f32 %v6531_v16, %v6225_v21  ;;  %6242 = vst.msk [vmem:[#allocation35] sm:$0xff] %vm495_vm1, %v6240_v24 }
0x3271   :  { %v6241_v26 = vadd.f32 %v6532_v19, %v6233_v25 }
0x3273   :  { %6243 = vst.msk [vmem:[#allocation35 + $0x8] sm:$0xff] %vm495_vm1, %v6241_v26 }
0x3274   :  { %8197 = shalt.err (!%p8194_p11)
}
0x3275   :  { %6255 = dma.vmem_to_hbm [thread:$0]  %s6250_s29, 256, %s8489_s24, [#allocation4], %s8267_s0, %s8267_s0, %s8268_s7  }
0x3276   :  { %8228 = dma.done.wait [#allocation4], 256  }
0x3277   :  { %8229 = vsyncadd [#allocation4], 4294967040 }
0x3278   :  { %6259 = vsyncpa [#allocation3], 1 }
0x3279   :  { %6260 = vsyncpa [#allocation6], 1 }
0x327a   :  { %6261 = vsyncpa [#allocation9], 1 }
0x327b   :  { %6262 = vsyncpa [#allocation12], 1 }
0x327c   :  { %6263 = vsyncpa [#allocation15], 1 }
0x327d   :  { %6264 = vsyncpa [#allocation18], 1 }
0x327e   :  { %6265 = vsyncpa [#allocation21], 1 }
0x327f   :  { %6266 = vsyncpa [#allocation24], 1 }
0x3280   :  { %6267 = vsyncpa [#allocation27], 1 }
0x3281   :  { %6268 = vsyncpa [#allocation30], 1 }
0x3282   :  { %6269 = vsyncpa [#allocation33], 1 }
0x3283   :  { %6270 = vsyncpa [#allocation4], 1 }

</bundles_post_ra>
